<compile_context>
chip_gen: v7x
topology: tpu7x:2x2x1
jax: 0.10.0
libtpu: 0.0.40
codegen_flags: <defaults>
</compile_context>

<pallas_src>
import functools

import jax
import jax.numpy as jnp
from jax.experimental import pallas as pl
from jax.experimental.pallas import tpu as pltpu


_VMEM = pl.BlockSpec(memory_space=pltpu.MemorySpace.VMEM)


# ----------------------------------------------------------------------------
# Single fused Pallas kernel
# ----------------------------------------------------------------------------
def actor_fused_kernel(p1_ref, idx2_ref, idx3_ref,
                       w1_ref, g1_ref, be1_ref,
                       w2_ref, g2_ref, be2_ref,
                       w3_ref, g3_ref, be3_ref,
                       wf1_ref, bf1_ref, wf2_ref, bf2_ref,
                       wh_ref, bh_ref,
                       out_ref,
                       *, n, m2, m3, sp3, kk):
    """Whole Actor forward pass with VMEM-resident activations.

    p1    : (m1, kh*kw*3) bf16   im2col patches of the input (K order i,j,cin)
    idx2  : (kk*m2, 1) int32     act1 row selected by stacked-gather row p*m2+m
    idx3  : (kk*m3, 1) int32     act2 row selected by stacked-gather row p*m3+m
    w1    : (48, 32)   bf16      conv1 weights, flat GEMM layout
    w2    : (512, 64)  bf16      conv2 weights, flat GEMM layout (i,j,cin rows)
    w3    : (1024,128) bf16      conv3 weights, flat GEMM layout
    g*/be*: (1, C) f32           BatchNorm gamma / beta (train-mode stats)
    wf*/bf*, wh/bh               MLP head (steering/throttle merged into wh)
    out   : (n, 2) f32           col 0 = tanh steering, col 1 = sigmoid throttle
    """
    f32 = jnp.float32
    bf16 = jnp.bfloat16
    eps = f32(1e-5)

    def bn_relu(acc, g_ref, be_ref):
        # One-pass batch statistics (review item 5): var = E[x^2] - mean^2.
        inv = f32(1.0 / acc.shape[0])
        mean = jnp.sum(acc, axis=0, keepdims=True) * inv
        ex2 = jnp.sum(acc * acc, axis=0, keepdims=True) * inv
        var = ex2 - mean * mean
        scale = g_ref[...] * jax.lax.rsqrt(var + eps)
        shift = be_ref[...] - mean * scale
        return jnp.maximum(acc * scale + shift, f32(0.0))

    def conv_patches(act_b16, idx_ref, m_out):
        """One stacked one-hot gather GEMM -> (m_out, kk*Cin) patch matrix."""
        m_in = act_b16.shape[0]
        rows = kk * m_out
        col = jax.lax.broadcasted_iota(jnp.int32, (rows, m_in), 1)
        sel = jnp.where(col == idx_ref[...], f32(1.0), f32(0.0)).astype(bf16)
        g = jnp.dot(sel, act_b16, preferred_element_type=f32)     # (kk*m_out, Cin)
        pieces = [g[p * m_out:(p + 1) * m_out, :] for p in range(kk)]
        return jnp.concatenate(pieces, axis=1).astype(bf16)       # (m_out, kk*Cin)

    # ---------------- conv block 1: GEMM + BN(batch stats) + ReLU ----------
    acc1 = jnp.dot(p1_ref[...], w1_ref[...], preferred_element_type=f32)
    act1 = bn_relu(acc1, g1_ref, be1_ref).astype(bf16)            # (m1, 32)

    # ---------------- conv block 2 -----------------------------------------
    patches2 = conv_patches(act1, idx2_ref, m2)                   # (m2, 512)
    acc2 = jnp.dot(patches2, w2_ref[...], preferred_element_type=f32)
    act2 = bn_relu(acc2, g2_ref, be2_ref).astype(bf16)            # (m2, 64)

    # ---------------- conv block 3 -----------------------------------------
    patches3 = conv_patches(act2, idx3_ref, m3)                   # (m3, 1024)
    acc3 = jnp.dot(patches3, w3_ref[...], preferred_element_type=f32)
    act3 = bn_relu(acc3, g3_ref, be3_ref).astype(bf16)            # (m3, 128)

    # -------- AdaptiveAvgPool2d((1,1)) (in-kernel mask, review item 4) ------
    rb = jax.lax.broadcasted_iota(jnp.int32, (n, m3), 0)
    cb = jax.lax.broadcasted_iota(jnp.int32, (n, m3), 1)
    pmask = jnp.where((cb >= rb * sp3) & (cb < (rb + 1) * sp3),
                      f32(1.0), f32(0.0)).astype(bf16)
    pooled = jnp.dot(pmask, act3, preferred_element_type=f32) * f32(1.0 / sp3)

    # -------- Flatten + MLP + merged output heads ---------------------------
    h = jnp.maximum(jnp.dot(pooled.astype(bf16), wf1_ref[...],
                            preferred_element_type=f32) + bf1_ref[...], f32(0.0))
    h = jnp.maximum(jnp.dot(h.astype(bf16), wf2_ref[...],
                            preferred_element_type=f32) + bf2_ref[...], f32(0.0))
    z = jnp.dot(h.astype(bf16), wh_ref[...], preferred_element_type=f32) + bh_ref[...]
    colh = jax.lax.broadcasted_iota(jnp.int32, z.shape, 1)
    out_ref[...] = jnp.where(colh == 0, jnp.tanh(z), jax.nn.sigmoid(z))


# ----------------------------------------------------------------------------
# Glue: layer-1 im2col, stacked gather indices, parameters
# ----------------------------------------------------------------------------
def _im2col(x_nhwc, kh, kw, stride):
    """x: (N,H,W,C) -> patches (N*Ho*Wo, kh*kw*C); K ordering is (i, j, cin)."""
    n, h, w, c = x_nhwc.shape
    ho = (h - kh) // stride + 1
    wo = (w - kw) // stride + 1
    cols = []
    for i in range(kh):
        for j in range(kw):
            cols.append(x_nhwc[:, i:i + stride * ho:stride,
                                  j:j + stride * wo:stride, :])
    patches = jnp.concatenate(cols, axis=-1)                   # (N,Ho,Wo,kh*kw*C)
    return patches.reshape(n * ho * wo, kh * kw * c), ho, wo


def _gather_rows(n, oh_in, ow_in, oh_out, ow_out, stride, kh, kw):
    """Stacked gather indices: row (i*kw+j)*m_out + (b,r,c) selects act-input
    row b*(oh_in*ow_in) + (stride*r+i)*ow_in + (stride*c+j)."""
    b = jnp.arange(n, dtype=jnp.int32).reshape(1, 1, n, 1, 1)
    i = jnp.arange(kh, dtype=jnp.int32).reshape(kh, 1, 1, 1, 1)
    j = jnp.arange(kw, dtype=jnp.int32).reshape(1, kw, 1, 1, 1)
    r = jnp.arange(oh_out, dtype=jnp.int32).reshape(1, 1, 1, oh_out, 1)
    c = jnp.arange(ow_out, dtype=jnp.int32).reshape(1, 1, 1, 1, ow_out)
    idx = (b * (oh_in * ow_in) + (stride * r + i) * ow_in + (stride * c + j))
    return idx.reshape(kh * kw * n * oh_out * ow_out, 1)


def init_params(key):
    """Deterministic synthetic parameters matching the module's shapes."""
    keys = jax.random.split(key, 12)
    k = iter(keys)

    def conv_flat(cout, cin, kh, kw):
        # PyTorch layout (Cout,Cin,KH,KW) -> flat GEMM layout (KH*KW*Cin, Cout)
        w = jax.random.normal(next(k), (cout, cin, kh, kw), jnp.float32) * 0.05
        return jnp.transpose(w, (2, 3, 1, 0)).reshape(kh * kw * cin, cout)

    def lin_w(out_f, in_f):
        w = jax.random.normal(next(k), (out_f, in_f), jnp.float32) * 0.05
        return w.T

    # NOTE: conv biases omitted on purpose — under train-mode BatchNorm a
    # per-channel constant bias is exactly cancelled by the mean subtraction.
    params = {
        "c1": (conv_flat(32, 3, 4, 4),
               jnp.ones((1, 32), jnp.float32), jnp.zeros((1, 32), jnp.float32)),
        "c2": (conv_flat(64, 32, 4, 4),
               jnp.ones((1, 64), jnp.float32), jnp.zeros((1, 64), jnp.float32)),
        "c3": (conv_flat(128, 64, 4, 4),
               jnp.ones((1, 128), jnp.float32), jnp.zeros((1, 128), jnp.float32)),
        "fc1": (lin_w(64, 128),
                jax.random.normal(next(k), (1, 64), jnp.float32) * 0.01),
        "fc2": (lin_w(64, 64),
                jax.random.normal(next(k), (1, 64), jnp.float32) * 0.01),
    }
    ws = lin_w(1, 64)
    bs = jax.random.normal(next(k), (1, 1), jnp.float32) * 0.01
    wt = lin_w(1, 64)
    bt = jax.random.normal(next(k), (1, 1), jnp.float32) * 0.01
    params["head"] = (jnp.concatenate([ws, wt], axis=1),    # (64, 2)
                      jnp.concatenate([bs, bt], axis=1))    # (1, 2)
    return params


@jax.jit
def actor_forward(x_nchw, params):
    """Forward pass of `Actor`. Input: NCHW float32, like the PyTorch module."""
    n = x_nchw.shape[0]
    x = jnp.transpose(x_nchw, (0, 2, 3, 1)).astype(jnp.float32)   # -> NHWC

    kh = kw = 4
    stride = 2
    p1, oh1, ow1 = _im2col(x, kh, kw, stride)
    oh2, ow2 = (oh1 - kh) // stride + 1, (ow1 - kw) // stride + 1
    oh3, ow3 = (oh2 - kh) // stride + 1, (ow2 - kw) // stride + 1
    m2, m3 = n * oh2 * ow2, n * oh3 * ow3

    idx2 = _gather_rows(n, oh1, ow1, oh2, ow2, stride, kh, kw)    # (16*m2, 1)
    idx3 = _gather_rows(n, oh2, ow2, oh3, ow3, stride, kh, kw)    # (16*m3, 1)

    w1, g1, be1 = params["c1"]
    w2, g2, be2 = params["c2"]
    w3, g3, be3 = params["c3"]
    wf1, bf1 = params["fc1"]
    wf2, bf2 = params["fc2"]
    wh, bh = params["head"]

    bf16 = jnp.bfloat16
    kernel = functools.partial(
        actor_fused_kernel,
        n=n, m2=m2, m3=m3, sp3=oh3 * ow3, kk=kh * kw)

    out = pl.pallas_call(
        kernel,
        out_shape=jax.ShapeDtypeStruct((n, 2), jnp.float32),
        in_specs=[_VMEM] * 18,
        out_specs=_VMEM,
    )(p1.astype(bf16), idx2, idx3,
      w1.astype(bf16), g1, be1,
      w2.astype(bf16), g2, be2,
      w3.astype(bf16), g3, be3,
      wf1.astype(bf16), bf1, wf2.astype(bf16), bf2,
      wh.astype(bf16), bh)

    return out[:, 0:1], out[:, 1:2]


# ----------------------------------------------------------------------------
# Pure-JAX reference (sanity check only)
# ----------------------------------------------------------------------------
def actor_reference(x_nchw, params):
    hp = jax.lax.Precision.HIGHEST
    kh = kw = 4
    x = x_nchw.astype(jnp.float32)

    def to_oihw(w_flat, cin, cout):
        return jnp.transpose(w_flat.reshape(kh, kw, cin, cout), (3, 2, 0, 1))

    def conv_bn_relu(x, w_oihw, gamma, beta):
        y = jax.lax.conv_general_dilated(
            x, w_oihw, window_strides=(2, 2), padding="VALID",
            dimension_numbers=("NCHW", "OIHW", "NCHW"), precision=hp)
        mean = jnp.mean(y, axis=(0, 2, 3), keepdims=True)
        var = jnp.mean((y - mean) ** 2, axis=(0, 2, 3), keepdims=True)
        g = gamma.reshape(1, -1, 1, 1)
        b = beta.reshape(1, -1, 1, 1)
        return jnp.maximum((y - mean) * jax.lax.rsqrt(var + 1e-5) * g + b, 0.0)

    y = conv_bn_relu(x, to_oihw(params["c1"][0], 3, 32), params["c1"][1], params["c1"][2])
    y = conv_bn_relu(y, to_oihw(params["c2"][0], 32, 64), params["c2"][1], params["c2"][2])
    y = conv_bn_relu(y, to_oihw(params["c3"][0], 64, 128), params["c3"][1], params["c3"][2])
    pooled = jnp.mean(y, axis=(2, 3))                          # (N, 128)
    h = jnp.maximum(jnp.dot(pooled, params["fc1"][0], precision=hp) + params["fc1"][1], 0.0)
    h = jnp.maximum(jnp.dot(h, params["fc2"][0], precision=hp) + params["fc2"][1], 0.0)
    z = jnp.dot(h, params["head"][0], precision=hp) + params["head"][1]
    return jnp.tanh(z[:, 0:1]), jax.nn.sigmoid(z[:, 1:2])


if __name__ == "__main__":
    key = jax.random.PRNGKey(0)
    pkey, xkey = jax.random.split(key)
    params = init_params(pkey)

    # Small input consistent with the module (NCHW, 3 channels):
    # 32x32 -> 15x15 -> 6x6 -> 2x2 -> pooled 128-dim feature.
    x = jax.random.normal(xkey, (2, 3, 32, 32), jnp.float32)

    steering, throttle = actor_forward(x, params)
    jax.block_until_ready((steering, throttle))

    assert steering.shape == (2, 1) and throttle.shape == (2, 1)
    assert bool(jnp.all(jnp.abs(steering) <= 1.0))
    assert bool(jnp.all((throttle >= 0.0) & (throttle <= 1.0)))

    ref_s, ref_t = actor_reference(x, params)
    assert float(jnp.max(jnp.abs(steering - ref_s))) < 5e-2
    assert float(jnp.max(jnp.abs(throttle - ref_t))) < 5e-2

    print("KERNEL_OK")
</pallas_src>

<mosaic_0001>
module attributes {stable_mosaic.version = 11 : i64} {
  func.func @actor_fused_kernel(%arg0: memref<450x48xbf16, #tpu.memory_space<vmem>>, %arg1: memref<1152x1xi32, #tpu.memory_space<vmem>>, %arg2: memref<128x1xi32, #tpu.memory_space<vmem>>, %arg3: memref<48x32xbf16, #tpu.memory_space<vmem>>, %arg4: memref<1x32xf32, #tpu.memory_space<vmem>>, %arg5: memref<1x32xf32, #tpu.memory_space<vmem>>, %arg6: memref<512x64xbf16, #tpu.memory_space<vmem>>, %arg7: memref<1x64xf32, #tpu.memory_space<vmem>>, %arg8: memref<1x64xf32, #tpu.memory_space<vmem>>, %arg9: memref<1024x128xbf16, #tpu.memory_space<vmem>>, %arg10: memref<1x128xf32, #tpu.memory_space<vmem>>, %arg11: memref<1x128xf32, #tpu.memory_space<vmem>>, %arg12: memref<128x64xbf16, #tpu.memory_space<vmem>>, %arg13: memref<1x64xf32, #tpu.memory_space<vmem>>, %arg14: memref<64x64xbf16, #tpu.memory_space<vmem>>, %arg15: memref<1x64xf32, #tpu.memory_space<vmem>>, %arg16: memref<64x2xbf16, #tpu.memory_space<vmem>>, %arg17: memref<1x2xf32, #tpu.memory_space<vmem>>, %arg18: memref<2x2xf32, #tpu.memory_space<vmem>>) attributes {dimension_semantics = [], scalar_prefetch = 0 : i64, scratch_operands = 0 : i64, tpu.core_type = #tpu.core_type<tc>} {
    %c0 = arith.constant 0 : index
    %c0_0 = arith.constant 0 : index
    %0 = vector.load %arg0[%c0, %c0_0] : memref<450x48xbf16, #tpu.memory_space<vmem>>, vector<450x48xbf16>
    %c0_1 = arith.constant 0 : index
    %c0_2 = arith.constant 0 : index
    %1 = vector.load %arg3[%c0_1, %c0_2] : memref<48x32xbf16, #tpu.memory_space<vmem>>, vector<48x32xbf16>
    %cst = arith.constant dense<0.000000e+00> : vector<450x32xf32>
    %2 = tpu.matmul %0, %1, %cst {dimension_numbers = #tpu.dot_dimension_numbers<[1], [0], [0], [1], [0, 0, 1, 1], [], []>} : vector<450x48xbf16>, vector<48x32xbf16>, vector<450x32xf32> -> vector<450x32xf32>
    %cst_3 = arith.constant dense<0.000000e+00> : vector<32xf32>
    %3 = vector.multi_reduction <add>, %2, %cst_3 [0] : vector<450x32xf32> to vector<32xf32>
    %4 = vector.shape_cast %3 : vector<32xf32> to vector<1x32xf32>
    %cst_4 = arith.constant 0.00222222228 : f32
    %5 = vector.broadcast %cst_4 : f32 to vector<1x32xf32>
    %6 = arith.mulf %4, %5 : vector<1x32xf32>
    %7 = arith.mulf %2, %2 : vector<450x32xf32>
    %cst_5 = arith.constant dense<0.000000e+00> : vector<32xf32>
    %8 = vector.multi_reduction <add>, %7, %cst_5 [0] : vector<450x32xf32> to vector<32xf32>
    %9 = vector.shape_cast %8 : vector<32xf32> to vector<1x32xf32>
    %cst_6 = arith.constant 0.00222222228 : f32
    %10 = vector.broadcast %cst_6 : f32 to vector<1x32xf32>
    %11 = arith.mulf %9, %10 : vector<1x32xf32>
    %12 = arith.mulf %6, %6 : vector<1x32xf32>
    %13 = arith.subf %11, %12 : vector<1x32xf32>
    %c0_7 = arith.constant 0 : index
    %c0_8 = arith.constant 0 : index
    %14 = vector.load %arg4[%c0_7, %c0_8] : memref<1x32xf32, #tpu.memory_space<vmem>>, vector<1x32xf32>
    %cst_9 = arith.constant 9.99999974E-6 : f32
    %15 = vector.broadcast %cst_9 : f32 to vector<1x32xf32>
    %16 = arith.addf %13, %15 : vector<1x32xf32>
    %17 = math.rsqrt %16 : vector<1x32xf32>
    %18 = arith.mulf %14, %17 : vector<1x32xf32>
    %c0_10 = arith.constant 0 : index
    %c0_11 = arith.constant 0 : index
    %19 = vector.load %arg5[%c0_10, %c0_11] : memref<1x32xf32, #tpu.memory_space<vmem>>, vector<1x32xf32>
    %20 = arith.mulf %6, %18 : vector<1x32xf32>
    %21 = arith.subf %19, %20 : vector<1x32xf32>
    %22 = vector.broadcast %18 : vector<1x32xf32> to vector<450x32xf32>
    %23 = arith.mulf %2, %22 : vector<450x32xf32>
    %24 = vector.broadcast %21 : vector<1x32xf32> to vector<450x32xf32>
    %25 = arith.addf %23, %24 : vector<450x32xf32>
    %cst_12 = arith.constant 0.000000e+00 : f32
    %26 = vector.broadcast %cst_12 : f32 to vector<450x32xf32>
    %27 = arith.maximumf %25, %26 : vector<450x32xf32>
    %28 = arith.truncf %27 : vector<450x32xf32> to vector<450x32xbf16>
    %29 = tpu.iota {dimensions = array<i32: 1>} : vector<1152x450xi32>
    %c0_13 = arith.constant 0 : index
    %c0_14 = arith.constant 0 : index
    %30 = vector.load %arg1[%c0_13, %c0_14] : memref<1152x1xi32, #tpu.memory_space<vmem>>, vector<1152x1xi32>
    %31 = vector.broadcast %30 : vector<1152x1xi32> to vector<1152x450xi32>
    %32 = arith.cmpi eq, %29, %31 : vector<1152x450xi32>
    %cst_15 = arith.constant 1.000000e+00 : f32
    %cst_16 = arith.constant 0.000000e+00 : f32
    %33 = vector.broadcast %cst_15 : f32 to vector<1152x450xf32>
    %34 = vector.broadcast %cst_16 : f32 to vector<1152x450xf32>
    %35 = arith.select %32, %33, %34 : vector<1152x450xi1>, vector<1152x450xf32>
    %36 = arith.truncf %35 : vector<1152x450xf32> to vector<1152x450xbf16>
    %cst_17 = arith.constant dense<0.000000e+00> : vector<1152x32xf32>
    %37 = tpu.matmul %36, %28, %cst_17 {dimension_numbers = #tpu.dot_dimension_numbers<[1], [0], [0], [1], [0, 0, 1, 1], [], []>} : vector<1152x450xbf16>, vector<450x32xbf16>, vector<1152x32xf32> -> vector<1152x32xf32>
    %38 = vector.extract_strided_slice %37 {offsets = [0, 0], sizes = [72, 32], strides = [1, 1]} : vector<1152x32xf32> to vector<72x32xf32>
    %39 = vector.extract_strided_slice %37 {offsets = [72, 0], sizes = [72, 32], strides = [1, 1]} : vector<1152x32xf32> to vector<72x32xf32>
    %40 = vector.extract_strided_slice %37 {offsets = [144, 0], sizes = [72, 32], strides = [1, 1]} : vector<1152x32xf32> to vector<72x32xf32>
    %41 = vector.extract_strided_slice %37 {offsets = [216, 0], sizes = [72, 32], strides = [1, 1]} : vector<1152x32xf32> to vector<72x32xf32>
    %42 = vector.extract_strided_slice %37 {offsets = [288, 0], sizes = [72, 32], strides = [1, 1]} : vector<1152x32xf32> to vector<72x32xf32>
    %43 = vector.extract_strided_slice %37 {offsets = [360, 0], sizes = [72, 32], strides = [1, 1]} : vector<1152x32xf32> to vector<72x32xf32>
    %44 = vector.extract_strided_slice %37 {offsets = [432, 0], sizes = [72, 32], strides = [1, 1]} : vector<1152x32xf32> to vector<72x32xf32>
    %45 = vector.extract_strided_slice %37 {offsets = [504, 0], sizes = [72, 32], strides = [1, 1]} : vector<1152x32xf32> to vector<72x32xf32>
    %46 = vector.extract_strided_slice %37 {offsets = [576, 0], sizes = [72, 32], strides = [1, 1]} : vector<1152x32xf32> to vector<72x32xf32>
    %47 = vector.extract_strided_slice %37 {offsets = [648, 0], sizes = [72, 32], strides = [1, 1]} : vector<1152x32xf32> to vector<72x32xf32>
    %48 = vector.extract_strided_slice %37 {offsets = [720, 0], sizes = [72, 32], strides = [1, 1]} : vector<1152x32xf32> to vector<72x32xf32>
    %49 = vector.extract_strided_slice %37 {offsets = [792, 0], sizes = [72, 32], strides = [1, 1]} : vector<1152x32xf32> to vector<72x32xf32>
    %50 = vector.extract_strided_slice %37 {offsets = [864, 0], sizes = [72, 32], strides = [1, 1]} : vector<1152x32xf32> to vector<72x32xf32>
    %51 = vector.extract_strided_slice %37 {offsets = [936, 0], sizes = [72, 32], strides = [1, 1]} : vector<1152x32xf32> to vector<72x32xf32>
    %52 = vector.extract_strided_slice %37 {offsets = [1008, 0], sizes = [72, 32], strides = [1, 1]} : vector<1152x32xf32> to vector<72x32xf32>
    %53 = vector.extract_strided_slice %37 {offsets = [1080, 0], sizes = [72, 32], strides = [1, 1]} : vector<1152x32xf32> to vector<72x32xf32>
    %54 = tpu.concatenate %38, %39, %40, %41, %42, %43, %44, %45, %46, %47, %48, %49, %50, %51, %52, %53 in 1 : vector<72x32xf32>, vector<72x32xf32>, vector<72x32xf32>, vector<72x32xf32>, vector<72x32xf32>, vector<72x32xf32>, vector<72x32xf32>, vector<72x32xf32>, vector<72x32xf32>, vector<72x32xf32>, vector<72x32xf32>, vector<72x32xf32>, vector<72x32xf32>, vector<72x32xf32>, vector<72x32xf32>, vector<72x32xf32> -> vector<72x512xf32>
    %55 = arith.truncf %54 : vector<72x512xf32> to vector<72x512xbf16>
    %c0_18 = arith.constant 0 : index
    %c0_19 = arith.constant 0 : index
    %56 = vector.load %arg6[%c0_18, %c0_19] : memref<512x64xbf16, #tpu.memory_space<vmem>>, vector<512x64xbf16>
    %cst_20 = arith.constant dense<0.000000e+00> : vector<72x64xf32>
    %57 = tpu.matmul %55, %56, %cst_20 {dimension_numbers = #tpu.dot_dimension_numbers<[1], [0], [0], [1], [0, 0, 1, 1], [], []>} : vector<72x512xbf16>, vector<512x64xbf16>, vector<72x64xf32> -> vector<72x64xf32>
    %cst_21 = arith.constant dense<0.000000e+00> : vector<64xf32>
    %58 = vector.multi_reduction <add>, %57, %cst_21 [0] : vector<72x64xf32> to vector<64xf32>
    %59 = vector.shape_cast %58 : vector<64xf32> to vector<1x64xf32>
    %cst_22 = arith.constant 0.013888889 : f32
    %60 = vector.broadcast %cst_22 : f32 to vector<1x64xf32>
    %61 = arith.mulf %59, %60 : vector<1x64xf32>
    %62 = arith.mulf %57, %57 : vector<72x64xf32>
    %cst_23 = arith.constant dense<0.000000e+00> : vector<64xf32>
    %63 = vector.multi_reduction <add>, %62, %cst_23 [0] : vector<72x64xf32> to vector<64xf32>
    %64 = vector.shape_cast %63 : vector<64xf32> to vector<1x64xf32>
    %cst_24 = arith.constant 0.013888889 : f32
    %65 = vector.broadcast %cst_24 : f32 to vector<1x64xf32>
    %66 = arith.mulf %64, %65 : vector<1x64xf32>
    %67 = arith.mulf %61, %61 : vector<1x64xf32>
    %68 = arith.subf %66, %67 : vector<1x64xf32>
    %c0_25 = arith.constant 0 : index
    %c0_26 = arith.constant 0 : index
    %69 = vector.load %arg7[%c0_25, %c0_26] : memref<1x64xf32, #tpu.memory_space<vmem>>, vector<1x64xf32>
    %cst_27 = arith.constant 9.99999974E-6 : f32
    %70 = vector.broadcast %cst_27 : f32 to vector<1x64xf32>
    %71 = arith.addf %68, %70 : vector<1x64xf32>
    %72 = math.rsqrt %71 : vector<1x64xf32>
    %73 = arith.mulf %69, %72 : vector<1x64xf32>
    %c0_28 = arith.constant 0 : index
    %c0_29 = arith.constant 0 : index
    %74 = vector.load %arg8[%c0_28, %c0_29] : memref<1x64xf32, #tpu.memory_space<vmem>>, vector<1x64xf32>
    %75 = arith.mulf %61, %73 : vector<1x64xf32>
    %76 = arith.subf %74, %75 : vector<1x64xf32>
    %77 = vector.broadcast %73 : vector<1x64xf32> to vector<72x64xf32>
    %78 = arith.mulf %57, %77 : vector<72x64xf32>
    %79 = vector.broadcast %76 : vector<1x64xf32> to vector<72x64xf32>
    %80 = arith.addf %78, %79 : vector<72x64xf32>
    %cst_30 = arith.constant 0.000000e+00 : f32
    %81 = vector.broadcast %cst_30 : f32 to vector<72x64xf32>
    %82 = arith.maximumf %80, %81 : vector<72x64xf32>
    %83 = arith.truncf %82 : vector<72x64xf32> to vector<72x64xbf16>
    %84 = tpu.iota {dimensions = array<i32: 1>} : vector<128x72xi32>
    %c0_31 = arith.constant 0 : index
    %c0_32 = arith.constant 0 : index
    %85 = vector.load %arg2[%c0_31, %c0_32] : memref<128x1xi32, #tpu.memory_space<vmem>>, vector<128x1xi32>
    %86 = vector.broadcast %85 : vector<128x1xi32> to vector<128x72xi32>
    %87 = arith.cmpi eq, %84, %86 : vector<128x72xi32>
    %cst_33 = arith.constant 1.000000e+00 : f32
    %cst_34 = arith.constant 0.000000e+00 : f32
    %88 = vector.broadcast %cst_33 : f32 to vector<128x72xf32>
    %89 = vector.broadcast %cst_34 : f32 to vector<128x72xf32>
    %90 = arith.select %87, %88, %89 : vector<128x72xi1>, vector<128x72xf32>
    %91 = arith.truncf %90 : vector<128x72xf32> to vector<128x72xbf16>
    %cst_35 = arith.constant dense<0.000000e+00> : vector<128x64xf32>
    %92 = tpu.matmul %91, %83, %cst_35 {dimension_numbers = #tpu.dot_dimension_numbers<[1], [0], [0], [1], [0, 0, 1, 1], [], []>} : vector<128x72xbf16>, vector<72x64xbf16>, vector<128x64xf32> -> vector<128x64xf32>
    %93 = vector.extract_strided_slice %92 {offsets = [0, 0], sizes = [8, 64], strides = [1, 1]} : vector<128x64xf32> to vector<8x64xf32>
    %94 = vector.extract_strided_slice %92 {offsets = [8, 0], sizes = [8, 64], strides = [1, 1]} : vector<128x64xf32> to vector<8x64xf32>
    %95 = vector.extract_strided_slice %92 {offsets = [16, 0], sizes = [8, 64], strides = [1, 1]} : vector<128x64xf32> to vector<8x64xf32>
    %96 = vector.extract_strided_slice %92 {offsets = [24, 0], sizes = [8, 64], strides = [1, 1]} : vector<128x64xf32> to vector<8x64xf32>
    %97 = vector.extract_strided_slice %92 {offsets = [32, 0], sizes = [8, 64], strides = [1, 1]} : vector<128x64xf32> to vector<8x64xf32>
    %98 = vector.extract_strided_slice %92 {offsets = [40, 0], sizes = [8, 64], strides = [1, 1]} : vector<128x64xf32> to vector<8x64xf32>
    %99 = vector.extract_strided_slice %92 {offsets = [48, 0], sizes = [8, 64], strides = [1, 1]} : vector<128x64xf32> to vector<8x64xf32>
    %100 = vector.extract_strided_slice %92 {offsets = [56, 0], sizes = [8, 64], strides = [1, 1]} : vector<128x64xf32> to vector<8x64xf32>
    %101 = vector.extract_strided_slice %92 {offsets = [64, 0], sizes = [8, 64], strides = [1, 1]} : vector<128x64xf32> to vector<8x64xf32>
    %102 = vector.extract_strided_slice %92 {offsets = [72, 0], sizes = [8, 64], strides = [1, 1]} : vector<128x64xf32> to vector<8x64xf32>
    %103 = vector.extract_strided_slice %92 {offsets = [80, 0], sizes = [8, 64], strides = [1, 1]} : vector<128x64xf32> to vector<8x64xf32>
    %104 = vector.extract_strided_slice %92 {offsets = [88, 0], sizes = [8, 64], strides = [1, 1]} : vector<128x64xf32> to vector<8x64xf32>
    %105 = vector.extract_strided_slice %92 {offsets = [96, 0], sizes = [8, 64], strides = [1, 1]} : vector<128x64xf32> to vector<8x64xf32>
    %106 = vector.extract_strided_slice %92 {offsets = [104, 0], sizes = [8, 64], strides = [1, 1]} : vector<128x64xf32> to vector<8x64xf32>
    %107 = vector.extract_strided_slice %92 {offsets = [112, 0], sizes = [8, 64], strides = [1, 1]} : vector<128x64xf32> to vector<8x64xf32>
    %108 = vector.extract_strided_slice %92 {offsets = [120, 0], sizes = [8, 64], strides = [1, 1]} : vector<128x64xf32> to vector<8x64xf32>
    %109 = tpu.concatenate %93, %94, %95, %96, %97, %98, %99, %100, %101, %102, %103, %104, %105, %106, %107, %108 in 1 : vector<8x64xf32>, vector<8x64xf32>, vector<8x64xf32>, vector<8x64xf32>, vector<8x64xf32>, vector<8x64xf32>, vector<8x64xf32>, vector<8x64xf32>, vector<8x64xf32>, vector<8x64xf32>, vector<8x64xf32>, vector<8x64xf32>, vector<8x64xf32>, vector<8x64xf32>, vector<8x64xf32>, vector<8x64xf32> -> vector<8x1024xf32>
    %110 = arith.truncf %109 : vector<8x1024xf32> to vector<8x1024xbf16>
    %c0_36 = arith.constant 0 : index
    %c0_37 = arith.constant 0 : index
    %111 = vector.load %arg9[%c0_36, %c0_37] : memref<1024x128xbf16, #tpu.memory_space<vmem>>, vector<1024x128xbf16>
    %cst_38 = arith.constant dense<0.000000e+00> : vector<8x128xf32>
    %112 = tpu.matmul %110, %111, %cst_38 {dimension_numbers = #tpu.dot_dimension_numbers<[1], [0], [0], [1], [0, 0, 1, 1], [], []>} : vector<8x1024xbf16>, vector<1024x128xbf16>, vector<8x128xf32> -> vector<8x128xf32>
    %cst_39 = arith.constant dense<0.000000e+00> : vector<128xf32>
    %113 = vector.multi_reduction <add>, %112, %cst_39 [0] : vector<8x128xf32> to vector<128xf32>
    %114 = vector.shape_cast %113 : vector<128xf32> to vector<1x128xf32>
    %cst_40 = arith.constant 1.250000e-01 : f32
    %115 = vector.broadcast %cst_40 : f32 to vector<1x128xf32>
    %116 = arith.mulf %114, %115 : vector<1x128xf32>
    %117 = arith.mulf %112, %112 : vector<8x128xf32>
    %cst_41 = arith.constant dense<0.000000e+00> : vector<128xf32>
    %118 = vector.multi_reduction <add>, %117, %cst_41 [0] : vector<8x128xf32> to vector<128xf32>
    %119 = vector.shape_cast %118 : vector<128xf32> to vector<1x128xf32>
    %cst_42 = arith.constant 1.250000e-01 : f32
    %120 = vector.broadcast %cst_42 : f32 to vector<1x128xf32>
    %121 = arith.mulf %119, %120 : vector<1x128xf32>
    %122 = arith.mulf %116, %116 : vector<1x128xf32>
    %123 = arith.subf %121, %122 : vector<1x128xf32>
    %c0_43 = arith.constant 0 : index
    %c0_44 = arith.constant 0 : index
    %124 = vector.load %arg10[%c0_43, %c0_44] : memref<1x128xf32, #tpu.memory_space<vmem>>, vector<1x128xf32>
    %cst_45 = arith.constant 9.99999974E-6 : f32
    %125 = vector.broadcast %cst_45 : f32 to vector<1x128xf32>
    %126 = arith.addf %123, %125 : vector<1x128xf32>
    %127 = math.rsqrt %126 : vector<1x128xf32>
    %128 = arith.mulf %124, %127 : vector<1x128xf32>
    %c0_46 = arith.constant 0 : index
    %c0_47 = arith.constant 0 : index
    %129 = vector.load %arg11[%c0_46, %c0_47] : memref<1x128xf32, #tpu.memory_space<vmem>>, vector<1x128xf32>
    %130 = arith.mulf %116, %128 : vector<1x128xf32>
    %131 = arith.subf %129, %130 : vector<1x128xf32>
    %132 = vector.broadcast %128 : vector<1x128xf32> to vector<8x128xf32>
    %133 = arith.mulf %112, %132 : vector<8x128xf32>
    %134 = vector.broadcast %131 : vector<1x128xf32> to vector<8x128xf32>
    %135 = arith.addf %133, %134 : vector<8x128xf32>
    %cst_48 = arith.constant 0.000000e+00 : f32
    %136 = vector.broadcast %cst_48 : f32 to vector<8x128xf32>
    %137 = arith.maximumf %135, %136 : vector<8x128xf32>
    %138 = arith.truncf %137 : vector<8x128xf32> to vector<8x128xbf16>
    %139 = tpu.iota {dimensions = array<i32: 0>} : vector<2x8xi32>
    %140 = tpu.iota {dimensions = array<i32: 1>} : vector<2x8xi32>
    %c4_i32 = arith.constant 4 : i32
    %141 = vector.broadcast %c4_i32 : i32 to vector<2x8xi32>
    %142 = arith.muli %139, %141 : vector<2x8xi32>
    %143 = arith.cmpi sge, %140, %142 : vector<2x8xi32>
    %c1_i32 = arith.constant 1 : i32
    %144 = vector.broadcast %c1_i32 : i32 to vector<2x8xi32>
    %145 = arith.addi %139, %144 : vector<2x8xi32>
    %c4_i32_49 = arith.constant 4 : i32
    %146 = vector.broadcast %c4_i32_49 : i32 to vector<2x8xi32>
    %147 = arith.muli %145, %146 : vector<2x8xi32>
    %148 = arith.cmpi slt, %140, %147 : vector<2x8xi32>
    %149 = arith.andi %143, %148 : vector<2x8xi1>
    %cst_50 = arith.constant 1.000000e+00 : f32
    %cst_51 = arith.constant 0.000000e+00 : f32
    %150 = vector.broadcast %cst_50 : f32 to vector<2x8xf32>
    %151 = vector.broadcast %cst_51 : f32 to vector<2x8xf32>
    %152 = arith.select %149, %150, %151 : vector<2x8xi1>, vector<2x8xf32>
    %153 = arith.truncf %152 : vector<2x8xf32> to vector<2x8xbf16>
    %cst_52 = arith.constant dense<0.000000e+00> : vector<2x128xf32>
    %154 = tpu.matmul %153, %138, %cst_52 {dimension_numbers = #tpu.dot_dimension_numbers<[1], [0], [0], [1], [0, 0, 1, 1], [], []>} : vector<2x8xbf16>, vector<8x128xbf16>, vector<2x128xf32> -> vector<2x128xf32>
    %cst_53 = arith.constant 2.500000e-01 : f32
    %155 = vector.broadcast %cst_53 : f32 to vector<2x128xf32>
    %156 = arith.mulf %154, %155 : vector<2x128xf32>
    %157 = arith.truncf %156 : vector<2x128xf32> to vector<2x128xbf16>
    %c0_54 = arith.constant 0 : index
    %c0_55 = arith.constant 0 : index
    %158 = vector.load %arg12[%c0_54, %c0_55] : memref<128x64xbf16, #tpu.memory_space<vmem>>, vector<128x64xbf16>
    %cst_56 = arith.constant dense<0.000000e+00> : vector<2x64xf32>
    %159 = tpu.matmul %157, %158, %cst_56 {dimension_numbers = #tpu.dot_dimension_numbers<[1], [0], [0], [1], [0, 0, 1, 1], [], []>} : vector<2x128xbf16>, vector<128x64xbf16>, vector<2x64xf32> -> vector<2x64xf32>
    %c0_57 = arith.constant 0 : index
    %c0_58 = arith.constant 0 : index
    %160 = vector.load %arg13[%c0_57, %c0_58] : memref<1x64xf32, #tpu.memory_space<vmem>>, vector<1x64xf32>
    %161 = vector.broadcast %160 : vector<1x64xf32> to vector<2x64xf32>
    %162 = arith.addf %159, %161 : vector<2x64xf32>
    %cst_59 = arith.constant 0.000000e+00 : f32
    %163 = vector.broadcast %cst_59 : f32 to vector<2x64xf32>
    %164 = arith.maximumf %162, %163 : vector<2x64xf32>
    %165 = arith.truncf %164 : vector<2x64xf32> to vector<2x64xbf16>
    %c0_60 = arith.constant 0 : index
    %c0_61 = arith.constant 0 : index
    %166 = vector.load %arg14[%c0_60, %c0_61] : memref<64x64xbf16, #tpu.memory_space<vmem>>, vector<64x64xbf16>
    %cst_62 = arith.constant dense<0.000000e+00> : vector<2x64xf32>
    %167 = tpu.matmul %165, %166, %cst_62 {dimension_numbers = #tpu.dot_dimension_numbers<[1], [0], [0], [1], [0, 0, 1, 1], [], []>} : vector<2x64xbf16>, vector<64x64xbf16>, vector<2x64xf32> -> vector<2x64xf32>
    %c0_63 = arith.constant 0 : index
    %c0_64 = arith.constant 0 : index
    %168 = vector.load %arg15[%c0_63, %c0_64] : memref<1x64xf32, #tpu.memory_space<vmem>>, vector<1x64xf32>
    %169 = vector.broadcast %168 : vector<1x64xf32> to vector<2x64xf32>
    %170 = arith.addf %167, %169 : vector<2x64xf32>
    %cst_65 = arith.constant 0.000000e+00 : f32
    %171 = vector.broadcast %cst_65 : f32 to vector<2x64xf32>
    %172 = arith.maximumf %170, %171 : vector<2x64xf32>
    %173 = arith.truncf %172 : vector<2x64xf32> to vector<2x64xbf16>
    %c0_66 = arith.constant 0 : index
    %c0_67 = arith.constant 0 : index
    %174 = vector.load %arg16[%c0_66, %c0_67] : memref<64x2xbf16, #tpu.memory_space<vmem>>, vector<64x2xbf16>
    %cst_68 = arith.constant dense<0.000000e+00> : vector<2x2xf32>
    %175 = tpu.matmul %173, %174, %cst_68 {dimension_numbers = #tpu.dot_dimension_numbers<[1], [0], [0], [1], [0, 0, 1, 1], [], []>} : vector<2x64xbf16>, vector<64x2xbf16>, vector<2x2xf32> -> vector<2x2xf32>
    %c0_69 = arith.constant 0 : index
    %c0_70 = arith.constant 0 : index
    %176 = vector.load %arg17[%c0_69, %c0_70] : memref<1x2xf32, #tpu.memory_space<vmem>>, vector<1x2xf32>
    %177 = vector.broadcast %176 : vector<1x2xf32> to vector<2x2xf32>
    %178 = arith.addf %175, %177 : vector<2x2xf32>
    %179 = tpu.iota {dimensions = array<i32: 1>} : vector<2x2xi32>
    %c0_i32 = arith.constant 0 : i32
    %180 = vector.broadcast %c0_i32 : i32 to vector<2x2xi32>
    %181 = arith.cmpi eq, %179, %180 : vector<2x2xi32>
    %182 = math.tanh %178 : vector<2x2xf32>
    %183 = arith.negf %178 : vector<2x2xf32>
    %184 = math.exp %183 : vector<2x2xf32>
    %cst_71 = arith.constant 1.000000e+00 : f32
    %185 = vector.broadcast %cst_71 : f32 to vector<2x2xf32>
    %186 = arith.addf %185, %184 : vector<2x2xf32>
    %187 = arith.divf %185, %186 : vector<2x2xf32>
    %188 = arith.select %181, %182, %187 : vector<2x2xi1>, vector<2x2xf32>
    %c0_72 = arith.constant 0 : index
    %c0_73 = arith.constant 0 : index
    %189 = vector.load %arg18[%c0_72, %c0_73] : memref<2x2xf32, #tpu.memory_space<vmem>>, vector<2x2xf32>
    tpu.vector_store %arg18[%c0_72, %c0_73], %188 {strides = array<i32>} : memref<2x2xf32, #tpu.memory_space<vmem>>, vector<2x2xf32>,
    return
  }
}

</mosaic_0001>

<bundles_post_ra>
// kernel: actor_forward.1
= control target key start
LH: loop header
LB: loop body
LE: loop exit
PB: predicated region body
PF: predicated region fallthrough
CT: control target
= control target key end

     0   :  { %v13735_v0 = vmov 0.0   ;;  %vm8860_vm0 = vmmov 0   ;;  %v13737_v4 = vmov 0   ;;  %vm284_vm1 = vcmask 392192   ;;  %s8865_s25 = smov 96   ;;  %s13713_s3 = inlined_call_operand.vmem [shape: bf16[48,32], index: 3, kind: input, shape index: {}]   ;;  %s13714_s0 = inlined_call_operand.vmem [shape: bf16[450,48], index: 0, kind: input, shape index: {}]   ;;  %s13715_s1 = inlined_call_operand.vmem [shape: s32[1152,1], index: 1, kind: input, shape index: {}]   ;;  %s13716_s4 = inlined_call_operand.vmem [shape: f32[1,32], index: 4, kind: input, shape index: {}]   ;;  %s13717_s5 = inlined_call_operand.vmem [shape: f32[1,32], index: 5, kind: input, shape index: {}]   ;;  %s13718_s6 = inlined_call_operand.vmem [shape: bf16[512,64], index: 6, kind: input, shape index: {}]   ;;  %s13719_s2 = inlined_call_operand.vmem [shape: s32[128,1], index: 2, kind: input, shape index: {}]   ;;  %s13720_s7 = inlined_call_operand.vmem [shape: f32[1,64], index: 7, kind: input, shape index: {}]   ;;  %s13721_s8 = inlined_call_operand.vmem [shape: f32[1,64], index: 8, kind: input, shape index: {}]   ;;  %s13722_s9 = inlined_call_operand.vmem [shape: bf16[1024,128], index: 9, kind: input, shape index: {}]   ;;  %s13723_s12 = inlined_call_operand.vmem [shape: bf16[128,64], index: 12, kind: input, shape index: {}]   ;;  %s13724_s10 = inlined_call_operand.vmem [shape: f32[1,128], index: 10, kind: input, shape index: {}]   ;;  %s13725_s11 = inlined_call_operand.vmem [shape: f32[1,128], index: 11, kind: input, shape index: {}]   ;;  %s13726_s14 = inlined_call_operand.vmem [shape: bf16[64,64], index: 14, kind: input, shape index: {}]   ;;  %s13727_s16 = inlined_call_operand.vmem [shape: bf16[64,2], index: 16, kind: input, shape index: {}]   ;;  %s13728_s13 = inlined_call_operand.vmem [shape: f32[1,64], index: 13, kind: input, shape index: {}]   ;;  %s13729_s15 = inlined_call_operand.vmem [shape: f32[1,64], index: 15, kind: input, shape index: {}]   ;;  %s13730_s17 = inlined_call_operand.vmem [shape: f32[1,2], index: 17, kind: input, shape index: {}]   ;;  %s13731_s18 = inlined_call_operand.vmem [shape: f32[2,2], index: 18, kind: output, shape index: {}]  }
   0x1   :  { %13915 = sst [smem:[#allocation111_spill]] %s13713_s3  ;;  %7969 = vmatprep.subr.bf16.mxu0 %v13735_v0  ;;  %7975 = vmatprep.mubr.msk.bf16.mxu0 %vm8860_vm0, %v13735_v0  ;;  %vm636_vm2 = vcmask 261120   ;;  %vm748_vm9 = vcmask 254976  }
   0x2   :  { %13916 = sst [smem:[#allocation112_spill]] %s13714_s0  ;;  %s13918_s29 = sld [smem:[#allocation111_spill]]  ;;  %8412 = vset.pattern.permute.xlu1 %v13737_v4  ;;  %8411 = vset.pattern.permute.xlu0 %v13737_v4 }
   0x3   :  { %13917 = sst [smem:[#allocation113_spill]] %s13715_s1  ;;  %8167 = vmatprep.subr.bf16.mxu1 %v13737_v4  ;;  %s13919_s22 = sld [smem:[#allocation112_spill]] }
   0x4   :  { %s13920_s26 = sld [smem:[#allocation113_spill]] }
   0x8   :  { %v8703_v1 = vld [vmem:[%s13918_s29] sm:$0xff]   ;;  %v8704_v2 = vld [vmem:[%s13918_s29 + $0x8] sm:$0xff]   ;;  %v8705_v3 = vld [vmem:[%s13918_s29 + $0x10] sm:$0xff]  }
   0x9   :  { %7970 = vmatpush3.bf16.msra.mxu0 %v8703_v1  ;;  %v8706_v5 = vld [vmem:[%s13919_s22] sm:$0xff]   ;;  %v8707_v6 = vld [vmem:[%s13919_s22 + $0x8] sm:$0xff]   ;;  %v8708_v11 = vld [vmem:[%s13919_s22 + $0x10] sm:$0xff]  }
   0xa   :  { %7971 = vmatprep.subr.bf16.mxu0 %v13735_v0  ;;  %v1247_v7 = vld [vmem:[%s13920_s26 + $0x2b0] sm:$0xff]  ;;  %v1245_v8 = vld [vmem:[%s13920_s26 + $0x2a0] sm:$0xff]  ;;  %v1248_v9 = vld [vmem:[%s13920_s26 + $0x2b8] sm:$0xff] }
   0xb   :  { %1564 = vperm.xlu1 %8412, %v1247_v7   ;;  %1558 = vperm.xlu0 %8411, %v1245_v8   ;;  %v1246_v10 = vld [vmem:[%s13920_s26 + $0x2a8] sm:$0xff]  ;;  %v1249_v13 = vld [vmem:[%s13920_s26 + $0x2c0] sm:$0xff]  ;;  %v1252_v14 = vld [vmem:[%s13920_s26 + $0x2d8] sm:$0xff] }
   0xc   :  { %v1250_v12 = vld [vmem:[%s13920_s26 + $0x2c8] sm:$0xff]  ;;  %v1251_v15 = vld [vmem:[%s13920_s26 + $0x2d0] sm:$0xff]  ;;  %v8709_v16 = vld [vmem:[%s13919_s22 + $0x18] sm:$0xff]  }
   0xd   :  { %7972 = vmatpush3.bf16.msra.mxu0 %v8704_v2  ;;  %v1254_v17 = vld [vmem:[%s13920_s26 + $0x2e8] sm:$0xff]  ;;  %v1253_v18 = vld [vmem:[%s13920_s26 + $0x2e0] sm:$0xff]  ;;  %v1256_v19 = vld [vmem:[%s13920_s26 + $0x2f8] sm:$0xff] }
   0xe   :  { %7973 = vmatprep.subr.bf16.mxu0 %v13735_v0  ;;  %v1255_v20 = vld [vmem:[%s13920_s26 + $0x2f0] sm:$0xff]  ;;  %v8710_v21 = vld [vmem:[%s13919_s22 + $0x20] sm:$0xff]   ;;  %v1258_v22 = vld [vmem:[%s13920_s26 + $0x308] sm:$0xff] }
   0xf   :  { %1567 = vperm.xlu1 %8412, %v1248_v9   ;;  %1561 = vperm.xlu0 %8411, %v1246_v10   ;;  %v1257_v23 = vld [vmem:[%s13920_s26 + $0x300] sm:$0xff]  ;;  %v1260_v24 = vld [vmem:[%s13920_s26 + $0x318] sm:$0xff]  ;;  %v1259_v25 = vld [vmem:[%s13920_s26 + $0x310] sm:$0xff] }
  0x10   :  { %v8711_v26 = vld [vmem:[%s13919_s22 + $0x28] sm:$0xff]   ;;  %v1261_v28 = vld [vmem:[%s13920_s26 + $0x320] sm:$0xff]  ;;  %v1264_v29 = vld [vmem:[%s13920_s26 + $0x338] sm:$0xff] }
  0x11   :  { %7974 = vmatpush3.bf16.msra.mxu0 %v8705_v3  ;;  %v1262_v27 = vld [vmem:[%s13920_s26 + $0x328] sm:$0xff]  ;;  %v1263_v30 = vld [vmem:[%s13920_s26 + $0x330] sm:$0xff]  ;;  %v1265_v33 = vld [vmem:[%s13920_s26 + $0x340] sm:$0xff] }
  0x12   :  { %3398 = vmatprep.subr.bf16.mxu0 %v13737_v4  ;;  %v8712_v31 = vld [vmem:[%s13919_s22 + $0x30] sm:$0xff]   ;;  %v1266_v32 = vld [vmem:[%s13920_s26 + $0x348] sm:$0xff]  ;;  %v1268_v34 = vld [vmem:[%s13920_s26 + $0x358] sm:$0xff] }
  0x13   :  { %1573 = vperm.xlu1 %8412, %v1250_v12   ;;  %1570 = vperm.xlu0 %8411, %v1249_v13   ;;  %v1267_v35 = vld [vmem:[%s13920_s26 + $0x350] sm:$0xff]  ;;  %v8713_v36 = vld [vmem:[%s13919_s22 + $0x38] sm:$0xff]   ;;  %v1270_v37 = vld [vmem:[%s13920_s26 + $0x368] sm:$0xff] }
  0x14   :  { %7976 = vmatmul.mubr.msk.bf16.vlgmr.msra.gmra.mrb[0].mxu0 %vm284_vm1, %v8706_v5  ;;  %v1269_v38 = vld [vmem:[%s13920_s26 + $0x360] sm:$0xff]  ;;  %v1272_v39 = vld [vmem:[%s13920_s26 + $0x378] sm:$0xff]  ;;  %v1271_v40 = vld [vmem:[%s13920_s26 + $0x370] sm:$0xff] }
  0x15   :  { %7979 = vmatprep.mubr.msk.bf16.mxu0 %vm8860_vm0, %v13735_v0  ;;  %v8714_v41 = vld [vmem:[%s13919_s22 + $0x40] sm:$0xff]   ;;  %v1274_v42 = vld [vmem:[%s13920_s26 + $0x388] sm:$0xff]  ;;  %v1276_v44 = vld [vmem:[%s13920_s26 + $0x398] sm:$0xff] }
  0x16   :  { %v1273_v43 = vld [vmem:[%s13920_s26 + $0x380] sm:$0xff]  ;;  %v1275_v45 = vld [vmem:[%s13920_s26 + $0x390] sm:$0xff]  ;;  %v8715_v46 = vld [vmem:[%s13919_s22 + $0x48] sm:$0xff]  }
  0x17   :  { %1579 = vperm.xlu1 %8412, %v1252_v14   ;;  %1576 = vperm.xlu0 %8411, %v1251_v15   ;;  %v1278_v47 = vld [vmem:[%s13920_s26 + $0x3a8] sm:$0xff]  ;;  %v1277_v48 = vld [vmem:[%s13920_s26 + $0x3a0] sm:$0xff]  ;;  %v1280_v49 = vld [vmem:[%s13920_s26 + $0x3b8] sm:$0xff] }
  0x18   :  { %v1279_v50 = vld [vmem:[%s13920_s26 + $0x3b0] sm:$0xff]  ;;  %v1282_v52 = vld [vmem:[%s13920_s26 + $0x3c8] sm:$0xff]  ;;  %v1281_v53 = vld [vmem:[%s13920_s26 + $0x3c0] sm:$0xff] }
  0x19   :  { %v8716_v51 = vld [vmem:[%s13919_s22 + $0x50] sm:$0xff]   ;;  %v1284_v54 = vld [vmem:[%s13920_s26 + $0x3d8] sm:$0xff]  ;;  %v1286_v57 = vld [vmem:[%s13920_s26 + $0x3e8] sm:$0xff] }
  0x1a   :  { %v1283_v55 = vld [vmem:[%s13920_s26 + $0x3d0] sm:$0xff]  ;;  %v8717_v56 = vld [vmem:[%s13919_s22 + $0x58] sm:$0xff]   ;;  %v1285_v58 = vld [vmem:[%s13920_s26 + $0x3e0] sm:$0xff] }
  0x1b   :  { %1585 = vperm.xlu1 %8412, %v1254_v17   ;;  %1582 = vperm.xlu0 %8411, %v1253_v18   ;;  %v1288_v59 = vld [vmem:[%s13920_s26 + $0x3f8] sm:$0xff]  ;;  %v1287_v60 = vld [vmem:[%s13920_s26 + $0x3f0] sm:$0xff]  ;;  %v8718_v61 = vld [vmem:[%s13919_s22 + $0x60] sm:$0xff]  }
  0x1c   :  { %7980 = vmatmul.mubr.msk.bf16.gmra.mrb[4].mxu0 %vm284_vm1, %v8707_v6  ;;  %v1290_v62 = vld [vmem:[%s13920_s26 + $0x408] sm:$0xff]  ;;  %v1289_v63 = vld [vmem:[%s13920_s26 + $0x400] sm:$0xff]  ;;  %v1292_v1 = vld [vmem:[%s13920_s26 + $0x418] sm:$0xff] }
  0x1d   :  { %7983 = vmatprep.mubr.msk.bf16.mxu0 %vm8860_vm0, %v13735_v0  ;;  %v1291_v2 = vld [vmem:[%s13920_s26 + $0x410] sm:$0xff]  ;;  %v8719_v3 = vld [vmem:[%s13919_s22 + $0x68] sm:$0xff]   ;;  %v1293_v6 = vld [vmem:[%s13920_s26 + $0x420] sm:$0xff] }
  0x1e   :  { %v1294_v5 = vld [vmem:[%s13920_s26 + $0x428] sm:$0xff]  ;;  %v1296_v7 = vld [vmem:[%s13920_s26 + $0x438] sm:$0xff]  ;;  %v1295_v8 = vld [vmem:[%s13920_s26 + $0x430] sm:$0xff] }
  0x1f   :  { %1591 = vperm.xlu1 %8412, %v1256_v19   ;;  %1588 = vperm.xlu0 %8411, %v1255_v20   ;;  %v8720_v9 = vld [vmem:[%s13919_s22 + $0x70] sm:$0xff]   ;;  %v1298_v10 = vld [vmem:[%s13920_s26 + $0x448] sm:$0xff]  ;;  %v1300_v12 = vld [vmem:[%s13920_s26 + $0x458] sm:$0xff] }
  0x20   :  { %v1299_v13 = vld [vmem:[%s13920_s26 + $0x450] sm:$0xff]  ;;  %v8721_v14 = vld [vmem:[%s13919_s22 + $0x78] sm:$0xff]   ;;  %v1302_v15 = vld [vmem:[%s13920_s26 + $0x468] sm:$0xff] }
  0x21   :  { %v1304_v17 = vld [vmem:[%s13920_s26 + $0x478] sm:$0xff]  ;;  %v1303_v18 = vld [vmem:[%s13920_s26 + $0x470] sm:$0xff]  ;;  %v8722_v19 = vld [vmem:[%s13919_s22 + $0x80] sm:$0xff]  }
  0x22   :  { %v1162_v20 = vld [vmem:[%s13920_s26 + $0x8] sm:$0xff]  ;;  %v1231_v4 = vld [vmem:[%s13920_s26 + $0x230] sm:$0xff] }
  0x23   :  { %1597 = vperm.xlu1 %8412, %v1258_v22   ;;  %1594 = vperm.xlu0 %8411, %v1257_v23   ;;  %v1164_v22 = vld [vmem:[%s13920_s26 + $0x18] sm:$0xff]  ;;  %v1163_v23 = vld [vmem:[%s13920_s26 + $0x10] sm:$0xff] }
  0x24   :  { %7984 = vmatmul.mubr.msk.bf16.gmra.mrb[8].mxu0 %vm284_vm1, %v8708_v11  ;;  %v1297_v11 = vld [vmem:[%s13920_s26 + $0x440] sm:$0xff] }
  0x25   :  { %7987 = vmatprep.mubr.msk.bf16.mxu0 %vm8860_vm0, %v13735_v0 }
  0x27   :  { %1603 = vperm.xlu1 %8412, %v1260_v24   ;;  %1600 = vperm.xlu0 %8411, %v1259_v25   ;;  %v8723_v24 = vld [vmem:[%s13919_s22 + $0x88] sm:$0xff]  }
  0x28   :  { %v1166_v25 = vld [vmem:[%s13920_s26 + $0x28] sm:$0xff] }
  0x2b   :  { %1609 = vperm.xlu1 %8412, %v1262_v27   ;;  %1606 = vperm.xlu0 %8411, %v1261_v28   ;;  %v1168_v27 = vld [vmem:[%s13920_s26 + $0x38] sm:$0xff]  ;;  %v1167_v28 = vld [vmem:[%s13920_s26 + $0x30] sm:$0xff] }
  0x2c   :  { %7988 = vmatmul.mubr.msk.bf16.gmra.mrb[12].mxu0 %vm284_vm1, %v8709_v16  ;;  %v1301_v16 = vld [vmem:[%s13920_s26 + $0x460] sm:$0xff] }
  0x2d   :  { %7991 = vmatprep.mubr.msk.bf16.mxu0 %vm8860_vm0, %v13735_v0 }
  0x2f   :  { %1615 = vperm.xlu1 %8412, %v1264_v29   ;;  %1612 = vperm.xlu0 %8411, %v1263_v30   ;;  %v8724_v29 = vld [vmem:[%s13919_s22 + $0x90] sm:$0xff]   ;;  %v1170_v30 = vld [vmem:[%s13920_s26 + $0x48] sm:$0xff] }
  0x33   :  { %1621 = vperm.xlu1 %8412, %v1266_v32   ;;  %1618 = vperm.xlu0 %8411, %v1265_v33   ;;  %v1172_v32 = vld [vmem:[%s13920_s26 + $0x58] sm:$0xff]  ;;  %v1171_v33 = vld [vmem:[%s13920_s26 + $0x50] sm:$0xff] }
  0x34   :  { %7992 = vmatmul.mubr.msk.bf16.gmra.mrb[16].mxu0 %vm284_vm1, %v8710_v21  ;;  %v1161_v21 = vld [vmem:[%s13920_s26] sm:$0xff] }
  0x35   :  { %7995 = vmatprep.mubr.msk.bf16.mxu0 %vm8860_vm0, %v13735_v0 }
  0x37   :  { %1627 = vperm.xlu1 %8412, %v1268_v34   ;;  %1624 = vperm.xlu0 %8411, %v1267_v35   ;;  %v8725_v34 = vld [vmem:[%s13919_s22 + $0x98] sm:$0xff]   ;;  %v1174_v35 = vld [vmem:[%s13920_s26 + $0x68] sm:$0xff] }
  0x3b   :  { %1633 = vperm.xlu1 %8412, %v1270_v37   ;;  %1630 = vperm.xlu0 %8411, %v1269_v38   ;;  %v1176_v37 = vld [vmem:[%s13920_s26 + $0x78] sm:$0xff]  ;;  %v1175_v38 = vld [vmem:[%s13920_s26 + $0x70] sm:$0xff] }
  0x3c   :  { %7996 = vmatmul.mubr.msk.bf16.gmra.mrb[20].mxu0 %vm284_vm1, %v8711_v26  ;;  %v1165_v26 = vld [vmem:[%s13920_s26 + $0x20] sm:$0xff] }
  0x3d   :  { %7999 = vmatprep.mubr.msk.bf16.mxu0 %vm8860_vm0, %v13735_v0 }
  0x3f   :  { %1639 = vperm.xlu1 %8412, %v1272_v39   ;;  %1636 = vperm.xlu0 %8411, %v1271_v40   ;;  %v8726_v39 = vld [vmem:[%s13919_s22 + $0xa0] sm:$0xff]   ;;  %v1178_v40 = vld [vmem:[%s13920_s26 + $0x88] sm:$0xff] }
  0x43   :  { %1645 = vperm.xlu1 %8412, %v1274_v42   ;;  %1642 = vperm.xlu0 %8411, %v1273_v43  }
  0x44   :  { %8000 = vmatmul.mubr.msk.bf16.gmra.mrb[24].mxu0 %vm284_vm1, %v8712_v31  ;;  %v1169_v31 = vld [vmem:[%s13920_s26 + $0x40] sm:$0xff] }
  0x45   :  { %8003 = vmatprep.mubr.msk.bf16.mxu0 %vm8860_vm0, %v13735_v0 }
  0x47   :  { %1651 = vperm.xlu1 %8412, %v1276_v44   ;;  %1648 = vperm.xlu0 %8411, %v1275_v45   ;;  %v1180_v44 = vld [vmem:[%s13920_s26 + $0x98] sm:$0xff]  ;;  %v1179_v45 = vld [vmem:[%s13920_s26 + $0x90] sm:$0xff] }
  0x4b   :  { %1657 = vperm.xlu1 %8412, %v1278_v47   ;;  %1654 = vperm.xlu0 %8411, %v1277_v48   ;;  %v1182_v47 = vld [vmem:[%s13920_s26 + $0xa8] sm:$0xff]  ;;  %v1181_v48 = vld [vmem:[%s13920_s26 + $0xa0] sm:$0xff] }
  0x4c   :  { %8004 = vmatmul.mubr.msk.bf16.gmra.mrb[28].mxu0 %vm284_vm1, %v8713_v36  ;;  %v1173_v36 = vld [vmem:[%s13920_s26 + $0x60] sm:$0xff] }
  0x4d   :  { %8007 = vmatprep.mubr.msk.bf16.mxu0 %vm8860_vm0, %v13735_v0 }
  0x4f   :  { %1663 = vperm.xlu1 %8412, %v1280_v49   ;;  %1660 = vperm.xlu0 %8411, %v1279_v50  }
  0x53   :  { %1669 = vperm.xlu1 %8412, %v1282_v52   ;;  %1666 = vperm.xlu0 %8411, %v1281_v53   ;;  %v1183_v52 = vld [vmem:[%s13920_s26 + $0xb0] sm:$0xff] }
  0x54   :  { %8008 = vmatmul.mubr.msk.bf16.gmra.mrb[32].mxu0 %vm284_vm1, %v8714_v41  ;;  %v1177_v41 = vld [vmem:[%s13920_s26 + $0x80] sm:$0xff] }
  0x55   :  { %8011 = vmatprep.mubr.msk.bf16.mxu0 %vm8860_vm0, %v13735_v0 }
  0x57   :  { %1675 = vperm.xlu1 %8412, %v1284_v54   ;;  %1672 = vperm.xlu0 %8411, %v1283_v55   ;;  %v8728_v54 = vld [vmem:[%s13919_s22 + $0xb0] sm:$0xff]  }
  0x5b   :  { %1681 = vperm.xlu1 %8412, %v1286_v57   ;;  %1678 = vperm.xlu0 %8411, %v1285_v58   ;;  %v1185_v57 = vld [vmem:[%s13920_s26 + $0xc0] sm:$0xff]  ;;  %v1188_v58 = vld [vmem:[%s13920_s26 + $0xd8] sm:$0xff] }
  0x5c   :  { %8012 = vmatmul.mubr.msk.bf16.gmra.mrb[36].mxu0 %vm284_vm1, %v8715_v46  ;;  %v8727_v46 = vld [vmem:[%s13919_s22 + $0xa8] sm:$0xff]  }
  0x5d   :  { %8015 = vmatprep.mubr.msk.bf16.mxu0 %vm8860_vm0, %v13735_v0 }
  0x5f   :  { %1687 = vperm.xlu1 %8412, %v1288_v59   ;;  %1684 = vperm.xlu0 %8411, %v1287_v60   ;;  %v1187_v59 = vld [vmem:[%s13920_s26 + $0xd0] sm:$0xff] }
  0x63   :  { %1693 = vperm.xlu1 %8412, %v1290_v62   ;;  %1690 = vperm.xlu0 %8411, %v1289_v63   ;;  %v8729_v62 = vld [vmem:[%s13919_s22 + $0xb8] sm:$0xff]   ;;  %v1190_v63 = vld [vmem:[%s13920_s26 + $0xe8] sm:$0xff] }
  0x64   :  { %8016 = vmatmul.mubr.msk.bf16.gmra.mrb[40].mxu0 %vm284_vm1, %v8716_v51  ;;  %v1184_v51 = vld [vmem:[%s13920_s26 + $0xb8] sm:$0xff] }
  0x65   :  { %8019 = vmatprep.mubr.msk.bf16.mxu0 %vm8860_vm0, %v13735_v0 }
  0x67   :  { %1699 = vperm.xlu1 %8412, %v1292_v1   ;;  %1696 = vperm.xlu0 %8411, %v1291_v2   ;;  %v1189_v1 = vld [vmem:[%s13920_s26 + $0xe0] sm:$0xff] }
  0x6b   :  { %1705 = vperm.xlu1 %8412, %v1294_v5   ;;  %1702 = vperm.xlu0 %8411, %v1293_v6   ;;  %v1192_v5 = vld [vmem:[%s13920_s26 + $0xf8] sm:$0xff]  ;;  %v1191_v6 = vld [vmem:[%s13920_s26 + $0xf0] sm:$0xff] }
  0x6c   :  { %8020 = vmatmul.mubr.msk.bf16.gmra.mrb[44].mxu0 %vm284_vm1, %v8717_v56  ;;  %v1186_v56 = vld [vmem:[%s13920_s26 + $0xc8] sm:$0xff] }
  0x6d   :  { %8023 = vmatprep.mubr.msk.bf16.mxu0 %vm8860_vm0, %v13735_v0 }
  0x6f   :  { %1711 = vperm.xlu1 %8412, %v1296_v7   ;;  %1708 = vperm.xlu0 %8411, %v1295_v8   ;;  %v8730_v7 = vld [vmem:[%s13919_s22 + $0xc0] sm:$0xff]   ;;  %v1194_v8 = vld [vmem:[%s13920_s26 + $0x108] sm:$0xff] }
  0x73   :  { %1717 = vperm.xlu1 %8412, %v1298_v10   ;;  %1714 = vperm.xlu0 %8411, %v1297_v11  }
  0x74   :  { %8024 = vmatmul.mubr.msk.bf16.gmra.mrb[48].mxu0 %vm284_vm1, %v8718_v61 }
  0x75   :  { %8027 = vmatprep.mubr.msk.bf16.mxu0 %vm8860_vm0, %v13735_v0 }
  0x77   :  { %1723 = vperm.xlu1 %8412, %v1300_v12   ;;  %1720 = vperm.xlu0 %8411, %v1299_v13   ;;  %v1196_v12 = vld [vmem:[%s13920_s26 + $0x118] sm:$0xff]  ;;  %v1195_v13 = vld [vmem:[%s13920_s26 + $0x110] sm:$0xff] }
  0x7b   :  { %1729 = vperm.xlu1 %8412, %v1302_v15   ;;  %1726 = vperm.xlu0 %8411, %v1301_v16   ;;  %v8731_v15 = vld [vmem:[%s13919_s22 + $0xc8] sm:$0xff]  }
  0x7c   :  { %8028 = vmatmul.mubr.msk.bf16.gmra.mrb[52].mxu0 %vm284_vm1, %v8719_v3 }
  0x7d   :  { %8031 = vmatprep.mubr.msk.bf16.mxu0 %vm8860_vm0, %v13735_v0 }
  0x7f   :  { %1735 = vperm.xlu1 %8412, %v1304_v17   ;;  %1732 = vperm.xlu0 %8411, %v1303_v18   ;;  %v1198_v17 = vld [vmem:[%s13920_s26 + $0x128] sm:$0xff]  ;;  %v1197_v18 = vld [vmem:[%s13920_s26 + $0x120] sm:$0xff] }
  0x83   :  { %1309 = vperm.xlu1 %8412, %v1162_v20   ;;  %1306 = vperm.xlu0 %8411, %v1161_v21   ;;  %v1199_v20 = vld [vmem:[%s13920_s26 + $0x130] sm:$0xff] }
  0x84   :  { %8032 = vmatmul.mubr.msk.bf16.gmra.mrb[56].mxu0 %vm284_vm1, %v8720_v9  ;;  %v1193_v9 = vld [vmem:[%s13920_s26 + $0x100] sm:$0xff] }
  0x85   :  { %8035 = vmatprep.mubr.msk.bf16.mxu0 %vm8860_vm0, %v13735_v0 }
  0x87   :  { %1315 = vperm.xlu1 %8412, %v1164_v22   ;;  %1312 = vperm.xlu0 %8411, %v1163_v23   ;;  %v8732_v23 = vld [vmem:[%s13919_s22 + $0xd0] sm:$0xff]  }
  0x8a   :  { %v9336_v42 = vpop.permute.xlu1 %1564  ;;  %v9339_v43 = vpop.permute.xlu0 %1558 }
  0x8b   :  { %1321 = vperm.xlu1 %8412, %v1166_v25   ;;  %1318 = vperm.xlu0 %8411, %v1165_v26   ;;  %13921 = vst [vmem:[#allocation2_spill] sm:$0xff] %v9336_v42  ;;  %13922 = vst [vmem:[#allocation3_spill] sm:$0xff] %v9339_v43  ;;  %v1201_v25 = vld [vmem:[%s13920_s26 + $0x140] sm:$0xff] }
  0x8c   :  { %8036 = vmatmul.mubr.msk.bf16.gmra.mrb[60].mxu0 %vm284_vm1, %v8721_v14 }
  0x8d   :  { %8039 = vmatprep.mubr.msk.bf16.mxu0 %vm8860_vm0, %v13735_v0 }
  0x8e   :  { %v9358_v49 = vpop.permute.xlu1 %1567  ;;  %v9360_v50 = vpop.permute.xlu0 %1561 }
  0x8f   :  { %1327 = vperm.xlu1 %8412, %v1168_v27   ;;  %1324 = vperm.xlu0 %8411, %v1167_v28   ;;  %13923 = vst [vmem:[#allocation4_spill] sm:$0xff] %v9358_v49  ;;  %13924 = vst [vmem:[#allocation5_spill] sm:$0xff] %v9360_v50  ;;  %v1204_v28 = vld [vmem:[%s13920_s26 + $0x158] sm:$0xff] }
  0x92   :  { %v9371_v53 = vpop.permute.xlu1 %1573  ;;  %v9376_v55 = vpop.permute.xlu0 %1570 }
  0x93   :  { %1333 = vperm.xlu1 %8412, %v1170_v30   ;;  %1330 = vperm.xlu0 %8411, %v1169_v31   ;;  %13925 = vst [vmem:[#allocation6_spill] sm:$0xff] %v9371_v53  ;;  %13926 = vst [vmem:[#allocation7_spill] sm:$0xff] %v9376_v55 }
  0x94   :  { %8040 = vmatmul.mubr.msk.bf16.gmra.mrb[64].mxu0 %vm284_vm1, %v8722_v19  ;;  %v1200_v19 = vld [vmem:[%s13920_s26 + $0x138] sm:$0xff] }
  0x95   :  { %8043 = vmatprep.mubr.msk.bf16.mxu0 %vm8860_vm0, %v13735_v0 }
  0x96   :  { %v9393_v60 = vpop.permute.xlu1 %1579  ;;  %v9395_v61 = vpop.permute.xlu0 %1576 }
  0x97   :  { %1339 = vperm.xlu1 %8412, %v1172_v32   ;;  %1336 = vperm.xlu0 %8411, %v1171_v33   ;;  %13927 = vst [vmem:[#allocation8_spill] sm:$0xff] %v9393_v60  ;;  %13928 = vst [vmem:[#allocation9_spill] sm:$0xff] %v9395_v61  ;;  %v8733_v33 = vld [vmem:[%s13919_s22 + $0xd8] sm:$0xff]  }
  0x9a   :  { %v9406_v2 = vpop.permute.xlu1 %1585  ;;  %v9409_v3 = vpop.permute.xlu0 %1582 }
  0x9b   :  { %1345 = vperm.xlu1 %8412, %v1174_v35   ;;  %1342 = vperm.xlu0 %8411, %v1173_v36   ;;  %13929 = vst [vmem:[#allocation10_spill] sm:$0xff] %v9406_v2  ;;  %13930 = vst [vmem:[#allocation11_spill] sm:$0xff] %v9409_v3  ;;  %v1205_v35 = vld [vmem:[%s13920_s26 + $0x160] sm:$0xff] }
  0x9c   :  { %8044 = vmatmul.mubr.msk.bf16.gmra.mrb[68].mxu0 %vm284_vm1, %v8723_v24  ;;  %v1202_v24 = vld [vmem:[%s13920_s26 + $0x148] sm:$0xff] }
  0x9d   :  { %8047 = vmatprep.mubr.msk.bf16.mxu0 %vm8860_vm0, %v13735_v0 }
  0x9e   :  { %v9428_v10 = vpop.permute.xlu1 %1591  ;;  %v9430_v11 = vpop.permute.xlu0 %1588 }
  0x9f   :  { %1351 = vperm.xlu1 %8412, %v1176_v37   ;;  %1348 = vperm.xlu0 %8411, %v1175_v38   ;;  %13931 = vst [vmem:[#allocation12_spill] sm:$0xff] %v9428_v10  ;;  %13932 = vst [vmem:[#allocation13_spill] sm:$0xff] %v9430_v11 }
  0xa2   :  { %v9441_v14 = vpop.permute.xlu1 %1597  ;;  %v9446_v16 = vpop.permute.xlu0 %1594 }
  0xa3   :  { %1357 = vperm.xlu1 %8412, %v1178_v40   ;;  %1354 = vperm.xlu0 %8411, %v1177_v41   ;;  %13933 = vst [vmem:[#allocation14_spill] sm:$0xff] %v9441_v14  ;;  %13934 = vst [vmem:[#allocation15_spill] sm:$0xff] %v9446_v16 }
  0xa4   :  { %8048 = vmatmul.mubr.msk.bf16.gmra.mrb[72].mxu0 %vm284_vm1, %v8724_v29  ;;  %v1203_v29 = vld [vmem:[%s13920_s26 + $0x150] sm:$0xff] }
  0xa5   :  { %8051 = vmatprep.mubr.msk.bf16.mxu0 %vm8860_vm0, %v13735_v0 }
  0xa6   :  { %v9463_v21 = vpop.permute.xlu1 %1603  ;;  %v9465_v22 = vpop.permute.xlu0 %1600 }
  0xa7   :  { %1363 = vperm.xlu1 %8412, %v1180_v44   ;;  %1360 = vperm.xlu0 %8411, %v1179_v45   ;;  %13935 = vst [vmem:[#allocation16_spill] sm:$0xff] %v9463_v21  ;;  %13936 = vst [vmem:[#allocation17_spill] sm:$0xff] %v9465_v22 }
  0xaa   :  { %v9476_v26 = vpop.permute.xlu1 %1609  ;;  %v9479_v27 = vpop.permute.xlu0 %1606 }
  0xab   :  { %1369 = vperm.xlu1 %8412, %v1182_v47   ;;  %1366 = vperm.xlu0 %8411, %v1181_v48   ;;  %13937 = vst [vmem:[#allocation18_spill] sm:$0xff] %v9476_v26  ;;  %13938 = vst [vmem:[#allocation19_spill] sm:$0xff] %v9479_v27  ;;  %v1208_v48 = vld [vmem:[%s13920_s26 + $0x178] sm:$0xff] }
  0xac   :  { %8052 = vmatmul.mubr.msk.bf16.gmra.mrb[76].mxu0 %vm284_vm1, %v8725_v34  ;;  %v1206_v34 = vld [vmem:[%s13920_s26 + $0x168] sm:$0xff] }
  0xad   :  { %8055 = vmatprep.mubr.msk.bf16.mxu0 %vm8860_vm0, %v13735_v0 }
  0xae   :  { %v9504_v37 = vpop.permute.xlu1 %1615  ;;  %v9512_v44 = vpop.permute.xlu0 %1612 }
  0xaf   :  { %1375 = vperm.xlu1 %8412, %v1184_v51   ;;  %1372 = vperm.xlu0 %8411, %v1183_v52   ;;  %13939 = vst [vmem:[#allocation20_spill] sm:$0xff] %v9504_v37  ;;  %13940 = vst [vmem:[#allocation21_spill] sm:$0xff] %v9512_v44  ;;  %v1207_v51 = vld [vmem:[%s13920_s26 + $0x170] sm:$0xff] }
  0xb3   :  { %1381 = vperm.xlu1 %8412, %v1186_v56   ;;  %1378 = vperm.xlu0 %8411, %v1185_v57   ;;  %v8734_v56 = vld [vmem:[%s13919_s22 + $0xe0] ss:$0 sps:$4 sm:$0x11]   ;;  %v9530_v57 = vpop.permute.xlu1 %1621 }
  0xb4   :  { %8056 = vmatmul.mubr.msk.bf16.gmra.mrb[80].mxu0 %vm284_vm1, %v8726_v39  ;;  %13941 = vst [vmem:[#allocation22_spill] sm:$0xff] %v9530_v57 }
  0xb5   :  { %8059 = vmatprep.mubr.msk.bf16.mxu0 %vm8860_vm0, %v13735_v0 }
  0xb7   :  { %1387 = vperm.xlu1 %8412, %v1188_v58   ;;  %1384 = vperm.xlu0 %8411, %v1187_v59  }
  0xbb   :  { %1393 = vperm.xlu1 %8412, %v1190_v63   ;;  %1390 = vperm.xlu0 %8411, %v1189_v1   ;;  %v9536_v63 = vpop.permute.xlu0 %1618  ;;  %v1210_v1 = vld [vmem:[%s13920_s26 + $0x188] sm:$0xff] }
  0xbc   :  { %8060 = vmatmul.mubr.msk.bf16.gmra.mrb[84].mxu0 %vm284_vm1, %v8727_v46  ;;  %13942 = vst [vmem:[#allocation23_spill] sm:$0xff] %v9536_v63 }
  0xbd   :  { %8063 = vmatprep.mubr.msk.bf16.mxu0 %vm8860_vm0, %v13735_v0 }
  0xbf   :  { %1399 = vperm.xlu1 %8412, %v1192_v5   ;;  %1396 = vperm.xlu0 %8411, %v1191_v6   ;;  %v1209_v5 = vld [vmem:[%s13920_s26 + $0x180] sm:$0xff] }
  0xc3   :  { %1405 = vperm.xlu1 %8412, %v1194_v8   ;;  %1402 = vperm.xlu0 %8411, %v1193_v9  }
  0xc4   :  { %8064 = vmatmul.mubr.msk.bf16.gmra.mrb[88].mxu0 %vm284_vm1, %v8728_v54 }
  0xc5   :  { %8067 = vmatprep.mubr.msk.bf16.mxu0 %vm8860_vm0, %v13735_v0 }
  0xc7   :  { %1411 = vperm.xlu1 %8412, %v1196_v12   ;;  %1408 = vperm.xlu0 %8411, %v1195_v13  }
  0xcb   :  { %1417 = vperm.xlu1 %8412, %v1198_v17   ;;  %1414 = vperm.xlu0 %8411, %v1197_v18  }
  0xcc   :  { %8068 = vmatmul.mubr.msk.bf16.gmra.mrb[92].mxu0 %vm284_vm1, %v8729_v62 }
  0xcd   :  { %8071 = vmatprep.mubr.msk.bf16.mxu0 %vm8860_vm0, %v13735_v0 }
  0xcf   :  { %1423 = vperm.xlu1 %8412, %v1200_v19   ;;  %1420 = vperm.xlu0 %8411, %v1199_v20   ;;  %v1212_v19 = vld [vmem:[%s13920_s26 + $0x198] sm:$0xff]  ;;  %v1211_v20 = vld [vmem:[%s13920_s26 + $0x190] sm:$0xff] }
  0xd3   :  { %1429 = vperm.xlu1 %8412, %v1202_v24   ;;  %1426 = vperm.xlu0 %8411, %v1201_v25   ;;  %v9559_v24 = vpop.permute.xlu1 %1627  ;;  %v9561_v25 = vpop.permute.xlu0 %1624 }
  0xd4   :  { %8072 = vmatmul.mubr.msk.bf16.gmra.mrb[96].mxu0 %vm284_vm1, %v8730_v7  ;;  %13943 = vst [vmem:[#allocation24_spill] sm:$0xff] %v9559_v24  ;;  %13944 = vst [vmem:[#allocation25_spill] sm:$0xff] %v9561_v25 }
  0xd5   :  { %8075 = vmatprep.mubr.msk.bf16.mxu0 %vm8860_vm0, %v13735_v0 }
  0xd7   :  { %1435 = vperm.xlu1 %8412, %v1204_v28   ;;  %1432 = vperm.xlu0 %8411, %v1203_v29  }
  0xdb   :  { %1441 = vperm.xlu1 %8412, %v1206_v34   ;;  %1438 = vperm.xlu0 %8411, %v1205_v35   ;;  %v1213_v34 = vld [vmem:[%s13920_s26 + $0x1a0] sm:$0xff] }
  0xdc   :  { %8076 = vmatmul.mubr.msk.bf16.gmra.mrb[100].mxu0 %vm284_vm1, %v8731_v15 }
  0xdd   :  { %8079 = vmatprep.mubr.msk.bf16.mxu0 %vm8860_vm0, %v13735_v0 }
  0xdf   :  { %1447 = vperm.xlu1 %8412, %v1208_v48   ;;  %1444 = vperm.xlu0 %8411, %v1207_v51   ;;  %v9582_v48 = vpop.permute.xlu1 %1633 }
  0xe0   :  { %13945 = vst [vmem:[#allocation26_spill] sm:$0xff] %v9582_v48 }
  0xe3   :  { %1453 = vperm.xlu1 %8412, %v1210_v1   ;;  %1450 = vperm.xlu0 %8411, %v1209_v5  }
  0xe4   :  { %8080 = vmatmul.mubr.msk.bf16.gmra.mrb[104].mxu0 %vm284_vm1, %v8732_v23 }
  0xe5   :  { %8083 = vmatprep.mubr.msk.bf16.mxu0 %vm8860_vm0, %v13735_v0 }
  0xe7   :  { %v9489_v30 = vpop.f32.mrb[0].mxu0  ;;  %1459 = vperm.xlu1 %8412, %v1212_v19   ;;  %1456 = vperm.xlu0 %8411, %v1211_v20  }
  0xe8   :  { %v758_v31 = vmul.f32 %v9489_v30, %v9489_v30  ;;  %v7977_v32 = vpop.f32.mrb[1].mxu0  ;;  %v637_v38 = vsel %vm636_vm2, %v9489_v30, 0.0 }
  0xe9   :  { %v9502_v36 = vpop.f32.mrb[2].mxu0 }
  0xea   :  { %v638_v39 = vsel %vm636_vm2, %v9502_v36, 0.0  ;;  %v759_v40 = vmul.f32 %v9502_v36, %v9502_v36  ;;  %v7978_v41 = vpop.f32.mrb[3].mxu0  ;;  %v815_v46 = vsel %vm636_vm2, %v758_v31, 0.0 }
  0xeb   :  { %v639_v45 = vadd.f32 %v638_v39, %v637_v38  ;;  %1462 = vperm.xlu0 %8411, %v1213_v34   ;;  %v1219_v34 = vld [vmem:[%s13920_s26 + $0x1d0] sm:$0xff] }
  0xec   :  { %v816_v47 = vsel %vm636_vm2, %v759_v40, 0.0  ;;  %8084 = vmatmul.mubr.msk.bf16.gmra.mrb[108].mxu0 %vm284_vm1, %v8733_v33  ;;  %v1214_v33 = vld [vmem:[%s13920_s26 + $0x1a8] sm:$0xff] }
  0xed   :  { %v817_v52 = vadd.f32 %v816_v47, %v815_v46  ;;  %8087 = vmatprep.mubr.msk.bf16.mxu0 %vm8860_vm0, %v13735_v0  ;;  %1465 = vperm.xlu1 %8412, %v1214_v33   ;;  %v1220_v33 = vld [vmem:[%s13920_s26 + $0x1d8] sm:$0xff] }
  0xee   :  { %v1232_v0 = vld [vmem:[%s13920_s26 + $0x238] sm:$0xff] }
  0xef   :  { %v9525_v54 = vpop.f32.mrb[4].mxu0 }
  0xf0   :  { %v640_v58 = vsel %vm636_vm2, %v9525_v54, 0.0  ;;  %v760_v59 = vmul.f32 %v9525_v54, %v9525_v54  ;;  %v7981_v62 = vpop.f32.mrb[5].mxu0 }
  0xf1   :  { %v641_v6 = vadd.f32 %v640_v58, %v639_v45  ;;  %v9544_v7 = vpop.f32.mrb[6].mxu0  ;;  %v1215_v58 = vld [vmem:[%s13920_s26 + $0x1b0] sm:$0xff] }
  0xf2   :  { %v818_v8 = vsel %vm636_vm2, %v760_v59, 0.0  ;;  %v642_v9 = vsel %vm636_vm2, %v9544_v7, 0.0  ;;  %v761_v12 = vmul.f32 %v9544_v7, %v9544_v7  ;;  %v7982_v13 = vpop.f32.mrb[7].mxu0  ;;  %1468 = vperm.xlu0 %8411, %v1215_v58  }
  0xf3   :  { %v819_v15 = vadd.f32 %v818_v8, %v817_v52  ;;  %v643_v17 = vadd.f32 %v642_v9, %v641_v6  ;;  %v9585_v52 = vpop.permute.xlu0 %1630  ;;  %v1218_v8 = vld [vmem:[%s13920_s26 + $0x1c8] sm:$0xff]  ;;  %v1217_v9 = vld [vmem:[%s13920_s26 + $0x1c0] sm:$0xff] }
  0xf4   :  { %v820_v18 = vsel %vm636_vm2, %v761_v12, 0.0  ;;  %8088 = vmatmul.mubr.msk.bf16.gmra.mrb[112].mxu0 %vm284_vm1, %v8734_v56  ;;  %13946 = vst [vmem:[#allocation27_spill] sm:$0xff] %v9585_v52  ;;  %v1216_v56 = vld [vmem:[%s13920_s26 + $0x1b8] sm:$0xff] }
  0xf5   :  { %v821_v23 = vadd.f32 %v820_v18, %v819_v15  ;;  %1471 = vperm.xlu1 %8412, %v1216_v56   ;;  %v9607_v15 = vpop.permute.xlu1 %1639  ;;  %v1221_v56 = vld [vmem:[%s13920_s26 + $0x1e0] sm:$0xff] }
  0xf6   :  { %13947 = vst [vmem:[#allocation28_spill] sm:$0xff] %v9607_v15  ;;  %1474 = vperm.xlu0 %8411, %v1217_v9  }
  0xf7   :  { %v9563_v28 = vpop.f32.mrb[8].mxu0 }
  0xf8   :  { %v644_v29 = vsel %vm636_vm2, %v9563_v28, 0.0  ;;  %v762_v31 = vmul.f32 %v9563_v28, %v9563_v28  ;;  %v7985_v32 = vpop.f32.mrb[9].mxu0 }
  0xf9   :  { %v645_v35 = vadd.f32 %v644_v29, %v643_v17  ;;  %v9575_v38 = vpop.f32.mrb[10].mxu0  ;;  %1477 = vperm.xlu1 %8412, %v1218_v8  }
  0xfa   :  { %v822_v39 = vsel %vm636_vm2, %v762_v31, 0.0  ;;  %v646_v40 = vsel %vm636_vm2, %v9575_v38, 0.0  ;;  %v763_v41 = vmul.f32 %v9575_v38, %v9575_v38  ;;  %v7986_v45 = vpop.f32.mrb[11].mxu0  ;;  %1480 = vperm.xlu0 %8411, %v1219_v34  }
  0xfb   :  { %v823_v46 = vadd.f32 %v822_v39, %v821_v23  ;;  %v647_v47 = vadd.f32 %v646_v40, %v645_v35  ;;  %v9614_v23 = vpop.permute.xlu0 %1636  ;;  %v9625_v40 = vpop.permute.xlu1 %1645 }
  0xfc   :  { %v824_v51 = vsel %vm636_vm2, %v763_v41, 0.0  ;;  %13948 = vst [vmem:[#allocation29_spill] sm:$0xff] %v9614_v23  ;;  %13949 = vst [vmem:[#allocation30_spill] sm:$0xff] %v9625_v40  ;;  %v1243_v40 = vld [vmem:[%s13920_s26 + $0x290] sm:$0xff] }
  0xfd   :  { %v825_v59 = vadd.f32 %v824_v51, %v823_v46  ;;  %1483 = vperm.xlu1 %8412, %v1220_v33   ;;  %v1222_v51 = vld [vmem:[%s13920_s26 + $0x1e8] sm:$0xff] }
  0xfe   :  { %1486 = vperm.xlu0 %8411, %v1221_v56  }
  0xff   :  { %v9593_v62 = vpop.f32.mrb[12].mxu0 }
 0x100   :  { %v648_v1 = vsel %vm636_vm2, %v9593_v62, 0.0  ;;  %v764_v5 = vmul.f32 %v9593_v62, %v9593_v62  ;;  %v7989_v6 = vpop.f32.mrb[13].mxu0 }
 0x101   :  { %v649_v12 = vadd.f32 %v648_v1, %v647_v47  ;;  %v9605_v13 = vpop.f32.mrb[14].mxu0  ;;  %v9631_v47 = vpop.permute.xlu0 %1642  ;;  %1489 = vperm.xlu1 %8412, %v1222_v51   ;;  %v1225_v51 = vld [vmem:[%s13920_s26 + $0x200] sm:$0xff] }
 0x102   :  { %v826_v17 = vsel %vm636_vm2, %v764_v5, 0.0  ;;  %v650_v18 = vsel %vm636_vm2, %v9605_v13, 0.0  ;;  %v765_v19 = vmul.f32 %v9605_v13, %v9605_v13  ;;  %v7990_v20 = vpop.f32.mrb[15].mxu0  ;;  %13950 = vst [vmem:[#allocation31_spill] sm:$0xff] %v9631_v47 }
 0x103   :  { %v827_v29 = vadd.f32 %v826_v17, %v825_v59  ;;  %v651_v31 = vadd.f32 %v650_v18, %v649_v12  ;;  %v1224_v18 = vld [vmem:[%s13920_s26 + $0x1f8] sm:$0xff] }
 0x104   :  { %v828_v32 = vsel %vm636_vm2, %v765_v19, 0.0  ;;  %v1223_v19 = vld [vmem:[%s13920_s26 + $0x1f0] sm:$0xff] }
 0x105   :  { %v829_v35 = vadd.f32 %v828_v32, %v827_v29  ;;  %v9653_v29 = vpop.permute.xlu1 %1651  ;;  %1495 = vperm.xlu1 %8412, %v1224_v18   ;;  %1492 = vperm.xlu0 %8411, %v1223_v19   ;;  %v1228_v18 = vld [vmem:[%s13920_s26 + $0x218] sm:$0xff] }
 0x106   :  { %13951 = vst [vmem:[#allocation32_spill] sm:$0xff] %v9653_v29 }
 0x107   :  { %v9623_v39 = vpop.f32.mrb[16].mxu0 }
 0x108   :  { %v652_v41 = vsel %vm636_vm2, %v9623_v39, 0.0  ;;  %v766_v45 = vmul.f32 %v9623_v39, %v9623_v39  ;;  %v7993_v46 = vpop.f32.mrb[17].mxu0 }
 0x109   :  { %v653_v58 = vadd.f32 %v652_v41, %v651_v31  ;;  %v9639_v59 = vpop.f32.mrb[18].mxu0  ;;  %v9655_v31 = vpop.permute.xlu0 %1648  ;;  %v1226_v41 = vld [vmem:[%s13920_s26 + $0x208] sm:$0xff]  ;;  %1498 = vperm.xlu0 %8411, %v1225_v51  }
 0x10a   :  { %v830_v1 = vsel %vm636_vm2, %v766_v45, 0.0  ;;  %v654_v5 = vsel %vm636_vm2, %v9639_v59, 0.0  ;;  %v767_v6 = vmul.f32 %v9639_v59, %v9639_v59  ;;  %v7994_v8 = vpop.f32.mrb[19].mxu0  ;;  %13952 = vst [vmem:[#allocation33_spill] sm:$0xff] %v9655_v31  ;;  %1501 = vperm.xlu1 %8412, %v1226_v41   ;;  %v1239_v31 = vld [vmem:[%s13920_s26 + $0x270] sm:$0xff] }
 0x10b   :  { %v831_v9 = vadd.f32 %v830_v1, %v829_v35  ;;  %v655_v12 = vadd.f32 %v654_v5, %v653_v58 }
 0x10c   :  { %v832_v17 = vsel %vm636_vm2, %v767_v6, 0.0 }
 0x10d   :  { %v833_v20 = vadd.f32 %v832_v17, %v831_v9  ;;  %v9676_v9 = vpop.permute.xlu1 %1657  ;;  %v9679_v17 = vpop.permute.xlu0 %1654 }
 0x10e   :  { %13953 = vst [vmem:[#allocation34_spill] sm:$0xff] %v9676_v9  ;;  %13954 = vst [vmem:[#allocation35_spill] sm:$0xff] %v9679_v17  ;;  %1507 = vperm.xlu1 %8412, %v1228_v18  }
 0x10f   :  { %v9657_v32 = vpop.f32.mrb[20].mxu0 }
 0x110   :  { %v656_v33 = vsel %vm636_vm2, %v9657_v32, 0.0  ;;  %v768_v34 = vmul.f32 %v9657_v32, %v9657_v32  ;;  %v7997_v35 = vpop.f32.mrb[21].mxu0 }
 0x111   :  { %v657_v45 = vadd.f32 %v656_v33, %v655_v12  ;;  %v9666_v46 = vpop.f32.mrb[22].mxu0  ;;  %v1227_v33 = vld [vmem:[%s13920_s26 + $0x210] sm:$0xff] }
 0x112   :  { %v834_v56 = vsel %vm636_vm2, %v768_v34, 0.0  ;;  %v658_v58 = vsel %vm636_vm2, %v9666_v46, 0.0  ;;  %v769_v1 = vmul.f32 %v9666_v46, %v9666_v46  ;;  %v7998_v5 = vpop.f32.mrb[23].mxu0  ;;  %1504 = vperm.xlu0 %8411, %v1227_v33   ;;  %v9708_v33 = vpop.permute.xlu0 %1660 }
 0x113   :  { %v835_v6 = vadd.f32 %v834_v56, %v833_v20  ;;  %v659_v8 = vadd.f32 %v658_v58, %v657_v45  ;;  %v1230_v45 = vld [vmem:[%s13920_s26 + $0x228] sm:$0xff]  ;;  %v9698_v58 = vpop.permute.xlu1 %1663  ;;  %13956 = vst [vmem:[#allocation37_spill] sm:$0xff] %v9708_v33 }
 0x114   :  { %v836_v12 = vsel %vm636_vm2, %v769_v1, 0.0  ;;  %13955 = vst [vmem:[#allocation36_spill] sm:$0xff] %v9698_v58  ;;  %v1229_v1 = vld [vmem:[%s13920_s26 + $0x220] sm:$0xff]  ;;  %1513 = vperm.xlu1 %8412, %v1230_v45  }
 0x115   :  { %v837_v19 = vadd.f32 %v836_v12, %v835_v6 }
 0x116   :  { %1510 = vperm.xlu0 %8411, %v1229_v1   ;;  %v9725_v1 = vpop.permute.xlu0 %1666 }
 0x117   :  { %v9687_v34 = vpop.f32.mrb[24].mxu0  ;;  %13958 = vst [vmem:[#allocation39_spill] sm:$0xff] %v9725_v1 }
 0x118   :  { %v660_v20 = vsel %vm636_vm2, %v9687_v34, 0.0  ;;  %v770_v35 = vmul.f32 %v9687_v34, %v9687_v34  ;;  %v8001_v41 = vpop.f32.mrb[25].mxu0  ;;  %1519 = vperm.xlu1 %8412, %v1232_v0   ;;  %v1233_v0 = vld [vmem:[%s13920_s26 + $0x240] sm:$0xff] }
 0x119   :  { %v661_v51 = vadd.f32 %v660_v20, %v659_v8  ;;  %v9696_v56 = vpop.f32.mrb[26].mxu0 }
 0x11a   :  { %v838_v5 = vsel %vm636_vm2, %v770_v35, 0.0  ;;  %v662_v6 = vsel %vm636_vm2, %v9696_v56, 0.0  ;;  %v771_v12 = vmul.f32 %v9696_v56, %v9696_v56  ;;  %v8002_v18 = vpop.f32.mrb[27].mxu0  ;;  %1516 = vperm.xlu0 %8411, %v1231_v4   ;;  %v9749_v17 = vpop.permute.xlu0 %1672 }
 0x11b   :  { %v839_v8 = vadd.f32 %v838_v5, %v837_v19  ;;  %v663_v20 = vadd.f32 %v662_v6, %v661_v51  ;;  %v9719_v18 = vpop.permute.xlu1 %1669  ;;  %v1234_v5 = vld [vmem:[%s13920_s26 + $0x248] sm:$0xff]  ;;  %13960 = vst [vmem:[#allocation41_spill] sm:$0xff] %v9749_v17 }
 0x11c   :  { %v840_v41 = vsel %vm636_vm2, %v771_v12, 0.0  ;;  %13957 = vst [vmem:[#allocation38_spill] sm:$0xff] %v9719_v18  ;;  %1525 = vperm.xlu1 %8412, %v1234_v5  }
 0x11d   :  { %v841_v35 = vadd.f32 %v840_v41, %v839_v8 }
 0x11e   :  { %1522 = vperm.xlu0 %8411, %v1233_v0  }
 0x11f   :  { %v9717_v58 = vpop.f32.mrb[28].mxu0  ;;  %v9744_v9 = vpop.permute.xlu1 %1675 }
 0x120   :  { %v664_v19 = vsel %vm636_vm2, %v9717_v58, 0.0  ;;  %v772_v45 = vmul.f32 %v9717_v58, %v9717_v58  ;;  %v8005_v51 = vpop.f32.mrb[29].mxu0  ;;  %13959 = vst [vmem:[#allocation40_spill] sm:$0xff] %v9744_v9 }
 0x121   :  { %v665_v6 = vadd.f32 %v664_v19, %v663_v20  ;;  %v9730_v12 = vpop.f32.mrb[30].mxu0  ;;  %v1236_v19 = vld [vmem:[%s13920_s26 + $0x258] sm:$0xff] }
 0x122   :  { %v842_v8 = vsel %vm636_vm2, %v772_v45, 0.0  ;;  %v666_v41 = vsel %vm636_vm2, %v9730_v12, 0.0  ;;  %v773_v51 = vmul.f32 %v9730_v12, %v9730_v12  ;;  %v8006_v4 = vpop.f32.mrb[31].mxu0  ;;  %v1235_v45 = vld [vmem:[%s13920_s26 + $0x250] sm:$0xff]  ;;  %1531 = vperm.xlu1 %8412, %v1236_v19  }
 0x123   :  { %v843_v18 = vadd.f32 %v842_v8, %v841_v35  ;;  %v667_v1 = vadd.f32 %v666_v41, %v665_v6  ;;  %1528 = vperm.xlu0 %8411, %v1235_v45   ;;  %v1237_v41 = vld [vmem:[%s13920_s26 + $0x260] sm:$0xff]  ;;  %v9770_v17 = vpop.permute.xlu1 %1681 }
 0x124   :  { %v844_v20 = vsel %vm636_vm2, %v773_v51, 0.0  ;;  %13961 = vst [vmem:[#allocation42_spill] sm:$0xff] %v9770_v17 }
 0x125   :  { %v845_v33 = vadd.f32 %v844_v20, %v843_v18  ;;  %v1238_v18 = vld [vmem:[%s13920_s26 + $0x268] sm:$0xff] }
 0x126   :  { %1537 = vperm.xlu1 %8412, %v1238_v18  }
 0x127   :  { %v9751_v4 = vpop.f32.mrb[32].mxu0  ;;  %1534 = vperm.xlu0 %8411, %v1237_v41   ;;  %v1242_v41 = vld [vmem:[%s13920_s26 + $0x288] sm:$0xff] }
 0x128   :  { %v668_v35 = vsel %vm636_vm2, %v9751_v4, 0.0  ;;  %v774_v5 = vmul.f32 %v9751_v4, %v9751_v4  ;;  %v8009_v6 = vpop.f32.mrb[33].mxu0 }
 0x129   :  { %v669_v0 = vadd.f32 %v668_v35, %v667_v1  ;;  %v9760_v8 = vpop.f32.mrb[34].mxu0  ;;  %v9773_v35 = vpop.permute.xlu0 %1678 }
 0x12a   :  { %v846_v51 = vsel %vm636_vm2, %v774_v5, 0.0  ;;  %v670_v20 = vsel %vm636_vm2, %v9760_v8, 0.0  ;;  %v775_v19 = vmul.f32 %v9760_v8, %v9760_v8  ;;  %v8010_v45 = vpop.f32.mrb[35].mxu0  ;;  %13962 = vst [vmem:[#allocation43_spill] sm:$0xff] %v9773_v35  ;;  %v1240_v5 = vld [vmem:[%s13920_s26 + $0x278] sm:$0xff] }
 0x12b   :  { %v847_v6 = vadd.f32 %v846_v51, %v845_v33  ;;  %v671_v9 = vadd.f32 %v670_v20, %v669_v0  ;;  %1543 = vperm.xlu1 %8412, %v1240_v5   ;;  %1540 = vperm.xlu0 %8411, %v1239_v31   ;;  %v1244_v35 = vld [vmem:[%s13920_s26 + $0x298] sm:$0xff] }
 0x12c   :  { %v848_v1 = vsel %vm636_vm2, %v775_v19, 0.0  ;;  %v9792_v19 = vpop.permute.xlu1 %1687 }
 0x12d   :  { %v849_v29 = vadd.f32 %v848_v1, %v847_v6  ;;  %13963 = vst [vmem:[#allocation44_spill] sm:$0xff] %v9792_v19  ;;  %v1241_v6 = vld [vmem:[%s13920_s26 + $0x280] sm:$0xff]  ;;  %v9802_v17 = vpop.permute.xlu0 %1684 }
 0x12e   :  { %13964 = vst [vmem:[#allocation45_spill] sm:$0xff] %v9802_v17 }
 0x12f   :  { %v9781_v45 = vpop.f32.mrb[36].mxu0  ;;  %1549 = vperm.xlu1 %8412, %v1242_v41   ;;  %1546 = vperm.xlu0 %8411, %v1241_v6  }
 0x130   :  { %v672_v33 = vsel %vm636_vm2, %v9781_v45, 0.0  ;;  %v776_v18 = vmul.f32 %v9781_v45, %v9781_v45  ;;  %v8013_v0 = vpop.f32.mrb[37].mxu0 }
 0x131   :  { %v673_v51 = vadd.f32 %v672_v33, %v671_v9  ;;  %v9790_v20 = vpop.f32.mrb[38].mxu0  ;;  %v9819_v6 = vpop.permute.xlu0 %1690 }
 0x132   :  { %v850_v1 = vsel %vm636_vm2, %v776_v18, 0.0  ;;  %v674_v5 = vsel %vm636_vm2, %v9790_v20, 0.0  ;;  %v777_v31 = vmul.f32 %v9790_v20, %v9790_v20  ;;  %v8014_v0 = vpop.f32.mrb[39].mxu0  ;;  %13966 = vst [vmem:[#allocation47_spill] sm:$0xff] %v9819_v6 }
 0x133   :  { %v851_v9 = vadd.f32 %v850_v1, %v849_v29  ;;  %v675_v33 = vadd.f32 %v674_v5, %v673_v51  ;;  %v9813_v0 = vpop.permute.xlu1 %1693  ;;  %1555 = vperm.xlu1 %8412, %v1244_v35   ;;  %1552 = vperm.xlu0 %8411, %v1243_v40  }
 0x134   :  { %v852_v19 = vsel %vm636_vm2, %v777_v31, 0.0  ;;  %13965 = vst [vmem:[#allocation46_spill] sm:$0xff] %v9813_v0 }
 0x135   :  { %v853_v18 = vadd.f32 %v852_v19, %v851_v9 }
 0x137   :  { %v9811_v47 = vpop.f32.mrb[40].mxu0 }
 0x138   :  { %v676_v29 = vsel %vm636_vm2, %v9811_v47, 0.0  ;;  %v778_v41 = vmul.f32 %v9811_v47, %v9811_v47  ;;  %v8017_v51 = vpop.f32.mrb[41].mxu0 }
 0x139   :  { %v677_v19 = vadd.f32 %v676_v29, %v675_v33  ;;  %v9821_v1 = vpop.f32.mrb[42].mxu0 }
 0x13a   :  { %v854_v5 = vsel %vm636_vm2, %v778_v41, 0.0  ;;  %v678_v31 = vsel %vm636_vm2, %v9821_v1, 0.0  ;;  %v779_v35 = vmul.f32 %v9821_v1, %v9821_v1  ;;  %v8018_v9 = vpop.f32.mrb[43].mxu0 }
 0x13b   :  { %v855_v0 = vadd.f32 %v854_v5, %v853_v18  ;;  %v679_v17 = vadd.f32 %v678_v31, %v677_v19 }
 0x13c   :  { %v856_v15 = vsel %vm636_vm2, %v779_v35, 0.0 }
 0x13d   :  { %v857_v51 = vadd.f32 %v856_v15, %v855_v0 }
 0x13f   :  { %v9829_v23 = vpop.f32.mrb[44].mxu0 }
 0x140   :  { %v680_v40 = vsel %vm636_vm2, %v9829_v23, 0.0  ;;  %v780_v33 = vmul.f32 %v9829_v23, %v9829_v23  ;;  %v8021_v29 = vpop.f32.mrb[45].mxu0 }
 0x141   :  { %v681_v41 = vadd.f32 %v680_v40, %v679_v17  ;;  %v9835_v6 = vpop.f32.mrb[46].mxu0 }
 0x142   :  { %v858_v48 = vsel %vm636_vm2, %v780_v33, 0.0  ;;  %v682_v18 = vsel %vm636_vm2, %v9835_v6, 0.0  ;;  %v781_v15 = vmul.f32 %v9835_v6, %v9835_v6  ;;  %v8022_v0 = vpop.f32.mrb[47].mxu0 }
 0x143   :  { %v859_v19 = vadd.f32 %v858_v48, %v857_v51  ;;  %v683_v5 = vadd.f32 %v682_v18, %v681_v41 }
 0x144   :  { %v860_v31 = vsel %vm636_vm2, %v781_v15, 0.0 }
 0x145   :  { %v861_v35 = vadd.f32 %v860_v31, %v859_v19 }
 0x147   :  { %v9843_v9 = vpop.f32.mrb[48].mxu0 }
 0x148   :  { %v684_v17 = vsel %vm636_vm2, %v9843_v9, 0.0  ;;  %v782_v40 = vmul.f32 %v9843_v9, %v9843_v9  ;;  %v8025_v33 = vpop.f32.mrb[49].mxu0 }
 0x149   :  { %v685_v29 = vadd.f32 %v684_v17, %v683_v5  ;;  %v9849_v52 = vpop.f32.mrb[50].mxu0 }
 0x14a   :  { %v862_v24 = vsel %vm636_vm2, %v782_v40, 0.0  ;;  %v686_v48 = vsel %vm636_vm2, %v9849_v52, 0.0  ;;  %v783_v51 = vmul.f32 %v9849_v52, %v9849_v52  ;;  %v8026_v41 = vpop.f32.mrb[51].mxu0 }
 0x14b   :  { %v863_v18 = vadd.f32 %v862_v24, %v861_v35  ;;  %v687_v15 = vadd.f32 %v686_v48, %v685_v29 }
 0x14c   :  { %v864_v0 = vsel %vm636_vm2, %v783_v51, 0.0 }
 0x14d   :  { %v865_v19 = vadd.f32 %v864_v0, %v863_v18 }
 0x14f   :  { %v9857_v31 = vpop.f32.mrb[52].mxu0 }
 0x150   :  { %v688_v5 = vsel %vm636_vm2, %v9857_v31, 0.0  ;;  %v784_v17 = vmul.f32 %v9857_v31, %v9857_v31  ;;  %v8029_v40 = vpop.f32.mrb[53].mxu0 }
 0x151   :  { %v689_v33 = vadd.f32 %v688_v5, %v687_v15  ;;  %v9863_v25 = vpop.f32.mrb[54].mxu0 }
 0x152   :  { %v866_v57 = vsel %vm636_vm2, %v784_v17, 0.0  ;;  %v690_v24 = vsel %vm636_vm2, %v9863_v25, 0.0  ;;  %v785_v35 = vmul.f32 %v9863_v25, %v9863_v25  ;;  %v8030_v29 = vpop.f32.mrb[55].mxu0 }
 0x153   :  { %v867_v48 = vadd.f32 %v866_v57, %v865_v19  ;;  %v691_v51 = vadd.f32 %v690_v24, %v689_v33 }
 0x154   :  { %v868_v41 = vsel %vm636_vm2, %v785_v35, 0.0 }
 0x155   :  { %v869_v18 = vadd.f32 %v868_v41, %v867_v48 }
 0x157   :  { %v9871_v0 = vpop.f32.mrb[56].mxu0 }
 0x158   :  { %v692_v15 = vsel %vm636_vm2, %v9871_v0, 0.0  ;;  %v786_v5 = vmul.f32 %v9871_v0, %v9871_v0  ;;  %v8033_v17 = vpop.f32.mrb[57].mxu0 }
 0x159   :  { %v693_v40 = vadd.f32 %v692_v15, %v691_v51  ;;  %v9877_v63 = vpop.f32.mrb[58].mxu0 }
 0x15a   :  { %v870_v37 = vsel %vm636_vm2, %v786_v5, 0.0  ;;  %v694_v57 = vsel %vm636_vm2, %v9877_v63, 0.0  ;;  %v787_v19 = vmul.f32 %v9877_v63, %v9877_v63  ;;  %v8034_v33 = vpop.f32.mrb[59].mxu0 }
 0x15b   :  { %v871_v24 = vadd.f32 %v870_v37, %v869_v18  ;;  %v695_v35 = vadd.f32 %v694_v57, %v693_v40 }
 0x15c   :  { %v872_v29 = vsel %vm636_vm2, %v787_v19, 0.0 }
 0x15d   :  { %v873_v48 = vadd.f32 %v872_v29, %v871_v24 }
 0x15f   :  { %v9885_v41 = vpop.f32.mrb[60].mxu0 }
 0x160   :  { %v696_v51 = vsel %vm636_vm2, %v9885_v41, 0.0  ;;  %v788_v15 = vmul.f32 %v9885_v41, %v9885_v41  ;;  %v8037_v5 = vpop.f32.mrb[61].mxu0 }
 0x161   :  { %v697_v17 = vadd.f32 %v696_v51, %v695_v35  ;;  %v9891_v44 = vpop.f32.mrb[62].mxu0 }
 0x162   :  { %v874_v26 = vsel %vm636_vm2, %v788_v15, 0.0  ;;  %v698_v37 = vsel %vm636_vm2, %v9891_v44, 0.0  ;;  %v789_v18 = vmul.f32 %v9891_v44, %v9891_v44  ;;  %v8038_v40 = vpop.f32.mrb[63].mxu0 }
 0x163   :  { %v875_v57 = vadd.f32 %v874_v26, %v873_v48  ;;  %v699_v19 = vadd.f32 %v698_v37, %v697_v17 }
 0x164   :  { %v876_v33 = vsel %vm636_vm2, %v789_v18, 0.0 }
 0x165   :  { %v877_v24 = vadd.f32 %v876_v33, %v875_v57 }
 0x167   :  { %v9899_v29 = vpop.f32.mrb[64].mxu0 }
 0x168   :  { %v700_v35 = vsel %vm636_vm2, %v9899_v29, 0.0  ;;  %v790_v51 = vmul.f32 %v9899_v29, %v9899_v29  ;;  %v8041_v15 = vpop.f32.mrb[65].mxu0 }
 0x169   :  { %v701_v5 = vadd.f32 %v700_v35, %v699_v19  ;;  %v9905_v27 = vpop.f32.mrb[66].mxu0 }
 0x16a   :  { %v878_v21 = vsel %vm636_vm2, %v790_v51, 0.0  ;;  %v702_v26 = vsel %vm636_vm2, %v9905_v27, 0.0  ;;  %v791_v48 = vmul.f32 %v9905_v27, %v9905_v27  ;;  %v8042_v17 = vpop.f32.mrb[67].mxu0 }
 0x16b   :  { %v879_v37 = vadd.f32 %v878_v21, %v877_v24  ;;  %v703_v18 = vadd.f32 %v702_v26, %v701_v5 }
 0x16c   :  { %v880_v40 = vsel %vm636_vm2, %v791_v48, 0.0 }
 0x16d   :  { %v881_v57 = vadd.f32 %v880_v40, %v879_v37 }
 0x16f   :  { %v9913_v33 = vpop.f32.mrb[68].mxu0 }
 0x170   :  { %v704_v19 = vsel %vm636_vm2, %v9913_v33, 0.0  ;;  %v792_v35 = vmul.f32 %v9913_v33, %v9913_v33  ;;  %v8045_v51 = vpop.f32.mrb[69].mxu0 }
 0x171   :  { %v705_v15 = vadd.f32 %v704_v19, %v703_v18  ;;  %v9919_v22 = vpop.f32.mrb[70].mxu0 }
 0x172   :  { %v882_v14 = vsel %vm636_vm2, %v792_v35, 0.0  ;;  %v706_v21 = vsel %vm636_vm2, %v9919_v22, 0.0  ;;  %v793_v24 = vmul.f32 %v9919_v22, %v9919_v22  ;;  %v8046_v5 = vpop.f32.mrb[71].mxu0 }
 0x173   :  { %v883_v26 = vadd.f32 %v882_v14, %v881_v57  ;;  %v707_v48 = vadd.f32 %v706_v21, %v705_v15 }
 0x174   :  { %v884_v17 = vsel %vm636_vm2, %v793_v24, 0.0 }
 0x175   :  { %v885_v37 = vadd.f32 %v884_v17, %v883_v26 }
 0x177   :  { %v9927_v40 = vpop.f32.mrb[72].mxu0 }
 0x178   :  { %v708_v18 = vsel %vm636_vm2, %v9927_v40, 0.0  ;;  %v794_v19 = vmul.f32 %v9927_v40, %v9927_v40  ;;  %v8049_v35 = vpop.f32.mrb[73].mxu0 }
 0x179   :  { %v709_v51 = vadd.f32 %v708_v18, %v707_v48  ;;  %v9933_v16 = vpop.f32.mrb[74].mxu0 }
 0x17a   :  { %v886_v10 = vsel %vm636_vm2, %v794_v19, 0.0  ;;  %v710_v14 = vsel %vm636_vm2, %v9933_v16, 0.0  ;;  %v795_v57 = vmul.f32 %v9933_v16, %v9933_v16  ;;  %v8050_v15 = vpop.f32.mrb[75].mxu0 }
 0x17b   :  { %v887_v21 = vadd.f32 %v886_v10, %v885_v37  ;;  %v711_v24 = vadd.f32 %v710_v14, %v709_v51 }
 0x17c   :  { %v888_v5 = vsel %vm636_vm2, %v795_v57, 0.0 }
 0x17d   :  { %v889_v26 = vadd.f32 %v888_v5, %v887_v21 }
 0x17f   :  { %v9941_v17 = vpop.f32.mrb[76].mxu0 }
 0x180   :  { %v712_v48 = vsel %vm636_vm2, %v9941_v17, 0.0  ;;  %v796_v18 = vmul.f32 %v9941_v17, %v9941_v17  ;;  %v8053_v19 = vpop.f32.mrb[77].mxu0 }
 0x181   :  { %v713_v35 = vadd.f32 %v712_v48, %v711_v24  ;;  %v9947_v11 = vpop.f32.mrb[78].mxu0 }
 0x182   :  { %v890_v2 = vsel %vm636_vm2, %v796_v18, 0.0  ;;  %v714_v10 = vsel %vm636_vm2, %v9947_v11, 0.0  ;;  %v797_v37 = vmul.f32 %v9947_v11, %v9947_v11  ;;  %v8054_v51 = vpop.f32.mrb[79].mxu0 }
 0x183   :  { %v891_v14 = vadd.f32 %v890_v2, %v889_v26  ;;  %v715_v57 = vadd.f32 %v714_v10, %v713_v35 }
 0x184   :  { %v892_v15 = vsel %vm636_vm2, %v797_v37, 0.0 }
 0x185   :  { %v893_v21 = vadd.f32 %v892_v15, %v891_v14 }
 0x187   :  { %v9955_v5 = vpop.f32.mrb[80].mxu0 }
 0x188   :  { %13967 = vst [vmem:[#allocation48_spill] sm:$0xff] %v9955_v5  ;;  %v716_v24 = vsel %vm636_vm2, %v9955_v5, 0.0  ;;  %v798_v48 = vmul.f32 %v9955_v5, %v9955_v5  ;;  %v8057_v18 = vpop.f32.mrb[81].mxu0 }
 0x189   :  { %v717_v19 = vadd.f32 %v716_v24, %v715_v57  ;;  %v9961_v3 = vpop.f32.mrb[82].mxu0 }
 0x18a   :  { %13968 = vst [vmem:[#allocation49_spill] sm:$0xff] %v9961_v3  ;;  %v894_v60 = vsel %vm636_vm2, %v798_v48, 0.0  ;;  %v718_v2 = vsel %vm636_vm2, %v9961_v3, 0.0  ;;  %v799_v26 = vmul.f32 %v9961_v3, %v9961_v3  ;;  %v8058_v35 = vpop.f32.mrb[83].mxu0 }
 0x18b   :  { %v895_v10 = vadd.f32 %v894_v60, %v893_v21  ;;  %v719_v37 = vadd.f32 %v718_v2, %v717_v19 }
 0x18c   :  { %v896_v51 = vsel %vm636_vm2, %v799_v26, 0.0 }
 0x18d   :  { %v897_v14 = vadd.f32 %v896_v51, %v895_v10  ;;  %v9983_v10 = vpop.permute.xlu0 %1696 }
 0x18e   :  { %13971 = vst [vmem:[#allocation52_spill] sm:$0xff] %v9983_v10 }
 0x18f   :  { %v9969_v15 = vpop.f32.mrb[84].mxu0 }
 0x190   :  { %13969 = vst [vmem:[#allocation50_spill] sm:$0xff] %v9969_v15  ;;  %v720_v57 = vsel %vm636_vm2, %v9969_v15, 0.0  ;;  %v800_v24 = vmul.f32 %v9969_v15, %v9969_v15  ;;  %v8061_v48 = vpop.f32.mrb[85].mxu0 }
 0x191   :  { %v721_v18 = vadd.f32 %v720_v57, %v719_v37  ;;  %v9975_v61 = vpop.f32.mrb[86].mxu0  ;;  %v9985_v48 = vpop.permute.xlu1 %1699 }
 0x192   :  { %13970 = vst [vmem:[#allocation51_spill] sm:$0xff] %v9975_v61  ;;  %v898_v53 = vsel %vm636_vm2, %v800_v24, 0.0  ;;  %v722_v60 = vsel %vm636_vm2, %v9975_v61, 0.0  ;;  %v801_v21 = vmul.f32 %v9975_v61, %v9975_v61  ;;  %v8062_v19 = vpop.f32.mrb[87].mxu0  ;;  %13972 = vst [vmem:[#allocation53_spill] sm:$0xff] %v9985_v48 }
 0x193   :  { %v899_v2 = vadd.f32 %v898_v53, %v897_v14  ;;  %v723_v26 = vadd.f32 %v722_v60, %v721_v18 }
 0x194   :  { %v900_v35 = vsel %vm636_vm2, %v801_v21, 0.0  ;;  %v10000_v21 = vpop.permute.xlu0 %1702 }
 0x195   :  { %v901_v51 = vadd.f32 %v900_v35, %v899_v2  ;;  %13975 = vst [vmem:[#allocation56_spill] sm:$0xff] %v10000_v21  ;;  %v10002_v48 = vpop.permute.xlu1 %1705 }
 0x196   :  { %13976 = vst [vmem:[#allocation57_spill] sm:$0xff] %v10002_v48 }
 0x197   :  { %v9987_v37 = vpop.f32.mrb[88].mxu0 }
 0x198   :  { %13973 = vst [vmem:[#allocation54_spill] sm:$0xff] %v9987_v37  ;;  %v724_v57 = vsel %vm636_vm2, %v9987_v37, 0.0  ;;  %v802_v24 = vmul.f32 %v9987_v37, %v9987_v37  ;;  %v8065_v55 = vpop.f32.mrb[89].mxu0 }
 0x199   :  { %v725_v49 = vadd.f32 %v724_v57, %v723_v26  ;;  %v9993_v19 = vpop.f32.mrb[90].mxu0 }
 0x19a   :  { %13974 = vst [vmem:[#allocation55_spill] sm:$0xff] %v9993_v19  ;;  %v902_v53 = vsel %vm636_vm2, %v802_v24, 0.0  ;;  %v726_v14 = vsel %vm636_vm2, %v9993_v19, 0.0  ;;  %v803_v18 = vmul.f32 %v9993_v19, %v9993_v19  ;;  %v8066_v60 = vpop.f32.mrb[91].mxu0  ;;  %v10011_v19 = vpop.permute.xlu0 %1708 }
 0x19b   :  { %v903_v2 = vadd.f32 %v902_v53, %v901_v51  ;;  %v727_v35 = vadd.f32 %v726_v14, %v725_v49  ;;  %13978 = vst [vmem:[#allocation59_spill] sm:$0xff] %v10011_v19  ;;  %v10015_v49 = vpop.permute.xlu1 %1711 }
 0x19c   :  { %v904_v55 = vsel %vm636_vm2, %v803_v18, 0.0  ;;  %13980 = vst [vmem:[#allocation61_spill] sm:$0xff] %v10015_v49 }
 0x19d   :  { %v905_v26 = vadd.f32 %v904_v55, %v903_v2 }
 0x19e   :  { %v10023_v19 = vpop.permute.xlu0 %1714 }
 0x19f   :  { %v10005_v57 = vpop.f32.mrb[92].mxu0  ;;  %13981 = vst [vmem:[#allocation62_spill] sm:$0xff] %v10023_v19 }
 0x1a0   :  { %13977 = vst [vmem:[#allocation58_spill] sm:$0xff] %v10005_v57  ;;  %v728_v24 = vsel %vm636_vm2, %v10005_v57, 0.0  ;;  %v804_v10 = vmul.f32 %v10005_v57, %v10005_v57  ;;  %v8069_v42 = vpop.f32.mrb[93].mxu0 }
 0x1a1   :  { %v729_v60 = vadd.f32 %v728_v24, %v727_v35  ;;  %v10013_v21 = vpop.f32.mrb[94].mxu0  ;;  %v10027_v24 = vpop.permute.xlu1 %1717 }
 0x1a2   :  { %13979 = vst [vmem:[#allocation60_spill] sm:$0xff] %v10013_v21  ;;  %v906_v51 = vsel %vm636_vm2, %v804_v10, 0.0  ;;  %v730_v53 = vsel %vm636_vm2, %v10013_v21, 0.0  ;;  %v805_v14 = vmul.f32 %v10013_v21, %v10013_v21  ;;  %v8070_v18 = vpop.f32.mrb[95].mxu0  ;;  %13983 = vst [vmem:[#allocation64_spill] sm:$0xff] %v10027_v24  ;;  %v10041_v24 = vpop.permute.xlu0 %1720 }
 0x1a3   :  { %v907_v2 = vadd.f32 %v906_v51, %v905_v26  ;;  %v731_v55 = vadd.f32 %v730_v53, %v729_v60  ;;  %13985 = vst [vmem:[#allocation66_spill] sm:$0xff] %v10041_v24 }
 0x1a4   :  { %v908_v42 = vsel %vm636_vm2, %v805_v14, 0.0 }
 0x1a5   :  { %v909_v48 = vadd.f32 %v908_v42, %v907_v2 }
 0x1a7   :  { %v10025_v35 = vpop.f32.mrb[96].mxu0 }
 0x1a8   :  { %13982 = vst [vmem:[#allocation63_spill] sm:$0xff] %v10025_v35  ;;  %v732_v10 = vsel %vm636_vm2, %v10025_v35, 0.0  ;;  %v806_v49 = vmul.f32 %v10025_v35, %v10025_v35  ;;  %v8073_v57 = vpop.f32.mrb[97].mxu0 }
 0x1a9   :  { %v733_v21 = vadd.f32 %v732_v10, %v731_v55  ;;  %v10033_v18 = vpop.f32.mrb[98].mxu0  ;;  %v10043_v57 = vpop.permute.xlu1 %1723 }
 0x1aa   :  { %13984 = vst [vmem:[#allocation65_spill] sm:$0xff] %v10033_v18  ;;  %v910_v26 = vsel %vm636_vm2, %v806_v49, 0.0  ;;  %v734_v60 = vsel %vm636_vm2, %v10033_v18, 0.0  ;;  %v807_v51 = vmul.f32 %v10033_v18, %v10033_v18  ;;  %v8074_v53 = vpop.f32.mrb[99].mxu0  ;;  %13986 = vst [vmem:[#allocation67_spill] sm:$0xff] %v10043_v57 }
 0x1ab   :  { %v911_v14 = vadd.f32 %v910_v26, %v909_v48  ;;  %v735_v2 = vadd.f32 %v734_v60, %v733_v21 }
 0x1ac   :  { %v912_v42 = vsel %vm636_vm2, %v807_v51, 0.0  ;;  %v10058_v51 = vpop.permute.xlu0 %1726 }
 0x1ad   :  { %v913_v19 = vadd.f32 %v912_v42, %v911_v14  ;;  %13989 = vst [vmem:[#allocation70_spill] sm:$0xff] %v10058_v51  ;;  %v10060_v57 = vpop.permute.xlu1 %1729 }
 0x1ae   :  { %13990 = vst [vmem:[#allocation71_spill] sm:$0xff] %v10060_v57 }
 0x1af   :  { %v10045_v55 = vpop.f32.mrb[100].mxu0 }
 0x1b0   :  { %13987 = vst [vmem:[#allocation68_spill] sm:$0xff] %v10045_v55  ;;  %v736_v49 = vsel %vm636_vm2, %v10045_v55, 0.0  ;;  %v808_v10 = vmul.f32 %v10045_v55, %v10045_v55  ;;  %v8077_v35 = vpop.f32.mrb[101].mxu0 }
 0x1b1   :  { %v737_v18 = vadd.f32 %v736_v49, %v735_v2  ;;  %v10051_v53 = vpop.f32.mrb[102].mxu0  ;;  %v13802_v49 = vlaneseq }
 0x1b2   :  { %13988 = vst [vmem:[#allocation69_spill] sm:$0xff] %v10051_v53  ;;  %v914_v48 = vsel %vm636_vm2, %v808_v10, 0.0  ;;  %v738_v21 = vsel %vm636_vm2, %v10051_v53, 0.0  ;;  %v809_v26 = vmul.f32 %v10051_v53, %v10051_v53  ;;  %v8078_v60 = vpop.f32.mrb[103].mxu0 }
 0x1b3   :  { %v915_v14 = vadd.f32 %v914_v48, %v913_v19  ;;  %v739_v42 = vadd.f32 %v738_v21, %v737_v18  ;;  %v10070_v60 = vand.u32 127, %v13802_v49  ;;  %v10072_v19 = vpop.permute.xlu0 %1732  ;;  %v10076_v21 = vpop.permute.xlu1 %1735 }
 0x1b4   :  { %v916_v35 = vsel %vm636_vm2, %v809_v26, 0.0  ;;  %13993 = vst [vmem:[#allocation74_spill] sm:$0xff] %v10072_v19  ;;  %13995 = vst [vmem:[#allocation76_spill] sm:$0xff] %v10076_v21 }
 0x1b5   :  { %v917_v2 = vadd.f32 %v916_v35, %v915_v14  ;;  %13992 = vst [vmem:[#allocation73_spill] sm:$0xff] %v10070_v60 }
 0x1b7   :  { %v10063_v24 = vpop.f32.mrb[104].mxu0 }
 0x1b8   :  { %13991 = vst [vmem:[#allocation72_spill] sm:$0xff] %v10063_v24  ;;  %v740_v10 = vsel %vm636_vm2, %v10063_v24, 0.0  ;;  %v810_v55 = vmul.f32 %v10063_v24, %v10063_v24  ;;  %v8081_v53 = vpop.f32.mrb[105].mxu0 }
 0x1b9   :  { %v741_v18 = vadd.f32 %v740_v10, %v739_v42  ;;  %v10074_v48 = vpop.f32.mrb[106].mxu0  ;;  %v10085_v42 = vadd.s32 128, %v10070_v60  ;;  %v10087_v10 = vpop.permute.xlu0 %1306 }
 0x1ba   :  { %13994 = vst [vmem:[#allocation75_spill] sm:$0xff] %v10074_v48  ;;  %v918_v26 = vsel %vm636_vm2, %v810_v55, 0.0  ;;  %v742_v14 = vsel %vm636_vm2, %v10074_v48, 0.0  ;;  %v811_v35 = vmul.f32 %v10074_v48, %v10074_v48  ;;  %v8082_v57 = vpop.f32.mrb[107].mxu0  ;;  %13997 = vst [vmem:[#allocation78_spill] sm:$0xff] %v10087_v10  ;;  %v10091_v55 = vpop.permute.xlu1 %1309 }
 0x1bb   :  { %v919_v53 = vadd.f32 %v918_v26, %v917_v2  ;;  %v743_v51 = vadd.f32 %v742_v14, %v741_v18  ;;  %13996 = vst [vmem:[#allocation77_spill] sm:$0xff] %v10085_v42  ;;  %13999 = vst [vmem:[#allocation80_spill] sm:$0xff] %v10091_v55  ;;  %vm1738_vm3 = vcmp.eq.s32.totalorder %v10085_v42, %v10087_v10 }
 0x1bc   :  { %v920_v49 = vsel %vm636_vm2, %v811_v35, 0.0  ;;  %vm1742_vm4 = vcmp.eq.s32.totalorder %v10085_v42, %v10091_v55  ;;  %vm2074_vm5 = vcmp.eq.s32.totalorder %v10085_v42, %v9339_v43  ;;  %vm2078_vm6 = vcmp.eq.s32.totalorder %v10085_v42, %v9360_v50 }
 0x1bd   :  { %v921_v24 = vadd.f32 %v920_v49, %v919_v53  ;;  %vm7092_vm7 = vmpackc.low %vm1742_vm4, %vm1738_vm3 }
 0x1be   :  { %vm7260_vm8 = vmpackc.low %vm2078_vm6, %vm2074_vm5 }
 0x1bf   :  { %v10089_v21 = vpop.f32.mrb[108].mxu0 }
 0x1c0   :  { %13998 = vst [vmem:[#allocation79_spill] sm:$0xff] %v10089_v21  ;;  %v744_v19 = vsel %vm636_vm2, %v10089_v21, 0.0  ;;  %v812_v57 = vmul.f32 %v10089_v21, %v10089_v21  ;;  %v8085_v2 = vpop.f32.mrb[109].mxu0 }
 0x1c1   :  { %v745_v49 = vadd.f32 %v744_v19, %v743_v51  ;;  %v10099_v18 = vpop.f32.mrb[110].mxu0  ;;  %v13820_v2 = vmov 1.0|1.0  }
 0x1c2   :  { %14000 = vst [vmem:[#allocation81_spill] sm:$0xff] %v10099_v18  ;;  %v922_v26 = vsel %vm636_vm2, %v812_v57, 0.0  ;;  %v746_v14 = vsel %vm636_vm2, %v10099_v18, 0.0  ;;  %v813_v35 = vmul.f32 %v10099_v18, %v10099_v18  ;;  %v8086_v51 = vpop.f32.mrb[111].mxu0  ;;  %7093 = vmatprep.mubr.msk.bf16.mxu0 %vm7092_vm7, %v13820_v2  ;;  %7261 = vmatprep.mubr.msk.bf16.mxu1 %vm7260_vm8, %v13820_v2 }
 0x1c3   :  { %v923_v19 = vadd.f32 %v922_v26, %v921_v24  ;;  %v747_v53 = vadd.f32 %v746_v14, %v745_v49 }
 0x1c4   :  { %v924_v43 = vsel %vm636_vm2, %v813_v35, 0.0 }
 0x1c5   :  { %v925_v42 = vadd.f32 %v924_v43, %v923_v19 }
 0x1c7   :  { %v10115_v57 = vpop.f32.mrb[112].mxu0 }
 0x1c8   :  { %14001 = vst [vmem:[#allocation82_spill] sm:$0xff] %v10115_v57  ;;  %v749_v50 = vsel %vm748_vm9, %v10115_v57, 0.0  ;;  %v814_v51 = vmul.f32 %v10115_v57, %v10115_v57  ;;  %v8089_v10 = vpop.f32.mrb[113].mxu0 }
 0x1c9   :  { %v750_v24 = vadd.f32 %v749_v50, %v747_v53  ;;  %v633_v49 = vpop.f32.mrb[114].mxu0 }
 0x1ca   :  { %v926_v26 = vsel %vm748_vm9, %v814_v51, 0.0  ;;  %v8090_v14 = vpop.f32.mrb[115].mxu0  ;;  %v14002_v51 = vlaneseq }
 0x1cb   :  { %v751_v60 = vrot.slane %v750_v24, 4  ;;  %v927_v55 = vadd.f32 %v926_v26, %v925_v42  ;;  %v14007_v14 = vld [vmem:[#allocation49_spill] sm:$0xff] }
 0x1cc   :  { %v10121_v49 = vshrl.u32 %v14002_v51, 7 }
 0x1cd   :  { %v752_v18 = vadd.f32 %v751_v60, %v750_v24  ;;  %v928_v35 = vrot.slane %v927_v55, 4  ;;  %v937_v60 = vld [vmem:[%s13716_s4] sm:$0x1]  ;;  %s8863_s4 = smov 32  }
 0x1ce   :  { %14003 = vst [vmem:[#allocation83_spill] sm:$0xff] %v10121_v49 }
 0x1cf   :  { %v753_v21 = vrot.slane %v752_v18, 2  ;;  %v929_v2 = vadd.f32 %v928_v35, %v927_v55  ;;  %v14008_v35 = vld [vmem:[#allocation50_spill] sm:$0xff] }
 0x1d1   :  { %v754_v43 = vadd.f32 %v753_v21, %v752_v18  ;;  %v930_v19 = vrot.slane %v929_v2, 2  ;;  %v10127_v21 = vsub.s32 0, %v10121_v49  ;;  %v14028_v49 = vld [vmem:[#allocation81_spill] sm:$0xff] }
 0x1d3   :  { %v755_v48 = vrot.slane %v754_v43, 1  ;;  %v931_v37 = vadd.f32 %v930_v19, %v929_v2  ;;  %14004 = vst [vmem:[#allocation84_spill] sm:$0xff] %v10127_v21  ;;  %v14010_v19 = vld [vmem:[#allocation54_spill] sm:$0xff] }
 0x1d5   :  { %v756_v61 = vadd.f32 %v755_v48, %v754_v43  ;;  %v932_v15 = vrot.slane %v931_v37, 1  ;;  %v14009_v43 = vld [vmem:[#allocation51_spill] sm:$0xff] }
 0x1d7   :  { %v757_v3 = vmul.f32 0.0022222223, %v756_v61  ;;  %v933_v5 = vadd.f32 %v932_v15, %v931_v37  ;;  %v941_v61 = vld [vmem:[%s13717_s5] sm:$0x1]  ;;  %s8864_s5 = smov 64  }
 0x1d9   :  { %v934_v57 = vmul.f32 0.0022222223, %v933_v5  ;;  %v935_v10 = vmul.f32 %v757_v3, %v757_v3 }
 0x1db   :  { %v936_v50 = vsub.f32 %v934_v57, %v935_v10  ;;  %v14011_v10 = vld [vmem:[#allocation55_spill] sm:$0xff] }
 0x1dd   :  { %v938_v53 = vadd.f32 1e-05, %v936_v50 }
 0x1df   :  { %8847 = vrsqrt.f32 %v938_v53  ;;  %v14012_v53 = vld [vmem:[#allocation58_spill] sm:$0xff] }
 0x1e9   :  { %v8848_v42 = vpop.eup %8847 }
 0x1ea   :  { %v940_v48 = vmul.f32 %v8848_v42, %v937_v60  ;;  %v14013_v60 = vld [vmem:[#allocation60_spill] sm:$0xff] }
 0x1ec   :  { %v942_v5 = vmul.f32 %v940_v48, %v757_v3  ;;  %v10133_v15 = vrot.slane %v940_v48, %v10127_v21  ;;  %v14014_v48 = vld [vmem:[#allocation63_spill] sm:$0xff] }
 0x1ee   :  { %14005 = vst [vmem:[#allocation85_spill] sm:$0xff] %v10133_v15  ;;  %v943_v37 = vsub.f32 %v941_v61, %v942_v5  ;;  %v950_v55 = vmul.f32 %v10133_v15, %v9489_v30  ;;  %v951_v18 = vmul.f32 %v10133_v15, %v9502_v36  ;;  %v952_v2 = vmul.f32 %v10133_v15, %v9525_v54  ;;  %v14016_v5 = vld [vmem:[#allocation65_spill] sm:$0xff] }
 0x1ef   :  { %v953_v57 = vmul.f32 %v10133_v15, %v9544_v7  ;;  %v954_v24 = vmul.f32 %v10133_v15, %v9563_v28  ;;  %v955_v3 = vmul.f32 %v10133_v15, %v9575_v38  ;;  %v956_v26 = vmul.f32 %v10133_v15, %v9593_v62 }
 0x1f0   :  { %v10150_v30 = vrot.slane %v943_v37, %v10127_v21  ;;  %v957_v36 = vmul.f32 %v10133_v15, %v9605_v13  ;;  %v10156_v54 = vmul.f32 %v10133_v15, %v9623_v39  ;;  %v10160_v7 = vmul.f32 %v10133_v15, %v9639_v59 }
 0x1f1   :  { %v10164_v28 = vmul.f32 %v10133_v15, %v9657_v32  ;;  %v10168_v38 = vmul.f32 %v10133_v15, %v9666_v46  ;;  %v10172_v62 = vmul.f32 %v10133_v15, %v9687_v34  ;;  %v10176_v13 = vmul.f32 %v10133_v15, %v9696_v56 }
 0x1f2   :  { %v10180_v39 = vmul.f32 %v10133_v15, %v9717_v58  ;;  %v10184_v59 = vmul.f32 %v10133_v15, %v9730_v12  ;;  %v10188_v32 = vmul.f32 %v10133_v15, %v9751_v4  ;;  %v10192_v46 = vmul.f32 %v10133_v15, %v9760_v8 }
 0x1f3   :  { %v10196_v34 = vmul.f32 %v10133_v15, %v9781_v45  ;;  %v10200_v56 = vmul.f32 %v10133_v15, %v9790_v20  ;;  %v10204_v58 = vmul.f32 %v10133_v15, %v9811_v47  ;;  %v10208_v12 = vmul.f32 %v10133_v15, %v9821_v1 }
 0x1f4   :  { %v10212_v4 = vmul.f32 %v10133_v15, %v9829_v23  ;;  %v10216_v8 = vmul.f32 %v10133_v15, %v9835_v6  ;;  %v10220_v45 = vmul.f32 %v10133_v15, %v9843_v9  ;;  %v10224_v47 = vmul.f32 %v10133_v15, %v9849_v52 }
 0x1f5   :  { %v10228_v20 = vmul.f32 %v10133_v15, %v9857_v31  ;;  %v10232_v23 = vmul.f32 %v10133_v15, %v9863_v25  ;;  %v10236_v6 = vmul.f32 %v10133_v15, %v9871_v0  ;;  %v10240_v1 = vmul.f32 %v10133_v15, %v9877_v63 }
 0x1f6   :  { %v10244_v52 = vmul.f32 %v10133_v15, %v9885_v41  ;;  %v10248_v9 = vmul.f32 %v10133_v15, %v9891_v44  ;;  %v10252_v25 = vmul.f32 %v10133_v15, %v9899_v29  ;;  %v10256_v31 = vmul.f32 %v10133_v15, %v9905_v27 }
 0x1f7   :  { %v10260_v63 = vmul.f32 %v10133_v15, %v9913_v33  ;;  %v10264_v0 = vmul.f32 %v10133_v15, %v9919_v22  ;;  %v10268_v44 = vmul.f32 %v10133_v15, %v9927_v40  ;;  %v10272_v41 = vmul.f32 %v10133_v15, %v9933_v16  ;;  %v14006_v33 = vld [vmem:[#allocation48_spill] sm:$0xff] }
 0x1f8   :  { %v10276_v27 = vmul.f32 %v10133_v15, %v9941_v17  ;;  %v10280_v29 = vmul.f32 %v10133_v15, %v9947_v11  ;;  %v10284_v22 = vmul.f32 %v10133_v15, %v14006_v33  ;;  %v10288_v40 = vmul.f32 %v10133_v15, %v14007_v14  ;;  %v14018_v33 = vld [vmem:[#allocation68_spill] sm:$0xff] }
 0x1f9   :  { %v10292_v16 = vmul.f32 %v10133_v15, %v14008_v35  ;;  %v10296_v17 = vmul.f32 %v10133_v15, %v14009_v43  ;;  %v10300_v11 = vmul.f32 %v10133_v15, %v14010_v19  ;;  %v10304_v50 = vmul.f32 %v10133_v15, %v14011_v10  ;;  %v14020_v35 = vld [vmem:[#allocation69_spill] sm:$0xff]  ;;  %v14022_v19 = vld [vmem:[#allocation72_spill] sm:$0xff] }
 0x1fa   :  { %v10308_v51 = vmul.f32 %v10133_v15, %v14012_v53  ;;  %v10312_v42 = vmul.f32 %v10133_v15, %v14013_v60  ;;  %v10316_v61 = vmul.f32 %v10133_v15, %v14014_v48  ;;  %v10320_v37 = vmul.f32 %v10133_v15, %v14016_v5  ;;  %v14024_v53 = vld [vmem:[#allocation75_spill] sm:$0xff] }
 0x1fb   :  { %v10324_v14 = vmul.f32 %v10133_v15, %v14018_v33  ;;  %v10328_v43 = vmul.f32 %v10133_v15, %v14020_v35  ;;  %v10332_v10 = vmul.f32 %v10133_v15, %v14022_v19  ;;  %v10336_v60 = vmul.f32 %v10133_v15, %v14024_v53  ;;  %v14026_v48 = vld [vmem:[#allocation79_spill] sm:$0xff] }
 0x1fc   :  { %14015 = vst [vmem:[#allocation48_spill] sm:$0xff] %v10316_v61  ;;  %14017 = vst [vmem:[#allocation49_spill] sm:$0xff] %v10320_v37  ;;  %v10340_v5 = vmul.f32 %v10133_v15, %v14026_v48  ;;  %v10344_v33 = vmul.f32 %v10133_v15, %v14028_v49  ;;  %v1013_v21 = vadd.f32 %v10150_v30, %v950_v55 }
 0x1fd   :  { %14019 = vst [vmem:[#allocation50_spill] sm:$0xff] %v10324_v14  ;;  %14021 = vst [vmem:[#allocation51_spill] sm:$0xff] %v10328_v43  ;;  %v1014_v35 = vadd.f32 %v10150_v30, %v951_v18  ;;  %v1015_v43 = vadd.f32 %v10150_v30, %v952_v2  ;;  %v1016_v19 = vadd.f32 %v10150_v30, %v953_v57 }
 0x1fe   :  { %14023 = vst [vmem:[#allocation54_spill] sm:$0xff] %v10332_v10  ;;  %14025 = vst [vmem:[#allocation55_spill] sm:$0xff] %v10336_v60  ;;  %v1017_v10 = vadd.f32 %v10150_v30, %v954_v24  ;;  %v1018_v53 = vadd.f32 %v10150_v30, %v955_v3  ;;  %v1070_v60 = vmax.f32 %v1013_v21, 0.0  ;;  %v1019_v48 = vadd.f32 %v10150_v30, %v956_v26 }
 0x1ff   :  { %14027 = vst [vmem:[#allocation58_spill] sm:$0xff] %v10340_v5  ;;  %14029 = vst [vmem:[#allocation60_spill] sm:$0xff] %v10344_v33  ;;  %v1071_v14 = vmax.f32 %v1014_v35, 0.0  ;;  %v1020_v5 = vadd.f32 %v10150_v30, %v957_v36  ;;  %v1072_v49 = vmax.f32 %v1015_v43, 0.0  ;;  %v1073_v15 = vmax.f32 %v1016_v19, 0.0 }
 0x200   :  { %v1074_v33 = vmax.f32 %v1017_v10, 0.0  ;;  %v1075_v55 = vmax.f32 %v1018_v53, 0.0  ;;  %v1076_v18 = vmax.f32 %v1019_v48, 0.0  ;;  %v1021_v2 = vadd.f32 %v10150_v30, %v10156_v54 }
 0x201   :  { %v1127_v37 = vpack.c.bf16 %v1071_v14, %v1070_v60  ;;  %v1077_v61 = vmax.f32 %v1020_v5, 0.0  ;;  %v1128_v57 = vpack.c.bf16 %v1073_v15, %v1072_v49  ;;  %v1022_v21 = vadd.f32 %v10150_v30, %v10160_v7 }
 0x202   :  { %v1129_v24 = vpack.c.bf16 %v1075_v55, %v1074_v33  ;;  %v1023_v3 = vadd.f32 %v10150_v30, %v10164_v28  ;;  %v1078_v36 = vmax.f32 %v1021_v2, 0.0  ;;  %v1024_v14 = vadd.f32 %v10150_v30, %v10168_v38 }
 0x203   :  { %3399 = vmatpush1.bf16.msra.mxu0 %v1127_v37  ;;  %8183 = vmatpush1.bf16.msra.mxu1 %v1127_v37  ;;  %v1130_v26 = vpack.c.bf16 %v1077_v61, %v1076_v18  ;;  %v1025_v43 = vadd.f32 %v10150_v30, %v10172_v62  ;;  %v14030_v10 = vmov 0   ;;  %v1079_v15 = vmax.f32 %v1022_v21, 0.0 }
 0x204   :  { %3400 = vmatprep.subr.bf16.mxu0 %v14030_v10  ;;  %8168 = vmatprep.subr.bf16.mxu1 %v14030_v10  ;;  %v1080_v54 = vmax.f32 %v1023_v3, 0.0  ;;  %v1026_v7 = vadd.f32 %v10150_v30, %v10176_v13  ;;  %v1027_v28 = vadd.f32 %v10150_v30, %v10180_v39  ;;  %v1081_v61 = vmax.f32 %v1024_v14, 0.0 }
 0x205   :  { %v1082_v37 = vmax.f32 %v1025_v43, 0.0  ;;  %v1028_v38 = vadd.f32 %v10150_v30, %v10184_v59  ;;  %v1029_v62 = vadd.f32 %v10150_v30, %v10188_v32  ;;  %v10374_v60 = vpack.c.bf16 %v1079_v15, %v1078_v36 }
 0x206   :  { %v1083_v5 = vmax.f32 %v1026_v7, 0.0  ;;  %v1084_v33 = vmax.f32 %v1027_v28, 0.0  ;;  %v1030_v35 = vadd.f32 %v10150_v30, %v10192_v46  ;;  %v10378_v13 = vpack.c.bf16 %v1081_v61, %v1080_v54 }
 0x207   :  { %3401 = vmatpush1.bf16.msra.mxu0 %v1128_v57  ;;  %8184 = vmatpush1.bf16.msra.mxu1 %v1128_v57  ;;  %v1085_v39 = vmax.f32 %v1028_v38, 0.0  ;;  %v1086_v19 = vmax.f32 %v1029_v62, 0.0  ;;  %v1031_v53 = vadd.f32 %v10150_v30, %v10196_v34  ;;  %v1032_v48 = vadd.f32 %v10150_v30, %v10200_v56 }
 0x208   :  { %3402 = vmatprep.subr.bf16.mxu0 %v14030_v10  ;;  %8169 = vmatprep.subr.bf16.mxu1 %v14030_v10  ;;  %v10384_v59 = vpack.c.bf16 %v1083_v5, %v1082_v37  ;;  %v1087_v32 = vmax.f32 %v1030_v35, 0.0  ;;  %v1033_v46 = vadd.f32 %v10150_v30, %v10204_v58  ;;  %v1034_v18 = vadd.f32 %v10150_v30, %v10208_v12 }
 0x209   :  { %v10390_v49 = vpack.c.bf16 %v1085_v39, %v1084_v33  ;;  %v1088_v55 = vmax.f32 %v1031_v53, 0.0  ;;  %v1035_v34 = vadd.f32 %v10150_v30, %v10212_v4  ;;  %v1089_v57 = vmax.f32 %v1032_v48, 0.0 }
 0x20a   :  { %v10396_v2 = vpack.c.bf16 %v1087_v32, %v1086_v19  ;;  %v1090_v21 = vmax.f32 %v1033_v46, 0.0  ;;  %v1036_v3 = vadd.f32 %v10150_v30, %v10216_v8  ;;  %v1091_v56 = vmax.f32 %v1034_v18, 0.0 }
 0x20b   :  { %3403 = vmatpush1.bf16.msra.mxu0 %v1129_v24  ;;  %8185 = vmatpush1.bf16.msra.mxu1 %v1129_v24  ;;  %v1092_v58 = vmax.f32 %v1035_v34, 0.0  ;;  %v1037_v36 = vadd.f32 %v10150_v30, %v10220_v45  ;;  %v1038_v12 = vadd.f32 %v10150_v30, %v10224_v47  ;;  %v10406_v4 = vpack.c.bf16 %v1089_v57, %v1088_v55 }
 0x20c   :  { %3404 = vmatprep.subr.bf16.mxu0 %v14030_v10  ;;  %8170 = vmatprep.subr.bf16.mxu1 %v14030_v10  ;;  %v1093_v14 = vmax.f32 %v1036_v3, 0.0  ;;  %v1039_v8 = vadd.f32 %v10150_v30, %v10228_v20  ;;  %v1040_v24 = vadd.f32 %v10150_v30, %v10232_v23  ;;  %v10412_v43 = vpack.c.bf16 %v1091_v56, %v1090_v21 }
 0x20d   :  { %v1094_v15 = vmax.f32 %v1037_v36, 0.0  ;;  %v1095_v45 = vmax.f32 %v1038_v12, 0.0  ;;  %v1041_v47 = vadd.f32 %v10150_v30, %v10236_v6  ;;  %v1042_v61 = vadd.f32 %v10150_v30, %v10240_v1 }
 0x20e   :  { %v10416_v54 = vpack.c.bf16 %v1093_v14, %v1092_v58  ;;  %v1096_v7 = vmax.f32 %v1039_v8, 0.0  ;;  %v1097_v28 = vmax.f32 %v1040_v24, 0.0  ;;  %v1043_v23 = vadd.f32 %v10150_v30, %v10244_v52  ;;  %v14031_v24 = vld [vmem:[#allocation48_spill] sm:$0xff] }
 0x20f   :  { %3405 = vmatpush1.bf16.msra.mxu0 %v1130_v26  ;;  %8186 = vmatpush1.bf16.msra.mxu1 %v1130_v26  ;;  %v10420_v20 = vpack.c.bf16 %v1095_v45, %v1094_v15  ;;  %v1098_v37 = vmax.f32 %v1041_v47, 0.0  ;;  %v1044_v38 = vadd.f32 %v10150_v30, %v10248_v9  ;;  %v1099_v62 = vmax.f32 %v1042_v61, 0.0  ;;  %v14032_v45 = vld [vmem:[#allocation49_spill] sm:$0xff]  ;;  %v14034_v61 = vld [vmem:[#allocation51_spill] sm:$0xff] }
 0x210   :  { %3406 = vmatprep.subr.bf16.mxu0 %v14030_v10  ;;  %8171 = vmatprep.subr.bf16.mxu1 %v14030_v10  ;;  %v10428_v6 = vpack.c.bf16 %v1097_v28, %v1096_v7  ;;  %v1045_v1 = vadd.f32 %v10150_v30, %v10252_v25  ;;  %v1046_v26 = vadd.f32 %v10150_v30, %v10256_v31  ;;  %v1100_v5 = vmax.f32 %v1043_v23, 0.0  ;;  %v14033_v28 = vld [vmem:[#allocation50_spill] sm:$0xff] }
 0x211   :  { %v1101_v33 = vmax.f32 %v1044_v38, 0.0  ;;  %v1047_v52 = vadd.f32 %v10150_v30, %v10260_v63  ;;  %v1048_v9 = vadd.f32 %v10150_v30, %v10264_v0  ;;  %v10438_v35 = vpack.c.bf16 %v1099_v62, %v1098_v37  ;;  %v14035_v62 = vld [vmem:[#allocation54_spill] sm:$0xff] }
 0x212   :  { %v1102_v39 = vmax.f32 %v1045_v1, 0.0  ;;  %v1103_v19 = vmax.f32 %v1046_v26, 0.0  ;;  %v1049_v53 = vadd.f32 %v10150_v30, %v10268_v44  ;;  %v1050_v63 = vadd.f32 %v10150_v30, %v10272_v41 }
 0x213   :  { %3407 = vmatpush1.bf16.msra.mxu0 %v10374_v60  ;;  %8187 = vmatpush1.bf16.msra.mxu1 %v10374_v60  ;;  %v10444_v25 = vpack.c.bf16 %v1101_v33, %v1100_v5  ;;  %v1104_v31 = vmax.f32 %v1047_v52, 0.0  ;;  %v1105_v32 = vmax.f32 %v1048_v9, 0.0  ;;  %v1051_v44 = vadd.f32 %v10150_v30, %v10276_v27  ;;  %v14036_v33 = vld [vmem:[#allocation55_spill] sm:$0xff] }
 0x214   :  { %3408 = vmatprep.subr.bf16.mxu0 %v14030_v10  ;;  %8172 = vmatprep.subr.bf16.mxu1 %v14030_v10  ;;  %v10450_v0 = vpack.c.bf16 %v1103_v19, %v1102_v39  ;;  %v1106_v48 = vmax.f32 %v1049_v53, 0.0  ;;  %v1052_v60 = vadd.f32 %v10150_v30, %v10280_v29  ;;  %v1107_v55 = vmax.f32 %v1050_v63, 0.0  ;;  %v14037_v19 = vld [vmem:[#allocation58_spill] sm:$0xff] }
 0x215   :  { %v10456_v46 = vpack.c.bf16 %v1105_v32, %v1104_v31  ;;  %v1053_v18 = vadd.f32 %v10150_v30, %v10284_v22  ;;  %v1054_v41 = vadd.f32 %v10150_v30, %v10288_v40  ;;  %v1108_v34 = vmax.f32 %v1051_v44, 0.0  ;;  %v14038_v31 = vld [vmem:[#allocation60_spill] sm:$0xff]  ;;  %v14039_v44 = vld [vmem:[#allocation82_spill] sm:$0xff] }
 0x216   :  { %v1109_v57 = vmax.f32 %v1052_v60, 0.0  ;;  %v1055_v21 = vadd.f32 %v10150_v30, %v10292_v16  ;;  %v1056_v27 = vadd.f32 %v10150_v30, %v10296_v17  ;;  %v10468_v29 = vpack.c.bf16 %v1107_v55, %v1106_v48  ;;  %v14040_v60 = vld [vmem:[#allocation85_spill] sm:$0xff] }
 0x217   :  { %3409 = vmatpush1.bf16.msra.mxu0 %v10378_v13  ;;  %8188 = vmatpush1.bf16.msra.mxu1 %v10378_v13  ;;  %v1110_v3 = vmax.f32 %v1053_v18, 0.0  ;;  %v1111_v56 = vmax.f32 %v1054_v41, 0.0  ;;  %v1057_v22 = vadd.f32 %v10150_v30, %v10300_v11  ;;  %v1058_v17 = vadd.f32 %v10150_v30, %v10304_v50 }
 0x218   :  { %3410 = vmatprep.subr.bf16.mxu0 %v14030_v10  ;;  %8173 = vmatprep.subr.bf16.mxu1 %v14030_v10  ;;  %v10474_v40 = vpack.c.bf16 %v1109_v57, %v1108_v34  ;;  %v1112_v16 = vmax.f32 %v1055_v21, 0.0  ;;  %v1113_v58 = vmax.f32 %v1056_v27, 0.0  ;;  %v1059_v12 = vadd.f32 %v10150_v30, %v10308_v51  ;;  %v14048_v27 = vld [vmem:[#allocation4_spill] sm:$0xff] }
 0x219   :  { %v10478_v36 = vpack.c.bf16 %v1111_v56, %v1110_v3  ;;  %v1114_v13 = vmax.f32 %v1057_v22, 0.0  ;;  %v1060_v11 = vadd.f32 %v10150_v30, %v10312_v42  ;;  %v1115_v8 = vmax.f32 %v1058_v17, 0.0  ;;  %v14051_v22 = vld [vmem:[#allocation6_spill] sm:$0xff] }
 0x21a   :  { %v10484_v14 = vpack.c.bf16 %v1113_v58, %v1112_v16  ;;  %v1061_v15 = vadd.f32 %v10150_v30, %v14031_v24  ;;  %v1062_v47 = vadd.f32 %v10150_v30, %v14032_v45  ;;  %v1116_v50 = vmax.f32 %v1059_v12, 0.0  ;;  %v14053_v58 = vld [vmem:[#allocation8_spill] sm:$0xff]  ;;  %v14058_v45 = vld [vmem:[#allocation15_spill] sm:$0xff] }
 0x21b   :  { %3411 = vmatpush1.bf16.msra.mxu0 %v10384_v59  ;;  %8189 = vmatpush1.bf16.msra.mxu1 %v10384_v59  ;;  %v1117_v7 = vmax.f32 %v1060_v11, 0.0  ;;  %v1063_v51 = vadd.f32 %v10150_v30, %v14033_v28  ;;  %v1064_v42 = vadd.f32 %v10150_v30, %v14034_v61  ;;  %v10498_v37 = vpack.c.bf16 %v1115_v8, %v1114_v13  ;;  %v14055_v13 = vld [vmem:[#allocation10_spill] sm:$0xff]  ;;  %v14057_v8 = vld [vmem:[#allocation12_spill] sm:$0xff] }
 0x21c   :  { %3412 = vmatprep.subr.bf16.mxu0 %v14030_v10  ;;  %8174 = vmatprep.subr.bf16.mxu1 %v14030_v10  ;;  %v1118_v23 = vmax.f32 %v1061_v15, 0.0  ;;  %v1119_v38 = vmax.f32 %v1062_v47, 0.0  ;;  %v1065_v1 = vadd.f32 %v10150_v30, %v14035_v62  ;;  %v1066_v52 = vadd.f32 %v10150_v30, %v14036_v33  ;;  %v14059_v47 = vld [vmem:[#allocation14_spill] sm:$0xff]  ;;  %v14061_v61 = vld [vmem:[#allocation16_spill] sm:$0xff] }
 0x21d   :  { %v10502_v59 = vpack.c.bf16 %v1117_v7, %v1116_v50  ;;  %v1120_v26 = vmax.f32 %v1063_v51, 0.0  ;;  %v1121_v5 = vmax.f32 %v1064_v42, 0.0  ;;  %v1067_v53 = vadd.f32 %v10150_v30, %v14037_v19  ;;  %v14060_v51 = vld [vmem:[#allocation17_spill] sm:$0xff]  ;;  %v14063_v62 = vld [vmem:[#allocation18_spill] sm:$0xff] }
 0x21e   :  { %v10506_v9 = vpack.c.bf16 %v1119_v38, %v1118_v23  ;;  %v1122_v39 = vmax.f32 %v1065_v1, 0.0  ;;  %v1068_v32 = vadd.f32 %v10150_v30, %v14038_v31  ;;  %v1123_v48 = vmax.f32 %v1066_v52, 0.0  ;;  %v14062_v38 = vld [vmem:[#allocation19_spill] sm:$0xff]  ;;  %v14068_v31 = vld [vmem:[#allocation25_spill] sm:$0xff] }
 0x21f   :  { %3413 = vmatpush1.bf16.msra.mxu0 %v10390_v49  ;;  %8190 = vmatpush1.bf16.msra.mxu1 %v10390_v49  ;;  %v10514_v63 = vpack.c.bf16 %v1121_v5, %v1120_v26  ;;  %v1006_v55 = vmul.f32 %v14040_v60, %v14039_v44  ;;  %v1124_v18 = vmax.f32 %v1067_v53, 0.0  ;;  %v14042_v49 = vld [vmem:[#allocation73_spill] sm:$0xff]  ;;  %v14049_v3 = vmov 1.0|1.0   ;;  %v14065_v5 = vld [vmem:[#allocation20_spill] sm:$0xff]  ;;  %v14070_v44 = vld [vmem:[#allocation27_spill] sm:$0xff] }
 0x220   :  { %3414 = vmatprep.subr.bf16.mxu0 %v14030_v10  ;;  %8175 = vmatprep.subr.bf16.mxu1 %v14030_v10  ;;  %v1125_v41 = vmax.f32 %v1068_v32, 0.0  ;;  %v10520_v34 = vpack.c.bf16 %v1123_v48, %v1122_v39  ;;  %v14064_v26 = vld [vmem:[#allocation21_spill] sm:$0xff]  ;;  %v14067_v39 = vld [vmem:[#allocation22_spill] sm:$0xff]  ;;  %v14069_v32 = vld [vmem:[#allocation24_spill] sm:$0xff] }
 0x221   :  { %v10523_v57 = vadd.f32 %v10150_v30, %v1006_v55  ;;  %v14041_v30 = vld [vmem:[#allocation80_spill] sm:$0xff]  ;;  %v14071_v60 = vld [vmem:[#allocation26_spill] sm:$0xff] }
 0x222   :  { %v10525_v21 = vpack.c.bf16 %v1125_v41, %v1124_v18  ;;  %vm1741_vm10 = vcmp.eq.s32.totalorder %v14042_v49, %v14041_v30  ;;  %v14072_v41 = vld [vmem:[#allocation29_spill] sm:$0xff] }
 0x223   :  { %3415 = vmatpush1.bf16.msra.mxu0 %v10396_v2  ;;  %8191 = vmatpush1.bf16.msra.mxu1 %v10396_v2  ;;  %v14043_v2 = vld [vmem:[#allocation78_spill] sm:$0xff]  ;;  %v1126_v50 = vmax.f32 %v10523_v57, 0.0 }
 0x224   :  { %3416 = vmatprep.subr.bf16.mxu0 %v14030_v10  ;;  %8176 = vmatprep.subr.bf16.mxu1 %v14030_v10  ;;  %vm1737_vm11 = vcmp.eq.s32.totalorder %v14042_v49, %v14043_v2 }
 0x225   :  { %vm7094_vm1 = vmpackc.low %vm1741_vm10, %vm1737_vm11  ;;  %vm2085_vm11 = vcmp.eq.s32.totalorder %v14042_v49, %v14048_v27  ;;  %v1155_v42 = vpack.c.bf16 %v1126_v50, %v1126_v50  ;;  %v14074_v50 = vld [vmem:[#allocation31_spill] sm:$0xff] }
 0x227   :  { %3417 = vmatpush1.bf16.msra.mxu0 %v10406_v4  ;;  %8192 = vmatpush1.bf16.msra.mxu1 %v10406_v4  ;;  %v14044_v4 = vld [vmem:[#allocation3_spill] sm:$0xff] }
 0x228   :  { %3418 = vmatprep.subr.bf16.mxu0 %v14030_v10  ;;  %8177 = vmatprep.subr.bf16.mxu1 %v14030_v10  ;;  %vm2073_vm12 = vcmp.eq.s32.totalorder %v14042_v49, %v14044_v4 }
 0x22b   :  { %3419 = vmatpush1.bf16.msra.mxu0 %v10412_v43  ;;  %8193 = vmatpush1.bf16.msra.mxu1 %v10412_v43  ;;  %v14045_v43 = vld [vmem:[#allocation5_spill] sm:$0xff] }
 0x22c   :  { %3420 = vmatprep.subr.bf16.mxu0 %v14030_v10  ;;  %8178 = vmatprep.subr.bf16.mxu1 %v14030_v10  ;;  %vm2077_vm13 = vcmp.eq.s32.totalorder %v14042_v49, %v14045_v43  ;;  %v14108_v43 = vld [vmem:[#allocation67_spill] sm:$0xff] }
 0x22d   :  { %vm7262_vm5 = vmpackc.low %vm2077_vm13, %vm2073_vm12 }
 0x22f   :  { %3421 = vmatpush1.bf16.msra.mxu0 %v10416_v54  ;;  %8194 = vmatpush1.bf16.msra.mxu1 %v10416_v54  ;;  %v10563_v54 = vpop.permute.xlu1 %1315 }
 0x230   :  { %3422 = vmatprep.subr.bf16.mxu0 %v14030_v10  ;;  %8179 = vmatprep.subr.bf16.mxu1 %v14030_v10  ;;  %vm1749_vm9 = vcmp.eq.s32.totalorder %v14042_v49, %v10563_v54 }
 0x233   :  { %3423 = vmatpush1.bf16.msra.mxu0 %v10420_v20  ;;  %8195 = vmatpush1.bf16.msra.mxu1 %v10420_v20  ;;  %v10565_v20 = vpop.permute.xlu0 %1312 }
 0x234   :  { %3424 = vmatprep.subr.bf16.mxu0 %v14030_v10  ;;  %8180 = vmatprep.subr.bf16.mxu1 %v14030_v10  ;;  %vm1745_vm8 = vcmp.eq.s32.totalorder %v14042_v49, %v10565_v20 }
 0x237   :  { %3425 = vmatpush1.bf16.msra.mxu0 %v10428_v6  ;;  %8196 = vmatpush1.bf16.msra.mxu1 %v10428_v6  ;;  %v14046_v6 = vld [vmem:[#allocation2_spill] sm:$0xff]  ;;  %v10590_v56 = vpop.permute.xlu0 %1318 }
 0x238   :  { %3426 = vmatprep.subr.bf16.mxu0 %v14030_v10  ;;  %8181 = vmatprep.subr.bf16.mxu1 %v14030_v10  ;;  %vm2081_vm10 = vcmp.eq.s32.totalorder %v14042_v49, %v14046_v6 }
 0x23b   :  { %3427 = vmatpush1.bf16.msra.mxu0 %v10438_v35  ;;  %8197 = vmatpush1.bf16.msra.mxu1 %v10438_v35  ;;  %v14047_v35 = vld [vmem:[#allocation77_spill] sm:$0xff]  ;;  %v10617_v16 = vpop.permute.xlu0 %1324 }
 0x23c   :  { %3428 = vmatprep.subr.bf16.mxu0 %v14030_v10  ;;  %8182 = vmatprep.subr.bf16.mxu1 %v14030_v10  ;;  %vm2082_vm14 = vcmp.eq.s32.totalorder %v14047_v35, %v14046_v6  ;;  %vm2086_vm15 = vcmp.eq.s32.totalorder %v14047_v35, %v14048_v27  ;;  %vm1746_vm3 = vcmp.eq.s32.totalorder %v14047_v35, %v10565_v20  ;;  %v14104_v27 = vld [vmem:[#allocation64_spill] sm:$0xff]  ;;  %v14107_v6 = vld [vmem:[#allocation66_spill] sm:$0xff] }
 0x23d   :  { %vm1750_vm4 = vcmp.eq.s32.totalorder %v14047_v35, %v10563_v54  ;;  %vm7264_vm6 = vmpackc.low %vm2086_vm15, %vm2082_vm14  ;;  %vm1754_vm12 = vcmp.eq.s32.totalorder %v14047_v35, %v10590_v56 }
 0x23e   :  { %vm7096_vm7 = vmpackc.low %vm1750_vm4, %vm1746_vm3 }
 0x23f   :  { %3429 = vmatpush1.bf16.msra.mxu0 %v10444_v25  ;;  %8198 = vmatpush1.bf16.msra.mxu1 %v10444_v25  ;;  %v10588_v25 = vpop.permute.xlu1 %1321  ;;  %vm7098_vm14 = vmpackc.low %vm1749_vm9, %vm1745_vm8  ;;  %vm2093_vm9 = vcmp.eq.s32.totalorder %v14042_v49, %v14051_v22  ;;  %v10645_v17 = vpop.permute.xlu0 %1330 }
 0x240   :  { %4007 = vmatprep.subr.bf16.mxu1 %v14030_v10  ;;  %vm1758_vm13 = vcmp.eq.s32.totalorder %v14047_v35, %v10588_v25  ;;  %vm7266_vm3 = vmpackc.low %vm2085_vm11, %vm2081_vm10  ;;  %vm1762_vm10 = vcmp.eq.s32.totalorder %v14047_v35, %v10617_v16 }
 0x241   :  { %vm7100_vm4 = vmpackc.low %vm1758_vm13, %vm1754_vm12 }
 0x242   :  { %7095 = vmatmul.mubr.msk.bf16.vlgmr.msra.gmra.mrb[116].mxu0 %vm7094_vm1, %v14049_v3  ;;  %7263 = vmatmul.mubr.msk.bf16.vlgmr.msra.gmra.mrb[0].mxu1 %vm7262_vm5, %v14049_v3  ;;  %vm2094_vm1 = vcmp.eq.s32.totalorder %v14047_v35, %v14051_v22  ;;  %v14103_v22 = vld [vmem:[#allocation62_spill] sm:$0xff] }
 0x243   :  { %7097 = vmatprep.mubr.msk.bf16.mxu0 %vm7096_vm7, %v14049_v3  ;;  %4008 = vmatpush1.bf16.msra.mxu1 %v10450_v0  ;;  %v14050_v0 = vld [vmem:[#allocation7_spill] sm:$0xff]  ;;  %vm1757_vm7 = vcmp.eq.s32.totalorder %v14042_v49, %v10588_v25  ;;  %v10673_v11 = vpop.permute.xlu0 %1336 }
 0x244   :  { %7265 = vmatprep.mubr.msk.bf16.mxu1 %vm7264_vm6, %v14049_v3  ;;  %4009 = vmatprep.subr.bf16.mxu1 %v14030_v10  ;;  %vm2090_vm15 = vcmp.eq.s32.totalorder %v14047_v35, %v14050_v0  ;;  %vm1753_vm6 = vcmp.eq.s32.totalorder %v14042_v49, %v10590_v56  ;;  %vm2089_vm8 = vcmp.eq.s32.totalorder %v14042_v49, %v14050_v0  ;;  %v14100_v0 = vld [vmem:[#allocation61_spill] sm:$0xff] }
 0x245   :  { %vm7268_vm5 = vmpackc.low %vm2094_vm1, %vm2090_vm15 }
 0x246   :  { %vm7102_vm12 = vmpackc.low %vm1757_vm7, %vm1753_vm6  ;;  %vm2101_vm7 = vcmp.eq.s32.totalorder %v14042_v49, %v14053_v58 }
 0x247   :  { %4010 = vmatpush1.bf16.msra.mxu1 %v10456_v46  ;;  %v10615_v46 = vpop.permute.xlu1 %1327  ;;  %vm7270_vm15 = vmpackc.low %vm2093_vm9, %vm2089_vm8  ;;  %vm1770_vm8 = vcmp.eq.s32.totalorder %v14047_v35, %v10645_v17  ;;  %v10701_v15 = vpop.permute.xlu0 %1342 }
 0x248   :  { %4011 = vmatprep.subr.bf16.mxu1 %v14030_v10  ;;  %vm1766_vm11 = vcmp.eq.s32.totalorder %v14047_v35, %v10615_v46 }
 0x249   :  { %vm7104_vm1 = vmpackc.low %vm1766_vm11, %vm1762_vm10 }
 0x24a   :  { %7099 = vmatmul.mubr.msk.bf16.gmra.mrb[120].mxu0 %vm7098_vm14, %v14049_v3  ;;  %7267 = vmatmul.mubr.msk.bf16.gmra.mrb[4].mxu1 %vm7266_vm3, %v14049_v3  ;;  %vm2102_vm14 = vcmp.eq.s32.totalorder %v14047_v35, %v14053_v58  ;;  %v14099_v58 = vld [vmem:[#allocation59_spill] sm:$0xff] }
 0x24b   :  { %7101 = vmatprep.mubr.msk.bf16.mxu0 %vm7100_vm4, %v14049_v3  ;;  %7269 = vmatprep.mubr.msk.bf16.mxu1 %vm7268_vm5, %v14049_v3  ;;  %vm1761_vm4 = vcmp.eq.s32.totalorder %v14042_v49, %v10617_v16  ;;  %vm1765_vm5 = vcmp.eq.s32.totalorder %v14042_v49, %v10615_v46  ;;  %v10730_v28 = vpop.permute.xlu0 %1348 }
 0x24c   :  { %4012 = vmatpush1.bf16.msra.mxu1 %v10468_v29  ;;  %v14052_v29 = vld [vmem:[#allocation9_spill] sm:$0xff]  ;;  %vm7106_vm10 = vmpackc.low %vm1765_vm5, %vm1761_vm4  ;;  %vm2109_vm5 = vcmp.eq.s32.totalorder %v14042_v49, %v14055_v13 }
 0x24d   :  { %4013 = vmatprep.subr.bf16.mxu1 %v14030_v10  ;;  %vm2098_vm13 = vcmp.eq.s32.totalorder %v14047_v35, %v14052_v29  ;;  %vm2097_vm6 = vcmp.eq.s32.totalorder %v14042_v49, %v14052_v29  ;;  %v14096_v29 = vld [vmem:[#allocation57_spill] sm:$0xff] }
 0x24e   :  { %vm7272_vm3 = vmpackc.low %vm2102_vm14, %vm2098_vm13 }
 0x24f   :  { %vm7274_vm13 = vmpackc.low %vm2101_vm7, %vm2097_vm6  ;;  %vm1778_vm6 = vcmp.eq.s32.totalorder %v14047_v35, %v10673_v11 }
 0x250   :  { %4014 = vmatpush1.bf16.msra.mxu1 %v10474_v40  ;;  %v10643_v40 = vpop.permute.xlu1 %1333 }
 0x251   :  { %4015 = vmatprep.subr.bf16.mxu1 %v14030_v10  ;;  %vm1774_vm9 = vcmp.eq.s32.totalorder %v14047_v35, %v10643_v40 }
 0x252   :  { %7103 = vmatmul.mubr.msk.bf16.gmra.mrb[124].mxu0 %vm7102_vm12, %v14049_v3  ;;  %7271 = vmatmul.mubr.msk.bf16.gmra.mrb[8].mxu1 %vm7270_vm15, %v14049_v3  ;;  %vm2110_vm12 = vcmp.eq.s32.totalorder %v14047_v35, %v14055_v13  ;;  %vm7108_vm14 = vmpackc.low %vm1774_vm9, %vm1770_vm8  ;;  %v14095_v13 = vld [vmem:[#allocation56_spill] sm:$0xff] }
 0x253   :  { %7105 = vmatprep.mubr.msk.bf16.mxu0 %vm7104_vm1, %v14049_v3  ;;  %7273 = vmatprep.mubr.msk.bf16.mxu1 %vm7272_vm3, %v14049_v3  ;;  %vm1769_vm1 = vcmp.eq.s32.totalorder %v14042_v49, %v10645_v17  ;;  %vm1773_vm3 = vcmp.eq.s32.totalorder %v14042_v49, %v10643_v40 }
 0x254   :  { %4016 = vmatpush1.bf16.msra.mxu1 %v10478_v36  ;;  %v14054_v36 = vld [vmem:[#allocation11_spill] sm:$0xff]  ;;  %v10671_v12 = vpop.permute.xlu1 %1339  ;;  %vm7110_vm8 = vmpackc.low %vm1773_vm3, %vm1769_vm1  ;;  %vm2117_vm3 = vcmp.eq.s32.totalorder %v14042_v49, %v14057_v8 }
 0x255   :  { %4017 = vmatprep.subr.bf16.mxu1 %v14030_v10  ;;  %vm2106_vm11 = vcmp.eq.s32.totalorder %v14047_v35, %v14054_v36  ;;  %vm2105_vm4 = vcmp.eq.s32.totalorder %v14042_v49, %v14054_v36  ;;  %vm1782_vm7 = vcmp.eq.s32.totalorder %v14047_v35, %v10671_v12  ;;  %v14093_v36 = vld [vmem:[#allocation53_spill] sm:$0xff] }
 0x256   :  { %vm7276_vm15 = vmpackc.low %vm2110_vm12, %vm2106_vm11 }
 0x257   :  { %vm7278_vm11 = vmpackc.low %vm2109_vm5, %vm2105_vm4  ;;  %vm1786_vm4 = vcmp.eq.s32.totalorder %v14047_v35, %v10701_v15 }
 0x258   :  { %4018 = vmatpush1.bf16.msra.mxu1 %v10484_v14  ;;  %v14056_v14 = vld [vmem:[#allocation13_spill] sm:$0xff]  ;;  %vm7112_vm12 = vmpackc.low %vm1782_vm7, %vm1778_vm6  ;;  %v10699_v24 = vpop.permute.xlu1 %1345  ;;  %vm2122_vm7 = vcmp.eq.s32.totalorder %v14047_v35, %v14058_v45 }
 0x259   :  { %4019 = vmatprep.subr.bf16.mxu1 %v14030_v10  ;;  %vm2114_vm9 = vcmp.eq.s32.totalorder %v14047_v35, %v14056_v14  ;;  %vm2113_vm1 = vcmp.eq.s32.totalorder %v14042_v49, %v14056_v14  ;;  %vm1790_vm5 = vcmp.eq.s32.totalorder %v14047_v35, %v10699_v24  ;;  %v14091_v14 = vld [vmem:[#allocation46_spill] sm:$0xff] }
 0x25a   :  { %7107 = vmatmul.mubr.msk.bf16.gmra.mrb[128].mxu0 %vm7106_vm10, %v14049_v3  ;;  %7275 = vmatmul.mubr.msk.bf16.gmra.mrb[12].mxu1 %vm7274_vm13, %v14049_v3  ;;  %vm2118_vm10 = vcmp.eq.s32.totalorder %v14047_v35, %v14057_v8  ;;  %v14092_v8 = vld [vmem:[#allocation52_spill] sm:$0xff] }
 0x25b   :  { %7109 = vmatprep.mubr.msk.bf16.mxu0 %vm7108_vm14, %v14049_v3  ;;  %7277 = vmatprep.mubr.msk.bf16.mxu1 %vm7276_vm15, %v14049_v3  ;;  %vm7280_vm13 = vmpackc.low %vm2118_vm10, %vm2114_vm9  ;;  %vm1777_vm14 = vcmp.eq.s32.totalorder %v14042_v49, %v10673_v11  ;;  %vm1781_vm15 = vcmp.eq.s32.totalorder %v14042_v49, %v10671_v12 }
 0x25c   :  { %4020 = vmatpush1.bf16.msra.mxu1 %v10498_v37  ;;  %vm7114_vm6 = vmpackc.low %vm1781_vm15, %vm1777_vm14  ;;  %v10728_v7 = vpop.permute.xlu1 %1351  ;;  %vm2121_vm14 = vcmp.eq.s32.totalorder %v14042_v49, %v14058_v45  ;;  %vm2125_vm15 = vcmp.eq.s32.totalorder %v14042_v49, %v14059_v47  ;;  %v14089_v45 = vld [vmem:[#allocation44_spill] sm:$0xff] }
 0x25d   :  { %4021 = vmatprep.subr.bf16.mxu1 %v14030_v10  ;;  %vm7282_vm9 = vmpackc.low %vm2117_vm3, %vm2113_vm1  ;;  %vm1794_vm1 = vcmp.eq.s32.totalorder %v14047_v35, %v10730_v28  ;;  %vm1798_vm3 = vcmp.eq.s32.totalorder %v14047_v35, %v10728_v7 }
 0x25e   :  { %vm7116_vm10 = vmpackc.low %vm1790_vm5, %vm1786_vm4  ;;  %vm2130_vm5 = vcmp.eq.s32.totalorder %v14047_v35, %v14060_v51 }
 0x260   :  { %4022 = vmatpush1.bf16.msra.mxu1 %v10502_v59  ;;  %v10755_v23 = vpop.permute.xlu1 %1357 }
 0x261   :  { %4023 = vmatprep.subr.bf16.mxu1 %v14030_v10 }
 0x262   :  { %7111 = vmatmul.mubr.msk.bf16.gmra.mrb[132].mxu0 %vm7110_vm8, %v14049_v3  ;;  %7279 = vmatmul.mubr.msk.bf16.gmra.mrb[16].mxu1 %vm7278_vm11, %v14049_v3  ;;  %vm2126_vm8 = vcmp.eq.s32.totalorder %v14047_v35, %v14059_v47  ;;  %v14090_v47 = vld [vmem:[#allocation47_spill] sm:$0xff] }
 0x263   :  { %7113 = vmatprep.mubr.msk.bf16.mxu0 %vm7112_vm12, %v14049_v3  ;;  %7281 = vmatprep.mubr.msk.bf16.mxu1 %vm7280_vm13, %v14049_v3  ;;  %vm7284_vm11 = vmpackc.low %vm2126_vm8, %vm2122_vm7  ;;  %vm1785_vm12 = vcmp.eq.s32.totalorder %v14042_v49, %v10701_v15  ;;  %vm1789_vm13 = vcmp.eq.s32.totalorder %v14042_v49, %v10699_v24  ;;  %vm3394_vm8 = vcmask 1040384  }
 0x264   :  { %4024 = vmatpush1.bf16.msra.mxu1 %v10506_v9  ;;  %vm7118_vm4 = vmpackc.low %vm1789_vm13, %vm1785_vm12  ;;  %v3396_v37 = vsel %vm3394_vm8, %v1155_v42, 0  ;;  %vm1797_vm12 = vcmp.eq.s32.totalorder %v14042_v49, %v10728_v7  ;;  %vm2129_vm13 = vcmp.eq.s32.totalorder %v14042_v49, %v14060_v51  ;;  %v10779_v1 = vpop.permute.xlu1 %1363  ;;  %v14066_v9 = vld [vmem:[#allocation23_spill] sm:$0xff]  ;;  %v14075_v42 = vld [vmem:[#allocation30_spill] sm:$0xff] }
 0x265   :  { %4025 = vmatprep.subr.bf16.mxu1 %v14030_v10  ;;  %vm7286_vm7 = vmpackc.low %vm2125_vm15, %vm2121_vm14  ;;  %vm2133_vm14 = vcmp.eq.s32.totalorder %v14042_v49, %v14061_v61  ;;  %v14087_v51 = vld [vmem:[#allocation42_spill] sm:$0xff] }
 0x268   :  { %4026 = vmatpush1.bf16.msra.mxu1 %v10514_v63  ;;  %v10803_v33 = vpop.permute.xlu1 %1369 }
 0x269   :  { %4027 = vmatprep.subr.bf16.mxu1 %v14030_v10 }
 0x26a   :  { %7115 = vmatmul.mubr.msk.bf16.gmra.mrb[136].mxu0 %vm7114_vm6, %v14049_v3  ;;  %7283 = vmatmul.mubr.msk.bf16.gmra.mrb[20].mxu1 %vm7282_vm9, %v14049_v3  ;;  %vm2134_vm6 = vcmp.eq.s32.totalorder %v14047_v35, %v14061_v61  ;;  %vm7120_vm9 = vmpackc.low %vm1798_vm3, %vm1794_vm1  ;;  %vm1806_vm1 = vcmp.eq.s32.totalorder %v14047_v35, %v10755_v23  ;;  %v14088_v61 = vld [vmem:[#allocation45_spill] sm:$0xff] }
 0x26b   :  { %7117 = vmatprep.mubr.msk.bf16.mxu0 %vm7116_vm10, %v14049_v3  ;;  %7285 = vmatprep.mubr.msk.bf16.mxu1 %vm7284_vm11, %v14049_v3  ;;  %vm7288_vm10 = vmpackc.low %vm2134_vm6, %vm2130_vm5  ;;  %vm1793_vm11 = vcmp.eq.s32.totalorder %v14042_v49, %v10730_v28  ;;  %vm2142_vm5 = vcmp.eq.s32.totalorder %v14047_v35, %v14063_v62 }
 0x26c   :  { %4028 = vmatpush1.bf16.msra.mxu1 %v10520_v34  ;;  %vm7122_vm3 = vmpackc.low %vm1797_vm12, %vm1793_vm11  ;;  %vm2137_vm11 = vcmp.eq.s32.totalorder %v14042_v49, %v14062_v38  ;;  %vm2141_vm12 = vcmp.eq.s32.totalorder %v14042_v49, %v14063_v62  ;;  %v10827_v19 = vpop.permute.xlu1 %1375  ;;  %v14073_v34 = vld [vmem:[#allocation28_spill] sm:$0xff]  ;;  %v14086_v62 = vld [vmem:[#allocation43_spill] sm:$0xff] }
 0x26d   :  { %4029 = vmatprep.subr.bf16.mxu1 %v14030_v10  ;;  %vm7290_vm6 = vmpackc.low %vm2133_vm14, %vm2129_vm13  ;;  %vm1814_vm14 = vcmp.eq.s32.totalorder %v14047_v35, %v10779_v1 }
 0x270   :  { %4030 = vmatpush1.bf16.msra.mxu1 %v10525_v21  ;;  %v10851_v63 = vpop.permute.xlu1 %1381 }
 0x271   :  { %4031 = vmatprep.subr.bf16.mxu1 %v14030_v10  ;;  %v10757_v10 = vpop.permute.xlu0 %1354 }
 0x272   :  { %7119 = vmatmul.mubr.msk.bf16.gmra.mrb[140].mxu0 %vm7118_vm4, %v14049_v3  ;;  %7287 = vmatmul.mubr.msk.bf16.gmra.mrb[24].mxu1 %vm7286_vm7, %v14049_v3  ;;  %vm1802_vm15 = vcmp.eq.s32.totalorder %v14047_v35, %v10757_v10  ;;  %vm2138_vm4 = vcmp.eq.s32.totalorder %v14047_v35, %v14062_v38  ;;  %v14085_v38 = vld [vmem:[#allocation40_spill] sm:$0xff] }
 0x273   :  { %7121 = vmatprep.mubr.msk.bf16.mxu0 %vm7120_vm9, %v14049_v3  ;;  %7289 = vmatprep.mubr.msk.bf16.mxu1 %vm7288_vm10, %v14049_v3  ;;  %vm7124_vm7 = vmpackc.low %vm1806_vm1, %vm1802_vm15  ;;  %vm1801_vm9 = vcmp.eq.s32.totalorder %v14042_v49, %v10757_v10  ;;  %vm1805_vm10 = vcmp.eq.s32.totalorder %v14042_v49, %v10755_v23  ;;  %vm2146_vm1 = vcmp.eq.s32.totalorder %v14047_v35, %v14064_v26 }
 0x274   :  { %4032 = vmatpush1.bf16.msra.mxu1 %v3396_v37  ;;  %vm7292_vm8 = vmpackc.low %vm2142_vm5, %vm2138_vm4  ;;  %v10875_v55 = vpop.permute.xlu1 %1387 }
 0x275   :  { %v10781_v59 = vpop.permute.xlu0 %1360  ;;  %vm7126_vm15 = vmpackc.low %vm1805_vm10, %vm1801_vm9  ;;  %vm2145_vm9 = vcmp.eq.s32.totalorder %v14042_v49, %v14064_v26  ;;  %vm2149_vm10 = vcmp.eq.s32.totalorder %v14042_v49, %v14065_v5  ;;  %v14083_v26 = vld [vmem:[#allocation38_spill] sm:$0xff] }
 0x276   :  { %vm1810_vm13 = vcmp.eq.s32.totalorder %v14047_v35, %v10781_v59  ;;  %vm7294_vm4 = vmpackc.low %vm2141_vm12, %vm2137_vm11  ;;  %vm1822_vm12 = vcmp.eq.s32.totalorder %v14047_v35, %v10803_v33 }
 0x277   :  { %vm7128_vm5 = vmpackc.low %vm1814_vm14, %vm1810_vm13  ;;  %vm2154_vm14 = vcmp.eq.s32.totalorder %v14047_v35, %v14066_v9 }
 0x278   :  { %v10899_v57 = vpop.permute.xlu1 %1393 }
 0x279   :  { %v10805_v52 = vpop.permute.xlu0 %1366 }
 0x27a   :  { %7123 = vmatmul.mubr.msk.bf16.gmra.mrb[144].mxu0 %vm7122_vm3, %v14049_v3  ;;  %7291 = vmatmul.mubr.msk.bf16.gmra.mrb[28].mxu1 %vm7290_vm6, %v14049_v3  ;;  %vm2150_vm3 = vcmp.eq.s32.totalorder %v14047_v35, %v14065_v5  ;;  %vm1818_vm11 = vcmp.eq.s32.totalorder %v14047_v35, %v10805_v52  ;;  %v14084_v5 = vld [vmem:[#allocation41_spill] sm:$0xff] }
 0x27b   :  { %7125 = vmatprep.mubr.msk.bf16.mxu0 %vm7124_vm7, %v14049_v3  ;;  %7293 = vmatprep.mubr.msk.bf16.mxu1 %vm7292_vm8, %v14049_v3  ;;  %vm7296_vm6 = vmpackc.low %vm2150_vm3, %vm2146_vm1  ;;  %vm1809_vm7 = vcmp.eq.s32.totalorder %v14042_v49, %v10781_v59  ;;  %vm1813_vm8 = vcmp.eq.s32.totalorder %v14042_v49, %v10779_v1 }
 0x27c   :  { %vm7130_vm13 = vmpackc.low %vm1813_vm8, %vm1809_vm7  ;;  %vm2153_vm7 = vcmp.eq.s32.totalorder %v14042_v49, %v14066_v9  ;;  %vm2157_vm8 = vcmp.eq.s32.totalorder %v14042_v49, %v14067_v39  ;;  %v10923_v37 = vpop.permute.xlu1 %1399  ;;  %v14082_v9 = vld [vmem:[#allocation39_spill] sm:$0xff] }
 0x27d   :  { %vm7298_vm1 = vmpackc.low %vm2149_vm10, %vm2145_vm9  ;;  %v10829_v53 = vpop.permute.xlu0 %1372  ;;  %vm1830_vm10 = vcmp.eq.s32.totalorder %v14047_v35, %v10827_v19 }
 0x27e   :  { %vm7132_vm3 = vmpackc.low %vm1822_vm12, %vm1818_vm11  ;;  %vm1826_vm9 = vcmp.eq.s32.totalorder %v14047_v35, %v10829_v53  ;;  %vm2162_vm12 = vcmp.eq.s32.totalorder %v14047_v35, %v14068_v31 }
 0x281   :  { %v10853_v48 = vpop.permute.xlu0 %1378 }
 0x282   :  { %7127 = vmatmul.mubr.msk.bf16.gmra.mrb[148].mxu0 %vm7126_vm15, %v14049_v3  ;;  %7295 = vmatmul.mubr.msk.bf16.gmra.mrb[32].mxu1 %vm7294_vm4, %v14049_v3  ;;  %vm2158_vm15 = vcmp.eq.s32.totalorder %v14047_v35, %v14067_v39  ;;  %v14081_v39 = vld [vmem:[#allocation36_spill] sm:$0xff] }
 0x283   :  { %7129 = vmatprep.mubr.msk.bf16.mxu0 %vm7128_vm5, %v14049_v3  ;;  %7297 = vmatprep.mubr.msk.bf16.mxu1 %vm7296_vm6, %v14049_v3  ;;  %vm7300_vm4 = vmpackc.low %vm2158_vm15, %vm2154_vm14  ;;  %vm1817_vm5 = vcmp.eq.s32.totalorder %v14042_v49, %v10805_v52  ;;  %vm1821_vm6 = vcmp.eq.s32.totalorder %v14042_v49, %v10803_v33 }
 0x284   :  { %vm7134_vm11 = vmpackc.low %vm1821_vm6, %vm1817_vm5  ;;  %vm2161_vm5 = vcmp.eq.s32.totalorder %v14042_v49, %v14068_v31  ;;  %vm2165_vm6 = vcmp.eq.s32.totalorder %v14042_v49, %v14069_v32  ;;  %v14080_v31 = vld [vmem:[#allocation37_spill] sm:$0xff] }
 0x285   :  { %vm7302_vm14 = vmpackc.low %vm2157_vm8, %vm2153_vm7  ;;  %vm1834_vm7 = vcmp.eq.s32.totalorder %v14047_v35, %v10853_v48  ;;  %vm1838_vm8 = vcmp.eq.s32.totalorder %v14047_v35, %v10851_v63  ;;  %v10877_v18 = vpop.permute.xlu0 %1384 }
 0x286   :  { %vm7136_vm15 = vmpackc.low %vm1830_vm10, %vm1826_vm9  ;;  %vm2170_vm10 = vcmp.eq.s32.totalorder %v14047_v35, %v14070_v44 }
 0x289   :  { %v10901_v21 = vpop.permute.xlu0 %1390 }
 0x28a   :  { %7131 = vmatmul.mubr.msk.bf16.gmra.mrb[152].mxu0 %vm7130_vm13, %v14049_v3  ;;  %7299 = vmatmul.mubr.msk.bf16.gmra.mrb[36].mxu1 %vm7298_vm1, %v14049_v3  ;;  %vm2166_vm13 = vcmp.eq.s32.totalorder %v14047_v35, %v14069_v32  ;;  %v14079_v32 = vld [vmem:[#allocation34_spill] sm:$0xff] }
 0x28b   :  { %7133 = vmatprep.mubr.msk.bf16.mxu0 %vm7132_vm3, %v14049_v3  ;;  %7301 = vmatprep.mubr.msk.bf16.mxu1 %vm7300_vm4, %v14049_v3  ;;  %vm7304_vm1 = vmpackc.low %vm2166_vm13, %vm2162_vm12  ;;  %vm1825_vm3 = vcmp.eq.s32.totalorder %v14042_v49, %v10829_v53  ;;  %vm1829_vm4 = vcmp.eq.s32.totalorder %v14042_v49, %v10827_v19 }
 0x28c   :  { %vm7138_vm9 = vmpackc.low %vm1829_vm4, %vm1825_vm3  ;;  %vm2169_vm3 = vcmp.eq.s32.totalorder %v14042_v49, %v14070_v44  ;;  %vm2173_vm4 = vcmp.eq.s32.totalorder %v14042_v49, %v14071_v60  ;;  %v14078_v44 = vld [vmem:[#allocation35_spill] sm:$0xff] }
 0x28d   :  { %vm7306_vm12 = vmpackc.low %vm2165_vm6, %vm2161_vm5  ;;  %vm1842_vm5 = vcmp.eq.s32.totalorder %v14047_v35, %v10877_v18  ;;  %vm1846_vm6 = vcmp.eq.s32.totalorder %v14047_v35, %v10875_v55 }
 0x28e   :  { %vm7140_vm13 = vmpackc.low %vm1838_vm8, %vm1834_vm7  ;;  %vm2178_vm8 = vcmp.eq.s32.totalorder %v14047_v35, %v14072_v41 }
 0x292   :  { %7135 = vmatmul.mubr.msk.bf16.gmra.mrb[156].mxu0 %vm7134_vm11, %v14049_v3  ;;  %7303 = vmatmul.mubr.msk.bf16.gmra.mrb[40].mxu1 %vm7302_vm14, %v14049_v3  ;;  %vm2174_vm11 = vcmp.eq.s32.totalorder %v14047_v35, %v14071_v60  ;;  %v14077_v60 = vld [vmem:[#allocation32_spill] sm:$0xff] }
 0x293   :  { %7137 = vmatprep.mubr.msk.bf16.mxu0 %vm7136_vm15, %v14049_v3  ;;  %7305 = vmatprep.mubr.msk.bf16.mxu1 %vm7304_vm1, %v14049_v3  ;;  %vm7308_vm14 = vmpackc.low %vm2174_vm11, %vm2170_vm10  ;;  %vm1833_vm15 = vcmp.eq.s32.totalorder %v14042_v49, %v10853_v48  ;;  %vm1837_vm1 = vcmp.eq.s32.totalorder %v14042_v49, %v10851_v63 }
 0x294   :  { %vm7142_vm7 = vmpackc.low %vm1837_vm1, %vm1833_vm15  ;;  %vm2177_vm15 = vcmp.eq.s32.totalorder %v14042_v49, %v14072_v41  ;;  %vm2181_vm1 = vcmp.eq.s32.totalorder %v14042_v49, %v14073_v34  ;;  %v10925_v41 = vpop.permute.xlu0 %1396 }
 0x295   :  { %vm7310_vm10 = vmpackc.low %vm2173_vm4, %vm2169_vm3  ;;  %vm1850_vm3 = vcmp.eq.s32.totalorder %v14047_v35, %v10901_v21  ;;  %vm1854_vm4 = vcmp.eq.s32.totalorder %v14047_v35, %v10899_v57 }
 0x296   :  { %vm7144_vm11 = vmpackc.low %vm1846_vm6, %vm1842_vm5  ;;  %vm2186_vm6 = vcmp.eq.s32.totalorder %v14047_v35, %v14074_v50 }
 0x29a   :  { %7139 = vmatmul.mubr.msk.bf16.gmra.mrb[160].mxu0 %vm7138_vm9, %v14049_v3  ;;  %7307 = vmatmul.mubr.msk.bf16.gmra.mrb[44].mxu1 %vm7306_vm12, %v14049_v3  ;;  %vm2182_vm9 = vcmp.eq.s32.totalorder %v14047_v35, %v14073_v34  ;;  %v14076_v34 = vld [vmem:[#allocation33_spill] sm:$0xff] }
 0x29b   :  { %7141 = vmatprep.mubr.msk.bf16.mxu0 %vm7140_vm13, %v14049_v3  ;;  %7309 = vmatprep.mubr.msk.bf16.mxu1 %vm7308_vm14, %v14049_v3  ;;  %vm7312_vm12 = vmpackc.low %vm2182_vm9, %vm2178_vm8  ;;  %vm1841_vm13 = vcmp.eq.s32.totalorder %v14042_v49, %v10877_v18  ;;  %vm1845_vm14 = vcmp.eq.s32.totalorder %v14042_v49, %v10875_v55 }
 0x29c   :  { %vm7146_vm5 = vmpackc.low %vm1845_vm14, %vm1841_vm13  ;;  %vm2185_vm13 = vcmp.eq.s32.totalorder %v14042_v49, %v14074_v50  ;;  %vm2189_vm14 = vcmp.eq.s32.totalorder %v14042_v49, %v14075_v42  ;;  %v10947_v50 = vpop.permute.xlu1 %1405 }
 0x29d   :  { %vm7314_vm8 = vmpackc.low %vm2181_vm1, %vm2177_vm15  ;;  %vm1858_vm15 = vcmp.eq.s32.totalorder %v14047_v35, %v10925_v41  ;;  %vm1862_vm1 = vcmp.eq.s32.totalorder %v14047_v35, %v10923_v37 }
 0x29e   :  { %vm7148_vm9 = vmpackc.low %vm1854_vm4, %vm1850_vm3  ;;  %vm2194_vm4 = vcmp.eq.s32.totalorder %v14047_v35, %v14076_v34 }
 0x2a2   :  { %7143 = vmatmul.mubr.msk.bf16.gmra.mrb[164].mxu0 %vm7142_vm7, %v14049_v3  ;;  %7311 = vmatmul.mubr.msk.bf16.gmra.mrb[48].mxu1 %vm7310_vm10, %v14049_v3  ;;  %vm2190_vm7 = vcmp.eq.s32.totalorder %v14047_v35, %v14075_v42  ;;  %v10949_v42 = vpop.permute.xlu0 %1402 }
 0x2a3   :  { %7145 = vmatprep.mubr.msk.bf16.mxu0 %vm7144_vm11, %v14049_v3  ;;  %7313 = vmatprep.mubr.msk.bf16.mxu1 %vm7312_vm12, %v14049_v3  ;;  %vm7316_vm10 = vmpackc.low %vm2190_vm7, %vm2186_vm6  ;;  %vm1849_vm11 = vcmp.eq.s32.totalorder %v14042_v49, %v10901_v21  ;;  %vm1853_vm12 = vcmp.eq.s32.totalorder %v14042_v49, %v10899_v57 }
 0x2a4   :  { %vm7150_vm3 = vmpackc.low %vm1853_vm12, %vm1849_vm11  ;;  %vm2193_vm11 = vcmp.eq.s32.totalorder %v14042_v49, %v14076_v34  ;;  %vm2197_vm12 = vcmp.eq.s32.totalorder %v14042_v49, %v14077_v60 }
 0x2a5   :  { %vm7318_vm6 = vmpackc.low %vm2189_vm14, %vm2185_vm13  ;;  %vm1866_vm13 = vcmp.eq.s32.totalorder %v14047_v35, %v10949_v42  ;;  %vm1870_vm14 = vcmp.eq.s32.totalorder %v14047_v35, %v10947_v50 }
 0x2a6   :  { %vm7152_vm7 = vmpackc.low %vm1862_vm1, %vm1858_vm15  ;;  %vm2202_vm1 = vcmp.eq.s32.totalorder %v14047_v35, %v14078_v44  ;;  %v10973_v34 = vpop.permute.xlu0 %1408 }
 0x2aa   :  { %7147 = vmatmul.mubr.msk.bf16.gmra.mrb[168].mxu0 %vm7146_vm5, %v14049_v3  ;;  %7315 = vmatmul.mubr.msk.bf16.gmra.mrb[52].mxu1 %vm7314_vm8, %v14049_v3  ;;  %vm2198_vm5 = vcmp.eq.s32.totalorder %v14047_v35, %v14077_v60  ;;  %v10971_v60 = vpop.permute.xlu1 %1411 }
 0x2ab   :  { %7149 = vmatprep.mubr.msk.bf16.mxu0 %vm7148_vm9, %v14049_v3  ;;  %7317 = vmatprep.mubr.msk.bf16.mxu1 %vm7316_vm10, %v14049_v3  ;;  %vm7320_vm8 = vmpackc.low %vm2198_vm5, %vm2194_vm4  ;;  %vm1857_vm9 = vcmp.eq.s32.totalorder %v14042_v49, %v10925_v41  ;;  %vm1861_vm10 = vcmp.eq.s32.totalorder %v14042_v49, %v10923_v37 }
 0x2ac   :  { %vm7154_vm15 = vmpackc.low %vm1861_vm10, %vm1857_vm9  ;;  %vm2201_vm9 = vcmp.eq.s32.totalorder %v14042_v49, %v14078_v44  ;;  %vm2205_vm10 = vcmp.eq.s32.totalorder %v14042_v49, %v14079_v32  ;;  %v10997_v44 = vpop.permute.xlu0 %1414 }
 0x2ad   :  { %vm7322_vm4 = vmpackc.low %vm2197_vm12, %vm2193_vm11  ;;  %vm1874_vm11 = vcmp.eq.s32.totalorder %v14047_v35, %v10973_v34  ;;  %vm1878_vm12 = vcmp.eq.s32.totalorder %v14047_v35, %v10971_v60 }
 0x2ae   :  { %vm7156_vm5 = vmpackc.low %vm1870_vm14, %vm1866_vm13  ;;  %vm2210_vm14 = vcmp.eq.s32.totalorder %v14047_v35, %v14080_v31 }
 0x2b2   :  { %7151 = vmatmul.mubr.msk.bf16.gmra.mrb[172].mxu0 %vm7150_vm3, %v14049_v3  ;;  %7319 = vmatmul.mubr.msk.bf16.gmra.mrb[56].mxu1 %vm7318_vm6, %v14049_v3  ;;  %vm2206_vm3 = vcmp.eq.s32.totalorder %v14047_v35, %v14079_v32  ;;  %v10995_v32 = vpop.permute.xlu1 %1417 }
 0x2b3   :  { %7153 = vmatprep.mubr.msk.bf16.mxu0 %vm7152_vm7, %v14049_v3  ;;  %7321 = vmatprep.mubr.msk.bf16.mxu1 %vm7320_vm8, %v14049_v3  ;;  %vm7324_vm6 = vmpackc.low %vm2206_vm3, %vm2202_vm1  ;;  %vm1865_vm7 = vcmp.eq.s32.totalorder %v14042_v49, %v10949_v42  ;;  %vm1869_vm8 = vcmp.eq.s32.totalorder %v14042_v49, %v10947_v50 }
 0x2b4   :  { %vm7158_vm13 = vmpackc.low %vm1869_vm8, %vm1865_vm7  ;;  %vm2209_vm7 = vcmp.eq.s32.totalorder %v14042_v49, %v14080_v31  ;;  %vm2213_vm8 = vcmp.eq.s32.totalorder %v14042_v49, %v14081_v39  ;;  %v11021_v31 = vpop.permute.xlu0 %1420 }
 0x2b5   :  { %vm7326_vm1 = vmpackc.low %vm2205_vm10, %vm2201_vm9  ;;  %vm1882_vm9 = vcmp.eq.s32.totalorder %v14047_v35, %v10997_v44  ;;  %vm1886_vm10 = vcmp.eq.s32.totalorder %v14047_v35, %v10995_v32 }
 0x2b6   :  { %vm7160_vm3 = vmpackc.low %vm1878_vm12, %vm1874_vm11  ;;  %vm2218_vm12 = vcmp.eq.s32.totalorder %v14047_v35, %v14082_v9 }
 0x2ba   :  { %7155 = vmatmul.mubr.msk.bf16.gmra.mrb[176].mxu0 %vm7154_vm15, %v14049_v3  ;;  %7323 = vmatmul.mubr.msk.bf16.gmra.mrb[60].mxu1 %vm7322_vm4, %v14049_v3  ;;  %vm2214_vm15 = vcmp.eq.s32.totalorder %v14047_v35, %v14081_v39  ;;  %v11019_v39 = vpop.permute.xlu1 %1423 }
 0x2bb   :  { %7157 = vmatprep.mubr.msk.bf16.mxu0 %vm7156_vm5, %v14049_v3  ;;  %7325 = vmatprep.mubr.msk.bf16.mxu1 %vm7324_vm6, %v14049_v3  ;;  %vm7328_vm4 = vmpackc.low %vm2214_vm15, %vm2210_vm14  ;;  %vm1873_vm5 = vcmp.eq.s32.totalorder %v14042_v49, %v10973_v34  ;;  %vm1877_vm6 = vcmp.eq.s32.totalorder %v14042_v49, %v10971_v60 }
 0x2bc   :  { %vm7162_vm11 = vmpackc.low %vm1877_vm6, %vm1873_vm5  ;;  %vm2217_vm5 = vcmp.eq.s32.totalorder %v14042_v49, %v14082_v9  ;;  %vm2221_vm6 = vcmp.eq.s32.totalorder %v14042_v49, %v14083_v26  ;;  %v11045_v9 = vpop.permute.xlu0 %1426 }
 0x2bd   :  { %vm7330_vm14 = vmpackc.low %vm2213_vm8, %vm2209_vm7  ;;  %vm1890_vm7 = vcmp.eq.s32.totalorder %v14047_v35, %v11021_v31  ;;  %vm1894_vm8 = vcmp.eq.s32.totalorder %v14047_v35, %v11019_v39 }
 0x2be   :  { %vm7164_vm15 = vmpackc.low %vm1886_vm10, %vm1882_vm9  ;;  %vm2226_vm10 = vcmp.eq.s32.totalorder %v14047_v35, %v14084_v5 }
 0x2c2   :  { %7159 = vmatmul.mubr.msk.bf16.gmra.mrb[180].mxu0 %vm7158_vm13, %v14049_v3  ;;  %7327 = vmatmul.mubr.msk.bf16.gmra.mrb[64].mxu1 %vm7326_vm1, %v14049_v3  ;;  %vm2222_vm13 = vcmp.eq.s32.totalorder %v14047_v35, %v14083_v26  ;;  %v11043_v26 = vpop.permute.xlu1 %1429 }
 0x2c3   :  { %7161 = vmatprep.mubr.msk.bf16.mxu0 %vm7160_vm3, %v14049_v3  ;;  %7329 = vmatprep.mubr.msk.bf16.mxu1 %vm7328_vm4, %v14049_v3  ;;  %vm7332_vm1 = vmpackc.low %vm2222_vm13, %vm2218_vm12  ;;  %vm1881_vm3 = vcmp.eq.s32.totalorder %v14042_v49, %v10997_v44  ;;  %vm1885_vm4 = vcmp.eq.s32.totalorder %v14042_v49, %v10995_v32 }
 0x2c4   :  { %vm7166_vm9 = vmpackc.low %vm1885_vm4, %vm1881_vm3  ;;  %vm2225_vm3 = vcmp.eq.s32.totalorder %v14042_v49, %v14084_v5  ;;  %vm2229_vm4 = vcmp.eq.s32.totalorder %v14042_v49, %v14085_v38 }
 0x2c5   :  { %vm7334_vm12 = vmpackc.low %vm2221_vm6, %vm2217_vm5  ;;  %vm1898_vm5 = vcmp.eq.s32.totalorder %v14047_v35, %v11045_v9  ;;  %vm1902_vm6 = vcmp.eq.s32.totalorder %v14047_v35, %v11043_v26 }
 0x2c6   :  { %vm7168_vm13 = vmpackc.low %vm1894_vm8, %vm1890_vm7  ;;  %vm2234_vm8 = vcmp.eq.s32.totalorder %v14047_v35, %v14086_v62  ;;  %v11067_v5 = vpop.permute.xlu1 %1435 }
 0x2ca   :  { %7163 = vmatmul.mubr.msk.bf16.gmra.mrb[184].mxu0 %vm7162_vm11, %v14049_v3  ;;  %7331 = vmatmul.mubr.msk.bf16.gmra.mrb[68].mxu1 %vm7330_vm14, %v14049_v3  ;;  %vm2230_vm11 = vcmp.eq.s32.totalorder %v14047_v35, %v14085_v38  ;;  %v11069_v38 = vpop.permute.xlu0 %1432 }
 0x2cb   :  { %7165 = vmatprep.mubr.msk.bf16.mxu0 %vm7164_vm15, %v14049_v3  ;;  %7333 = vmatprep.mubr.msk.bf16.mxu1 %vm7332_vm1, %v14049_v3  ;;  %vm7336_vm14 = vmpackc.low %vm2230_vm11, %vm2226_vm10  ;;  %vm1889_vm15 = vcmp.eq.s32.totalorder %v14042_v49, %v11021_v31  ;;  %vm1893_vm1 = vcmp.eq.s32.totalorder %v14042_v49, %v11019_v39 }
 0x2cc   :  { %vm7170_vm7 = vmpackc.low %vm1893_vm1, %vm1889_vm15  ;;  %vm2233_vm15 = vcmp.eq.s32.totalorder %v14042_v49, %v14086_v62  ;;  %vm2237_vm1 = vcmp.eq.s32.totalorder %v14042_v49, %v14087_v51  ;;  %v11091_v62 = vpop.permute.xlu1 %1441 }
 0x2cd   :  { %vm7338_vm10 = vmpackc.low %vm2229_vm4, %vm2225_vm3  ;;  %vm1906_vm3 = vcmp.eq.s32.totalorder %v14047_v35, %v11069_v38  ;;  %vm1910_vm4 = vcmp.eq.s32.totalorder %v14047_v35, %v11067_v5 }
 0x2ce   :  { %vm7172_vm11 = vmpackc.low %vm1902_vm6, %vm1898_vm5  ;;  %vm2242_vm6 = vcmp.eq.s32.totalorder %v14047_v35, %v14088_v61 }
 0x2d2   :  { %7167 = vmatmul.mubr.msk.bf16.gmra.mrb[188].mxu0 %vm7166_vm9, %v14049_v3  ;;  %7335 = vmatmul.mubr.msk.bf16.gmra.mrb[72].mxu1 %vm7334_vm12, %v14049_v3  ;;  %vm2238_vm9 = vcmp.eq.s32.totalorder %v14047_v35, %v14087_v51  ;;  %v11093_v51 = vpop.permute.xlu0 %1438 }
 0x2d3   :  { %7169 = vmatprep.mubr.msk.bf16.mxu0 %vm7168_vm13, %v14049_v3  ;;  %7337 = vmatprep.mubr.msk.bf16.mxu1 %vm7336_vm14, %v14049_v3  ;;  %vm7340_vm12 = vmpackc.low %vm2238_vm9, %vm2234_vm8  ;;  %vm1897_vm13 = vcmp.eq.s32.totalorder %v14042_v49, %v11045_v9  ;;  %vm1901_vm14 = vcmp.eq.s32.totalorder %v14042_v49, %v11043_v26 }
 0x2d4   :  { %vm7174_vm5 = vmpackc.low %vm1901_vm14, %vm1897_vm13  ;;  %vm2241_vm13 = vcmp.eq.s32.totalorder %v14042_v49, %v14088_v61  ;;  %vm2245_vm14 = vcmp.eq.s32.totalorder %v14042_v49, %v14089_v45  ;;  %v11115_v61 = vpop.permute.xlu1 %1447 }
 0x2d5   :  { %vm7342_vm8 = vmpackc.low %vm2237_vm1, %vm2233_vm15  ;;  %vm1914_vm15 = vcmp.eq.s32.totalorder %v14047_v35, %v11093_v51  ;;  %vm1918_vm1 = vcmp.eq.s32.totalorder %v14047_v35, %v11091_v62 }
 0x2d6   :  { %vm7176_vm9 = vmpackc.low %vm1910_vm4, %vm1906_vm3  ;;  %vm2250_vm4 = vcmp.eq.s32.totalorder %v14047_v35, %v14090_v47 }
 0x2da   :  { %7171 = vmatmul.mubr.msk.bf16.gmra.mrb[192].mxu0 %vm7170_vm7, %v14049_v3  ;;  %7339 = vmatmul.mubr.msk.bf16.gmra.mrb[76].mxu1 %vm7338_vm10, %v14049_v3  ;;  %vm2246_vm7 = vcmp.eq.s32.totalorder %v14047_v35, %v14089_v45  ;;  %v11117_v45 = vpop.permute.xlu0 %1444 }
 0x2db   :  { %7173 = vmatprep.mubr.msk.bf16.mxu0 %vm7172_vm11, %v14049_v3  ;;  %7341 = vmatprep.mubr.msk.bf16.mxu1 %vm7340_vm12, %v14049_v3  ;;  %vm7344_vm10 = vmpackc.low %vm2246_vm7, %vm2242_vm6  ;;  %vm1905_vm11 = vcmp.eq.s32.totalorder %v14042_v49, %v11069_v38  ;;  %vm1909_vm12 = vcmp.eq.s32.totalorder %v14042_v49, %v11067_v5 }
 0x2dc   :  { %vm7178_vm3 = vmpackc.low %vm1909_vm12, %vm1905_vm11  ;;  %vm2249_vm11 = vcmp.eq.s32.totalorder %v14042_v49, %v14090_v47  ;;  %vm2253_vm12 = vcmp.eq.s32.totalorder %v14042_v49, %v14091_v14  ;;  %v11139_v47 = vpop.permute.xlu1 %1453 }
 0x2dd   :  { %vm7346_vm6 = vmpackc.low %vm2245_vm14, %vm2241_vm13  ;;  %vm1922_vm13 = vcmp.eq.s32.totalorder %v14047_v35, %v11117_v45  ;;  %vm1926_vm14 = vcmp.eq.s32.totalorder %v14047_v35, %v11115_v61 }
 0x2de   :  { %vm7180_vm7 = vmpackc.low %vm1918_vm1, %vm1914_vm15  ;;  %vm2258_vm1 = vcmp.eq.s32.totalorder %v14047_v35, %v14092_v8 }
 0x2e2   :  { %7175 = vmatmul.mubr.msk.bf16.gmra.mrb[196].mxu0 %vm7174_vm5, %v14049_v3  ;;  %7343 = vmatmul.mubr.msk.bf16.gmra.mrb[80].mxu1 %vm7342_vm8, %v14049_v3  ;;  %vm2254_vm5 = vcmp.eq.s32.totalorder %v14047_v35, %v14091_v14  ;;  %v11141_v14 = vpop.permute.xlu0 %1450 }
 0x2e3   :  { %7177 = vmatprep.mubr.msk.bf16.mxu0 %vm7176_vm9, %v14049_v3  ;;  %7345 = vmatprep.mubr.msk.bf16.mxu1 %vm7344_vm10, %v14049_v3  ;;  %vm7348_vm8 = vmpackc.low %vm2254_vm5, %vm2250_vm4  ;;  %vm1913_vm9 = vcmp.eq.s32.totalorder %v14042_v49, %v11093_v51  ;;  %vm1917_vm10 = vcmp.eq.s32.totalorder %v14042_v49, %v11091_v62  ;;  %14094 = vst [vmem:[#allocation63_spill] sm:$0xff] %v11141_v14 }
 0x2e4   :  { %vm7182_vm15 = vmpackc.low %vm1917_vm10, %vm1913_vm9  ;;  %vm2257_vm9 = vcmp.eq.s32.totalorder %v14042_v49, %v14092_v8  ;;  %vm2261_vm10 = vcmp.eq.s32.totalorder %v14042_v49, %v14093_v36  ;;  %v11163_v8 = vpop.permute.xlu1 %1459 }
 0x2e5   :  { %vm7350_vm4 = vmpackc.low %vm2253_vm12, %vm2249_vm11  ;;  %vm1930_vm11 = vcmp.eq.s32.totalorder %v14047_v35, %v11141_v14  ;;  %vm1934_vm12 = vcmp.eq.s32.totalorder %v14047_v35, %v11139_v47  ;;  %14097 = vst [vmem:[#allocation65_spill] sm:$0xff] %v11163_v8 }
 0x2e6   :  { %vm7184_vm5 = vmpackc.low %vm1926_vm14, %vm1922_vm13  ;;  %vm2266_vm14 = vcmp.eq.s32.totalorder %v14047_v35, %v14095_v13 }
 0x2ea   :  { %7179 = vmatmul.mubr.msk.bf16.gmra.mrb[200].mxu0 %vm7178_vm3, %v14049_v3  ;;  %7347 = vmatmul.mubr.msk.bf16.gmra.mrb[84].mxu1 %vm7346_vm6, %v14049_v3  ;;  %vm2262_vm3 = vcmp.eq.s32.totalorder %v14047_v35, %v14093_v36  ;;  %v11165_v36 = vpop.permute.xlu0 %1456 }
 0x2eb   :  { %7181 = vmatprep.mubr.msk.bf16.mxu0 %vm7180_vm7, %v14049_v3  ;;  %7349 = vmatprep.mubr.msk.bf16.mxu1 %vm7348_vm8, %v14049_v3  ;;  %vm7352_vm6 = vmpackc.low %vm2262_vm3, %vm2258_vm1  ;;  %vm1921_vm7 = vcmp.eq.s32.totalorder %v14042_v49, %v11117_v45  ;;  %vm1925_vm8 = vcmp.eq.s32.totalorder %v14042_v49, %v11115_v61  ;;  %14098 = vst [vmem:[#allocation68_spill] sm:$0xff] %v11165_v36 }
 0x2ec   :  { %vm7186_vm13 = vmpackc.low %vm1925_vm8, %vm1921_vm7  ;;  %vm2265_vm7 = vcmp.eq.s32.totalorder %v14042_v49, %v14095_v13  ;;  %vm2269_vm8 = vcmp.eq.s32.totalorder %v14042_v49, %v14096_v29  ;;  %v11187_v13 = vpop.permute.xlu1 %1465 }
 0x2ed   :  { %vm7354_vm1 = vmpackc.low %vm2261_vm10, %vm2257_vm9  ;;  %vm1938_vm9 = vcmp.eq.s32.totalorder %v14047_v35, %v11165_v36  ;;  %vm1942_vm10 = vcmp.eq.s32.totalorder %v14047_v35, %v11163_v8  ;;  %14101 = vst [vmem:[#allocation69_spill] sm:$0xff] %v11187_v13 }
 0x2ee   :  { %vm7188_vm3 = vmpackc.low %vm1934_vm12, %vm1930_vm11  ;;  %vm2274_vm12 = vcmp.eq.s32.totalorder %v14047_v35, %v14099_v58 }
 0x2f2   :  { %7183 = vmatmul.mubr.msk.bf16.gmra.mrb[204].mxu0 %vm7182_vm15, %v14049_v3  ;;  %7351 = vmatmul.mubr.msk.bf16.gmra.mrb[88].mxu1 %vm7350_vm4, %v14049_v3  ;;  %vm2270_vm15 = vcmp.eq.s32.totalorder %v14047_v35, %v14096_v29  ;;  %v11189_v29 = vpop.permute.xlu0 %1462 }
 0x2f3   :  { %7185 = vmatprep.mubr.msk.bf16.mxu0 %vm7184_vm5, %v14049_v3  ;;  %7353 = vmatprep.mubr.msk.bf16.mxu1 %vm7352_vm6, %v14049_v3  ;;  %vm7356_vm4 = vmpackc.low %vm2270_vm15, %vm2266_vm14  ;;  %vm1929_vm5 = vcmp.eq.s32.totalorder %v14042_v49, %v11141_v14  ;;  %vm1933_vm6 = vcmp.eq.s32.totalorder %v14042_v49, %v11139_v47  ;;  %14102 = vst [vmem:[#allocation72_spill] sm:$0xff] %v11189_v29 }
 0x2f4   :  { %vm7190_vm11 = vmpackc.low %vm1933_vm6, %vm1929_vm5  ;;  %vm2273_vm5 = vcmp.eq.s32.totalorder %v14042_v49, %v14099_v58  ;;  %vm2277_vm6 = vcmp.eq.s32.totalorder %v14042_v49, %v14100_v0  ;;  %v11211_v58 = vpop.permute.xlu1 %1471 }
 0x2f5   :  { %vm7358_vm14 = vmpackc.low %vm2269_vm8, %vm2265_vm7  ;;  %vm1946_vm7 = vcmp.eq.s32.totalorder %v14047_v35, %v11189_v29  ;;  %vm1950_vm8 = vcmp.eq.s32.totalorder %v14047_v35, %v11187_v13  ;;  %14105 = vst [vmem:[#allocation75_spill] sm:$0xff] %v11211_v58 }
 0x2f6   :  { %vm7192_vm15 = vmpackc.low %vm1942_vm10, %vm1938_vm9  ;;  %vm2282_vm10 = vcmp.eq.s32.totalorder %v14047_v35, %v14103_v22 }
 0x2fa   :  { %7187 = vmatmul.mubr.msk.bf16.gmra.mrb[208].mxu0 %vm7186_vm13, %v14049_v3  ;;  %7355 = vmatmul.mubr.msk.bf16.gmra.mrb[92].mxu1 %vm7354_vm1, %v14049_v3  ;;  %vm2278_vm13 = vcmp.eq.s32.totalorder %v14047_v35, %v14100_v0  ;;  %v11213_v0 = vpop.permute.xlu0 %1468 }
 0x2fb   :  { %7189 = vmatprep.mubr.msk.bf16.mxu0 %vm7188_vm3, %v14049_v3  ;;  %7357 = vmatprep.mubr.msk.bf16.mxu1 %vm7356_vm4, %v14049_v3  ;;  %vm7360_vm1 = vmpackc.low %vm2278_vm13, %vm2274_vm12  ;;  %vm1937_vm3 = vcmp.eq.s32.totalorder %v14042_v49, %v11165_v36  ;;  %vm1941_vm4 = vcmp.eq.s32.totalorder %v14042_v49, %v11163_v8  ;;  %14106 = vst [vmem:[#allocation79_spill] sm:$0xff] %v11213_v0  ;;  %v14121_v36 = vmov 0.0  }
 0x2fc   :  { %vm7194_vm9 = vmpackc.low %vm1941_vm4, %vm1937_vm3  ;;  %vm2281_vm3 = vcmp.eq.s32.totalorder %v14042_v49, %v14103_v22  ;;  %vm2285_vm4 = vcmp.eq.s32.totalorder %v14042_v49, %v14104_v27  ;;  %v11231_v22 = vpop.permute.xlu1 %1477 }
 0x2fd   :  { %vm7362_vm12 = vmpackc.low %vm2277_vm6, %vm2273_vm5  ;;  %vm1954_vm5 = vcmp.eq.s32.totalorder %v14047_v35, %v11213_v0  ;;  %vm1958_vm6 = vcmp.eq.s32.totalorder %v14047_v35, %v11211_v58  ;;  %14109 = vst [vmem:[#allocation81_spill] sm:$0xff] %v11231_v22 }
 0x2fe   :  { %vm7196_vm13 = vmpackc.low %vm1950_vm8, %vm1946_vm7  ;;  %vm2290_vm8 = vcmp.eq.s32.totalorder %v14047_v35, %v14107_v6 }
 0x302   :  { %7191 = vmatmul.mubr.msk.bf16.gmra.mrb[212].mxu0 %vm7190_vm11, %v14049_v3  ;;  %7359 = vmatmul.mubr.msk.bf16.gmra.mrb[96].mxu1 %vm7358_vm14, %v14049_v3  ;;  %vm2286_vm11 = vcmp.eq.s32.totalorder %v14047_v35, %v14104_v27  ;;  %v11237_v27 = vpop.permute.xlu0 %1474 }
 0x303   :  { %7193 = vmatprep.mubr.msk.bf16.mxu0 %vm7192_vm15, %v14049_v3  ;;  %7361 = vmatprep.mubr.msk.bf16.mxu1 %vm7360_vm1, %v14049_v3  ;;  %vm7364_vm14 = vmpackc.low %vm2286_vm11, %vm2282_vm10  ;;  %vm1945_vm15 = vcmp.eq.s32.totalorder %v14042_v49, %v11189_v29  ;;  %vm1949_vm1 = vcmp.eq.s32.totalorder %v14042_v49, %v11187_v13  ;;  %14110 = vst [vmem:[#allocation48_spill] sm:$0xff] %v11237_v27 }
 0x304   :  { %vm7198_vm7 = vmpackc.low %vm1949_vm1, %vm1945_vm15  ;;  %vm2289_vm15 = vcmp.eq.s32.totalorder %v14042_v49, %v14107_v6  ;;  %vm2293_vm1 = vcmp.eq.s32.totalorder %v14042_v49, %v14108_v43 }
 0x305   :  { %vm7366_vm10 = vmpackc.low %vm2285_vm4, %vm2281_vm3  ;;  %vm1962_vm3 = vcmp.eq.s32.totalorder %v14047_v35, %v11237_v27  ;;  %vm1966_vm4 = vcmp.eq.s32.totalorder %v14047_v35, %v11231_v22 }
 0x306   :  { %vm7200_vm11 = vmpackc.low %vm1958_vm6, %vm1954_vm5 }
 0x30a   :  { %7195 = vmatmul.mubr.msk.bf16.gmra.mrb[216].mxu0 %vm7194_vm9, %v14049_v3  ;;  %7363 = vmatmul.mubr.msk.bf16.gmra.mrb[100].mxu1 %vm7362_vm12, %v14049_v3  ;;  %vm2294_vm9 = vcmp.eq.s32.totalorder %v14047_v35, %v14108_v43 }
 0x30b   :  { %7197 = vmatprep.mubr.msk.bf16.mxu0 %vm7196_vm13, %v14049_v3  ;;  %7365 = vmatprep.mubr.msk.bf16.mxu1 %vm7364_vm14, %v14049_v3  ;;  %vm7368_vm12 = vmpackc.low %vm2294_vm9, %vm2290_vm8  ;;  %vm1953_vm13 = vcmp.eq.s32.totalorder %v14042_v49, %v11213_v0  ;;  %vm1957_vm14 = vcmp.eq.s32.totalorder %v14042_v49, %v11211_v58  ;;  %v14113_v58 = vld [vmem:[#allocation70_spill] sm:$0xff] }
 0x30c   :  { %vm7202_vm5 = vmpackc.low %vm1957_vm14, %vm1953_vm13  ;;  %vm2298_vm6 = vcmp.eq.s32.totalorder %v14047_v35, %v14113_v58  ;;  %vm2297_vm13 = vcmp.eq.s32.totalorder %v14042_v49, %v14113_v58  ;;  %v14119_v58 = vld [vmem:[#allocation76_spill] sm:$0xff] }
 0x30d   :  { %vm7370_vm8 = vmpackc.low %vm2293_vm1, %vm2289_vm15 }
 0x30e   :  { %vm7204_vm9 = vmpackc.low %vm1966_vm4, %vm1962_vm3 }
 0x312   :  { %7199 = vmatmul.mubr.msk.bf16.gmra.mrb[220].mxu0 %vm7198_vm7, %v14049_v3  ;;  %7367 = vmatmul.mubr.msk.bf16.gmra.mrb[104].mxu1 %vm7366_vm10, %v14049_v3 }
 0x313   :  { %7201 = vmatprep.mubr.msk.bf16.mxu0 %vm7200_vm11, %v14049_v3  ;;  %7369 = vmatprep.mubr.msk.bf16.mxu1 %vm7368_vm12, %v14049_v3  ;;  %vm1961_vm11 = vcmp.eq.s32.totalorder %v14042_v49, %v11237_v27  ;;  %vm1965_vm12 = vcmp.eq.s32.totalorder %v14042_v49, %v11231_v22  ;;  %v11278_v27 = vadd.s32 384, %v14042_v49 }
 0x314   :  { %vm7206_vm3 = vmpackc.low %vm1965_vm12, %vm1961_vm11 }
 0x315   :  { %v11239_v4 = vpop.f32.mrb[116].mxu0 }
 0x316   :  { %14111 = vst [vmem:[#allocation49_spill] sm:$0xff] %v11239_v4  ;;  %v3434_v29 = vpop.f32.mrb[117].mxu0  ;;  %v14114_v4 = vld [vmem:[#allocation71_spill] sm:$0xff] }
 0x317   :  { %v11249_v0 = vpop.f32.mrb[118].mxu0  ;;  %vm2302_vm7 = vcmp.eq.s32.totalorder %v14047_v35, %v14114_v4  ;;  %v11259_v29 = vpop.permute.xlu1 %1483  ;;  %vm2301_vm14 = vcmp.eq.s32.totalorder %v14042_v49, %v14114_v4 }
 0x318   :  { %14112 = vst [vmem:[#allocation50_spill] sm:$0xff] %v11249_v0  ;;  %v3437_v6 = vpop.f32.mrb[119].mxu0  ;;  %vm7372_vm10 = vmpackc.low %vm2302_vm7, %vm2298_vm6  ;;  %vm1974_vm1 = vcmp.eq.s32.totalorder %v14047_v35, %v11259_v29  ;;  %vm1973_vm12 = vcmp.eq.s32.totalorder %v14042_v49, %v11259_v29 }
 0x319   :  { %v11265_v6 = vpop.permute.xlu0 %1480  ;;  %vm7374_vm6 = vmpackc.low %vm2301_vm14, %vm2297_vm13  ;;  %vm2309_vm14 = vcmp.eq.s32.totalorder %v14042_v49, %v14119_v58 }
 0x31a   :  { %7203 = vmatmul.mubr.msk.bf16.gmra.mrb[224].mxu0 %vm7202_vm5, %v14049_v3  ;;  %7371 = vmatmul.mubr.msk.bf16.gmra.mrb[108].mxu1 %vm7370_vm8, %v14049_v3  ;;  %14115 = vst [vmem:[#allocation51_spill] sm:$0xff] %v11265_v6  ;;  %vm1970_vm15 = vcmp.eq.s32.totalorder %v14047_v35, %v11265_v6  ;;  %vm2310_vm5 = vcmp.eq.s32.totalorder %v14047_v35, %v14119_v58 }
 0x31b   :  { %7205 = vmatprep.mubr.msk.bf16.mxu0 %vm7204_vm9, %v14049_v3  ;;  %7373 = vmatprep.mubr.msk.bf16.mxu1 %vm7372_vm10, %v14049_v3  ;;  %vm7208_vm7 = vmpackc.low %vm1974_vm1, %vm1970_vm15  ;;  %vm1744_vm9 = vcmp.eq.s32.totalorder %v11278_v27, %v14041_v30  ;;  %vm1740_vm10 = vcmp.eq.s32.totalorder %v11278_v27, %v14043_v2  ;;  %vm1969_vm11 = vcmp.eq.s32.totalorder %v14042_v49, %v11265_v6 }
 0x31c   :  { %v2316_v8 = vsel %vm1740_vm10, 1.0, %v14121_v36  ;;  %v2320_v14 = vsel %vm1744_vm9, 1.0, %v14121_v36 }
 0x31d   :  { %v11267_v43 = vpop.f32.mrb[120].mxu0 }
 0x31e   :  { %14116 = vst [vmem:[#allocation54_spill] sm:$0xff] %v11267_v43  ;;  %v3442_v0 = vpop.f32.mrb[121].mxu0  ;;  %v14118_v43 = vld [vmem:[#allocation74_spill] sm:$0xff] }
 0x31f   :  { %v11280_v22 = vpop.f32.mrb[122].mxu0  ;;  %vm2306_vm4 = vcmp.eq.s32.totalorder %v14047_v35, %v14118_v43  ;;  %v11294_v0 = vpop.permute.xlu1 %1489  ;;  %vm2305_vm13 = vcmp.eq.s32.totalorder %v14042_v49, %v14118_v43  ;;  %v2892_v43 = vpack.c.bf16 %v2320_v14, %v2316_v8 }
 0x320   :  { %14117 = vst [vmem:[#allocation55_spill] sm:$0xff] %v11280_v22  ;;  %v3445_v4 = vpop.f32.mrb[123].mxu0  ;;  %vm7376_vm8 = vmpackc.low %vm2310_vm5, %vm2306_vm4  ;;  %v11302_v22 = vpop.permute.xlu0 %1486  ;;  %vm1982_vm1 = vcmp.eq.s32.totalorder %v14047_v35, %v11294_v0  ;;  %vm3177_vm4 = vcmask 539648  }
 0x321   :  { %vm1978_vm15 = vcmp.eq.s32.totalorder %v14047_v35, %v11302_v22  ;;  %vm7378_vm5 = vmpackc.low %vm2309_vm14, %vm2305_vm13 }
 0x322   :  { %7207 = vmatmul.mubr.msk.bf16.gmra.mrb[228].mxu0 %vm7206_vm3, %v14049_v3  ;;  %7375 = vmatmul.mubr.msk.bf16.gmra.mrb[112].mxu1 %vm7374_vm6, %v14049_v3  ;;  %vm7210_vm3 = vmpackc.low %vm1973_vm12, %vm1969_vm11  ;;  %vm1977_vm11 = vcmp.eq.s32.totalorder %v14042_v49, %v11302_v22  ;;  %vm1981_vm12 = vcmp.eq.s32.totalorder %v14042_v49, %v11294_v0 }
 0x323   :  { %7209 = vmatprep.mubr.msk.bf16.mxu0 %vm7208_vm7, %v14049_v3  ;;  %7377 = vmatprep.mubr.msk.bf16.mxu1 %vm7376_vm8, %v14049_v3  ;;  %vm7212_vm6 = vmpackc.low %vm1982_vm1, %vm1978_vm15  ;;  %vm1752_vm7 = vcmp.eq.s32.totalorder %v11278_v27, %v10563_v54  ;;  %vm1748_vm8 = vcmp.eq.s32.totalorder %v11278_v27, %v10565_v20  ;;  %v11331_v14 = vpop.permute.xlu1 %1495 }
 0x324   :  { %vm1990_vm14 = vcmp.eq.s32.totalorder %v14047_v35, %v11331_v14  ;;  %vm7214_vm1 = vmpackc.low %vm1981_vm12, %vm1977_vm11 }
 0x325   :  { %v11296_v4 = vpop.f32.mrb[124].mxu0 }
 0x326   :  { %14120 = vst [vmem:[#allocation58_spill] sm:$0xff] %v11296_v4  ;;  %v3450_v13 = vpop.f32.mrb[125].mxu0 }
 0x327   :  { %v11310_v4 = vpop.f32.mrb[126].mxu0  ;;  %v11317_v13 = vadd.s32 256, %v14042_v49 }
 0x328   :  { %14122 = vst [vmem:[#allocation60_spill] sm:$0xff] %v11310_v4  ;;  %v3453_v6 = vpop.f32.mrb[127].mxu0 }
 0x329   :  { %vm1743_vm9 = vcmp.eq.s32.totalorder %v11317_v13, %v14041_v30  ;;  %vm1739_vm10 = vcmp.eq.s32.totalorder %v11317_v13, %v14043_v2  ;;  %v11335_v6 = vpop.permute.xlu0 %1492  ;;  %v2328_v30 = vsel %vm1752_vm7, 1.0, %v14121_v36 }
 0x32a   :  { %7211 = vmatmul.mubr.msk.bf16.gmra.mrb[232].mxu0 %vm7210_vm3, %v14049_v3  ;;  %7379 = vmatmul.mubr.msk.bf16.gmra.mrb[116].mxu1 %vm7378_vm5, %v14049_v3  ;;  %14124 = vst [vmem:[#allocation85_spill] sm:$0xff] %v11335_v6  ;;  %vm1986_vm13 = vcmp.eq.s32.totalorder %v14047_v35, %v11335_v6  ;;  %vm7381_vm15 = vmpackc.low %vm1743_vm9, %vm1739_vm10  ;;  %vm1760_vm5 = vcmp.eq.s32.totalorder %v11278_v27, %v10588_v25 }
 0x32b   :  { %7213 = vmatprep.mubr.msk.bf16.mxu0 %vm7212_vm6, %v14049_v3  ;;  %7380 = vmatprep.mubr.msk.bf16.mxu1 %vm3177_vm4, %v2892_v43  ;;  %v2324_v43 = vsel %vm1748_vm8, 1.0, %v14121_v36  ;;  %vm7216_vm3 = vmpackc.low %vm1990_vm14, %vm1986_vm13  ;;  %vm1756_vm6 = vcmp.eq.s32.totalorder %v11278_v27, %v10590_v56  ;;  %vm1985_vm7 = vcmp.eq.s32.totalorder %v14042_v49, %v11335_v6  ;;  %vm1989_vm8 = vcmp.eq.s32.totalorder %v14042_v49, %v11331_v14 }
 0x32c   :  { %vm1747_vm9 = vcmp.eq.s32.totalorder %v11317_v13, %v10565_v20  ;;  %vm1751_vm10 = vcmp.eq.s32.totalorder %v11317_v13, %v10563_v54  ;;  %vm7218_vm13 = vmpackc.low %vm1989_vm8, %vm1985_vm7  ;;  %vm1755_vm7 = vcmp.eq.s32.totalorder %v11317_v13, %v10590_v56  ;;  %vm1759_vm8 = vcmp.eq.s32.totalorder %v11317_v13, %v10588_v25 }
 0x32d   :  { %v11333_v8 = vpop.f32.mrb[128].mxu0  ;;  %vm7384_vm14 = vmpackc.low %vm1751_vm10, %vm1747_vm9 }
 0x32e   :  { %14123 = vst [vmem:[#allocation82_spill] sm:$0xff] %v11333_v8  ;;  %v3458_v58 = vpop.f32.mrb[129].mxu0  ;;  %v2336_v8 = vsel %vm1760_vm5, 1.0, %v14121_v36 }
 0x32f   :  { %v11343_v4 = vpop.f32.mrb[130].mxu0  ;;  %v2896_v58 = vpack.c.bf16 %v2328_v30, %v2324_v43  ;;  %v11365_v43 = vpop.permute.xlu0 %1498 }
 0x330   :  { %14125 = vst [vmem:[#allocation80_spill] sm:$0xff] %v11343_v4  ;;  %v3461_v2 = vpop.f32.mrb[131].mxu0  ;;  %v11357_v4 = vpop.permute.xlu1 %1501  ;;  %vm1994_vm11 = vcmp.eq.s32.totalorder %v14047_v35, %v11365_v43  ;;  %vm1993_vm5 = vcmp.eq.s32.totalorder %v14042_v49, %v11365_v43 }
 0x331   :  { %vm1998_vm12 = vcmp.eq.s32.totalorder %v14047_v35, %v11357_v4 }
 0x332   :  { %7215 = vmatmul.mubr.msk.bf16.gmra.mrb[236].mxu0 %vm7214_vm1, %v14049_v3  ;;  %7382 = vmatmul.mubr.msk.bf16.vlgmr.msra.gmra.mrb[120].mxu1 %vm7381_vm15, %v14049_v3  ;;  %vm7220_vm15 = vmpackc.low %vm1998_vm12, %vm1994_vm11  ;;  %vm1768_vm1 = vcmp.eq.s32.totalorder %v11278_v27, %v10615_v46 }
 0x333   :  { %7217 = vmatprep.mubr.msk.bf16.mxu0 %vm7216_vm3, %v14049_v3  ;;  %7383 = vmatprep.mubr.msk.bf16.mxu1 %vm3177_vm4, %v2896_v58  ;;  %v2332_v58 = vsel %vm1756_vm6, 1.0, %v14121_v36  ;;  %vm1764_vm3 = vcmp.eq.s32.totalorder %v11278_v27, %v10617_v16  ;;  %vm1997_vm6 = vcmp.eq.s32.totalorder %v14042_v49, %v11357_v4  ;;  %vm7387_vm12 = vmpackc.low %vm1759_vm8, %vm1755_vm7 }
 0x334   :  { %v11387_v54 = vpop.permute.xlu1 %1507  ;;  %vm7222_vm11 = vmpackc.low %vm1997_vm6, %vm1993_vm5  ;;  %vm1763_vm5 = vcmp.eq.s32.totalorder %v11317_v13, %v10617_v16  ;;  %vm1767_vm6 = vcmp.eq.s32.totalorder %v11317_v13, %v10615_v46 }
 0x335   :  { %v11359_v2 = vpop.f32.mrb[132].mxu0  ;;  %vm2006_vm10 = vcmp.eq.s32.totalorder %v14047_v35, %v11387_v54 }
 0x336   :  { %14126 = vst [vmem:[#allocation78_spill] sm:$0xff] %v11359_v2  ;;  %v3466_v30 = vpop.f32.mrb[133].mxu0 }
 0x337   :  { %v11373_v2 = vpop.f32.mrb[134].mxu0  ;;  %v2900_v30 = vpack.c.bf16 %v2336_v8, %v2332_v58  ;;  %v11395_v8 = vpop.permute.xlu0 %1504  ;;  %v2340_v58 = vsel %vm1764_vm3, 1.0, %v14121_v36  ;;  %vm2005_vm3 = vcmp.eq.s32.totalorder %v14042_v49, %v11387_v54 }
 0x338   :  { %14127 = vst [vmem:[#allocation77_spill] sm:$0xff] %v11373_v2  ;;  %v3469_v6 = vpop.f32.mrb[135].mxu0  ;;  %vm2002_vm9 = vcmp.eq.s32.totalorder %v14047_v35, %v11395_v8  ;;  %v11417_v25 = vpop.permute.xlu1 %1513 }
 0x339   :  { %vm2014_vm8 = vcmp.eq.s32.totalorder %v14047_v35, %v11417_v25 }
 0x33a   :  { %7219 = vmatmul.mubr.msk.bf16.gmra.mrb[240].mxu0 %vm7218_vm13, %v14049_v3  ;;  %7385 = vmatmul.mubr.msk.bf16.gmra.mrb[124].mxu1 %vm7384_vm14, %v14049_v3  ;;  %vm7224_vm13 = vmpackc.low %vm2006_vm10, %vm2002_vm9  ;;  %vm1776_vm14 = vcmp.eq.s32.totalorder %v11278_v27, %v10643_v40 }
 0x33b   :  { %7221 = vmatprep.mubr.msk.bf16.mxu0 %vm7220_vm15, %v14049_v3  ;;  %7386 = vmatprep.mubr.msk.bf16.mxu1 %vm3177_vm4, %v2900_v30  ;;  %v2344_v30 = vsel %vm1768_vm1, 1.0, %v14121_v36  ;;  %vm1772_vm15 = vcmp.eq.s32.totalorder %v11278_v27, %v10645_v17  ;;  %vm2001_vm1 = vcmp.eq.s32.totalorder %v14042_v49, %v11395_v8  ;;  %vm7390_vm10 = vmpackc.low %vm1767_vm6, %vm1763_vm5 }
 0x33c   :  { %vm7226_vm9 = vmpackc.low %vm2005_vm3, %vm2001_vm1  ;;  %v11447_v46 = vpop.permute.xlu1 %1519  ;;  %vm1771_vm1 = vcmp.eq.s32.totalorder %v11317_v13, %v10645_v17  ;;  %vm1775_vm3 = vcmp.eq.s32.totalorder %v11317_v13, %v10643_v40 }
 0x33d   :  { %v11389_v20 = vpop.f32.mrb[136].mxu0  ;;  %vm2022_vm6 = vcmp.eq.s32.totalorder %v14047_v35, %v11447_v46 }
 0x33e   :  { %14128 = vst [vmem:[#allocation86_spill] sm:$0xff] %v11389_v20  ;;  %v3474_v6 = vpop.f32.mrb[137].mxu0 }
 0x33f   :  { %v11403_v20 = vpop.f32.mrb[138].mxu0  ;;  %v2904_v6 = vpack.c.bf16 %v2344_v30, %v2340_v58  ;;  %v2348_v30 = vsel %vm1772_vm15, 1.0, %v14121_v36  ;;  %vm2013_vm15 = vcmp.eq.s32.totalorder %v14042_v49, %v11417_v25 }
 0x340   :  { %14129 = vst [vmem:[#allocation87_spill] sm:$0xff] %v11403_v20  ;;  %v3477_v2 = vpop.f32.mrb[139].mxu0  ;;  %v11481_v40 = vpop.permute.xlu1 %1525 }
 0x341   :  { %v11425_v2 = vpop.permute.xlu0 %1510 }
 0x342   :  { %7223 = vmatmul.mubr.msk.bf16.gmra.mrb[244].mxu0 %vm7222_vm11, %v14049_v3  ;;  %7388 = vmatmul.mubr.msk.bf16.gmra.mrb[128].mxu1 %vm7387_vm12, %v14049_v3  ;;  %vm2010_vm7 = vcmp.eq.s32.totalorder %v14047_v35, %v11425_v2  ;;  %vm1784_vm12 = vcmp.eq.s32.totalorder %v11278_v27, %v10671_v12 }
 0x343   :  { %7225 = vmatprep.mubr.msk.bf16.mxu0 %vm7224_vm13, %v14049_v3  ;;  %7389 = vmatprep.mubr.msk.bf16.mxu1 %vm3177_vm4, %v2904_v6  ;;  %v2352_v6 = vsel %vm1776_vm14, 1.0, %v14121_v36  ;;  %vm7228_vm11 = vmpackc.low %vm2014_vm8, %vm2010_vm7  ;;  %vm1780_vm13 = vcmp.eq.s32.totalorder %v11278_v27, %v10673_v11  ;;  %vm2009_vm14 = vcmp.eq.s32.totalorder %v14042_v49, %v11425_v2 }
 0x344   :  { %vm7230_vm7 = vmpackc.low %vm2013_vm15, %vm2009_vm14  ;;  %vm1779_vm14 = vcmp.eq.s32.totalorder %v11317_v13, %v10673_v11  ;;  %vm1783_vm15 = vcmp.eq.s32.totalorder %v11317_v13, %v10671_v12  ;;  %v11511_v12 = vpop.permute.xlu1 %1531 }
 0x345   :  { %v11419_v56 = vpop.f32.mrb[140].mxu0  ;;  %vm7393_vm8 = vmpackc.low %vm1775_vm3, %vm1771_vm1  ;;  %vm2030_vm3 = vcmp.eq.s32.totalorder %v14047_v35, %v11481_v40 }
 0x346   :  { %14130 = vst [vmem:[#allocation88_spill] sm:$0xff] %v11419_v56  ;;  %v3482_v58 = vpop.f32.mrb[141].mxu0 }
 0x347   :  { %v11433_v56 = vpop.f32.mrb[142].mxu0  ;;  %v2908_v58 = vpack.c.bf16 %v2352_v6, %v2348_v30  ;;  %v2356_v6 = vsel %vm1780_vm13, 1.0, %v14121_v36 }
 0x348   :  { %14131 = vst [vmem:[#allocation89_spill] sm:$0xff] %v11433_v56  ;;  %v3485_v20 = vpop.f32.mrb[143].mxu0 }
 0x349   :  { %v11455_v20 = vpop.permute.xlu0 %1516 }
 0x34a   :  { %7227 = vmatmul.mubr.msk.bf16.gmra.mrb[248].mxu0 %vm7226_vm9, %v14049_v3  ;;  %7391 = vmatmul.mubr.msk.bf16.gmra.mrb[132].mxu1 %vm7390_vm10, %v14049_v3  ;;  %vm2018_vm5 = vcmp.eq.s32.totalorder %v14047_v35, %v11455_v20  ;;  %vm1792_vm10 = vcmp.eq.s32.totalorder %v11278_v27, %v10699_v24  ;;  %vm2017_vm13 = vcmp.eq.s32.totalorder %v14042_v49, %v11455_v20 }
 0x34b   :  { %7229 = vmatprep.mubr.msk.bf16.mxu0 %vm7228_vm11, %v14049_v3  ;;  %7392 = vmatprep.mubr.msk.bf16.mxu1 %vm3177_vm4, %v2908_v58  ;;  %v2360_v58 = vsel %vm1784_vm12, 1.0, %v14121_v36  ;;  %vm7232_vm9 = vmpackc.low %vm2022_vm6, %vm2018_vm5  ;;  %vm1788_vm11 = vcmp.eq.s32.totalorder %v11278_v27, %v10701_v15  ;;  %vm2021_vm12 = vcmp.eq.s32.totalorder %v14042_v49, %v11447_v46 }
 0x34c   :  { %vm7234_vm5 = vmpackc.low %vm2021_vm12, %vm2017_vm13  ;;  %vm1787_vm12 = vcmp.eq.s32.totalorder %v11317_v13, %v10701_v15  ;;  %vm1791_vm13 = vcmp.eq.s32.totalorder %v11317_v13, %v10699_v24  ;;  %v11541_v24 = vpop.permute.xlu1 %1537 }
 0x34d   :  { %v11449_v16 = vpop.f32.mrb[144].mxu0  ;;  %vm7396_vm6 = vmpackc.low %vm1783_vm15, %vm1779_vm14  ;;  %vm2038_vm15 = vcmp.eq.s32.totalorder %v14047_v35, %v11511_v12 }
 0x34e   :  { %14132 = vst [vmem:[#allocation90_spill] sm:$0xff] %v11449_v16  ;;  %v3490_v30 = vpop.f32.mrb[145].mxu0 }
 0x34f   :  { %v11463_v16 = vpop.f32.mrb[146].mxu0  ;;  %v2912_v30 = vpack.c.bf16 %v2360_v58, %v2356_v6  ;;  %v2364_v58 = vsel %vm1788_vm11, 1.0, %v14121_v36 }
 0x350   :  { %14133 = vst [vmem:[#allocation91_spill] sm:$0xff] %v11463_v16  ;;  %v3493_v56 = vpop.f32.mrb[147].mxu0 }
 0x351   :  { %v11485_v56 = vpop.permute.xlu0 %1522 }
 0x352   :  { %7231 = vmatmul.mubr.msk.bf16.gmra.mrb[252].mxu0 %vm7230_vm7, %v14049_v3  ;;  %7394 = vmatmul.mubr.msk.bf16.gmra.mrb[136].mxu1 %vm7393_vm8, %v14049_v3  ;;  %vm2026_vm1 = vcmp.eq.s32.totalorder %v14047_v35, %v11485_v56  ;;  %vm1800_vm8 = vcmp.eq.s32.totalorder %v11278_v27, %v10728_v7  ;;  %vm2025_vm11 = vcmp.eq.s32.totalorder %v14042_v49, %v11485_v56 }
 0x353   :  { %7233 = vmatprep.mubr.msk.bf16.mxu0 %vm7232_vm9, %v14049_v3  ;;  %7395 = vmatprep.mubr.msk.bf16.mxu1 %vm3177_vm4, %v2912_v30  ;;  %v2368_v30 = vsel %vm1792_vm10, 1.0, %v14121_v36  ;;  %vm7236_vm7 = vmpackc.low %vm2030_vm3, %vm2026_vm1  ;;  %vm1796_vm9 = vcmp.eq.s32.totalorder %v11278_v27, %v10730_v28  ;;  %vm2029_vm10 = vcmp.eq.s32.totalorder %v14042_v49, %v11481_v40 }
 0x354   :  { %vm7238_vm1 = vmpackc.low %vm2029_vm10, %vm2025_vm11  ;;  %vm1795_vm10 = vcmp.eq.s32.totalorder %v11317_v13, %v10730_v28  ;;  %vm1799_vm11 = vcmp.eq.s32.totalorder %v11317_v13, %v10728_v7  ;;  %v11571_v7 = vpop.permute.xlu1 %1543 }
 0x355   :  { %v11483_v17 = vpop.f32.mrb[148].mxu0  ;;  %vm7399_vm3 = vmpackc.low %vm1791_vm13, %vm1787_vm12  ;;  %vm2046_vm13 = vcmp.eq.s32.totalorder %v14047_v35, %v11541_v24 }
 0x356   :  { %14134 = vst [vmem:[#allocation92_spill] sm:$0xff] %v11483_v17  ;;  %v3498_v6 = vpop.f32.mrb[149].mxu0  ;;  %v2916_v17 = vpack.c.bf16 %v2368_v30, %v2364_v58  ;;  %v11515_v58 = vpop.permute.xlu0 %1528 }
 0x357   :  { %v11493_v16 = vpop.f32.mrb[150].mxu0  ;;  %vm2034_vm14 = vcmp.eq.s32.totalorder %v14047_v35, %v11515_v58 }
 0x358   :  { %14135 = vst [vmem:[#allocation93_spill] sm:$0xff] %v11493_v16  ;;  %v3501_v6 = vpop.f32.mrb[151].mxu0 }
 0x359   :  { %v2376_v6 = vsel %vm1800_vm8, 1.0, %v14121_v36  ;;  %vm2037_vm8 = vcmp.eq.s32.totalorder %v14042_v49, %v11511_v12 }
 0x35a   :  { %7235 = vmatmul.mubr.msk.bf16.gmra.mrb[0].mxu0 %vm7234_vm5, %v14049_v3  ;;  %7397 = vmatmul.mubr.msk.bf16.gmra.mrb[140].mxu1 %vm7396_vm6, %v14049_v3  ;;  %vm7240_vm5 = vmpackc.low %vm2038_vm15, %vm2034_vm14  ;;  %vm1808_vm6 = vcmp.eq.s32.totalorder %v11278_v27, %v10755_v23 }
 0x35b   :  { %7237 = vmatprep.mubr.msk.bf16.mxu0 %vm7236_vm7, %v14049_v3  ;;  %7398 = vmatprep.mubr.msk.bf16.mxu1 %vm3177_vm4, %v2916_v17  ;;  %v2372_v17 = vsel %vm1796_vm9, 1.0, %v14121_v36  ;;  %vm1804_vm7 = vcmp.eq.s32.totalorder %v11278_v27, %v10757_v10  ;;  %vm2033_vm9 = vcmp.eq.s32.totalorder %v14042_v49, %v11515_v58  ;;  %vm7402_vm15 = vmpackc.low %vm1799_vm11, %vm1795_vm10  ;;  %vm2054_vm11 = vcmp.eq.s32.totalorder %v14047_v35, %v11571_v7 }
 0x35c   :  { %vm7242_vm14 = vmpackc.low %vm2037_vm8, %vm2033_vm9  ;;  %vm1803_vm8 = vcmp.eq.s32.totalorder %v11317_v13, %v10757_v10  ;;  %vm1807_vm9 = vcmp.eq.s32.totalorder %v11317_v13, %v10755_v23  ;;  %v11601_v23 = vpop.permute.xlu1 %1549 }
 0x35d   :  { %v11513_v11 = vpop.f32.mrb[152].mxu0 }
 0x35e   :  { %14136 = vst [vmem:[#allocation94_spill] sm:$0xff] %v11513_v11  ;;  %v3506_v30 = vpop.f32.mrb[153].mxu0  ;;  %v2920_v11 = vpack.c.bf16 %v2376_v6, %v2372_v17  ;;  %v11545_v17 = vpop.permute.xlu0 %1534 }
 0x35f   :  { %v11523_v16 = vpop.f32.mrb[154].mxu0  ;;  %vm2042_vm12 = vcmp.eq.s32.totalorder %v14047_v35, %v11545_v17 }
 0x360   :  { %14137 = vst [vmem:[#allocation95_spill] sm:$0xff] %v11523_v16  ;;  %v3509_v30 = vpop.f32.mrb[155].mxu0 }
 0x361   :  { %v2384_v30 = vsel %vm1808_vm6, 1.0, %v14121_v36  ;;  %vm2045_vm6 = vcmp.eq.s32.totalorder %v14042_v49, %v11541_v24 }
 0x362   :  { %7239 = vmatmul.mubr.msk.bf16.gmra.mrb[4].mxu0 %vm7238_vm1, %v14049_v3  ;;  %7400 = vmatmul.mubr.msk.bf16.gmra.mrb[144].mxu1 %vm7399_vm3, %v14049_v3  ;;  %vm7244_vm1 = vmpackc.low %vm2046_vm13, %vm2042_vm12  ;;  %vm1816_vm3 = vcmp.eq.s32.totalorder %v11278_v27, %v10779_v1 }
 0x363   :  { %7241 = vmatprep.mubr.msk.bf16.mxu0 %vm7240_vm5, %v14049_v3  ;;  %7401 = vmatprep.mubr.msk.bf16.mxu1 %vm3177_vm4, %v2920_v11  ;;  %v2380_v11 = vsel %vm1804_vm7, 1.0, %v14121_v36  ;;  %vm1812_vm5 = vcmp.eq.s32.totalorder %v11278_v27, %v10781_v59  ;;  %vm2041_vm7 = vcmp.eq.s32.totalorder %v14042_v49, %v11545_v17  ;;  %vm7405_vm13 = vmpackc.low %vm1807_vm9, %vm1803_vm8  ;;  %vm2062_vm9 = vcmp.eq.s32.totalorder %v14047_v35, %v11601_v23 }
 0x364   :  { %vm7246_vm12 = vmpackc.low %vm2045_vm6, %vm2041_vm7  ;;  %vm1811_vm6 = vcmp.eq.s32.totalorder %v11317_v13, %v10781_v59  ;;  %vm1815_vm7 = vcmp.eq.s32.totalorder %v11317_v13, %v10779_v1  ;;  %v11627_v1 = vpop.permute.xlu1 %1555 }
 0x365   :  { %v11543_v15 = vpop.f32.mrb[156].mxu0 }
 0x366   :  { %14138 = vst [vmem:[#allocation96_spill] sm:$0xff] %v11543_v15  ;;  %v3514_v6 = vpop.f32.mrb[157].mxu0  ;;  %v2924_v15 = vpack.c.bf16 %v2384_v30, %v2380_v11  ;;  %v11575_v11 = vpop.permute.xlu0 %1540 }
 0x367   :  { %v11553_v16 = vpop.f32.mrb[158].mxu0  ;;  %vm2050_vm10 = vcmp.eq.s32.totalorder %v14047_v35, %v11575_v11 }
 0x368   :  { %14139 = vst [vmem:[#allocation97_spill] sm:$0xff] %v11553_v16  ;;  %v3517_v6 = vpop.f32.mrb[159].mxu0 }
 0x369   :  { %v2392_v6 = vsel %vm1816_vm3, 1.0, %v14121_v36  ;;  %vm2053_vm3 = vcmp.eq.s32.totalorder %v14042_v49, %v11571_v7 }
 0x36a   :  { %7243 = vmatmul.mubr.msk.bf16.gmra.mrb[8].mxu0 %vm7242_vm14, %v14049_v3  ;;  %7403 = vmatmul.mubr.msk.bf16.gmra.mrb[148].mxu1 %vm7402_vm15, %v14049_v3  ;;  %vm7248_vm14 = vmpackc.low %vm2054_vm11, %vm2050_vm10  ;;  %vm1824_vm15 = vcmp.eq.s32.totalorder %v11278_v27, %v10803_v33 }
 0x36b   :  { %7245 = vmatprep.mubr.msk.bf16.mxu0 %vm7244_vm1, %v14049_v3  ;;  %7404 = vmatprep.mubr.msk.bf16.mxu1 %vm3177_vm4, %v2924_v15  ;;  %v2388_v15 = vsel %vm1812_vm5, 1.0, %v14121_v36  ;;  %vm1820_vm1 = vcmp.eq.s32.totalorder %v11278_v27, %v10805_v52  ;;  %vm2049_vm5 = vcmp.eq.s32.totalorder %v14042_v49, %v11575_v11  ;;  %vm7408_vm11 = vmpackc.low %vm1815_vm7, %vm1811_vm6  ;;  %vm2070_vm7 = vcmp.eq.s32.totalorder %v14047_v35, %v11627_v1 }
 0x36c   :  { %vm7250_vm10 = vmpackc.low %vm2053_vm3, %vm2049_vm5  ;;  %vm1819_vm3 = vcmp.eq.s32.totalorder %v11317_v13, %v10805_v52  ;;  %vm1823_vm5 = vcmp.eq.s32.totalorder %v11317_v13, %v10803_v33 }
 0x36d   :  { %v11573_v28 = vpop.f32.mrb[160].mxu0 }
 0x36e   :  { %14140 = vst [vmem:[#allocation98_spill] sm:$0xff] %v11573_v28  ;;  %v3522_v30 = vpop.f32.mrb[161].mxu0  ;;  %v2928_v28 = vpack.c.bf16 %v2392_v6, %v2388_v15  ;;  %v11605_v15 = vpop.permute.xlu0 %1546 }
 0x36f   :  { %v11583_v16 = vpop.f32.mrb[162].mxu0  ;;  %vm2058_vm8 = vcmp.eq.s32.totalorder %v14047_v35, %v11605_v15 }
 0x370   :  { %14141 = vst [vmem:[#allocation99_spill] sm:$0xff] %v11583_v16  ;;  %v3525_v30 = vpop.f32.mrb[163].mxu0 }
 0x371   :  { %v2400_v30 = vsel %vm1824_vm15, 1.0, %v14121_v36  ;;  %vm2061_vm15 = vcmp.eq.s32.totalorder %v14042_v49, %v11601_v23 }
 0x372   :  { %7247 = vmatmul.mubr.msk.bf16.gmra.mrb[12].mxu0 %vm7246_vm12, %v14049_v3  ;;  %7406 = vmatmul.mubr.msk.bf16.gmra.mrb[152].mxu1 %vm7405_vm13, %v14049_v3  ;;  %vm7252_vm12 = vmpackc.low %vm2062_vm9, %vm2058_vm8  ;;  %vm1832_vm13 = vcmp.eq.s32.totalorder %v11278_v27, %v10827_v19  ;;  %v11629_v59 = vpop.permute.xlu0 %1552 }
 0x373   :  { %7249 = vmatprep.mubr.msk.bf16.mxu0 %vm7248_vm14, %v14049_v3  ;;  %7407 = vmatprep.mubr.msk.bf16.mxu1 %vm3177_vm4, %v2928_v28  ;;  %v2396_v28 = vsel %vm1820_vm1, 1.0, %v14121_v36  ;;  %vm1828_vm14 = vcmp.eq.s32.totalorder %v11278_v27, %v10829_v53  ;;  %vm2057_vm1 = vcmp.eq.s32.totalorder %v14042_v49, %v11605_v15  ;;  %vm2066_vm6 = vcmp.eq.s32.totalorder %v14047_v35, %v11629_v59  ;;  %vm7411_vm9 = vmpackc.low %vm1823_vm5, %vm1819_vm3 }
 0x374   :  { %vm7254_vm8 = vmpackc.low %vm2061_vm15, %vm2057_vm1  ;;  %vm1827_vm15 = vcmp.eq.s32.totalorder %v11317_v13, %v10829_v53  ;;  %vm1831_vm1 = vcmp.eq.s32.totalorder %v11317_v13, %v10827_v19 }
 0x375   :  { %v11603_v10 = vpop.f32.mrb[164].mxu0  ;;  %vm7414_vm5 = vmpackc.low %vm1831_vm1, %vm1827_vm15  ;;  %vm1864_vm1 = vcmp.eq.s32.totalorder %v11278_v27, %v10923_v37 }
 0x376   :  { %14142 = vst [vmem:[#allocation100_spill] sm:$0xff] %v11603_v10  ;;  %v3530_v6 = vpop.f32.mrb[165].mxu0  ;;  %v2932_v10 = vpack.c.bf16 %v2400_v30, %v2396_v28 }
 0x377   :  { %v11613_v16 = vpop.f32.mrb[166].mxu0 }
 0x378   :  { %14143 = vst [vmem:[#allocation101_spill] sm:$0xff] %v11613_v16  ;;  %v3533_v6 = vpop.f32.mrb[167].mxu0 }
 0x379   :  { %v2408_v6 = vsel %vm1832_vm13, 1.0, %v14121_v36  ;;  %vm2069_vm13 = vcmp.eq.s32.totalorder %v14042_v49, %v11627_v1 }
 0x37a   :  { %7251 = vmatmul.mubr.msk.bf16.gmra.mrb[16].mxu0 %vm7250_vm10, %v14049_v3  ;;  %7409 = vmatmul.mubr.msk.bf16.gmra.mrb[156].mxu1 %vm7408_vm11, %v14049_v3  ;;  %vm7256_vm10 = vmpackc.low %vm2070_vm7, %vm2066_vm6  ;;  %vm1840_vm11 = vcmp.eq.s32.totalorder %v11278_v27, %v10851_v63  ;;  %vm1848_vm6 = vcmp.eq.s32.totalorder %v11278_v27, %v10875_v55  ;;  %vm1844_vm7 = vcmp.eq.s32.totalorder %v11278_v27, %v10877_v18 }
 0x37b   :  { %7253 = vmatprep.mubr.msk.bf16.mxu0 %vm7252_vm12, %v14049_v3  ;;  %7410 = vmatprep.mubr.msk.bf16.mxu1 %vm3177_vm4, %v2932_v10  ;;  %v2404_v10 = vsel %vm1828_vm14, 1.0, %v14121_v36  ;;  %vm1836_vm12 = vcmp.eq.s32.totalorder %v11278_v27, %v10853_v48  ;;  %vm2065_vm14 = vcmp.eq.s32.totalorder %v14042_v49, %v11629_v59 }
 0x37c   :  { %v2412_v52 = vsel %vm1836_vm12, 1.0, %v14121_v36  ;;  %vm7258_vm3 = vmpackc.low %vm2069_vm13, %vm2065_vm14  ;;  %vm1852_vm12 = vcmp.eq.s32.totalorder %v11278_v27, %v10901_v21  ;;  %vm1843_vm13 = vcmp.eq.s32.totalorder %v11317_v13, %v10877_v18  ;;  %vm1847_vm14 = vcmp.eq.s32.totalorder %v11317_v13, %v10875_v55 }
 0x37d   :  { %v11635_v28 = vpop.f32.mrb[168].mxu0  ;;  %vm7420_vm15 = vmpackc.low %vm1847_vm14, %vm1843_vm13  ;;  %vm1880_vm13 = vcmp.eq.s32.totalorder %v11278_v27, %v10971_v60  ;;  %vm1876_vm14 = vcmp.eq.s32.totalorder %v11278_v27, %v10973_v34 }
 0x37e   :  { %14144 = vst [vmem:[#allocation102_spill] sm:$0xff] %v11635_v28  ;;  %v3538_v30 = vpop.f32.mrb[169].mxu0  ;;  %v2936_v28 = vpack.c.bf16 %v2408_v6, %v2404_v10  ;;  %v2416_v10 = vsel %vm1840_vm11, 1.0, %v14121_v36  ;;  %vm1856_vm11 = vcmp.eq.s32.totalorder %v11278_v27, %v10899_v57 }
 0x37f   :  { %v11643_v16 = vpop.f32.mrb[170].mxu0 }
 0x380   :  { %v3541_v30 = vpop.f32.mrb[171].mxu0 }
 0x381   :  { %v2940_v30 = vpack.c.bf16 %v2416_v10, %v2412_v52  ;;  %v2424_v52 = vsel %vm1848_vm6, 1.0, %v14121_v36  ;;  %vm1855_vm6 = vcmp.eq.s32.totalorder %v11317_v13, %v10899_v57 }
 0x382   :  { %7255 = vmatmul.mubr.msk.bf16.gmra.mrb[20].mxu0 %vm7254_vm8, %v14049_v3  ;;  %7412 = vmatmul.mubr.msk.bf16.gmra.mrb[160].mxu1 %vm7411_vm9, %v14049_v3  ;;  %vm1835_vm8 = vcmp.eq.s32.totalorder %v11317_v13, %v10853_v48  ;;  %vm1839_vm9 = vcmp.eq.s32.totalorder %v11317_v13, %v10851_v63 }
 0x383   :  { %7257 = vmatprep.mubr.msk.bf16.mxu0 %vm7256_vm10, %v14049_v3  ;;  %7413 = vmatprep.mubr.msk.bf16.mxu1 %vm3177_vm4, %v2936_v28  ;;  %vm7417_vm10 = vmpackc.low %vm1839_vm9, %vm1835_vm8  ;;  %vm1872_vm8 = vcmp.eq.s32.totalorder %v11278_v27, %v10947_v50  ;;  %vm1868_vm9 = vcmp.eq.s32.totalorder %v11278_v27, %v10949_v42 }
 0x385   :  { %v11661_v35 = vpop.f32.mrb[172].mxu0 }
 0x386   :  { %v3546_v33 = vpop.f32.mrb[173].mxu0 }
 0x387   :  { %v11669_v28 = vpop.f32.mrb[174].mxu0  ;;  %v2420_v33 = vsel %vm1844_vm7, 1.0, %v14121_v36 }
 0x388   :  { %v3549_v6 = vpop.f32.mrb[175].mxu0  ;;  %v2944_v49 = vpack.c.bf16 %v2424_v52, %v2420_v33 }
 0x38a   :  { %7259 = vmatmul.mubr.msk.bf16.gmra.mrb[24].mxu0 %vm7258_vm3, %v14049_v3  ;;  %7415 = vmatmul.mubr.msk.bf16.gmra.mrb[164].mxu1 %vm7414_vm5, %v14049_v3  ;;  %vm1860_vm3 = vcmp.eq.s32.totalorder %v11278_v27, %v10925_v41  ;;  %vm1851_vm5 = vcmp.eq.s32.totalorder %v11317_v13, %v10901_v21 }
 0x38b   :  { %7416 = vmatprep.mubr.msk.bf16.mxu1 %vm3177_vm4, %v2940_v30  ;;  %v2428_v30 = vsel %vm1852_vm12, 1.0, %v14121_v36  ;;  %v2436_v18 = vsel %vm1860_vm3, 1.0, %v14121_v36  ;;  %vm7423_vm7 = vmpackc.low %vm1855_vm6, %vm1851_vm5  ;;  %vm1888_vm5 = vcmp.eq.s32.totalorder %v11278_v27, %v10995_v32  ;;  %vm1884_vm6 = vcmp.eq.s32.totalorder %v11278_v27, %v10997_v44 }
 0x38d   :  { %v11678_v19 = vpop.f32.mrb[176].mxu0 }
 0x38e   :  { %v3554_v53 = vpop.f32.mrb[177].mxu0 }
 0x38f   :  { %v11686_v10 = vpop.f32.mrb[178].mxu0  ;;  %v2432_v53 = vsel %vm1856_vm11, 1.0, %v14121_v36  ;;  %vm1863_vm11 = vcmp.eq.s32.totalorder %v11317_v13, %v10923_v37 }
 0x390   :  { %v3557_v6 = vpop.f32.mrb[179].mxu0 }
 0x391   :  { %v2948_v6 = vpack.c.bf16 %v2432_v53, %v2428_v30 }
 0x392   :  { %7418 = vmatmul.mubr.msk.bf16.gmra.mrb[168].mxu1 %vm7417_vm10, %v14049_v3  ;;  %vm1859_vm10 = vcmp.eq.s32.totalorder %v11317_v13, %v10925_v41 }
 0x393   :  { %7419 = vmatprep.mubr.msk.bf16.mxu1 %vm3177_vm4, %v2944_v49  ;;  %vm7426_vm12 = vmpackc.low %vm1863_vm11, %vm1859_vm10  ;;  %vm1896_vm10 = vcmp.eq.s32.totalorder %v11278_v27, %v11019_v39  ;;  %vm1892_vm11 = vcmp.eq.s32.totalorder %v11278_v27, %v11021_v31 }
 0x395   :  { %v11694_v63 = vpop.f32.mrb[180].mxu0 }
 0x396   :  { %v3562_v48 = vpop.f32.mrb[181].mxu0 }
 0x397   :  { %v11702_v33 = vpop.f32.mrb[182].mxu0  ;;  %v2440_v48 = vsel %vm1864_vm1, 1.0, %v14121_v36  ;;  %vm1871_vm1 = vcmp.eq.s32.totalorder %v11317_v13, %v10947_v50 }
 0x398   :  { %v3565_v52 = vpop.f32.mrb[183].mxu0 }
 0x399   :  { %v2952_v52 = vpack.c.bf16 %v2440_v48, %v2436_v18 }
 0x39a   :  { %7421 = vmatmul.mubr.msk.bf16.gmra.mrb[172].mxu1 %vm7420_vm15, %v14049_v3  ;;  %vm1867_vm15 = vcmp.eq.s32.totalorder %v11317_v13, %v10949_v42 }
 0x39b   :  { %7422 = vmatprep.mubr.msk.bf16.mxu1 %vm3177_vm4, %v2948_v6  ;;  %v2444_v6 = vsel %vm1868_vm9, 1.0, %v14121_v36  ;;  %vm7429_vm3 = vmpackc.low %vm1871_vm1, %vm1867_vm15  ;;  %vm1904_vm15 = vcmp.eq.s32.totalorder %v11278_v27, %v11043_v26  ;;  %vm1900_vm1 = vcmp.eq.s32.totalorder %v11278_v27, %v11045_v9 }
 0x39d   :  { %v11710_v49 = vpop.f32.mrb[184].mxu0 }
 0x39e   :  { %v3570_v55 = vpop.f32.mrb[185].mxu0 }
 0x39f   :  { %v11718_v30 = vpop.f32.mrb[186].mxu0  ;;  %v2448_v55 = vsel %vm1872_vm8, 1.0, %v14121_v36  ;;  %vm1879_vm8 = vcmp.eq.s32.totalorder %v11317_v13, %v10971_v60 }
 0x3a0   :  { %v3573_v53 = vpop.f32.mrb[187].mxu0 }
 0x3a1   :  { %v2956_v53 = vpack.c.bf16 %v2448_v55, %v2444_v6 }
 0x3a2   :  { %7424 = vmatmul.mubr.msk.bf16.gmra.mrb[176].mxu1 %vm7423_vm7, %v14049_v3  ;;  %vm1875_vm7 = vcmp.eq.s32.totalorder %v11317_v13, %v10973_v34 }
 0x3a3   :  { %7425 = vmatprep.mubr.msk.bf16.mxu1 %vm3177_vm4, %v2952_v52  ;;  %v2452_v52 = vsel %vm1876_vm14, 1.0, %v14121_v36  ;;  %vm7432_vm9 = vmpackc.low %vm1879_vm8, %vm1875_vm7  ;;  %vm1912_vm7 = vcmp.eq.s32.totalorder %v11278_v27, %v11067_v5  ;;  %vm1908_vm8 = vcmp.eq.s32.totalorder %v11278_v27, %v11069_v38 }
 0x3a5   :  { %v11726_v57 = vpop.f32.mrb[188].mxu0 }
 0x3a6   :  { %v3578_v21 = vpop.f32.mrb[189].mxu0 }
 0x3a7   :  { %v11734_v18 = vpop.f32.mrb[190].mxu0  ;;  %v2456_v21 = vsel %vm1880_vm13, 1.0, %v14121_v36  ;;  %vm1887_vm13 = vcmp.eq.s32.totalorder %v11317_v13, %v10995_v32 }
 0x3a8   :  { %v3581_v48 = vpop.f32.mrb[191].mxu0 }
 0x3a9   :  { %v2960_v48 = vpack.c.bf16 %v2456_v21, %v2452_v52 }
 0x3aa   :  { %7427 = vmatmul.mubr.msk.bf16.gmra.mrb[180].mxu1 %vm7426_vm12, %v14049_v3  ;;  %vm1883_vm12 = vcmp.eq.s32.totalorder %v11317_v13, %v10997_v44 }
 0x3ab   :  { %7428 = vmatprep.mubr.msk.bf16.mxu1 %vm3177_vm4, %v2956_v53  ;;  %v2460_v53 = vsel %vm1884_vm6, 1.0, %v14121_v36  ;;  %vm7435_vm14 = vmpackc.low %vm1887_vm13, %vm1883_vm12  ;;  %vm1920_vm12 = vcmp.eq.s32.totalorder %v11278_v27, %v11091_v62  ;;  %vm1916_vm13 = vcmp.eq.s32.totalorder %v11278_v27, %v11093_v51 }
 0x3ad   :  { %v11742_v41 = vpop.f32.mrb[192].mxu0 }
 0x3ae   :  { %v3586_v37 = vpop.f32.mrb[193].mxu0 }
 0x3af   :  { %v11750_v6 = vpop.f32.mrb[194].mxu0  ;;  %v2464_v37 = vsel %vm1888_vm5, 1.0, %v14121_v36  ;;  %vm1895_vm5 = vcmp.eq.s32.totalorder %v11317_v13, %v11019_v39 }
 0x3b0   :  { %v3589_v55 = vpop.f32.mrb[195].mxu0 }
 0x3b1   :  { %v2964_v55 = vpack.c.bf16 %v2464_v37, %v2460_v53 }
 0x3b2   :  { %7430 = vmatmul.mubr.msk.bf16.gmra.mrb[184].mxu1 %vm7429_vm3, %v14049_v3  ;;  %vm1891_vm3 = vcmp.eq.s32.totalorder %v11317_v13, %v11021_v31 }
 0x3b3   :  { %7431 = vmatprep.mubr.msk.bf16.mxu1 %vm3177_vm4, %v2960_v48  ;;  %v2468_v48 = vsel %vm1892_vm11, 1.0, %v14121_v36  ;;  %vm7438_vm6 = vmpackc.low %vm1895_vm5, %vm1891_vm3  ;;  %vm1928_vm3 = vcmp.eq.s32.totalorder %v11278_v27, %v11115_v61  ;;  %vm1924_vm5 = vcmp.eq.s32.totalorder %v11278_v27, %v11117_v45 }
 0x3b5   :  { %v11758_v50 = vpop.f32.mrb[196].mxu0 }
 0x3b6   :  { %v3594_v42 = vpop.f32.mrb[197].mxu0 }
 0x3b7   :  { %v11766_v52 = vpop.f32.mrb[198].mxu0  ;;  %v2472_v42 = vsel %vm1896_vm10, 1.0, %v14121_v36  ;;  %vm1903_vm10 = vcmp.eq.s32.totalorder %v11317_v13, %v11043_v26 }
 0x3b8   :  { %v3597_v21 = vpop.f32.mrb[199].mxu0 }
 0x3b9   :  { %v2968_v21 = vpack.c.bf16 %v2472_v42, %v2468_v48 }
 0x3ba   :  { %7433 = vmatmul.mubr.msk.bf16.gmra.mrb[188].mxu1 %vm7432_vm9, %v14049_v3  ;;  %vm1899_vm9 = vcmp.eq.s32.totalorder %v11317_v13, %v11045_v9 }
 0x3bb   :  { %7434 = vmatprep.mubr.msk.bf16.mxu1 %vm3177_vm4, %v2964_v55  ;;  %v2476_v55 = vsel %vm1900_vm1, 1.0, %v14121_v36  ;;  %vm7441_vm11 = vmpackc.low %vm1903_vm10, %vm1899_vm9  ;;  %vm1936_vm9 = vcmp.eq.s32.totalorder %v11278_v27, %v11139_v47 }
 0x3bd   :  { %v11774_v60 = vpop.f32.mrb[200].mxu0 }
 0x3be   :  { %v3602_v34 = vpop.f32.mrb[201].mxu0 }
 0x3bf   :  { %v11782_v53 = vpop.f32.mrb[202].mxu0  ;;  %v2480_v34 = vsel %vm1904_vm15, 1.0, %v14121_v36  ;;  %vm1911_vm15 = vcmp.eq.s32.totalorder %v11317_v13, %v11067_v5 }
 0x3c0   :  { %v3605_v37 = vpop.f32.mrb[203].mxu0 }
 0x3c1   :  { %v2972_v37 = vpack.c.bf16 %v2480_v34, %v2476_v55 }
 0x3c2   :  { %7436 = vmatmul.mubr.msk.bf16.gmra.mrb[192].mxu1 %vm7435_vm14, %v14049_v3  ;;  %vm1907_vm14 = vcmp.eq.s32.totalorder %v11317_v13, %v11069_v38 }
 0x3c3   :  { %7437 = vmatprep.mubr.msk.bf16.mxu1 %vm3177_vm4, %v2968_v21  ;;  %v2484_v21 = vsel %vm1908_vm8, 1.0, %v14121_v36  ;;  %vm7444_vm1 = vmpackc.low %vm1911_vm15, %vm1907_vm14 }
 0x3c5   :  { %v11790_v32 = vpop.f32.mrb[204].mxu0 }
 0x3c6   :  { %v3610_v44 = vpop.f32.mrb[205].mxu0 }
 0x3c7   :  { %v11798_v48 = vpop.f32.mrb[206].mxu0  ;;  %v2488_v44 = vsel %vm1912_vm7, 1.0, %v14121_v36  ;;  %vm1919_vm7 = vcmp.eq.s32.totalorder %v11317_v13, %v11091_v62 }
 0x3c8   :  { %v3613_v42 = vpop.f32.mrb[207].mxu0 }
 0x3c9   :  { %v2976_v42 = vpack.c.bf16 %v2488_v44, %v2484_v21 }
 0x3ca   :  { %7439 = vmatmul.mubr.msk.bf16.gmra.mrb[196].mxu1 %vm7438_vm6, %v14049_v3  ;;  %vm1915_vm6 = vcmp.eq.s32.totalorder %v11317_v13, %v11093_v51 }
 0x3cb   :  { %7440 = vmatprep.mubr.msk.bf16.mxu1 %vm3177_vm4, %v2972_v37  ;;  %v2492_v37 = vsel %vm1916_vm13, 1.0, %v14121_v36  ;;  %vm7447_vm8 = vmpackc.low %vm1919_vm7, %vm1915_vm6 }
 0x3cd   :  { %v11806_v39 = vpop.f32.mrb[208].mxu0 }
 0x3ce   :  { %v3618_v31 = vpop.f32.mrb[209].mxu0 }
 0x3cf   :  { %v11814_v55 = vpop.f32.mrb[210].mxu0  ;;  %v2496_v31 = vsel %vm1920_vm12, 1.0, %v14121_v36  ;;  %vm1927_vm12 = vcmp.eq.s32.totalorder %v11317_v13, %v11115_v61 }
 0x3d0   :  { %14145 = vst [vmem:[#allocation103_spill] sm:$0xff] %v11814_v55  ;;  %v3621_v34 = vpop.f32.mrb[211].mxu0 }
 0x3d1   :  { %v2980_v34 = vpack.c.bf16 %v2496_v31, %v2492_v37 }
 0x3d2   :  { %7442 = vmatmul.mubr.msk.bf16.gmra.mrb[200].mxu1 %vm7441_vm11, %v14049_v3  ;;  %vm1923_vm11 = vcmp.eq.s32.totalorder %v11317_v13, %v11117_v45 }
 0x3d3   :  { %7443 = vmatprep.mubr.msk.bf16.mxu1 %vm3177_vm4, %v2976_v42  ;;  %v2500_v42 = vsel %vm1924_vm5, 1.0, %v14121_v36  ;;  %vm7450_vm13 = vmpackc.low %vm1927_vm12, %vm1923_vm11 }
 0x3d5   :  { %v11822_v26 = vpop.f32.mrb[212].mxu0 }
 0x3d6   :  { %14146 = vst [vmem:[#allocation104_spill] sm:$0xff] %v11822_v26  ;;  %v3626_v9 = vpop.f32.mrb[213].mxu0 }
 0x3d7   :  { %v11830_v21 = vpop.f32.mrb[214].mxu0  ;;  %v2504_v9 = vsel %vm1928_vm3, 1.0, %v14121_v36  ;;  %vm1935_vm3 = vcmp.eq.s32.totalorder %v11317_v13, %v11139_v47 }
 0x3d8   :  { %14147 = vst [vmem:[#allocation105_spill] sm:$0xff] %v11830_v21  ;;  %v3629_v44 = vpop.f32.mrb[215].mxu0 }
 0x3d9   :  { %v2984_v44 = vpack.c.bf16 %v2504_v9, %v2500_v42  ;;  %v2512_v42 = vsel %vm1936_vm9, 1.0, %v14121_v36 }
 0x3da   :  { %7445 = vmatmul.mubr.msk.bf16.gmra.mrb[204].mxu1 %vm7444_vm1, %v14049_v3 }
 0x3db   :  { %7446 = vmatprep.mubr.msk.bf16.mxu1 %vm3177_vm4, %v2980_v34  ;;  %v14150_v34 = vld [vmem:[#allocation63_spill] sm:$0xff] }
 0x3dc   :  { %vm1932_vm10 = vcmp.eq.s32.totalorder %v11278_v27, %v14150_v34  ;;  %vm1931_vm1 = vcmp.eq.s32.totalorder %v11317_v13, %v14150_v34 }
 0x3dd   :  { %v11838_v38 = vpop.f32.mrb[216].mxu0  ;;  %vm7453_vm5 = vmpackc.low %vm1935_vm3, %vm1931_vm1 }
 0x3de   :  { %14148 = vst [vmem:[#allocation106_spill] sm:$0xff] %v11838_v38  ;;  %v3634_v5 = vpop.f32.mrb[217].mxu0 }
 0x3df   :  { %v11846_v37 = vpop.f32.mrb[218].mxu0  ;;  %v2508_v5 = vsel %vm1932_vm10, 1.0, %v14121_v36 }
 0x3e0   :  { %14149 = vst [vmem:[#allocation107_spill] sm:$0xff] %v11846_v37  ;;  %v3637_v31 = vpop.f32.mrb[219].mxu0  ;;  %v2988_v37 = vpack.c.bf16 %v2512_v42, %v2508_v5 }
 0x3e2   :  { %7448 = vmatmul.mubr.msk.bf16.gmra.mrb[208].mxu1 %vm7447_vm8, %v14049_v3 }
 0x3e3   :  { %7449 = vmatprep.mubr.msk.bf16.mxu1 %vm3177_vm4, %v2984_v44  ;;  %v14153_v44 = vld [vmem:[#allocation65_spill] sm:$0xff] }
 0x3e4   :  { %vm1944_vm14 = vcmp.eq.s32.totalorder %v11278_v27, %v14153_v44  ;;  %vm1943_vm9 = vcmp.eq.s32.totalorder %v11317_v13, %v14153_v44 }
 0x3e5   :  { %v11854_v51 = vpop.f32.mrb[220].mxu0  ;;  %v2520_v42 = vsel %vm1944_vm14, 1.0, %v14121_v36 }
 0x3e6   :  { %14151 = vst [vmem:[#allocation63_spill] sm:$0xff] %v11854_v51  ;;  %v3642_v62 = vpop.f32.mrb[221].mxu0 }
 0x3e7   :  { %v11862_v9 = vpop.f32.mrb[222].mxu0  ;;  %v14154_v62 = vld [vmem:[#allocation68_spill] sm:$0xff] }
 0x3e8   :  { %14152 = vst [vmem:[#allocation108_spill] sm:$0xff] %v11862_v9  ;;  %v3645_v31 = vpop.f32.mrb[223].mxu0  ;;  %vm1940_vm15 = vcmp.eq.s32.totalorder %v11278_v27, %v14154_v62  ;;  %vm1939_vm8 = vcmp.eq.s32.totalorder %v11317_v13, %v14154_v62 }
 0x3e9   :  { %v2516_v5 = vsel %vm1940_vm15, 1.0, %v14121_v36  ;;  %vm7456_vm10 = vmpackc.low %vm1943_vm9, %vm1939_vm8  ;;  %vm1976_vm8 = vcmp.eq.s32.totalorder %v11278_v27, %v11259_v29 }
 0x3ea   :  { %7451 = vmatmul.mubr.msk.bf16.gmra.mrb[212].mxu1 %vm7450_vm13, %v14049_v3  ;;  %v2992_v51 = vpack.c.bf16 %v2520_v42, %v2516_v5 }
 0x3eb   :  { %7452 = vmatprep.mubr.msk.bf16.mxu1 %vm3177_vm4, %v2988_v37  ;;  %v14157_v37 = vld [vmem:[#allocation69_spill] sm:$0xff] }
 0x3ec   :  { %vm1952_vm6 = vcmp.eq.s32.totalorder %v11278_v27, %v14157_v37  ;;  %vm1951_vm14 = vcmp.eq.s32.totalorder %v11317_v13, %v14157_v37 }
 0x3ed   :  { %v11870_v45 = vpop.f32.mrb[224].mxu0  ;;  %v2528_v5 = vsel %vm1952_vm6, 1.0, %v14121_v36 }
 0x3ee   :  { %14155 = vst [vmem:[#allocation65_spill] sm:$0xff] %v11870_v45  ;;  %v3650_v61 = vpop.f32.mrb[225].mxu0 }
 0x3ef   :  { %v11878_v31 = vpop.f32.mrb[226].mxu0  ;;  %v14158_v61 = vld [vmem:[#allocation72_spill] sm:$0xff] }
 0x3f0   :  { %14156 = vst [vmem:[#allocation68_spill] sm:$0xff] %v11878_v31  ;;  %v3653_v9 = vpop.f32.mrb[227].mxu0  ;;  %vm1948_vm7 = vcmp.eq.s32.totalorder %v11278_v27, %v14158_v61  ;;  %vm1947_vm13 = vcmp.eq.s32.totalorder %v11317_v13, %v14158_v61 }
 0x3f1   :  { %v2524_v9 = vsel %vm1948_vm7, 1.0, %v14121_v36  ;;  %vm7459_vm15 = vmpackc.low %vm1951_vm14, %vm1947_vm13  ;;  %vm1984_vm13 = vcmp.eq.s32.totalorder %v11278_v27, %v11294_v0  ;;  %vm1980_vm14 = vcmp.eq.s32.totalorder %v11278_v27, %v11302_v22 }
 0x3f2   :  { %7454 = vmatmul.mubr.msk.bf16.gmra.mrb[216].mxu1 %vm7453_vm5, %v14049_v3  ;;  %v2996_v45 = vpack.c.bf16 %v2528_v5, %v2524_v9 }
 0x3f3   :  { %7455 = vmatprep.mubr.msk.bf16.mxu1 %vm3177_vm4, %v2992_v51  ;;  %v14161_v51 = vld [vmem:[#allocation75_spill] sm:$0xff] }
 0x3f4   :  { %vm1960_vm11 = vcmp.eq.s32.totalorder %v11278_v27, %v14161_v51  ;;  %vm1959_vm6 = vcmp.eq.s32.totalorder %v11317_v13, %v14161_v51  ;;  %v14172_v51 = vld [vmem:[#allocation51_spill] sm:$0xff] }
 0x3f5   :  { %v11886_v47 = vpop.f32.mrb[228].mxu0  ;;  %v2536_v9 = vsel %vm1960_vm11, 1.0, %v14121_v36  ;;  %vm1972_vm9 = vcmp.eq.s32.totalorder %v11278_v27, %v14172_v51 }
 0x3f6   :  { %14159 = vst [vmem:[#allocation69_spill] sm:$0xff] %v11886_v47  ;;  %v3658_v34 = vpop.f32.mrb[229].mxu0 }
 0x3f7   :  { %v11894_v42 = vpop.f32.mrb[230].mxu0  ;;  %v14162_v34 = vld [vmem:[#allocation79_spill] sm:$0xff] }
 0x3f8   :  { %14160 = vst [vmem:[#allocation72_spill] sm:$0xff] %v11894_v42  ;;  %v3661_v31 = vpop.f32.mrb[231].mxu0  ;;  %vm1956_vm12 = vcmp.eq.s32.totalorder %v11278_v27, %v14162_v34  ;;  %vm1955_vm5 = vcmp.eq.s32.totalorder %v11317_v13, %v14162_v34 }
 0x3f9   :  { %v2532_v31 = vsel %vm1956_vm12, 1.0, %v14121_v36  ;;  %vm7462_vm7 = vmpackc.low %vm1959_vm6, %vm1955_vm5  ;;  %vm1992_vm5 = vcmp.eq.s32.totalorder %v11278_v27, %v11331_v14 }
 0x3fa   :  { %7457 = vmatmul.mubr.msk.bf16.gmra.mrb[220].mxu1 %vm7456_vm10, %v14049_v3  ;;  %v3000_v47 = vpack.c.bf16 %v2536_v9, %v2532_v31 }
 0x3fb   :  { %7458 = vmatprep.mubr.msk.bf16.mxu1 %vm3177_vm4, %v2996_v45  ;;  %v14165_v45 = vld [vmem:[#allocation81_spill] sm:$0xff] }
 0x3fc   :  { %vm1968_vm1 = vcmp.eq.s32.totalorder %v11278_v27, %v14165_v45  ;;  %vm1967_vm11 = vcmp.eq.s32.totalorder %v11317_v13, %v14165_v45  ;;  %v2560_v45 = vsel %vm1984_vm13, 1.0, %v14121_v36  ;;  %vm1991_vm13 = vcmp.eq.s32.totalorder %v11317_v13, %v11331_v14 }
 0x3fd   :  { %v11902_v44 = vpop.f32.mrb[232].mxu0  ;;  %v2544_v38 = vsel %vm1968_vm1, 1.0, %v14121_v36  ;;  %vm1975_vm1 = vcmp.eq.s32.totalorder %v11317_v13, %v11259_v29  ;;  %v2568_v29 = vsel %vm1992_vm5, 1.0, %v14121_v36  ;;  %vm1999_vm5 = vcmp.eq.s32.totalorder %v11317_v13, %v11357_v4 }
 0x3fe   :  { %14163 = vst [vmem:[#allocation75_spill] sm:$0xff] %v11902_v44  ;;  %v3666_v62 = vpop.f32.mrb[233].mxu0 }
 0x3ff   :  { %v11910_v5 = vpop.f32.mrb[234].mxu0  ;;  %v14166_v62 = vld [vmem:[#allocation48_spill] sm:$0xff] }
 0x400   :  { %14164 = vst [vmem:[#allocation79_spill] sm:$0xff] %v11910_v5  ;;  %v3669_v42 = vpop.f32.mrb[235].mxu0  ;;  %vm1964_vm3 = vcmp.eq.s32.totalorder %v11278_v27, %v14166_v62  ;;  %v14168_v5 = vld [vmem:[#allocation49_spill] sm:$0xff]  ;;  %vm1963_vm10 = vcmp.eq.s32.totalorder %v11317_v13, %v14166_v62 }
 0x401   :  { %v2540_v44 = vsel %vm1964_vm3, 1.0, %v14121_v36  ;;  %vm7465_vm12 = vmpackc.low %vm1967_vm11, %vm1963_vm10  ;;  %vm2000_vm10 = vcmp.eq.s32.totalorder %v11278_v27, %v11357_v4  ;;  %vm1996_vm11 = vcmp.eq.s32.totalorder %v11278_v27, %v11365_v43 }
 0x402   :  { %7460 = vmatmul.mubr.msk.bf16.gmra.mrb[224].mxu1 %vm7459_vm15, %v14049_v3  ;;  %vm1971_vm15 = vcmp.eq.s32.totalorder %v11317_v13, %v14172_v51 }
 0x403   :  { %7461 = vmatprep.mubr.msk.bf16.mxu1 %vm3177_vm4, %v3000_v47  ;;  %vm7468_vm3 = vmpackc.low %vm1975_vm1, %vm1971_vm15  ;;  %vm2008_vm15 = vcmp.eq.s32.totalorder %v11278_v27, %v11387_v54  ;;  %vm2004_vm1 = vcmp.eq.s32.totalorder %v11278_v27, %v11395_v8 }
 0x404   :  { %v2584_v14 = vsel %vm2008_vm15, 1.0, %v14121_v36  ;;  %vm2011_vm15 = vcmp.eq.s32.totalorder %v11317_v13, %v11425_v2 }
 0x405   :  { %v11918_v37 = vpop.f32.mrb[236].mxu0  ;;  %v4041_v61 = vpop.f32.mrb[120].mxu1 }
 0x406   :  { %14167 = vst [vmem:[#allocation81_spill] sm:$0xff] %v11918_v37  ;;  %v11923_v42 = vadd.f32 %v4041_v61, %v14168_v5  ;;  %v3674_v31 = vpop.f32.mrb[237].mxu0  ;;  %v4043_v9 = vpop.f32.mrb[121].mxu1  ;;  %v14171_v37 = vld [vmem:[#allocation50_spill] sm:$0xff]  ;;  %v3004_v5 = vpack.c.bf16 %v2544_v38, %v2540_v44 }
 0x407   :  { %v11929_v21 = vpop.f32.mrb[238].mxu0  ;;  %v4044_v47 = vpop.f32.mrb[122].mxu1  ;;  %v2548_v9 = vsel %vm1972_vm9, 1.0, %v14121_v36 }
 0x408   :  { %14169 = vst [vmem:[#allocation48_spill] sm:$0xff] %v11923_v42  ;;  %14170 = vst [vmem:[#allocation49_spill] sm:$0xff] %v11929_v21  ;;  %v11932_v26 = vadd.f32 %v4044_v47, %v14171_v37  ;;  %v3677_v55 = vpop.f32.mrb[239].mxu0  ;;  %v4046_v34 = vpop.f32.mrb[123].mxu1  ;;  %v2552_v47 = vsel %vm1976_vm8, 1.0, %v14121_v36  ;;  %vm1983_vm8 = vcmp.eq.s32.totalorder %v11317_v13, %v11294_v0 }
 0x409   :  { %v14174_v55 = vld [vmem:[#allocation54_spill] sm:$0xff] }
 0x40a   :  { %7463 = vmatmul.mubr.msk.bf16.gmra.mrb[228].mxu1 %vm7462_vm7, %v14049_v3  ;;  %vm1979_vm7 = vcmp.eq.s32.totalorder %v11317_v13, %v11302_v22  ;;  %v2576_v22 = vsel %vm2000_vm10, 1.0, %v14121_v36  ;;  %vm2007_vm10 = vcmp.eq.s32.totalorder %v11317_v13, %v11387_v54 }
 0x40b   :  { %7464 = vmatprep.mubr.msk.bf16.mxu1 %vm3177_vm4, %v3004_v5  ;;  %vm7471_vm9 = vmpackc.low %vm1983_vm8, %vm1979_vm7  ;;  %vm2016_vm7 = vcmp.eq.s32.totalorder %v11278_v27, %v11417_v25  ;;  %vm2012_vm8 = vcmp.eq.s32.totalorder %v11278_v27, %v11425_v2 }
 0x40c   :  { %v2592_v4 = vsel %vm2016_vm7, 1.0, %v14121_v36  ;;  %vm2019_vm7 = vcmp.eq.s32.totalorder %v11317_v13, %v11455_v20 }
 0x40d   :  { %v11940_v61 = vpop.f32.mrb[240].mxu0  ;;  %v4049_v31 = vpop.f32.mrb[124].mxu1 }
 0x40e   :  { %14173 = vst [vmem:[#allocation50_spill] sm:$0xff] %v11940_v61  ;;  %v11945_v37 = vadd.f32 %v4049_v31, %v14174_v55  ;;  %v3682_v38 = vpop.f32.mrb[241].mxu0  ;;  %v4051_v44 = vpop.f32.mrb[125].mxu1  ;;  %v14177_v61 = vld [vmem:[#allocation55_spill] sm:$0xff]  ;;  %v3008_v31 = vpack.c.bf16 %v2552_v47, %v2548_v9 }
 0x40f   :  { %v11951_v34 = vpop.f32.mrb[242].mxu0  ;;  %v4052_v5 = vpop.f32.mrb[126].mxu1  ;;  %v14180_v38 = vld [vmem:[#allocation58_spill] sm:$0xff] }
 0x410   :  { %14175 = vst [vmem:[#allocation51_spill] sm:$0xff] %v11945_v37  ;;  %14176 = vst [vmem:[#allocation54_spill] sm:$0xff] %v11951_v34  ;;  %v11954_v21 = vadd.f32 %v4052_v5, %v14177_v61  ;;  %v3685_v42 = vpop.f32.mrb[243].mxu0  ;;  %v4054_v62 = vpop.f32.mrb[127].mxu1 }
 0x411   :  { %v2556_v42 = vsel %vm1980_vm14, 1.0, %v14121_v36 }
 0x412   :  { %14178 = vst [vmem:[#allocation55_spill] sm:$0xff] %v11954_v21  ;;  %7466 = vmatmul.mubr.msk.bf16.gmra.mrb[232].mxu1 %vm7465_vm12, %v14049_v3  ;;  %v3012_v21 = vpack.c.bf16 %v2560_v45, %v2556_v42 }
 0x413   :  { %7467 = vmatprep.mubr.msk.bf16.mxu1 %vm3177_vm4, %v3008_v31  ;;  %v14183_v31 = vld [vmem:[#allocation60_spill] sm:$0xff] }
 0x415   :  { %v11963_v55 = vpop.f32.mrb[244].mxu0  ;;  %v4057_v61 = vpop.f32.mrb[128].mxu1 }
 0x416   :  { %14179 = vst [vmem:[#allocation109_spill] sm:$0xff] %v11963_v55  ;;  %v11967_v44 = vadd.f32 %v4057_v61, %v14180_v38  ;;  %v3690_v9 = vpop.f32.mrb[245].mxu0  ;;  %v4059_v47 = vpop.f32.mrb[129].mxu1  ;;  %v14184_v61 = vld [vmem:[#allocation85_spill] sm:$0xff] }
 0x417   :  { %v11973_v5 = vpop.f32.mrb[246].mxu0  ;;  %v4060_v62 = vpop.f32.mrb[130].mxu1  ;;  %vm1988_vm6 = vcmp.eq.s32.totalorder %v11278_v27, %v14184_v61  ;;  %vm1987_vm12 = vcmp.eq.s32.totalorder %v11317_v13, %v14184_v61 }
 0x418   :  { %14181 = vst [vmem:[#allocation58_spill] sm:$0xff] %v11967_v44  ;;  %14182 = vst [vmem:[#allocation110_spill] sm:$0xff] %v11973_v5  ;;  %v11976_v34 = vadd.f32 %v4060_v62, %v14183_v31  ;;  %v3693_v55 = vpop.f32.mrb[247].mxu0  ;;  %v4062_v37 = vpop.f32.mrb[131].mxu1  ;;  %v14188_v62 = vld [vmem:[#allocation80_spill] sm:$0xff] }
 0x419   :  { %v2564_v55 = vsel %vm1988_vm6, 1.0, %v14121_v36  ;;  %v14186_v37 = vld [vmem:[#allocation82_spill] sm:$0xff]  ;;  %vm7474_vm14 = vmpackc.low %vm1991_vm13, %vm1987_vm12  ;;  %vm2024_vm12 = vcmp.eq.s32.totalorder %v11278_v27, %v11447_v46  ;;  %vm2020_vm13 = vcmp.eq.s32.totalorder %v11278_v27, %v11455_v20 }
 0x41a   :  { %7469 = vmatmul.mubr.msk.bf16.gmra.mrb[236].mxu1 %vm7468_vm3, %v14049_v3  ;;  %v3016_v44 = vpack.c.bf16 %v2568_v29, %v2564_v55  ;;  %vm1995_vm3 = vcmp.eq.s32.totalorder %v11317_v13, %v11365_v43 }
 0x41b   :  { %7470 = vmatprep.mubr.msk.bf16.mxu1 %vm3177_vm4, %v3012_v21  ;;  %vm7477_vm6 = vmpackc.low %vm1999_vm5, %vm1995_vm3  ;;  %vm2032_vm3 = vcmp.eq.s32.totalorder %v11278_v27, %v11481_v40  ;;  %vm2028_vm5 = vcmp.eq.s32.totalorder %v11278_v27, %v11485_v56 }
 0x41d   :  { %v11985_v51 = vpop.f32.mrb[248].mxu0  ;;  %v4065_v38 = vpop.f32.mrb[132].mxu1 }
 0x41e   :  { %14185 = vst [vmem:[#allocation60_spill] sm:$0xff] %v11985_v51  ;;  %v11989_v9 = vadd.f32 %v4065_v38, %v14186_v37  ;;  %v3698_v45 = vpop.f32.mrb[249].mxu0  ;;  %v4067_v42 = vpop.f32.mrb[133].mxu1 }
 0x41f   :  { %v11995_v47 = vpop.f32.mrb[250].mxu0  ;;  %v4068_v21 = vpop.f32.mrb[134].mxu1  ;;  %v14193_v42 = vld [vmem:[#allocation77_spill] sm:$0xff] }
 0x420   :  { %14187 = vst [vmem:[#allocation85_spill] sm:$0xff] %v11995_v47  ;;  %v11998_v31 = vadd.f32 %v4068_v21, %v14188_v62  ;;  %v3701_v51 = vpop.f32.mrb[251].mxu0  ;;  %v4070_v5 = vpop.f32.mrb[135].mxu1 }
 0x421   :  { %v2572_v51 = vsel %vm1996_vm11, 1.0, %v14121_v36  ;;  %v14190_v5 = vld [vmem:[#allocation78_spill] sm:$0xff] }
 0x422   :  { %7472 = vmatmul.mubr.msk.bf16.gmra.mrb[240].mxu1 %vm7471_vm9, %v14049_v3  ;;  %v3020_v47 = vpack.c.bf16 %v2576_v22, %v2572_v51  ;;  %vm2003_vm9 = vcmp.eq.s32.totalorder %v11317_v13, %v11395_v8 }
 0x423   :  { %7473 = vmatprep.mubr.msk.bf16.mxu1 %vm3177_vm4, %v3016_v44  ;;  %vm7480_vm11 = vmpackc.low %vm2007_vm10, %vm2003_vm9  ;;  %vm2040_vm9 = vcmp.eq.s32.totalorder %v11278_v27, %v11511_v12  ;;  %vm2036_vm10 = vcmp.eq.s32.totalorder %v11278_v27, %v11515_v58 }
 0x425   :  { %v12007_v0 = vpop.f32.mrb[252].mxu0  ;;  %v4073_v38 = vpop.f32.mrb[136].mxu1 }
 0x426   :  { %14189 = vst [vmem:[#allocation82_spill] sm:$0xff] %v12007_v0  ;;  %v12011_v37 = vadd.f32 %v4073_v38, %v14190_v5  ;;  %v3706_v29 = vpop.f32.mrb[253].mxu0  ;;  %v4075_v55 = vpop.f32.mrb[137].mxu1  ;;  %v2580_v5 = vsel %vm2004_vm1, 1.0, %v14121_v36 }
 0x427   :  { %v12017_v45 = vpop.f32.mrb[254].mxu0  ;;  %v4076_v44 = vpop.f32.mrb[138].mxu1 }
 0x428   :  { %14191 = vst [vmem:[#allocation80_spill] sm:$0xff] %v12011_v37  ;;  %14192 = vst [vmem:[#allocation78_spill] sm:$0xff] %v12017_v45  ;;  %v4077_v21 = vadd.f32 %v4076_v44, %v14193_v42  ;;  %v3709_v62 = vpop.f32.mrb[255].mxu0  ;;  %v4078_v0 = vpop.f32.mrb[139].mxu1  ;;  %v14196_v42 = vld [vmem:[#allocation87_spill] sm:$0xff]  ;;  %v3024_v45 = vpack.c.bf16 %v2584_v14, %v2580_v5  ;;  %v14197_v14 = vld [vmem:[#allocation88_spill] sm:$0xff] }
 0x429   :  { %v14195_v0 = vld [vmem:[#allocation86_spill] sm:$0xff] }
 0x42a   :  { %7475 = vmatmul.mubr.msk.bf16.gmra.mrb[244].mxu1 %vm7474_vm14, %v14049_v3  ;;  %vm2015_vm14 = vcmp.eq.s32.totalorder %v11317_v13, %v11417_v25 }
 0x42b   :  { %7476 = vmatprep.mubr.msk.bf16.mxu1 %vm3177_vm4, %v3020_v47  ;;  %vm7483_vm1 = vmpackc.low %vm2015_vm14, %vm2011_vm15  ;;  %vm2048_vm14 = vcmp.eq.s32.totalorder %v11278_v27, %v11541_v24  ;;  %vm2044_vm15 = vcmp.eq.s32.totalorder %v11278_v27, %v11545_v17 }
 0x42d   :  { %v12027_v61 = vpop.f32.mrb[0].mxu0  ;;  %v4081_v38 = vpop.f32.mrb[140].mxu1 }
 0x42e   :  { %14194 = vst [vmem:[#allocation77_spill] sm:$0xff] %v12027_v61  ;;  %v4082_v29 = vadd.f32 %v4081_v38, %v14195_v0  ;;  %v3714_v22 = vpop.f32.mrb[1].mxu0  ;;  %v4083_v51 = vpop.f32.mrb[141].mxu1 }
 0x42f   :  { %v12035_v55 = vpop.f32.mrb[2].mxu0  ;;  %v4084_v47 = vpop.f32.mrb[142].mxu1  ;;  %v14198_v22 = vld [vmem:[#allocation89_spill] sm:$0xff] }
 0x430   :  { %v8413_v44 = vpack.i.bf16 %v4082_v29, %v4077_v21  ;;  %v4085_v62 = vadd.f32 %v4084_v47, %v14196_v42  ;;  %v3717_v37 = vpop.f32.mrb[3].mxu0  ;;  %v4086_v61 = vpop.f32.mrb[143].mxu1  ;;  %v2588_v21 = vsel %vm2012_vm8, 1.0, %v14121_v36 }
 0x431   :  { %v3028_v42 = vpack.c.bf16 %v2592_v4, %v2588_v21  ;;  %v2596_v4 = vsel %vm2020_vm13, 1.0, %v14121_v36 }
 0x432   :  { %7478 = vmatmul.mubr.msk.bf16.gmra.mrb[248].mxu1 %vm7477_vm6, %v14049_v3  ;;  %8414 = vrot.lane.b32.xlu1 %v8413_v44, %s8863_s4  ;;  %vm2023_vm6 = vcmp.eq.s32.totalorder %v11317_v13, %v11447_v46 }
 0x433   :  { %7479 = vmatprep.mubr.msk.bf16.mxu1 %vm3177_vm4, %v3024_v45  ;;  %vm7486_vm8 = vmpackc.low %vm2023_vm6, %vm2019_vm7  ;;  %vm2056_vm6 = vcmp.eq.s32.totalorder %v11278_v27, %v11571_v7  ;;  %vm2052_vm7 = vcmp.eq.s32.totalorder %v11278_v27, %v11575_v11 }
 0x435   :  { %v12046_v43 = vpop.f32.mrb[4].mxu0  ;;  %v4089_v37 = vpop.f32.mrb[144].mxu1 }
 0x436   :  { %v4090_v61 = vadd.f32 %v4089_v37, %v14197_v14  ;;  %v3722_v38 = vpop.f32.mrb[5].mxu0  ;;  %v4091_v5 = vpop.f32.mrb[145].mxu1  ;;  %v14199_v37 = vld [vmem:[#allocation90_spill] sm:$0xff] }
 0x437   :  { %v12054_v0 = vpop.f32.mrb[6].mxu0  ;;  %v4092_v45 = vpop.f32.mrb[146].mxu1 }
 0x438   :  { %v8418_v29 = vpack.i.bf16 %v4090_v61, %v4085_v62  ;;  %v4093_v51 = vadd.f32 %v4092_v45, %v14198_v22  ;;  %v3725_v47 = vpop.f32.mrb[7].mxu0  ;;  %v4094_v44 = vpop.f32.mrb[147].mxu1  ;;  %v2600_v62 = vsel %vm2024_vm12, 1.0, %v14121_v36  ;;  %vm2027_vm12 = vcmp.eq.s32.totalorder %v11317_v13, %v11485_v56 }
 0x439   :  { %v3032_v2 = vpack.c.bf16 %v2600_v62, %v2596_v4  ;;  %v14201_v62 = vld [vmem:[#allocation92_spill] sm:$0xff] }
 0x43a   :  { %7481 = vmatmul.mubr.msk.bf16.gmra.mrb[252].mxu1 %vm7480_vm11, %v14049_v3  ;;  %8419 = vrot.lane.b32.xlu1 %v8418_v29, %s8863_s4  ;;  %v14200_v29 = vld [vmem:[#allocation91_spill] sm:$0xff]  ;;  %vm2031_vm11 = vcmp.eq.s32.totalorder %v11317_v13, %v11481_v40 }
 0x43b   :  { %7482 = vmatprep.mubr.msk.bf16.mxu1 %vm3177_vm4, %v3028_v42  ;;  %v2608_v42 = vsel %vm2032_vm3, 1.0, %v14121_v36  ;;  %vm7489_vm13 = vmpackc.low %vm2031_vm11, %vm2027_vm12  ;;  %vm2035_vm3 = vcmp.eq.s32.totalorder %v11317_v13, %v11515_v58  ;;  %vm2064_vm11 = vcmp.eq.s32.totalorder %v11278_v27, %v11601_v23  ;;  %vm2060_vm12 = vcmp.eq.s32.totalorder %v11278_v27, %v11605_v15 }
 0x43d   :  { %v12066_v54 = vpop.f32.mrb[8].mxu0  ;;  %v4097_v8 = vpop.f32.mrb[148].mxu1 }
 0x43e   :  { %v4098_v21 = vadd.f32 %v4097_v8, %v14199_v37  ;;  %v3730_v14 = vpop.f32.mrb[9].mxu0  ;;  %v4099_v61 = vpop.f32.mrb[149].mxu1  ;;  %v2604_v8 = vsel %vm2028_vm5, 1.0, %v14121_v36 }
 0x43f   :  { %v12073_v38 = vpop.f32.mrb[10].mxu0  ;;  %v4100_v5 = vpop.f32.mrb[150].mxu1  ;;  %v3036_v20 = vpack.c.bf16 %v2608_v42, %v2604_v8  ;;  %v14203_v42 = vld [vmem:[#allocation94_spill] sm:$0xff] }
 0x440   :  { %v8423_v45 = vpack.i.bf16 %v4098_v21, %v4093_v51  ;;  %v4101_v22 = vadd.f32 %v4100_v5, %v14200_v29  ;;  %v3733_v47 = vpop.f32.mrb[11].mxu0  ;;  %v4102_v44 = vpop.f32.mrb[151].mxu1 }
 0x442   :  { %7484 = vmatmul.mubr.msk.bf16.gmra.mrb[120].mxu1 %vm7483_vm1, %v14049_v3  ;;  %8424 = vrot.lane.b32.xlu1 %v8423_v45, %s8863_s4  ;;  %v14202_v45 = vld [vmem:[#allocation93_spill] sm:$0xff]  ;;  %vm2039_vm1 = vcmp.eq.s32.totalorder %v11317_v13, %v11511_v12 }
 0x443   :  { %7485 = vmatprep.mubr.msk.bf16.mxu1 %vm3177_vm4, %v3032_v2  ;;  %v2616_v2 = vsel %vm2040_vm9, 1.0, %v14121_v36  ;;  %vm7492_vm5 = vmpackc.low %vm2039_vm1, %vm2035_vm3  ;;  %vm2043_vm9 = vcmp.eq.s32.totalorder %v11317_v13, %v11545_v17  ;;  %vm2072_vm1 = vcmp.eq.s32.totalorder %v11278_v27, %v11627_v1  ;;  %vm2068_vm3 = vcmp.eq.s32.totalorder %v11278_v27, %v11629_v59 }
 0x445   :  { %v12088_v51 = vpop.f32.mrb[12].mxu0  ;;  %v4105_v25 = vpop.f32.mrb[152].mxu1 }
 0x446   :  { %v4106_v4 = vadd.f32 %v4105_v25, %v14201_v62  ;;  %v3738_v37 = vpop.f32.mrb[13].mxu0  ;;  %v4107_v21 = vpop.f32.mrb[153].mxu1  ;;  %v2612_v25 = vsel %vm2036_vm10, 1.0, %v14121_v36 }
 0x447   :  { %v12095_v14 = vpop.f32.mrb[14].mxu0  ;;  %v4108_v61 = vpop.f32.mrb[154].mxu1 }
 0x448   :  { %v8428_v5 = vpack.i.bf16 %v4106_v4, %v4101_v22  ;;  %v12098_v29 = vadd.f32 %v4108_v61, %v14202_v45  ;;  %v3741_v47 = vpop.f32.mrb[15].mxu0  ;;  %v4110_v44 = vpop.f32.mrb[155].mxu1  ;;  %v14204_v61 = vld [vmem:[#allocation95_spill] sm:$0xff] }
 0x449   :  { %v3040_v47 = vpack.c.bf16 %v2616_v2, %v2612_v25  ;;  %v2620_v2 = vsel %vm2044_vm15, 1.0, %v14121_v36  ;;  %v14205_v25 = vld [vmem:[#allocation96_spill] sm:$0xff] }
 0x44a   :  { %7487 = vmatmul.mubr.msk.bf16.gmra.mrb[124].mxu1 %vm7486_vm8, %v14049_v3  ;;  %8429 = vrot.lane.b32.xlu1 %v8428_v5, %s8863_s4  ;;  %vm2047_vm8 = vcmp.eq.s32.totalorder %v11317_v13, %v11541_v24 }
 0x44b   :  { %7488 = vmatprep.mubr.msk.bf16.mxu1 %vm3177_vm4, %v3036_v20  ;;  %vm7495_vm10 = vmpackc.low %vm2047_vm8, %vm2043_vm9 }
 0x44d   :  { %v12112_v22 = vpop.f32.mrb[16].mxu0  ;;  %v4113_v46 = vpop.f32.mrb[156].mxu1 }
 0x44e   :  { %v4114_v8 = vadd.f32 %v4113_v46, %v14203_v42  ;;  %v3746_v62 = vpop.f32.mrb[17].mxu0  ;;  %v4115_v4 = vpop.f32.mrb[157].mxu1  ;;  %v2624_v46 = vsel %vm2048_vm14, 1.0, %v14121_v36  ;;  %vm2051_vm14 = vcmp.eq.s32.totalorder %v11317_v13, %v11575_v11  ;;  %v2648_v11 = vsel %vm2072_vm1, 1.0, %v14121_v36 }
 0x44f   :  { %v12119_v37 = vpop.f32.mrb[18].mxu0  ;;  %v4116_v21 = vpop.f32.mrb[158].mxu1 }
 0x450   :  { %v4117_v5 = vadd.f32 %v4116_v21, %v14204_v61  ;;  %v3749_v40 = vpop.f32.mrb[19].mxu0  ;;  %v4118_v45 = vpop.f32.mrb[159].mxu1  ;;  %v14206_v61 = vld [vmem:[#allocation97_spill] sm:$0xff] }
 0x451   :  { %v3044_v45 = vpack.c.bf16 %v2624_v46, %v2620_v2  ;;  %v2628_v46 = vsel %vm2052_vm7, 1.0, %v14121_v36  ;;  %v14207_v2 = vld [vmem:[#allocation98_spill] sm:$0xff] }
 0x452   :  { %v8433_v44 = vpack.i.bf16 %v4117_v5, %v4114_v8  ;;  %7490 = vmatmul.mubr.msk.bf16.gmra.mrb[128].mxu1 %vm7489_vm13, %v14049_v3  ;;  %vm2055_vm13 = vcmp.eq.s32.totalorder %v11317_v13, %v11571_v7 }
 0x453   :  { %7491 = vmatprep.mubr.msk.bf16.mxu1 %vm3177_vm4, %v3040_v47  ;;  %vm7498_vm15 = vmpackc.low %vm2055_vm13, %vm2051_vm14 }
 0x454   :  { %8434 = vrot.lane.b32.xlu1 %v8433_v44, %s8864_s5 }
 0x455   :  { %v12131_v56 = vpop.f32.mrb[20].mxu0  ;;  %v4121_v20 = vpop.f32.mrb[160].mxu1 }
 0x456   :  { %v4122_v42 = vadd.f32 %v4121_v20, %v14205_v25  ;;  %v3754_v8 = vpop.f32.mrb[21].mxu0  ;;  %v4123_v62 = vpop.f32.mrb[161].mxu1  ;;  %v2632_v20 = vsel %vm2056_vm6, 1.0, %v14121_v36  ;;  %vm2059_vm6 = vcmp.eq.s32.totalorder %v11317_v13, %v11605_v15  ;;  %v14213_v15 = vld [vmem:[#allocation5_spill] sm:$0xff] }
 0x457   :  { %v12138_v4 = vpop.f32.mrb[22].mxu0  ;;  %v4124_v21 = vpop.f32.mrb[162].mxu1  ;;  %vm2080_vm9 = vcmp.eq.s32.totalorder %v11278_v27, %v14213_v15  ;;  %vm2079_vm1 = vcmp.eq.s32.totalorder %v11317_v13, %v14213_v15 }
 0x458   :  { %v4125_v5 = vadd.f32 %v4124_v21, %v14206_v61  ;;  %v3757_v12 = vpop.f32.mrb[23].mxu0  ;;  %v4126_v40 = vpop.f32.mrb[163].mxu1  ;;  %v14208_v61 = vld [vmem:[#allocation99_spill] sm:$0xff] }
 0x459   :  { %v3048_v40 = vpack.c.bf16 %v2632_v20, %v2628_v46  ;;  %v14209_v20 = vld [vmem:[#allocation100_spill] sm:$0xff] }
 0x45a   :  { %v8438_v47 = vpack.i.bf16 %v4125_v5, %v4122_v42  ;;  %7493 = vmatmul.mubr.msk.bf16.gmra.mrb[132].mxu1 %vm7492_vm5, %v14049_v3  ;;  %vm2063_vm5 = vcmp.eq.s32.totalorder %v11317_v13, %v11601_v23  ;;  %v14212_v23 = vld [vmem:[#allocation3_spill] sm:$0xff] }
 0x45b   :  { %7494 = vmatprep.mubr.msk.bf16.mxu1 %vm3177_vm4, %v3044_v45  ;;  %vm7501_vm7 = vmpackc.low %vm2063_vm5, %vm2059_vm6  ;;  %vm2076_vm8 = vcmp.eq.s32.totalorder %v11278_v27, %v14212_v23 }
 0x45c   :  { %8439 = vrot.lane.b32.xlu1 %v8438_v47, %s8864_s5  ;;  %v2640_v47 = vsel %vm2064_vm11, 1.0, %v14121_v36  ;;  %vm2067_vm11 = vcmp.eq.s32.totalorder %v11317_v13, %v11629_v59  ;;  %v14215_v59 = vld [vmem:[#allocation4_spill] sm:$0xff] }
 0x45d   :  { %v12150_v58 = vpop.f32.mrb[24].mxu0  ;;  %v4129_v44 = vpop.f32.mrb[164].mxu1  ;;  %vm2088_vm14 = vcmp.eq.s32.totalorder %v11278_v27, %v14215_v59 }
 0x45e   :  { %v4130_v25 = vadd.f32 %v4129_v44, %v14207_v2  ;;  %v3762_v42 = vpop.f32.mrb[25].mxu0  ;;  %v4131_v8 = vpop.f32.mrb[165].mxu1  ;;  %v2636_v44 = vsel %vm2060_vm12, 1.0, %v14121_v36 }
 0x45f   :  { %v12157_v62 = vpop.f32.mrb[26].mxu0  ;;  %v4132_v21 = vpop.f32.mrb[166].mxu1  ;;  %v14210_v42 = vld [vmem:[#allocation101_spill] sm:$0xff] }
 0x460   :  { %v4133_v5 = vadd.f32 %v4132_v21, %v14208_v61  ;;  %v3765_v24 = vpop.f32.mrb[27].mxu0  ;;  %v4134_v12 = vpop.f32.mrb[167].mxu1  ;;  %v3052_v61 = vpack.c.bf16 %v2640_v47, %v2636_v44 }
 0x461   :  { %v2644_v24 = vsel %vm2068_vm3, 1.0, %v14121_v36  ;;  %v14211_v12 = vld [vmem:[#allocation102_spill] sm:$0xff] }
 0x462   :  { %v8443_v45 = vpack.i.bf16 %v4133_v5, %v4130_v25  ;;  %7496 = vmatmul.mubr.msk.bf16.gmra.mrb[136].mxu1 %vm7495_vm10, %v14049_v3  ;;  %vm2071_vm10 = vcmp.eq.s32.totalorder %v11317_v13, %v11627_v1  ;;  %v14214_v1 = vld [vmem:[#allocation2_spill] sm:$0xff] }
 0x463   :  { %7497 = vmatprep.mubr.msk.bf16.mxu1 %vm3177_vm4, %v3048_v40  ;;  %vm7504_vm12 = vmpackc.low %vm2071_vm10, %vm2067_vm11  ;;  %vm2084_vm13 = vcmp.eq.s32.totalorder %v11278_v27, %v14214_v1 }
 0x464   :  { %8444 = vrot.lane.b32.xlu1 %v8443_v45, %s8864_s5 }
 0x465   :  { %v4137_v17 = vpop.f32.mrb[168].mxu1 }
 0x466   :  { %v4138_v46 = vadd.f32 %v4137_v17, %v14209_v20  ;;  %v4139_v2 = vpop.f32.mrb[169].mxu1  ;;  %v3056_v20 = vpack.c.bf16 %v2648_v11, %v2644_v24  ;;  %v2660_v24 = vsel %vm2084_vm13, 1.0, %v14121_v36 }
 0x467   :  { %v4140_v25 = vpop.f32.mrb[170].mxu1 }
 0x468   :  { %v4141_v8 = vadd.f32 %v4140_v25, %v14210_v42  ;;  %v4142_v21 = vpop.f32.mrb[171].mxu1  ;;  %v2652_v25 = vsel %vm2076_vm8, 1.0, %v14121_v36  ;;  %v2656_v42 = vsel %vm2080_vm9, 1.0, %v14121_v36  ;;  %vm2087_vm8 = vcmp.eq.s32.totalorder %v11317_v13, %v14215_v59 }
 0x46a   :  { %v8448_v5 = vpack.i.bf16 %v4141_v8, %v4138_v46  ;;  %7499 = vmatmul.mubr.msk.bf16.gmra.mrb[140].mxu1 %vm7498_vm15, %v14049_v3  ;;  %vm2075_vm15 = vcmp.eq.s32.totalorder %v11317_v13, %v14212_v23  ;;  %v14217_v23 = vld [vmem:[#allocation7_spill] sm:$0xff] }
 0x46b   :  { %7500 = vmatprep.mubr.msk.bf16.mxu1 %vm3177_vm4, %v3052_v61  ;;  %vm7507_vm3 = vmpackc.low %vm2079_vm1, %vm2075_vm15  ;;  %vm2092_vm6 = vcmp.eq.s32.totalorder %v11278_v27, %v14217_v23 }
 0x46c   :  { %8449 = vrot.lane.b32.xlu1 %v8448_v5, %s8864_s5 }
 0x46d   :  { %v4145_v7 = vpop.f32.mrb[172].mxu1 }
 0x46e   :  { %v12189_v40 = vadd.f32 %v4145_v7, %v14211_v12  ;;  %v4147_v45 = vpop.f32.mrb[173].mxu1  ;;  %v3060_v7 = vpack.c.bf16 %v2656_v42, %v2652_v25  ;;  %v2664_v12 = vsel %vm2088_vm14, 1.0, %v14121_v36 }
 0x46f   :  { %v4148_v17 = vpop.f32.mrb[174].mxu1 }
 0x470   :  { %v4149_v47 = vadd.f32 %v4148_v17, %v11643_v16  ;;  %v4150_v44 = vpop.f32.mrb[175].mxu1 }
 0x472   :  { %7502 = vmatmul.mubr.msk.bf16.gmra.mrb[144].mxu1 %vm7501_vm7, %v14049_v3  ;;  %vm2083_vm7 = vcmp.eq.s32.totalorder %v11317_v13, %v14214_v1 }
 0x473   :  { %7503 = vmatprep.mubr.msk.bf16.mxu1 %vm3177_vm4, %v3056_v20  ;;  %v3064_v20 = vpack.c.bf16 %v2664_v12, %v2660_v24  ;;  %vm7510_vm9 = vmpackc.low %vm2087_vm8, %vm2083_vm7 }
 0x475   :  { %v4153_v46 = vpop.f32.mrb[176].mxu1 }
 0x476   :  { %v4154_v16 = vadd.f32 %v4153_v46, %v11661_v35  ;;  %v4155_v2 = vpop.f32.mrb[177].mxu1 }
 0x477   :  { %v4156_v8 = vpop.f32.mrb[178].mxu1 }
 0x478   :  { %v8453_v21 = vpack.i.bf16 %v4154_v16, %v4149_v47  ;;  %v4157_v61 = vadd.f32 %v4156_v8, %v11669_v28  ;;  %v4158_v5 = vpop.f32.mrb[179].mxu1  ;;  %v2668_v16 = vsel %vm2092_vm6, 1.0, %v14121_v36 }
 0x479   :  { %v14219_v5 = vld [vmem:[#allocation9_spill] sm:$0xff] }
 0x47a   :  { %7505 = vmatmul.mubr.msk.bf16.gmra.mrb[148].mxu1 %vm7504_vm12, %v14049_v3  ;;  %8454 = vrot.lane.b32.xlu1 %v8453_v21, %s8865_s25  ;;  %vm2100_vm11 = vcmp.eq.s32.totalorder %v11278_v27, %v14219_v5  ;;  %vm2091_vm12 = vcmp.eq.s32.totalorder %v11317_v13, %v14217_v23 }
 0x47b   :  { %7506 = vmatprep.mubr.msk.bf16.mxu1 %vm3177_vm4, %v3060_v7  ;;  %v2676_v59 = vsel %vm2100_vm11, 1.0, %v14121_v36 }
 0x47d   :  { %v4161_v35 = vpop.f32.mrb[180].mxu1 }
 0x47e   :  { %v4162_v28 = vadd.f32 %v4161_v35, %v11678_v19  ;;  %v4163_v11 = vpop.f32.mrb[181].mxu1  ;;  %v14216_v19 = vld [vmem:[#allocation6_spill] sm:$0xff] }
 0x47f   :  { %v4164_v45 = vpop.f32.mrb[182].mxu1  ;;  %vm2096_vm5 = vcmp.eq.s32.totalorder %v11278_v27, %v14216_v19  ;;  %vm2095_vm13 = vcmp.eq.s32.totalorder %v11317_v13, %v14216_v19 }
 0x480   :  { %v8458_v17 = vpack.i.bf16 %v4162_v28, %v4157_v61  ;;  %v4165_v47 = vadd.f32 %v4164_v45, %v11686_v10  ;;  %v4166_v44 = vpop.f32.mrb[183].mxu1  ;;  %v2672_v2 = vsel %vm2096_vm5, 1.0, %v14121_v36  ;;  %vm7513_vm14 = vmpackc.low %vm2095_vm13, %vm2091_vm12 }
 0x481   :  { %v3068_v61 = vpack.c.bf16 %v2672_v2, %v2668_v16  ;;  %v14222_v16 = vld [vmem:[#allocation12_spill] sm:$0xff] }
 0x482   :  { %7508 = vmatmul.mubr.msk.bf16.gmra.mrb[0].mxu1 %vm7507_vm3, %v14049_v3  ;;  %8459 = vrot.lane.b32.xlu1 %v8458_v17, %s8865_s25  ;;  %v14221_v17 = vld [vmem:[#allocation11_spill] sm:$0xff]  ;;  %vm2099_vm3 = vcmp.eq.s32.totalorder %v11317_v13, %v14219_v5  ;;  %vm2120_vm7 = vcmp.eq.s32.totalorder %v11278_v27, %v14222_v16 }
 0x483   :  { %7509 = vmatprep.mubr.msk.bf16.mxu1 %vm3177_vm4, %v3064_v20  ;;  %vm2108_vm1 = vcmp.eq.s32.totalorder %v11278_v27, %v14221_v17 }
 0x484   :  { %v2684_v20 = vsel %vm2108_vm1, 1.0, %v14121_v36 }
 0x485   :  { %v4169_v15 = vpop.f32.mrb[184].mxu1 }
 0x486   :  { %v4170_v10 = vadd.f32 %v4169_v15, %v11694_v63  ;;  %v4171_v46 = vpop.f32.mrb[185].mxu1  ;;  %v14218_v63 = vld [vmem:[#allocation8_spill] sm:$0xff] }
 0x487   :  { %v4172_v25 = vpop.f32.mrb[186].mxu1  ;;  %vm2104_vm10 = vcmp.eq.s32.totalorder %v11278_v27, %v14218_v63  ;;  %vm2103_vm5 = vcmp.eq.s32.totalorder %v11317_v13, %v14218_v63 }
 0x488   :  { %v8463_v42 = vpack.i.bf16 %v4170_v10, %v4165_v47  ;;  %v4173_v8 = vadd.f32 %v4172_v25, %v11702_v33  ;;  %v4174_v21 = vpop.f32.mrb[187].mxu1  ;;  %v2680_v35 = vsel %vm2104_vm10, 1.0, %v14121_v36  ;;  %vm7516_vm6 = vmpackc.low %vm2103_vm5, %vm2099_vm3 }
 0x489   :  { %v3072_v45 = vpack.c.bf16 %v2680_v35, %v2676_v59 }
 0x48a   :  { %7511 = vmatmul.mubr.msk.bf16.gmra.mrb[4].mxu1 %vm7510_vm9, %v14049_v3  ;;  %8464 = vrot.lane.b32.xlu1 %v8463_v42, %s8865_s25  ;;  %vm2107_vm9 = vcmp.eq.s32.totalorder %v11317_v13, %v14221_v17 }
 0x48b   :  { %7512 = vmatprep.mubr.msk.bf16.mxu1 %vm3177_vm4, %v3068_v61 }
 0x48d   :  { %v4177_v7 = vpop.f32.mrb[188].mxu1 }
 0x48e   :  { %v4178_v33 = vadd.f32 %v4177_v7, %v11710_v49  ;;  %v4179_v1 = vpop.f32.mrb[189].mxu1  ;;  %v14220_v49 = vld [vmem:[#allocation10_spill] sm:$0xff] }
 0x48f   :  { %v4180_v28 = vpop.f32.mrb[190].mxu1  ;;  %vm2112_vm15 = vcmp.eq.s32.totalorder %v11278_v27, %v14220_v49  ;;  %vm2111_vm10 = vcmp.eq.s32.totalorder %v11317_v13, %v14220_v49  ;;  %v14224_v7 = vld [vmem:[#allocation14_spill] sm:$0xff]  ;;  %v14226_v49 = vld [vmem:[#allocation16_spill] sm:$0xff] }
 0x490   :  { %v8468_v11 = vpack.i.bf16 %v4178_v33, %v4173_v8  ;;  %v12251_v24 = vadd.f32 %v4180_v28, %v11718_v30  ;;  %v4182_v12 = vpop.f32.mrb[191].mxu1  ;;  %v2688_v19 = vsel %vm2112_vm15, 1.0, %v14121_v36  ;;  %v2696_v8 = vsel %vm2120_vm7, 1.0, %v14121_v36  ;;  %vm7519_vm11 = vmpackc.low %vm2111_vm10, %vm2107_vm9 }
 0x491   :  { %v3076_v46 = vpack.c.bf16 %v2688_v19, %v2684_v20  ;;  %vm2128_vm12 = vcmp.eq.s32.totalorder %v11278_v27, %v14224_v7  ;;  %vm2119_vm15 = vcmp.eq.s32.totalorder %v11317_v13, %v14222_v16  ;;  %vm2136_vm3 = vcmp.eq.s32.totalorder %v11278_v27, %v14226_v49  ;;  %v14228_v16 = vld [vmem:[#allocation18_spill] sm:$0xff] }
 0x492   :  { %7514 = vmatmul.mubr.msk.bf16.gmra.mrb[8].mxu1 %vm7513_vm14, %v14049_v3  ;;  %8469 = vrot.lane.b32.xlu1 %v8468_v11, %s8865_s25  ;;  %v2704_v35 = vsel %vm2128_vm12, 1.0, %v14121_v36  ;;  %vm2127_vm7 = vcmp.eq.s32.totalorder %v11317_v13, %v14224_v7  ;;  %v2712_v20 = vsel %vm2136_vm3, 1.0, %v14121_v36  ;;  %vm2144_vm9 = vcmp.eq.s32.totalorder %v11278_v27, %v14228_v16  ;;  %v14230_v7 = vld [vmem:[#allocation20_spill] sm:$0xff] }
 0x493   :  { %7515 = vmatprep.mubr.msk.bf16.mxu1 %vm3177_vm4, %v3072_v45  ;;  %vm2135_vm12 = vcmp.eq.s32.totalorder %v11317_v13, %v14226_v49  ;;  %vm2143_vm3 = vcmp.eq.s32.totalorder %v11317_v13, %v14228_v16 }
 0x495   :  { %v4185_v47 = vpop.f32.mrb[192].mxu1 }
 0x496   :  { %v12263_v30 = vadd.f32 %v4185_v47, %v11726_v57  ;;  %v4187_v44 = vpop.f32.mrb[193].mxu1  ;;  %v14223_v57 = vld [vmem:[#allocation13_spill] sm:$0xff] }
 0x497   :  { %v4188_v23 = vpop.f32.mrb[194].mxu1  ;;  %vm2116_vm8 = vcmp.eq.s32.totalorder %v11278_v27, %v14223_v57  ;;  %vm2115_vm14 = vcmp.eq.s32.totalorder %v11317_v13, %v14223_v57 }
 0x498   :  { %v12270_v15 = vadd.f32 %v4188_v23, %v11734_v18  ;;  %v4190_v10 = vpop.f32.mrb[195].mxu1  ;;  %v2692_v42 = vsel %vm2116_vm8, 1.0, %v14121_v36  ;;  %vm7522_vm1 = vmpackc.low %vm2119_vm15, %vm2115_vm14  ;;  %vm2152_vm14 = vcmp.eq.s32.totalorder %v11278_v27, %v14230_v7 }
 0x499   :  { %v3080_v5 = vpack.c.bf16 %v2696_v8, %v2692_v42  ;;  %v2720_v42 = vsel %vm2144_vm9, 1.0, %v14121_v36  ;;  %vm2151_vm9 = vcmp.eq.s32.totalorder %v11317_v13, %v14230_v7 }
 0x49a   :  { %7517 = vmatmul.mubr.msk.bf16.gmra.mrb[12].mxu1 %vm7516_vm6, %v14049_v3 }
 0x49b   :  { %7518 = vmatprep.mubr.msk.bf16.mxu1 %vm3177_vm4, %v3076_v46 }
 0x49d   :  { %v4193_v2 = vpop.f32.mrb[196].mxu1 }
 0x49e   :  { %v12281_v18 = vadd.f32 %v4193_v2, %v11742_v41  ;;  %v4195_v25 = vpop.f32.mrb[197].mxu1  ;;  %v14225_v41 = vld [vmem:[#allocation15_spill] sm:$0xff] }
 0x49f   :  { %v4196_v21 = vpop.f32.mrb[198].mxu1  ;;  %vm2124_vm13 = vcmp.eq.s32.totalorder %v11278_v27, %v14225_v41  ;;  %vm2123_vm6 = vcmp.eq.s32.totalorder %v11317_v13, %v14225_v41 }
 0x4a0   :  { %v12288_v61 = vadd.f32 %v4196_v21, %v11750_v6  ;;  %v4198_v63 = vpop.f32.mrb[199].mxu1  ;;  %v2700_v59 = vsel %vm2124_vm13, 1.0, %v14121_v36  ;;  %vm7525_vm8 = vmpackc.low %vm2127_vm7, %vm2123_vm6 }
 0x4a1   :  { %v3084_v45 = vpack.c.bf16 %v2704_v35, %v2700_v59  ;;  %v2728_v59 = vsel %vm2152_vm14, 1.0, %v14121_v36 }
 0x4a2   :  { %7520 = vmatmul.mubr.msk.bf16.gmra.mrb[16].mxu1 %vm7519_vm11, %v14049_v3 }
 0x4a3   :  { %7521 = vmatprep.mubr.msk.bf16.mxu1 %vm3177_vm4, %v3080_v5 }
 0x4a4   :  { %v12384_v7 = vpop.permute.xlu1 %8414 }
 0x4a5   :  { %v4201_v33 = vpop.f32.mrb[200].mxu1 }
 0x4a6   :  { %v12299_v6 = vadd.f32 %v4201_v33, %v11758_v50  ;;  %v4203_v1 = vpop.f32.mrb[201].mxu1  ;;  %v14227_v50 = vld [vmem:[#allocation17_spill] sm:$0xff] }
 0x4a7   :  { %v4204_v28 = vpop.f32.mrb[202].mxu1  ;;  %vm2132_vm5 = vcmp.eq.s32.totalorder %v11278_v27, %v14227_v50  ;;  %vm2131_vm11 = vcmp.eq.s32.totalorder %v11317_v13, %v14227_v50  ;;  %v8735_v50 = vld [vmem:[%s13718_s6 + $0x40] sm:$0xff]  }
 0x4a8   :  { %v12306_v11 = vadd.f32 %v4204_v28, %v11766_v52  ;;  %v4206_v12 = vpop.f32.mrb[203].mxu1  ;;  %v2708_v44 = vsel %vm2132_vm5, 1.0, %v14121_v36  ;;  %vm7528_vm13 = vmpackc.low %vm2135_vm12, %vm2131_vm11  ;;  %7755 = vmatprep.subr.bf16.mxu0 %v8735_v50 }
 0x4a9   :  { %v3088_v46 = vpack.c.bf16 %v2712_v20, %v2708_v44  ;;  %v14232_v12 = vld [vmem:[#allocation103_spill] sm:$0xff]  ;;  %v14234_v44 = vld [vmem:[#allocation22_spill] sm:$0xff] }
 0x4aa   :  { %7523 = vmatmul.mubr.msk.bf16.gmra.mrb[20].mxu1 %vm7522_vm1, %v14049_v3  ;;  %vm2160_vm7 = vcmp.eq.s32.totalorder %v11278_v27, %v14234_v44  ;;  %vm2159_vm14 = vcmp.eq.s32.totalorder %v11317_v13, %v14234_v44 }
 0x4ab   :  { %7524 = vmatprep.mubr.msk.bf16.mxu1 %vm3177_vm4, %v3084_v45 }
 0x4ad   :  { %v4209_v17 = vpop.f32.mrb[204].mxu1 }
 0x4ae   :  { %v12317_v52 = vadd.f32 %v4209_v17, %v11774_v60  ;;  %v4211_v47 = vpop.f32.mrb[205].mxu1  ;;  %v14229_v60 = vld [vmem:[#allocation19_spill] sm:$0xff] }
 0x4af   :  { %v4212_v19 = vpop.f32.mrb[206].mxu1  ;;  %vm2140_vm10 = vcmp.eq.s32.totalorder %v11278_v27, %v14229_v60  ;;  %vm2139_vm1 = vcmp.eq.s32.totalorder %v11317_v13, %v14229_v60  ;;  %v14233_v47 = vld [vmem:[#allocation23_spill] sm:$0xff]  ;;  %v2736_v60 = vsel %vm2160_vm7, 1.0, %v14121_v36 }
 0x4b0   :  { %v12324_v23 = vadd.f32 %v4212_v19, %v11782_v53  ;;  %v4214_v10 = vpop.f32.mrb[207].mxu1  ;;  %v2716_v25 = vsel %vm2140_vm10, 1.0, %v14121_v36  ;;  %vm7531_vm5 = vmpackc.low %vm2143_vm3, %vm2139_vm1  ;;  %vm2156_vm6 = vcmp.eq.s32.totalorder %v11278_v27, %v14233_v47 }
 0x4b1   :  { %v3092_v5 = vpack.c.bf16 %v2720_v42, %v2716_v25  ;;  %v2732_v19 = vsel %vm2156_vm6, 1.0, %v14121_v36  ;;  %v14235_v10 = vld [vmem:[#allocation104_spill] sm:$0xff]  ;;  %v14236_v25 = vld [vmem:[#allocation105_spill] sm:$0xff] }
 0x4b2   :  { %7526 = vmatmul.mubr.msk.bf16.gmra.mrb[24].mxu1 %vm7525_vm8, %v14049_v3 }
 0x4b3   :  { %7527 = vmatprep.mubr.msk.bf16.mxu1 %vm3177_vm4, %v3088_v46 }
 0x4b5   :  { %v4217_v57 = vpop.f32.mrb[208].mxu1 }
 0x4b6   :  { %v12335_v53 = vadd.f32 %v4217_v57, %v11790_v32  ;;  %v4219_v2 = vpop.f32.mrb[209].mxu1  ;;  %v14231_v32 = vld [vmem:[#allocation21_spill] sm:$0xff] }
 0x4b7   :  { %v4220_v8 = vpop.f32.mrb[210].mxu1  ;;  %vm2148_vm15 = vcmp.eq.s32.totalorder %v11278_v27, %v14231_v32  ;;  %vm2147_vm8 = vcmp.eq.s32.totalorder %v11317_v13, %v14231_v32 }
 0x4b8   :  { %v4221_v21 = vadd.f32 %v4220_v8, %v11798_v48  ;;  %v4222_v63 = vpop.f32.mrb[211].mxu1  ;;  %v2724_v1 = vsel %vm2148_vm15, 1.0, %v14121_v36  ;;  %vm7534_vm10 = vmpackc.low %vm2151_vm9, %vm2147_vm8 }
 0x4b9   :  { %v3096_v17 = vpack.c.bf16 %v2728_v59, %v2724_v1  ;;  %v14237_v63 = vld [vmem:[#allocation25_spill] sm:$0xff] }
 0x4ba   :  { %7529 = vmatmul.mubr.msk.bf16.gmra.mrb[28].mxu1 %vm7528_vm13, %v14049_v3  ;;  %vm2164_vm11 = vcmp.eq.s32.totalorder %v11278_v27, %v14237_v63  ;;  %vm2155_vm13 = vcmp.eq.s32.totalorder %v11317_v13, %v14233_v47  ;;  %v14242_v47 = vld [vmem:[#allocation26_spill] sm:$0xff] }
 0x4bb   :  { %7530 = vmatprep.mubr.msk.bf16.mxu1 %vm3177_vm4, %v3092_v5  ;;  %v14238_v5 = vld [vmem:[#allocation24_spill] sm:$0xff]  ;;  %vm7537_vm15 = vmpackc.low %vm2159_vm14, %vm2155_vm13  ;;  %vm2176_vm3 = vcmp.eq.s32.totalorder %v11278_v27, %v14242_v47 }
 0x4bc   :  { %vm2168_vm12 = vcmp.eq.s32.totalorder %v11278_v27, %v14238_v5  ;;  %vm2167_vm6 = vcmp.eq.s32.totalorder %v11317_v13, %v14238_v5 }
 0x4bd   :  { %v4225_v48 = vpop.f32.mrb[212].mxu1  ;;  %v2744_v59 = vsel %vm2168_vm12, 1.0, %v14121_v36 }
 0x4be   :  { %v4226_v41 = vadd.f32 %v4225_v48, %v11806_v39  ;;  %v4227_v33 = vpop.f32.mrb[213].mxu1  ;;  %v8736_v39 = vld [vmem:[%s13718_s6] sm:$0xff]   ;;  %v2740_v48 = vsel %vm2164_vm11, 1.0, %v14121_v36  ;;  %vm2175_vm11 = vcmp.eq.s32.totalorder %v11317_v13, %v14242_v47 }
 0x4bf   :  { %v4228_v35 = vpop.f32.mrb[214].mxu1  ;;  %7756 = vmatpush3.bf16.msra.mxu0 %v8736_v39  ;;  %v14241_v39 = vld [vmem:[#allocation27_spill] sm:$0xff] }
 0x4c0   :  { %v8473_v28 = vpack.i.bf16 %v4226_v41, %v4221_v21  ;;  %v4229_v45 = vadd.f32 %v4228_v35, %v14232_v12  ;;  %v4230_v49 = vpop.f32.mrb[215].mxu1  ;;  %v3100_v21 = vpack.c.bf16 %v2736_v60, %v2732_v19  ;;  %v14239_v41 = vld [vmem:[#allocation106_spill] sm:$0xff]  ;;  %vm2172_vm1 = vcmp.eq.s32.totalorder %v11278_v27, %v14241_v39 }
 0x4c1   :  { %v2748_v19 = vsel %vm2172_vm1, 1.0, %v14121_v36  ;;  %v2752_v60 = vsel %vm2176_vm3, 1.0, %v14121_v36 }
 0x4c2   :  { %7532 = vmatmul.mubr.msk.bf16.gmra.mrb[32].mxu1 %vm7531_vm5, %v14049_v3  ;;  %8474 = vrot.lane.b32.xlu0 %v8473_v28, %s8863_s4  ;;  %v12393_v28 = vpop.permute.xlu1 %8419  ;;  %vm2163_vm5 = vcmp.eq.s32.totalorder %v11317_v13, %v14237_v63  ;;  %v3108_v63 = vpack.c.bf16 %v2752_v60, %v2748_v19 }
 0x4c3   :  { %7533 = vmatprep.mubr.msk.bf16.mxu1 %vm3177_vm4, %v3096_v17  ;;  %v3104_v17 = vpack.c.bf16 %v2744_v59, %v2740_v48  ;;  %vm7540_vm7 = vmpackc.low %vm2167_vm6, %vm2163_vm5  ;;  %v14246_v48 = vld [vmem:[#allocation29_spill] sm:$0xff] }
 0x4c4   :  { %vm2180_vm9 = vcmp.eq.s32.totalorder %v11278_v27, %v14246_v48 }
 0x4c5   :  { %v4233_v20 = vpop.f32.mrb[216].mxu1 }
 0x4c6   :  { %v4234_v46 = vadd.f32 %v4233_v20, %v14235_v10  ;;  %v4235_v16 = vpop.f32.mrb[217].mxu1  ;;  %v12403_v44 = vpop.permute.xlu1 %8424  ;;  %v14243_v10 = vld [vmem:[#allocation63_spill] sm:$0xff] }
 0x4c7   :  { %v4236_v57 = vpop.f32.mrb[218].mxu1 }
 0x4c8   :  { %v8478_v2 = vpack.i.bf16 %v4234_v46, %v4229_v45  ;;  %v4237_v42 = vadd.f32 %v4236_v57, %v14236_v25  ;;  %v4238_v8 = vpop.f32.mrb[219].mxu1  ;;  %v14240_v45 = vld [vmem:[#allocation107_spill] sm:$0xff] }
 0x4ca   :  { %7535 = vmatmul.mubr.msk.bf16.gmra.mrb[36].mxu1 %vm7534_vm10, %v14049_v3  ;;  %8479 = vrot.lane.b32.xlu0 %v8478_v2, %s8863_s4  ;;  %v12412_v2 = vpop.permute.xlu1 %8429  ;;  %vm2171_vm10 = vcmp.eq.s32.totalorder %v11317_v13, %v14241_v39  ;;  %v14249_v39 = vld [vmem:[#allocation30_spill] sm:$0xff] }
 0x4cb   :  { %7536 = vmatprep.mubr.msk.bf16.mxu1 %vm3177_vm4, %v3100_v21  ;;  %vm7543_vm12 = vmpackc.low %vm2175_vm11, %vm2171_vm10  ;;  %vm2192_vm13 = vcmp.eq.s32.totalorder %v11278_v27, %v14249_v39  ;;  %vm2191_vm10 = vcmp.eq.s32.totalorder %v11317_v13, %v14249_v39  ;;  %v8743_v39 = vld [vmem:[%s13718_s6 + $0x60] sm:$0xff]  }
 0x4cd   :  { %v4241_v32 = vpop.f32.mrb[220].mxu1 }
 0x4ce   :  { %v4242_v33 = vadd.f32 %v4241_v32, %v14239_v41  ;;  %v4243_v1 = vpop.f32.mrb[221].mxu1  ;;  %v14245_v32 = vld [vmem:[#allocation28_spill] sm:$0xff]  ;;  %v12426_v41 = vpop.permute.xlu1 %8434 }
 0x4cf   :  { %v4244_v35 = vpop.f32.mrb[222].mxu1  ;;  %vm2184_vm8 = vcmp.eq.s32.totalorder %v11278_v27, %v14245_v32  ;;  %v14247_v1 = vld [vmem:[#allocation65_spill] sm:$0xff]  ;;  %vm2183_vm1 = vcmp.eq.s32.totalorder %v11317_v13, %v14245_v32  ;;  %v8737_v32 = vld [vmem:[%s13718_s6 + $0x48] sm:$0xff]  }
 0x4d0   :  { %v8483_v12 = vpack.i.bf16 %v4242_v33, %v4237_v42  ;;  %v4245_v49 = vadd.f32 %v4244_v35, %v14240_v45  ;;  %v4246_v50 = vpop.f32.mrb[223].mxu1  ;;  %v14244_v42 = vld [vmem:[#allocation108_spill] sm:$0xff]  ;;  %v2760_v45 = vsel %vm2184_vm8, 1.0, %v14121_v36  ;;  %7757 = vmatprep.subr.bf16.mxu0 %v8737_v32  ;;  %vm5067_vm8 = vcmask 785408   ;;  %v14256_v32 = vld [vmem:[#allocation75_spill] sm:$0xff] }
 0x4d2   :  { %7538 = vmatmul.mubr.msk.bf16.gmra.mrb[40].mxu1 %vm7537_vm15, %v14049_v3  ;;  %8484 = vrot.lane.b32.xlu0 %v8483_v12, %s8863_s4  ;;  %v2756_v12 = vsel %vm2180_vm9, 1.0, %v14121_v36  ;;  %v12435_v50 = vpop.permute.xlu1 %8439  ;;  %vm2179_vm15 = vcmp.eq.s32.totalorder %v11317_v13, %v14246_v48  ;;  %v8417_v48 = vunpack.i.h.bf16 %v12384_v7 }
 0x4d3   :  { %7539 = vmatprep.mubr.msk.bf16.mxu1 %vm3177_vm4, %v3104_v17  ;;  %v14248_v17 = vld [vmem:[#allocation68_spill] sm:$0xff]  ;;  %vm7546_vm5 = vmpackc.low %vm2183_vm1, %vm2179_vm15 }
 0x4d5   :  { %v4249_v20 = vpop.f32.mrb[224].mxu1 }
 0x4d6   :  { %v4250_v46 = vadd.f32 %v4249_v20, %v14243_v10  ;;  %v4251_v16 = vpop.f32.mrb[225].mxu1  ;;  %v3112_v10 = vpack.c.bf16 %v2760_v45, %v2756_v12  ;;  %v12444_v47 = vpop.permute.xlu1 %8444  ;;  %v14253_v45 = vld [vmem:[#allocation33_spill] sm:$0xff] }
 0x4d7   :  { %v4252_v57 = vpop.f32.mrb[226].mxu1  ;;  %v14250_v16 = vld [vmem:[#allocation31_spill] sm:$0xff]  ;;  %vm2196_vm3 = vcmp.eq.s32.totalorder %v11278_v27, %v14253_v45 }
 0x4d8   :  { %v8488_v25 = vpack.i.bf16 %v4250_v46, %v4245_v49  ;;  %v12415_v8 = vadd.f32 %v4252_v57, %v14244_v42  ;;  %v4254_v21 = vpop.f32.mrb[227].mxu1  ;;  %vm2188_vm14 = vcmp.eq.s32.totalorder %v11278_v27, %v14250_v16  ;;  %v14251_v57 = vld [vmem:[#allocation69_spill] sm:$0xff]  ;;  %vm2187_vm9 = vcmp.eq.s32.totalorder %v11317_v13, %v14250_v16 }
 0x4d9   :  { %v2764_v21 = vsel %vm2188_vm14, 1.0, %v14121_v36  ;;  %vm2195_vm14 = vcmp.eq.s32.totalorder %v11317_v13, %v14253_v45 }
 0x4da   :  { %7541 = vmatmul.mubr.msk.bf16.gmra.mrb[44].mxu1 %vm7540_vm7, %v14049_v3  ;;  %8489 = vrot.lane.b32.xlu0 %v8488_v25, %s8863_s4  ;;  %vm5057_vm7 = vcmask 523264  }
 0x4db   :  { %7542 = vmatprep.mubr.msk.bf16.mxu1 %vm3177_vm4, %v3108_v63  ;;  %v2768_v63 = vsel %vm2192_vm13, 1.0, %v14121_v36 }
 0x4dd   :  { %v4257_v33 = vpop.f32.mrb[228].mxu1 }
 0x4de   :  { %v4258_v59 = vadd.f32 %v4257_v33, %v14247_v1  ;;  %v4259_v35 = vpop.f32.mrb[229].mxu1  ;;  %v12454_v1 = vpop.permute.xlu1 %8449 }
 0x4df   :  { %v4260_v49 = vpop.f32.mrb[230].mxu1 }
 0x4e0   :  { %v4261_v20 = vadd.f32 %v4260_v49, %v14248_v17  ;;  %v4262_v19 = vpop.f32.mrb[231].mxu1  ;;  %v8416_v49 = vunpack.i.l.bf16 %v12384_v7  ;;  %v3116_v17 = vpack.c.bf16 %v2768_v63, %v2764_v21  ;;  %v8739_v7 = vld [vmem:[%s13718_s6 + $0x50] sm:$0xff]  }
 0x4e1   :  { %v8437_v19 = vunpack.i.h.bf16 %v12426_v41  ;;  %v14255_v21 = vld [vmem:[#allocation48_spill] sm:$0xff] }
 0x4e2   :  { %v8493_v46 = vpack.i.bf16 %v4261_v20, %v4258_v59  ;;  %7544 = vmatmul.mubr.msk.bf16.gmra.mrb[48].mxu1 %vm7543_vm12, %v14049_v3  ;;  %v14252_v59 = vld [vmem:[#allocation72_spill] sm:$0xff]  ;;  %v8738_v20 = vld [vmem:[%s13718_s6 + $0x8] sm:$0xff]   ;;  %v5048_v63 = vsel %vm636_vm2, %v14255_v21, %v8416_v49  ;;  %v8422_v21 = vunpack.i.h.bf16 %v12393_v28  ;;  %vm7549_vm12 = vmpackc.low %vm2191_vm10, %vm2187_vm9 }
 0x4e3   :  { %7545 = vmatprep.mubr.msk.bf16.mxu1 %vm3177_vm4, %v3112_v10  ;;  %v8436_v10 = vunpack.i.l.bf16 %v12426_v41  ;;  %v2772_v41 = vsel %vm2196_vm3, 1.0, %v14121_v36  ;;  %7758 = vmatpush3.bf16.msra.mxu0 %v8738_v20 }
 0x4e4   :  { %8494 = vrot.lane.b32.xlu0 %v8493_v46, %s8864_s5  ;;  %7759 = vmatprep.subr.bf16.mxu0 %v8739_v7  ;;  %v14257_v7 = vld [vmem:[#allocation79_spill] sm:$0xff] }
 0x4e5   :  { %v4265_v60 = vpop.f32.mrb[232].mxu1 }
 0x4e6   :  { %v4266_v25 = vadd.f32 %v4265_v60, %v14251_v57  ;;  %v4267_v42 = vpop.f32.mrb[233].mxu1  ;;  %v14254_v60 = vld [vmem:[#allocation32_spill] sm:$0xff] }
 0x4e7   :  { %v4268_v33 = vpop.f32.mrb[234].mxu1  ;;  %vm2200_vm6 = vcmp.eq.s32.totalorder %v11278_v27, %v14254_v60  ;;  %v5049_v42 = vsel %vm636_vm2, %v11932_v26, %v8417_v48  ;;  %vm2199_vm15 = vcmp.eq.s32.totalorder %v11317_v13, %v14254_v60  ;;  %v8748_v60 = vld [vmem:[%s13718_s6 + $0x30] sm:$0xff]  }
 0x4e8   :  { %v4269_v35 = vadd.f32 %v4268_v33, %v14252_v59  ;;  %v4270_v12 = vpop.f32.mrb[235].mxu1  ;;  %v2776_v5 = vsel %vm2200_vm6, 1.0, %v14121_v36  ;;  %vm7552_vm3 = vmpackc.low %vm2199_vm15, %vm2195_vm14 }
 0x4e9   :  { %v5059_v12 = vsel %vm5057_vm7, %v5049_v42, %v8437_v19  ;;  %v14258_v42 = vld [vmem:[#allocation35_spill] sm:$0xff] }
 0x4ea   :  { %v8498_v46 = vpack.i.bf16 %v4269_v35, %v4266_v25  ;;  %7547 = vmatmul.mubr.msk.bf16.gmra.mrb[52].mxu1 %vm7546_vm5, %v14049_v3  ;;  %v8740_v25 = vld [vmem:[%s13718_s6 + $0x10] sm:$0xff]   ;;  %vm2204_vm11 = vcmp.eq.s32.totalorder %v11278_v27, %v14258_v42  ;;  %vm2203_vm6 = vcmp.eq.s32.totalorder %v11317_v13, %v14258_v42 }
 0x4eb   :  { %7548 = vmatprep.mubr.msk.bf16.mxu1 %vm3177_vm4, %v3116_v17  ;;  %v5058_v17 = vsel %vm5057_vm7, %v5048_v63, %v8436_v10  ;;  %7760 = vmatpush3.bf16.msra.mxu0 %v8740_v25  ;;  %v8421_v63 = vunpack.i.l.bf16 %v12393_v28  ;;  %v8742_v25 = vld [vmem:[%s13718_s6 + $0x18] sm:$0xff]   ;;  %v8441_v28 = vunpack.i.l.bf16 %v12435_v50 }
 0x4ec   :  { %v8455_v57 = vpop.permute.xlu1 %8454  ;;  %8499 = vrot.lane.b32.xlu0 %v8498_v46, %s8864_s5 }
 0x4ed   :  { %v8457_v33 = vunpack.i.h.bf16 %v8455_v57  ;;  %v8456_v59 = vunpack.i.l.bf16 %v8455_v57  ;;  %v4273_v35 = vpop.f32.mrb[236].mxu1 }
 0x4ee   :  { %v4274_v20 = vadd.f32 %v4273_v35, %v14256_v32  ;;  %v4275_v46 = vpop.f32.mrb[237].mxu1  ;;  %v8442_v35 = vunpack.i.h.bf16 %v12435_v50  ;;  %v2780_v50 = vsel %vm2204_vm11, 1.0, %v14121_v36 }
 0x4ef   :  { %v12500_v26 = vsel %vm5067_vm8, %v5059_v12, %v8457_v33  ;;  %v12503_v48 = vsel %vm5067_vm8, %v5058_v17, %v8456_v59  ;;  %v4276_v49 = vpop.f32.mrb[238].mxu1  ;;  %v3120_v33 = vpack.c.bf16 %v2776_v5, %v2772_v41  ;;  %v8741_v59 = vld [vmem:[%s13718_s6 + $0x58] sm:$0xff]   ;;  %v14259_v5 = vld [vmem:[#allocation34_spill] sm:$0xff]  ;;  %v14260_v17 = vld [vmem:[#allocation55_spill] sm:$0xff] }
 0x4f0   :  { %v4277_v10 = vadd.f32 %v4276_v49, %v14257_v7  ;;  %v4278_v57 = vpop.f32.mrb[239].mxu1  ;;  %vm2208_vm13 = vcmp.eq.s32.totalorder %v11278_v27, %v14259_v5  ;;  %7761 = vmatprep.subr.bf16.mxu0 %v8741_v59  ;;  %v8744_v41 = vld [vmem:[%s13718_s6 + $0x20] sm:$0xff]   ;;  %v5051_v32 = vsel %vm636_vm2, %v14260_v17, %v8422_v21  ;;  %v14262_v59 = vld [vmem:[#allocation81_spill] sm:$0xff]  ;;  %vm2207_vm9 = vcmp.eq.s32.totalorder %v11317_v13, %v14259_v5 }
 0x4f1   :  { %7762 = vmatpush3.bf16.msra.mxu0 %v8742_v25  ;;  %v5061_v57 = vsel %vm5057_vm7, %v5051_v32, %v8442_v35  ;;  %v2784_v19 = vsel %vm2208_vm13, 1.0, %v14121_v36  ;;  %v8745_v32 = vld [vmem:[%s13718_s6 + $0x68] sm:$0xff]   ;;  %vm7555_vm11 = vmpackc.low %vm2207_vm9, %vm2203_vm6 }
 0x4f2   :  { %v8503_v12 = vpack.i.bf16 %v4277_v10, %v4274_v20  ;;  %7550 = vmatmul.mubr.msk.bf16.gmra.mrb[56].mxu1 %vm7549_vm12, %v14049_v3  ;;  %v14261_v20 = vld [vmem:[#allocation51_spill] sm:$0xff]  ;;  %7763 = vmatprep.subr.bf16.mxu0 %v8743_v39  ;;  %v14263_v39 = vld [vmem:[#allocation49_spill] sm:$0xff] }
 0x4f3   :  { %7551 = vmatprep.mubr.msk.bf16.mxu1 %vm3177_vm4, %v3120_v33  ;;  %v5050_v46 = vsel %vm636_vm2, %v14261_v20, %v8421_v63  ;;  %v8746_v20 = vld [vmem:[%s13718_s6 + $0x28] sm:$0xff]  }
 0x4f4   :  { %v8460_v16 = vpop.permute.xlu1 %8459  ;;  %8504 = vrot.lane.b32.xlu0 %v8503_v12, %s8864_s5  ;;  %v5060_v33 = vsel %vm5057_vm7, %v5050_v46, %v8441_v28  ;;  %v14264_v46 = vld [vmem:[#allocation37_spill] sm:$0xff] }
 0x4f5   :  { %v8462_v49 = vunpack.i.h.bf16 %v8460_v16  ;;  %v8461_v7 = vunpack.i.l.bf16 %v8460_v16  ;;  %v4281_v10 = vpop.f32.mrb[240].mxu1  ;;  %7764 = vmatpush3.bf16.msra.mxu0 %v8744_v41  ;;  %vm2212_vm1 = vcmp.eq.s32.totalorder %v11278_v27, %v14264_v46  ;;  %v3124_v41 = vpack.c.bf16 %v2784_v19, %v2780_v50  ;;  %v14266_v50 = vld [vmem:[#allocation58_spill] sm:$0xff] }
 0x4f6   :  { %v4282_v25 = vadd.f32 %v4281_v10, %v14262_v59  ;;  %v4283_v12 = vpop.f32.mrb[241].mxu1  ;;  %v8447_v10 = vunpack.i.h.bf16 %v12444_v47  ;;  %7765 = vmatprep.subr.bf16.mxu0 %v8745_v32  ;;  %v14265_v59 = vld [vmem:[#allocation36_spill] sm:$0xff]  ;;  %v14267_v32 = vld [vmem:[#allocation50_spill] sm:$0xff]  ;;  %vm2211_vm13 = vcmp.eq.s32.totalorder %v11317_v13, %v14264_v46 }
 0x4f7   :  { %v12557_v21 = vsel %vm5067_vm8, %v5061_v57, %v8462_v49  ;;  %v12560_v63 = vsel %vm5067_vm8, %v5060_v33, %v8461_v7  ;;  %v4284_v16 = vpop.f32.mrb[242].mxu1  ;;  %v8427_v49 = vunpack.i.h.bf16 %v12403_v44  ;;  %v8426_v7 = vunpack.i.l.bf16 %v12403_v44  ;;  %v8747_v44 = vld [vmem:[%s13718_s6 + $0x70] sm:$0xff]  }
 0x4f8   :  { %v5162_v35 = vpack.c.bf16 %v12557_v21, %v12560_v63  ;;  %v4285_v28 = vadd.f32 %v4284_v16, %v14263_v39  ;;  %v4286_v17 = vpop.f32.mrb[243].mxu1  ;;  %v8446_v57 = vunpack.i.l.bf16 %v12444_v47  ;;  %vm2216_vm5 = vcmp.eq.s32.totalorder %v11278_v27, %v14265_v59  ;;  %v14275_v46 = vld [vmem:[#allocation60_spill] sm:$0xff] }
 0x4f9   :  { %v2788_v47 = vsel %vm2212_vm1, 1.0, %v14121_v36  ;;  %7766 = vmatpush3.bf16.msra.mxu0 %v8746_v20  ;;  %v5053_v19 = vsel %vm636_vm2, %v11976_v34, %v8427_v49  ;;  %vm2215_vm14 = vcmp.eq.s32.totalorder %v11317_v13, %v14265_v59 }
 0x4fa   :  { %v8508_v33 = vpack.i.bf16 %v4285_v28, %v4282_v25  ;;  %7553 = vmatmul.mubr.msk.bf16.gmra.mrb[60].mxu1 %vm7552_vm3, %v14049_v3  ;;  %v5052_v25 = vsel %vm636_vm2, %v14266_v50, %v8426_v7  ;;  %7767 = vmatprep.subr.bf16.mxu0 %v8747_v44  ;;  %v5063_v28 = vsel %vm5057_vm7, %v5053_v19, %v8447_v10  ;;  %v14268_v44 = vld [vmem:[#allocation54_spill] sm:$0xff]  ;;  %v8749_v50 = vld [vmem:[%s13718_s6 + $0x78] sm:$0xff]   ;;  %vm7558_vm15 = vmpackc.low %vm2215_vm14, %vm2211_vm13 }
 0x4fb   :  { %7554 = vmatprep.mubr.msk.bf16.mxu1 %vm3177_vm4, %v3124_v41  ;;  %v5062_v17 = vsel %vm5057_vm7, %v5052_v25, %v8446_v57  ;;  %v8750_v25 = vld [vmem:[%s13718_s6 + $0x38] sm:$0xff]  }
 0x4fc   :  { %v8465_v45 = vpop.permute.xlu1 %8464  ;;  %8509 = vrot.lane.b32.xlu0 %v8508_v33, %s8864_s5  ;;  %v2792_v33 = vsel %vm2216_vm5, 1.0, %v14121_v36 }
 0x4fd   :  { %v8467_v12 = vunpack.i.h.bf16 %v8465_v45  ;;  %v8466_v16 = vunpack.i.l.bf16 %v8465_v45  ;;  %v4289_v39 = vpop.f32.mrb[244].mxu1  ;;  %7768 = vmatpush3.bf16.msra.mxu0 %v8748_v60  ;;  %v8452_v60 = vunpack.i.h.bf16 %v12454_v1 }
 0x4fe   :  { %v4290_v20 = vadd.f32 %v4289_v39, %v14267_v32  ;;  %v4291_v41 = vpop.f32.mrb[245].mxu1  ;;  %v8431_v39 = vunpack.i.l.bf16 %v12412_v2  ;;  %7769 = vmatprep.subr.bf16.mxu0 %v8749_v50 }
 0x4ff   :  { %v12614_v34 = vsel %vm5067_vm8, %v5063_v28, %v8467_v12  ;;  %v12617_v49 = vsel %vm5067_vm8, %v5062_v17, %v8466_v16  ;;  %v4292_v7 = vpop.f32.mrb[246].mxu1  ;;  %v14269_v12 = vld [vmem:[#allocation39_spill] sm:$0xff]  ;;  %v8432_v16 = vunpack.i.h.bf16 %v12412_v2  ;;  %v8451_v28 = vunpack.i.l.bf16 %v12454_v1  ;;  %v14270_v17 = vld [vmem:[#allocation38_spill] sm:$0xff] }
 0x500   :  { %v5166_v10 = vpack.c.bf16 %v12614_v34, %v12617_v49  ;;  %v8523_v57 = vpack.i.bf16 %v12189_v40, %v4290_v20  ;;  %v4293_v45 = vadd.f32 %v4292_v7, %v14268_v44  ;;  %v4294_v19 = vpop.f32.mrb[247].mxu1  ;;  %vm2220_vm10 = vcmp.eq.s32.totalorder %v11278_v27, %v14269_v12  ;;  %v14271_v7 = vld [vmem:[#allocation109_spill] sm:$0xff] }
 0x501   :  { %v3128_v40 = vpack.c.bf16 %v2792_v33, %v2788_v47  ;;  %vm2224_vm12 = vcmp.eq.s32.totalorder %v11278_v27, %v14270_v17  ;;  %v2796_v42 = vsel %vm2220_vm10, 1.0, %v14121_v36  ;;  %7770 = vmatpush3.bf16.msra.mxu0 %v8750_v25  ;;  %v5055_v1 = vsel %vm636_vm2, %v11998_v31, %v8432_v16 }
 0x502   :  { %7556 = vmatmul.mubr.msk.bf16.gmra.mrb[64].mxu1 %vm7555_vm11, %v14049_v3  ;;  %8524 = vrot.lane.b32.xlu1 %v8523_v57, %s8864_s5  ;;  %v5054_v5 = vsel %vm636_vm2, %v11989_v9, %v8431_v39  ;;  %v5065_v41 = vsel %vm5057_vm7, %v5055_v1, %v8452_v60  ;;  %v2800_v19 = vsel %vm2224_vm12, 1.0, %v14121_v36  ;;  %v14272_v39 = vld [vmem:[#allocation110_spill] sm:$0xff]  ;;  %v14274_v1 = vld [vmem:[#allocation41_spill] sm:$0xff]  ;;  %vm2219_vm5 = vcmp.eq.s32.totalorder %v11317_v13, %v14269_v12 }
 0x503   :  { %7557 = vmatprep.mubr.msk.bf16.mxu1 %vm3177_vm4, %v3128_v40  ;;  %v5064_v33 = vsel %vm5057_vm7, %v5054_v5, %v8451_v28  ;;  %v3132_v28 = vpack.c.bf16 %v2800_v19, %v2796_v42  ;;  %vm2228_vm3 = vcmp.eq.s32.totalorder %v11278_v27, %v14274_v1  ;;  %v14276_v42 = vpack.i.bf16 %v12098_v29, %v12415_v8  ;;  %v14278_v29 = vld [vmem:[#allocation42_spill] sm:$0xff]  ;;  %v14279_v8 = vld [vmem:[#allocation43_spill] sm:$0xff] }
 0x504   :  { %v8470_v2 = vpop.permute.xlu1 %8469  ;;  %vm2223_vm6 = vcmp.eq.s32.totalorder %v11317_v13, %v14270_v17  ;;  %vm2240_vm10 = vcmp.eq.s32.totalorder %v11278_v27, %v14278_v29  ;;  %vm2236_vm11 = vcmp.eq.s32.totalorder %v11278_v27, %v14279_v8  ;;  %vm2227_vm12 = vcmp.eq.s32.totalorder %v11317_v13, %v14274_v1  ;;  %v14282_v1 = vld [vmem:[#allocation44_spill] sm:$0xff] }
 0x505   :  { %v8472_v47 = vunpack.i.h.bf16 %v8470_v2  ;;  %v8471_v32 = vunpack.i.l.bf16 %v8470_v2  ;;  %v4297_v20 = vpop.f32.mrb[248].mxu1  ;;  %v14273_v2 = vld [vmem:[#allocation40_spill] sm:$0xff]  ;;  %vm7561_vm9 = vmpackc.low %vm2223_vm6, %vm2219_vm5  ;;  %vm2239_vm5 = vcmp.eq.s32.totalorder %v11317_v13, %v14278_v29  ;;  %v14286_v29 = vld [vmem:[#allocation47_spill] sm:$0xff] }
 0x506   :  { %v4298_v57 = vadd.f32 %v4297_v20, %v14271_v7  ;;  %v4299_v44 = vpop.f32.mrb[249].mxu1  ;;  %vm2232_vm1 = vcmp.eq.s32.totalorder %v11278_v27, %v14273_v2  ;;  %vm2231_vm13 = vcmp.eq.s32.totalorder %v11317_v13, %v14273_v2 }
 0x507   :  { %v12663_v31 = vsel %vm5067_vm8, %v5065_v41, %v8472_v47  ;;  %v12666_v9 = vsel %vm5067_vm8, %v5064_v33, %v8471_v32  ;;  %v4300_v50 = vpop.f32.mrb[250].mxu1  ;;  %v2804_v47 = vsel %vm2228_vm3, 1.0, %v14121_v36  ;;  %v2808_v32 = vsel %vm2232_vm1, 1.0, %v14121_v36  ;;  %v14277_v33 = vld [vmem:[#allocation85_spill] sm:$0xff]  ;;  %v14280_v44 = vld [vmem:[#allocation82_spill] sm:$0xff]  ;;  %vm7564_vm14 = vmpackc.low %vm2231_vm13, %vm2227_vm12 }
 0x508   :  { %v5170_v25 = vpack.c.bf16 %v12663_v31, %v12666_v9  ;;  %v8513_v16 = vpack.i.bf16 %v4298_v57, %v4293_v45  ;;  %v4301_v40 = vadd.f32 %v4300_v50, %v14272_v39  ;;  %v4302_v60 = vpop.f32.mrb[251].mxu1  ;;  %v3136_v57 = vpack.c.bf16 %v2808_v32, %v2804_v47 }
 0x509   :  { %v2816_v39 = vsel %vm2240_vm10, 1.0, %v14121_v36  ;;  %vm2235_vm3 = vcmp.eq.s32.totalorder %v11317_v13, %v14279_v8  ;;  %v14285_v8 = vld [vmem:[#allocation46_spill] sm:$0xff]  ;;  %vm2252_vm10 = vcmp.eq.s32.totalorder %v11278_v27, %v14286_v29  ;;  %vm2247_vm12 = vcmp.eq.s32.totalorder %v11317_v13, %v14282_v1 }
 0x50a   :  { %7559 = vmatmul.mubr.msk.bf16.gmra.mrb[68].mxu1 %vm7558_vm15, %v14049_v3  ;;  %8514 = vrot.lane.b32.xlu0 %v8513_v16, %s8865_s25  ;;  %v2812_v16 = vsel %vm2236_vm11, 1.0, %v14121_v36  ;;  %vm2248_vm15 = vcmp.eq.s32.totalorder %v11278_v27, %v14282_v1  ;;  %vm7567_vm6 = vmpackc.low %vm2239_vm5, %vm2235_vm3  ;;  %vm2255_vm3 = vcmp.eq.s32.totalorder %v11317_v13, %v14285_v8 }
 0x50b   :  { %7560 = vmatprep.mubr.msk.bf16.mxu1 %vm3177_vm4, %v3132_v28  ;;  %v14281_v28 = vld [vmem:[#allocation78_spill] sm:$0xff] }
 0x50d   :  { %v4305_v45 = vpop.f32.mrb[252].mxu1 }
 0x50e   :  { %v4306_v59 = vadd.f32 %v4305_v45, %v14275_v46  ;;  %v4307_v5 = vpop.f32.mrb[253].mxu1  ;;  %8519 = vrot.lane.b32.xlu0 %v14276_v42, %s8863_s4  ;;  %v14284_v42 = vld [vmem:[#allocation77_spill] sm:$0xff] }
 0x50f   :  { %v4308_v20 = vpop.f32.mrb[254].mxu1  ;;  %v14283_v5 = vld [vmem:[#allocation45_spill] sm:$0xff] }
 0x510   :  { %v8528_v41 = vpack.i.bf16 %v4306_v59, %v4301_v40  ;;  %v4309_v7 = vadd.f32 %v4308_v20, %v14277_v33  ;;  %v4310_v12 = vpop.f32.mrb[255].mxu1  ;;  %v3140_v59 = vpack.c.bf16 %v2816_v39, %v2812_v16  ;;  %vm2244_vm1 = vcmp.eq.s32.totalorder %v11278_v27, %v14283_v5 }
 0x511   :  { %v2820_v20 = vsel %vm2244_vm1, 1.0, %v14121_v36  ;;  %vm2243_vm11 = vcmp.eq.s32.totalorder %v11317_v13, %v14283_v5  ;;  %vm2251_vm1 = vcmp.eq.s32.totalorder %v11317_v13, %v14286_v29  ;;  %v14291_v29 = vld [vmem:[#allocation61_spill] sm:$0xff] }
 0x512   :  { %7562 = vmatmul.mubr.msk.bf16.gmra.mrb[72].mxu1 %vm7561_vm9, %v14049_v3  ;;  %8529 = vrot.lane.b32.xlu0 %v8528_v41, %s8865_s25  ;;  %v2824_v41 = vsel %vm2248_vm15, 1.0, %v14121_v36  ;;  %vm2256_vm9 = vcmp.eq.s32.totalorder %v11278_v27, %v14285_v8  ;;  %vm7570_vm13 = vmpackc.low %vm2247_vm12, %vm2243_vm11 }
 0x513   :  { %7563 = vmatprep.mubr.msk.bf16.mxu1 %vm3177_vm4, %v3136_v57  ;;  %v2832_v16 = vsel %vm2256_vm9, 1.0, %v14121_v36  ;;  %vm7573_vm5 = vmpackc.low %vm2255_vm3, %vm2251_vm1 }
 0x515   :  { %v4313_v17 = vpop.f32.mrb[120].mxu1 }
 0x516   :  { %v4314_v19 = vadd.f32 %v4313_v17, %v14280_v44  ;;  %v4315_v50 = vpop.f32.mrb[121].mxu1  ;;  %v3144_v17 = vpack.c.bf16 %v2824_v41, %v2820_v20  ;;  %v14289_v20 = vld [vmem:[#allocation57_spill] sm:$0xff] }
 0x517   :  { %v4316_v40 = vpop.f32.mrb[122].mxu1  ;;  %v2828_v50 = vsel %vm2252_vm10, 1.0, %v14121_v36  ;;  %vm2271_vm1 = vcmp.eq.s32.totalorder %v11317_v13, %v14289_v20 }
 0x518   :  { %v8533_v60 = vpack.i.bf16 %v4314_v19, %v4309_v7  ;;  %v4317_v45 = vadd.f32 %v4316_v40, %v14281_v28  ;;  %v4318_v46 = vpop.f32.mrb[123].mxu1  ;;  %v3148_v28 = vpack.c.bf16 %v2832_v16, %v2828_v50 }
 0x51a   :  { %7565 = vmatmul.mubr.msk.bf16.gmra.mrb[76].mxu1 %vm7564_vm14, %v14049_v3  ;;  %8534 = vrot.lane.b32.xlu0 %v8533_v60, %s8865_s25 }
 0x51b   :  { %7566 = vmatprep.mubr.msk.bf16.mxu1 %vm3177_vm4, %v3140_v59 }
 0x51d   :  { %v4321_v2 = vpop.f32.mrb[124].mxu1 }
 0x51e   :  { %v4322_v47 = vadd.f32 %v4321_v2, %v14284_v42  ;;  %v4323_v32 = vpop.f32.mrb[125].mxu1 }
 0x51f   :  { %v4324_v33 = vpop.f32.mrb[126].mxu1 }
 0x520   :  { %v8538_v7 = vpack.i.bf16 %v4322_v47, %v4317_v45  ;;  %v4325_v12 = vadd.f32 %v4324_v33, %v12035_v55  ;;  %v4326_v57 = vpop.f32.mrb[127].mxu1  ;;  %v14288_v45 = vld [vmem:[#allocation52_spill] sm:$0xff] }
 0x521   :  { %vm2260_vm15 = vcmp.eq.s32.totalorder %v11278_v27, %v14288_v45  ;;  %vm2259_vm10 = vcmp.eq.s32.totalorder %v11317_v13, %v14288_v45  ;;  %v14293_v45 = vld [vmem:[#allocation64_spill] sm:$0xff] }
 0x522   :  { %v8543_v44 = vpack.i.bf16 %v12251_v24, %v4325_v12  ;;  %7568 = vmatmul.mubr.msk.bf16.gmra.mrb[80].mxu1 %vm7567_vm6, %v14049_v3  ;;  %8539 = vrot.lane.b32.xlu0 %v8538_v7, %s8865_s25  ;;  %v2836_v1 = vsel %vm2260_vm15, 1.0, %v14121_v36  ;;  %vm2272_vm6 = vcmp.eq.s32.totalorder %v11278_v27, %v14289_v20 }
 0x523   :  { %7569 = vmatprep.mubr.msk.bf16.mxu1 %vm3177_vm4, %v3144_v17  ;;  %v2848_v12 = vsel %vm2272_vm6, 1.0, %v14121_v36 }
 0x525   :  { %v4329_v19 = vpop.f32.mrb[128].mxu1 }
 0x526   :  { %v12737_v55 = vadd.f32 %v4329_v19, %v12046_v43  ;;  %v4331_v24 = vpop.f32.mrb[129].mxu1  ;;  %8544 = vrot.lane.b32.xlu0 %v8543_v44, %s8865_s25  ;;  %v14287_v43 = vld [vmem:[#allocation53_spill] sm:$0xff] }
 0x527   :  { %v4332_v39 = vpop.f32.mrb[130].mxu1  ;;  %vm2264_vm14 = vcmp.eq.s32.totalorder %v11278_v27, %v14287_v43  ;;  %vm2263_vm11 = vcmp.eq.s32.totalorder %v11317_v13, %v14287_v43 }
 0x528   :  { %v12745_v40 = vadd.f32 %v4332_v39, %v12054_v0  ;;  %v4334_v60 = vpop.f32.mrb[131].mxu1  ;;  %v2840_v5 = vsel %vm2264_vm14, 1.0, %v14121_v36  ;;  %vm7576_vm12 = vmpackc.low %vm2263_vm11, %vm2259_vm10  ;;  %vm2279_vm10 = vcmp.eq.s32.totalorder %v11317_v13, %v14291_v29 }
 0x529   :  { %v3152_v32 = vpack.c.bf16 %v2840_v5, %v2836_v1 }
 0x52a   :  { %7571 = vmatmul.mubr.msk.bf16.gmra.mrb[84].mxu1 %vm7570_vm13, %v14049_v3  ;;  %vm2280_vm13 = vcmp.eq.s32.totalorder %v11278_v27, %v14291_v29 }
 0x52b   :  { %7572 = vmatprep.mubr.msk.bf16.mxu1 %vm3177_vm4, %v3148_v28  ;;  %v2856_v16 = vsel %vm2280_vm13, 1.0, %v14121_v36 }
 0x52d   :  { %v4337_v46 = vpop.f32.mrb[132].mxu1 }
 0x52e   :  { %v12756_v0 = vadd.f32 %v4337_v46, %v12066_v54  ;;  %v4339_v59 = vpop.f32.mrb[133].mxu1  ;;  %v14290_v54 = vld [vmem:[#allocation56_spill] sm:$0xff] }
 0x52f   :  { %v4340_v2 = vpop.f32.mrb[134].mxu1  ;;  %vm2268_vm9 = vcmp.eq.s32.totalorder %v11278_v27, %v14290_v54  ;;  %vm2267_vm15 = vcmp.eq.s32.totalorder %v11317_v13, %v14290_v54  ;;  %v14295_v54 = vld [vmem:[#allocation67_spill] sm:$0xff] }
 0x530   :  { %v12763_v42 = vadd.f32 %v4340_v2, %v12073_v38  ;;  %v4342_v47 = vpop.f32.mrb[135].mxu1  ;;  %v2844_v7 = vsel %vm2268_vm9, 1.0, %v14121_v36  ;;  %vm7579_vm3 = vmpackc.low %vm2271_vm1, %vm2267_vm15  ;;  %vm2287_vm15 = vcmp.eq.s32.totalorder %v11317_v13, %v14293_v45 }
 0x531   :  { %v3156_v8 = vpack.c.bf16 %v2848_v12, %v2844_v7 }
 0x532   :  { %7574 = vmatmul.mubr.msk.bf16.gmra.mrb[88].mxu1 %vm7573_vm5, %v14049_v3  ;;  %vm2288_vm5 = vcmp.eq.s32.totalorder %v11278_v27, %v14293_v45 }
 0x533   :  { %7575 = vmatprep.mubr.msk.bf16.mxu1 %vm3177_vm4, %v3152_v32  ;;  %v2864_v5 = vsel %vm2288_vm5, 1.0, %v14121_v36 }
 0x535   :  { %v4345_v41 = vpop.f32.mrb[136].mxu1 }
 0x536   :  { %v12774_v38 = vadd.f32 %v4345_v41, %v12088_v51  ;;  %v4347_v33 = vpop.f32.mrb[137].mxu1  ;;  %v14292_v51 = vld [vmem:[#allocation59_spill] sm:$0xff] }
 0x537   :  { %v4348_v57 = vpop.f32.mrb[138].mxu1  ;;  %vm2276_vm14 = vcmp.eq.s32.totalorder %v11278_v27, %v14292_v51  ;;  %vm2275_vm9 = vcmp.eq.s32.totalorder %v11317_v13, %v14292_v51 }
 0x538   :  { %v12781_v17 = vadd.f32 %v4348_v57, %v12095_v14  ;;  %v4350_v44 = vpop.f32.mrb[139].mxu1  ;;  %v2852_v50 = vsel %vm2276_vm14, 1.0, %v14121_v36  ;;  %vm7582_vm11 = vmpackc.low %vm2279_vm10, %vm2275_vm9  ;;  %vm2295_vm9 = vcmp.eq.s32.totalorder %v11317_v13, %v14295_v54 }
 0x539   :  { %v3160_v43 = vpack.c.bf16 %v2856_v16, %v2852_v50 }
 0x53a   :  { %7577 = vmatmul.mubr.msk.bf16.gmra.mrb[92].mxu1 %vm7576_vm12, %v14049_v3  ;;  %vm2296_vm12 = vcmp.eq.s32.totalorder %v11278_v27, %v14295_v54 }
 0x53b   :  { %7578 = vmatprep.mubr.msk.bf16.mxu1 %vm3177_vm4, %v3156_v8  ;;  %v2872_v12 = vsel %vm2296_vm12, 1.0, %v14121_v36 }
 0x53d   :  { %v4353_v19 = vpop.f32.mrb[140].mxu1 }
 0x53e   :  { %v12792_v14 = vadd.f32 %v4353_v19, %v12112_v22  ;;  %v4355_v24 = vpop.f32.mrb[141].mxu1  ;;  %v14294_v22 = vld [vmem:[#allocation62_spill] sm:$0xff] }
 0x53f   :  { %v4356_v39 = vpop.f32.mrb[142].mxu1  ;;  %vm2284_vm6 = vcmp.eq.s32.totalorder %v11278_v27, %v14294_v22  ;;  %vm2283_vm14 = vcmp.eq.s32.totalorder %v11317_v13, %v14294_v22  ;;  %v14298_v19 = vld [vmem:[#allocation70_spill] sm:$0xff]  ;;  %v14299_v22 = vld [vmem:[#allocation76_spill] sm:$0xff] }
 0x540   :  { %v12799_v60 = vadd.f32 %v4356_v39, %v12119_v37  ;;  %v4358_v28 = vpop.f32.mrb[143].mxu1  ;;  %v2860_v1 = vsel %vm2284_vm6, 1.0, %v14121_v36  ;;  %vm7585_vm1 = vmpackc.low %vm2287_vm15, %vm2283_vm14  ;;  %vm2300_vm5 = vcmp.eq.s32.totalorder %v11278_v27, %v14298_v19 }
 0x541   :  { %v3164_v20 = vpack.c.bf16 %v2864_v5, %v2860_v1  ;;  %v2876_v16 = vsel %vm2300_vm5, 1.0, %v14121_v36 }
 0x542   :  { %7580 = vmatmul.mubr.msk.bf16.gmra.mrb[96].mxu1 %vm7579_vm3, %v14049_v3 }
 0x543   :  { %7581 = vmatprep.mubr.msk.bf16.mxu1 %vm3177_vm4, %v3160_v43 }
 0x545   :  { %v4361_v46 = vpop.f32.mrb[144].mxu1 }
 0x546   :  { %v12810_v37 = vadd.f32 %v4361_v46, %v12131_v56  ;;  %v4363_v59 = vpop.f32.mrb[145].mxu1  ;;  %v14296_v56 = vld [vmem:[#allocation66_spill] sm:$0xff] }
 0x547   :  { %v4364_v2 = vpop.f32.mrb[146].mxu1  ;;  %vm2292_vm13 = vcmp.eq.s32.totalorder %v11278_v27, %v14296_v56  ;;  %vm2291_vm6 = vcmp.eq.s32.totalorder %v11317_v13, %v14296_v56  ;;  %v14300_v46 = vld [vmem:[#allocation74_spill] sm:$0xff]  ;;  %v8475_v59 = vpop.permute.xlu0 %8474 }
 0x548   :  { %v4365_v47 = vadd.f32 %v4364_v2, %v12138_v4  ;;  %v4366_v32 = vpop.f32.mrb[147].mxu1  ;;  %v2868_v7 = vsel %vm2292_vm13, 1.0, %v14121_v36  ;;  %vm7588_vm10 = vmpackc.low %vm2295_vm9, %vm2291_vm6  ;;  %vm2308_vm12 = vcmp.eq.s32.totalorder %v11278_v27, %v14300_v46  ;;  %vm2299_vm13 = vcmp.eq.s32.totalorder %v11317_v13, %v14298_v19 }
 0x549   :  { %v3168_v51 = vpack.c.bf16 %v2872_v12, %v2868_v7  ;;  %vm5792_vm6 = vcmask 588800  }
 0x54a   :  { %7583 = vmatmul.mubr.msk.bf16.gmra.mrb[100].mxu1 %vm7582_vm11, %v14049_v3  ;;  %vm2312_vm11 = vcmp.eq.s32.totalorder %v11278_v27, %v14299_v22 }
 0x54b   :  { %7584 = vmatprep.mubr.msk.bf16.mxu1 %vm3177_vm4, %v3164_v20  ;;  %v2888_v32 = vsel %vm2312_vm11, 1.0, %v14121_v36  ;;  %v12859_v54 = vpop.permute.xlu0 %8479 }
 0x54d   :  { %v4369_v41 = vpop.f32.mrb[148].mxu1 }
 0x54e   :  { %v4370_v33 = vadd.f32 %v4369_v41, %v12150_v58  ;;  %v4371_v4 = vpop.f32.mrb[149].mxu1  ;;  %v14297_v58 = vld [vmem:[#allocation71_spill] sm:$0xff] }
 0x54f   :  { %v4372_v57 = vpop.f32.mrb[150].mxu1  ;;  %vm2304_vm3 = vcmp.eq.s32.totalorder %v11278_v27, %v14297_v58  ;;  %vm2303_vm14 = vcmp.eq.s32.totalorder %v11317_v13, %v14297_v58  ;;  %v12864_v41 = vpop.permute.xlu0 %8484 }
 0x550   :  { %v8548_v44 = vpack.i.bf16 %v4370_v33, %v4365_v47  ;;  %v4373_v8 = vadd.f32 %v4372_v57, %v12157_v62  ;;  %v4374_v29 = vpop.f32.mrb[151].mxu1  ;;  %v2880_v39 = vsel %vm2304_vm3, 1.0, %v14121_v36  ;;  %v2884_v47 = vsel %vm2308_vm12, 1.0, %v14121_v36  ;;  %vm7591_vm15 = vmpackc.low %vm2303_vm14, %vm2299_vm13 }
 0x551   :  { %v3172_v45 = vpack.c.bf16 %v2880_v39, %v2876_v16  ;;  %v3176_v56 = vpack.c.bf16 %v2888_v32, %v2884_v47  ;;  %vm2311_vm3 = vcmp.eq.s32.totalorder %v11317_v13, %v14299_v22  ;;  %v8477_v22 = vunpack.i.h.bf16 %v8475_v59 }
 0x552   :  { %7586 = vmatmul.mubr.msk.bf16.gmra.mrb[104].mxu1 %vm7585_vm1, %v14049_v3  ;;  %8549 = vrot.lane.b32.xlu0 %v8548_v44, %s8863_s4  ;;  %vm2307_vm1 = vcmp.eq.s32.totalorder %v11317_v13, %v14300_v46 }
 0x553   :  { %7587 = vmatprep.mubr.msk.bf16.mxu1 %vm3177_vm4, %v3168_v51  ;;  %v12876_v57 = vpop.permute.xlu0 %8489 }
 0x555   :  { %v4377_v24 = vpop.f32.mrb[0].mxu1 }
 0x556   :  { %v8553_v62 = vpack.i.bf16 %v4377_v24, %v4373_v8  ;;  %v4379_v50 = vpop.f32.mrb[1].mxu1 }
 0x557   :  { %v4380_v28 = vpop.f32.mrb[2].mxu1  ;;  %v8495_v8 = vpop.permute.xlu0 %8494 }
 0x558   :  { %v4382_v43 = vpop.f32.mrb[3].mxu1  ;;  %8554 = vrot.lane.b32.xlu0 %v8553_v62, %s8863_s4  ;;  %v8497_v46 = vunpack.i.h.bf16 %v8495_v8 }
 0x55a   :  { %7589 = vmatmul.mubr.msk.bf16.gmra.mrb[108].mxu1 %vm7588_vm10, %v14049_v3  ;;  %vm5817_vm10 = vcmask 1043456  }
 0x55b   :  { %7590 = vmatprep.mubr.msk.bf16.mxu1 %vm3177_vm4, %v3172_v45 }
 0x55d   :  { %v4385_v1 = vpop.f32.mrb[4].mxu1 }
 0x55e   :  { %v8558_v5 = vpack.i.bf16 %v4385_v1, %v4380_v28  ;;  %v4387_v2 = vpop.f32.mrb[5].mxu1  ;;  %v8500_v19 = vpop.permute.xlu0 %8499  ;;  %v8496_v1 = vunpack.i.l.bf16 %v8495_v8 }
 0x55f   :  { %v12857_v20 = vpop.f32.mrb[6].mxu1  ;;  %v5078_v2 = vsel %vm636_vm2, %v12270_v15, %v8477_v22 }
 0x560   :  { %v4390_v27 = vpop.f32.mrb[7].mxu1  ;;  %8559 = vrot.lane.b32.xlu0 %v8558_v5, %s8863_s4 }
 0x562   :  { %7592 = vmatmul.mubr.msk.bf16.gmra.mrb[112].mxu1 %vm7591_vm15, %v14049_v3 }
 0x563   :  { %7593 = vmatprep.mubr.msk.bf16.mxu1 %vm3177_vm4, %v3176_v56  ;;  %vm7594_vm4 = vmpackc.low %vm2311_vm3, %vm2307_vm1 }
 0x565   :  { %v12866_v33 = vpop.f32.mrb[8].mxu1 }
 0x566   :  { %v8638_v4 = vpack.i.bf16 %v12866_v33, %v12857_v20  ;;  %v4395_v7 = vpop.f32.mrb[9].mxu1  ;;  %v12880_v50 = vpop.permute.xlu0 %8504 }
 0x567   :  { %v12874_v12 = vpop.f32.mrb[10].mxu1  ;;  %v5087_v7 = vsel %vm5057_vm7, %v5078_v2, %v8497_v46 }
 0x568   :  { %v4398_v44 = vpop.f32.mrb[11].mxu1 }
 0x56a   :  { %7595 = vmatmul.mubr.msk.bf16.gmra.mrb[116].mxu1 %vm7594_vm4, %v14049_v3  ;;  %v8476_v3 = vunpack.i.l.bf16 %v8475_v59 }
 0x56c   :  { %v5077_v47 = vsel %vm636_vm2, %v12263_v30, %v8476_v3 }
 0x56d   :  { %v4401_v29 = vpop.f32.mrb[12].mxu1  ;;  %v5086_v44 = vsel %vm5057_vm7, %v5077_v47, %v8496_v1 }
 0x56e   :  { %v4403_v51 = vpop.f32.mrb[13].mxu1  ;;  %v12882_v28 = vpop.permute.xlu0 %8509 }
 0x56f   :  { %v4404_v58 = vpop.f32.mrb[14].mxu1 }
 0x570   :  { %v8563_v24 = vpack.i.bf16 %v4404_v58, %v4401_v29  ;;  %v4406_v62 = vpop.f32.mrb[15].mxu1 }
 0x571   :  { %v8482_v62 = vunpack.i.h.bf16 %v12859_v54 }
 0x572   :  { %8564 = vrot.lane.b32.xlu0 %v8563_v24, %s8864_s5 }
 0x573   :  { %v5080_v22 = vsel %vm636_vm2, %v12288_v61, %v8482_v62 }
 0x575   :  { %v4409_v13 = vpop.f32.mrb[16].mxu1 }
 0x576   :  { %v4411_v16 = vpop.f32.mrb[17].mxu1 }
 0x577   :  { %v4412_v39 = vpop.f32.mrb[18].mxu1  ;;  %v8502_v16 = vunpack.i.h.bf16 %v8500_v19 }
 0x578   :  { %v8568_v43 = vpack.i.bf16 %v4412_v39, %v4409_v13  ;;  %v4414_v45 = vpop.f32.mrb[19].mxu1  ;;  %v8481_v13 = vunpack.i.l.bf16 %v12859_v54  ;;  %v8501_v39 = vunpack.i.l.bf16 %v8500_v19 }
 0x579   :  { %v5089_v54 = vsel %vm5057_vm7, %v5080_v22, %v8502_v16  ;;  %v8511_v22 = vunpack.i.l.bf16 %v12882_v28 }
 0x57a   :  { %8569 = vrot.lane.b32.xlu0 %v8568_v43, %s8864_s5  ;;  %v14301_v43 = vpack.c.bf16 %v12500_v26, %v12503_v48  ;;  %v5079_v3 = vsel %vm636_vm2, %v12281_v18, %v8481_v13 }
 0x57b   :  { %v5088_v19 = vsel %vm5057_vm7, %v5079_v3, %v8501_v39 }
 0x57c   :  { %v8515_v5 = vpop.permute.xlu0 %8514 }
 0x57d   :  { %v8517_v32 = vunpack.i.h.bf16 %v8515_v5  ;;  %v8516_v27 = vunpack.i.l.bf16 %v8515_v5  ;;  %v12889_v56 = vpop.f32.mrb[20].mxu1 }
 0x57e   :  { %v4419_v59 = vpop.f32.mrb[21].mxu1 }
 0x57f   :  { %v12893_v29 = vpop.f32.mrb[22].mxu1  ;;  %v5095_v8 = vsel %vm5067_vm8, %v5086_v44, %v8516_v27  ;;  %v5096_v51 = vsel %vm5067_vm8, %v5087_v7, %v8517_v32  ;;  %v8487_v27 = vunpack.i.h.bf16 %v12864_v41  ;;  %v8486_v7 = vunpack.i.l.bf16 %v12864_v41 }
 0x580   :  { %v8618_v15 = vpack.i.bf16 %v12893_v29, %v12889_v56  ;;  %v4422_v58 = vpop.f32.mrb[23].mxu1  ;;  %v12899_v30 = vpop.permute.xlu0 %8519  ;;  %v5159_v24 = vpack.c.bf16 %v5096_v51, %v5095_v8  ;;  %v8507_v44 = vunpack.i.h.bf16 %v12880_v50  ;;  %v8506_v59 = vunpack.i.l.bf16 %v12880_v50 }
 0x581   :  { %v5082_v51 = vsel %vm636_vm2, %v12306_v11, %v8487_v27  ;;  %v5081_v58 = vsel %vm636_vm2, %v12299_v6, %v8486_v7  ;;  %v8492_v11 = vunpack.i.h.bf16 %v12876_v57  ;;  %v8491_v6 = vunpack.i.l.bf16 %v12876_v57 }
 0x582   :  { %5466 = vmatprep.mubr.bf16.mxu0 %v5159_v24  ;;  %v5091_v41 = vsel %vm5057_vm7, %v5082_v51, %v8507_v44  ;;  %v5090_v50 = vsel %vm5057_vm7, %v5081_v58, %v8506_v59  ;;  %v8521_v3 = vunpack.i.l.bf16 %v12899_v30  ;;  %v14302_v51 = vld [vmem:[#allocation80_spill] sm:$0xff] }
 0x583   :  { %5467 = vmatmul.mubr.bf16.vlgmr.msra.gmra.mrb[28].mxu0 %v14301_v43 }
 0x584   :  { %v8530_v45 = vpop.permute.xlu0 %8529  ;;  %v5085_v49 = vsel %vm636_vm2, %v12335_v53, %v8521_v3 }
 0x585   :  { %v8532_v46 = vunpack.i.h.bf16 %v8530_v45  ;;  %v8531_v1 = vunpack.i.l.bf16 %v8530_v45  ;;  %v12910_v5 = vpop.f32.mrb[24].mxu1  ;;  %v8512_v45 = vunpack.i.h.bf16 %v12882_v28 }
 0x586   :  { %v4427_v2 = vpop.f32.mrb[25].mxu1 }
 0x587   :  { %v12914_v47 = vpop.f32.mrb[26].mxu1  ;;  %v5097_v26 = vsel %vm5067_vm8, %v5088_v19, %v8531_v1  ;;  %v5098_v48 = vsel %vm5067_vm8, %v5089_v54, %v8532_v46  ;;  %v5084_v1 = vsel %vm636_vm2, %v12324_v23, %v8492_v11  ;;  %v5083_v54 = vsel %vm636_vm2, %v12317_v52, %v8491_v6  ;;  %v8525_v19 = vpop.permute.xlu1 %8524 }
 0x588   :  { %v8653_v61 = vpack.i.bf16 %v12914_v47, %v12910_v5  ;;  %v4430_v32 = vpop.f32.mrb[27].mxu1  ;;  %v5163_v18 = vpack.c.bf16 %v5098_v48, %v5097_v26  ;;  %v5093_v28 = vsel %vm5057_vm7, %v5084_v1, %v8512_v45  ;;  %v5092_v48 = vsel %vm5057_vm7, %v5083_v54, %v8511_v22 }
 0x589   :  { %v8522_v32 = vunpack.i.h.bf16 %v12899_v30  ;;  %v8526_v27 = vunpack.i.l.bf16 %v8525_v19  ;;  %v8527_v53 = vunpack.i.h.bf16 %v8525_v19 }
 0x58a   :  { %5474 = vmatprep.mubr.bf16.mxu0 %v5163_v18 }
 0x58b   :  { %5475 = vmatmul.mubr.bf16.gmra.mrb[32].mxu0 %v5162_v35  ;;  %v5056_v30 = vsel %vm636_vm2, %v14302_v51, %v8522_v32 }
 0x58c   :  { %v8535_v8 = vpop.permute.xlu0 %8534 }
 0x58d   :  { %v8537_v24 = vunpack.i.h.bf16 %v8535_v8  ;;  %v8536_v62 = vunpack.i.l.bf16 %v8535_v8  ;;  %v12931_v13 = vpop.f32.mrb[28].mxu1 }
 0x58e   :  { %v4435_v16 = vpop.f32.mrb[29].mxu1 }
 0x58f   :  { %v4436_v39 = vpop.f32.mrb[30].mxu1  ;;  %v5099_v21 = vsel %vm5067_vm8, %v5090_v50, %v8536_v62  ;;  %v5100_v63 = vsel %vm5067_vm8, %v5091_v41, %v8537_v24  ;;  %v5094_v24 = vsel %vm5057_vm7, %v5085_v49, %v8526_v27  ;;  %v5066_v50 = vsel %vm5057_vm7, %v5056_v30, %v8527_v53 }
 0x590   :  { %v4438_v35 = vpop.f32.mrb[31].mxu1  ;;  %v5167_v43 = vpack.c.bf16 %v5100_v63, %v5099_v21 }
 0x592   :  { %5482 = vmatprep.mubr.bf16.mxu0 %v5167_v43 }
 0x593   :  { %5483 = vmatmul.mubr.bf16.gmra.mrb[36].mxu0 %v5166_v10 }
 0x594   :  { %v8540_v46 = vpop.permute.xlu0 %8539 }
 0x595   :  { %v8542_v57 = vunpack.i.h.bf16 %v8540_v46  ;;  %v8541_v2 = vunpack.i.l.bf16 %v8540_v46  ;;  %v4441_v26 = vpop.f32.mrb[32].mxu1 }
 0x596   :  { %v8573_v18 = vpack.i.bf16 %v4441_v26, %v4436_v39  ;;  %v4443_v34 = vpop.f32.mrb[33].mxu1 }
 0x597   :  { %v4444_v10 = vpop.f32.mrb[34].mxu1  ;;  %v5101_v23 = vsel %vm5067_vm8, %v5092_v48, %v8541_v2  ;;  %v5102_v52 = vsel %vm5067_vm8, %v5093_v28, %v8542_v57 }
 0x598   :  { %v4446_v7 = vpop.f32.mrb[35].mxu1  ;;  %v8545_v44 = vpop.permute.xlu0 %8544  ;;  %8574 = vrot.lane.b32.xlu0 %v8573_v18, %s8865_s25  ;;  %v5171_v59 = vpack.c.bf16 %v5102_v52, %v5101_v23 }
 0x599   :  { %v8546_v8 = vunpack.i.l.bf16 %v8545_v44  ;;  %v8547_v58 = vunpack.i.h.bf16 %v8545_v44 }
 0x59a   :  { %5490 = vmatprep.mubr.bf16.mxu0 %v5171_v59 }
 0x59b   :  { %5491 = vmatmul.mubr.bf16.gmra.mrb[40].mxu0 %v5170_v25  ;;  %v5103_v62 = vsel %vm5067_vm8, %v5094_v24, %v8546_v8  ;;  %v5076_v39 = vsel %vm5067_vm8, %v5066_v50, %v8547_v58 }
 0x59c   :  { %v5175_v41 = vpack.c.bf16 %v5103_v62, %v5103_v62  ;;  %v5174_v11 = vpack.c.bf16 %v5076_v39, %v5076_v39 }
 0x59d   :  { %v4449_v16 = vpop.f32.mrb[36].mxu1 }
 0x59e   :  { %v8578_v21 = vpack.i.bf16 %v4449_v16, %v4444_v10  ;;  %v4451_v63 = vpop.f32.mrb[37].mxu1  ;;  %5498 = vmatprep.mubr.bf16.mxu0 %v5175_v41 }
 0x59f   :  { %v4452_v35 = vpop.f32.mrb[38].mxu1 }
 0x5a0   :  { %v4454_v43 = vpop.f32.mrb[39].mxu1  ;;  %8579 = vrot.lane.b32.xlu0 %v8578_v21, %s8865_s25 }
 0x5a3   :  { %5499 = vmatmul.mubr.bf16.gmra.mrb[44].mxu0 %v5174_v11 }
 0x5a4   :  { %8619 = vrot.lane.b32.xlu0 %v8618_v15, %s8864_s5 }
 0x5a5   :  { %v4457_v31 = vpop.f32.mrb[40].mxu1 }
 0x5a6   :  { %v8623_v9 = vpack.i.bf16 %v4457_v31, %v4452_v35  ;;  %v4459_v25 = vpop.f32.mrb[41].mxu1 }
 0x5a7   :  { %v4460_v6 = vpop.f32.mrb[42].mxu1 }
 0x5a8   :  { %v4462_v45 = vpop.f32.mrb[43].mxu1  ;;  %8624 = vrot.lane.b32.xlu0 %v8623_v9, %s8865_s25 }
 0x5ac   :  { %8639 = vrot.lane.b32.xlu0 %v8638_v4, %s8863_s4 }
 0x5ad   :  { %v4465_v22 = vpop.f32.mrb[44].mxu1 }
 0x5ae   :  { %v8658_v3 = vpack.i.bf16 %v4465_v22, %v4460_v6  ;;  %v4467_v46 = vpop.f32.mrb[45].mxu1  ;;  %v8751_v22 = vld [vmem:[%s13718_s6 + $0xc0] sm:$0xff]  }
 0x5af   :  { %v12976_v1 = vpop.f32.mrb[46].mxu1  ;;  %v8753_v46 = vld [vmem:[%s13718_s6 + $0xc8] sm:$0xff]   ;;  %7801 = vmatprep.subr.bf16.mxu0 %v8751_v22 }
 0x5b0   :  { %v4470_v54 = vpop.f32.mrb[47].mxu1  ;;  %8654 = vrot.lane.b32.xlu0 %v8653_v61, %s8864_s5 }
 0x5b4   :  { %8659 = vrot.lane.b32.xlu0 %v8658_v3, %s8865_s25  ;;  %v8752_v3 = vld [vmem:[%s13718_s6 + $0x80] sm:$0xff]  }
 0x5b5   :  { %v12983_v56 = vpop.f32.mrb[48].mxu1  ;;  %7802 = vmatpush3.bf16.msra.mxu0 %v8752_v3 }
 0x5b6   :  { %v4475_v29 = vpop.f32.mrb[49].mxu1  ;;  %7803 = vmatprep.subr.bf16.mxu0 %v8753_v46 }
 0x5b7   :  { %v12985_v15 = vpop.f32.mrb[50].mxu1 }
 0x5b8   :  { %v4478_v20 = vpop.f32.mrb[51].mxu1 }
 0x5bd   :  { %v12987_v33 = vpop.f32.mrb[52].mxu1 }
 0x5be   :  { %v4483_v4 = vpop.f32.mrb[53].mxu1 }
 0x5bf   :  { %v12989_v19 = vpop.f32.mrb[54].mxu1  ;;  %v8754_v4 = vld [vmem:[%s13718_s6 + $0x88] sm:$0xff]  }
 0x5c0   :  { %v4486_v57 = vpop.f32.mrb[55].mxu1  ;;  %7804 = vmatpush3.bf16.msra.mxu0 %v8754_v4 }
 0x5c1   :  { %v8755_v57 = vld [vmem:[%s13718_s6 + $0xd0] sm:$0xff]  }
 0x5c2   :  { %7805 = vmatprep.subr.bf16.mxu0 %v8755_v57 }
 0x5c4   :  { %v8550_v39 = vpop.permute.xlu0 %8549 }
 0x5c5   :  { %v12991_v2 = vpop.f32.mrb[56].mxu1 }
 0x5c6   :  { %v4491_v26 = vpop.f32.mrb[57].mxu1 }
 0x5c7   :  { %v12993_v28 = vpop.f32.mrb[58].mxu1 }
 0x5c8   :  { %v4494_v5 = vpop.f32.mrb[59].mxu1 }
 0x5ca   :  { %v13014_v31 = vpop.permute.xlu0 %8554 }
 0x5cd   :  { %v12995_v47 = vpop.f32.mrb[60].mxu1 }
 0x5ce   :  { %v4499_v61 = vpop.f32.mrb[61].mxu1 }
 0x5cf   :  { %v12997_v48 = vpop.f32.mrb[62].mxu1 }
 0x5d0   :  { %v4502_v32 = vpop.f32.mrb[63].mxu1 }
 0x5d1   :  { %v8756_v32 = vld [vmem:[%s13718_s6 + $0x90] sm:$0xff]  }
 0x5d2   :  { %v13016_v25 = vpop.permute.xlu0 %8559  ;;  %7806 = vmatpush3.bf16.msra.mxu0 %v8756_v32  ;;  %v8763_v32 = vld [vmem:[%s13718_s6 + $0xf0] sm:$0xff]  }
 0x5d5   :  { %v12999_v18 = vpop.f32.mrb[64].mxu1 }
 0x5d6   :  { %v4507_v34 = vpop.f32.mrb[65].mxu1 }
 0x5d7   :  { %v4508_v49 = vpop.f32.mrb[66].mxu1  ;;  %v8552_v34 = vunpack.i.h.bf16 %v8550_v39 }
 0x5d8   :  { %v4510_v10 = vpop.f32.mrb[67].mxu1 }
 0x5dd   :  { %v4513_v23 = vpop.f32.mrb[68].mxu1 }
 0x5de   :  { %v8583_v52 = vpack.i.bf16 %v4513_v23, %v4508_v49  ;;  %v4515_v27 = vpop.f32.mrb[69].mxu1  ;;  %v8551_v49 = vunpack.i.l.bf16 %v8550_v39  ;;  %v8757_v23 = vld [vmem:[%s13718_s6 + $0xd8] sm:$0xff]  }
 0x5df   :  { %v4516_v7 = vpop.f32.mrb[70].mxu1  ;;  %7807 = vmatprep.subr.bf16.mxu0 %v8757_v23 }
 0x5e0   :  { %v4518_v44 = vpop.f32.mrb[71].mxu1  ;;  %8584 = vrot.lane.b32.xlu1 %v8583_v52, %s8863_s4 }
 0x5e4   :  { %v8565_v20 = vpop.permute.xlu0 %8564 }
 0x5e5   :  { %v4521_v59 = vpop.f32.mrb[72].mxu1  ;;  %v8567_v52 = vunpack.i.h.bf16 %v8565_v20  ;;  %v8566_v27 = vunpack.i.l.bf16 %v8565_v20 }
 0x5e6   :  { %v8588_v8 = vpack.i.bf16 %v4521_v59, %v4516_v7  ;;  %v4523_v51 = vpop.f32.mrb[73].mxu1 }
 0x5e7   :  { %v4524_v30 = vpop.f32.mrb[74].mxu1  ;;  %v5105_v51 = vsel %vm636_vm2, %v12745_v40, %v8552_v34 }
 0x5e8   :  { %v4526_v58 = vpop.f32.mrb[75].mxu1  ;;  %8589 = vrot.lane.b32.xlu1 %v8588_v8, %s8863_s4  ;;  %v8758_v8 = vld [vmem:[%s13718_s6 + $0x98] sm:$0xff]  }
 0x5e9   :  { %7808 = vmatpush3.bf16.msra.mxu0 %v8758_v8 }
 0x5ec   :  { %v8570_v5 = vpop.permute.xlu0 %8569 }
 0x5ed   :  { %v4529_v24 = vpop.f32.mrb[76].mxu1  ;;  %v8572_v3 = vunpack.i.h.bf16 %v8570_v5  ;;  %v8571_v46 = vunpack.i.l.bf16 %v8570_v5  ;;  %v8762_v5 = vld [vmem:[%s13718_s6 + $0xa8] sm:$0xff]  }
 0x5ee   :  { %v8593_v53 = vpack.i.bf16 %v4529_v24, %v4524_v30  ;;  %v4531_v62 = vpop.f32.mrb[77].mxu1  ;;  %v5104_v30 = vsel %vm636_vm2, %v12737_v55, %v8551_v49 }
 0x5ef   :  { %v13003_v41 = vpop.f32.mrb[78].mxu1  ;;  %v5114_v62 = vsel %vm5057_vm7, %v5105_v51, %v8567_v52 }
 0x5f0   :  { %v4534_v50 = vpop.f32.mrb[79].mxu1  ;;  %8594 = vrot.lane.b32.xlu1 %v8593_v53, %s8863_s4  ;;  %v8759_v53 = vld [vmem:[%s13718_s6 + $0xe0] sm:$0xff]  }
 0x5f1   :  { %v5113_v50 = vsel %vm5057_vm7, %v5104_v30, %v8566_v27  ;;  %7809 = vmatprep.subr.bf16.mxu0 %v8759_v53 }
 0x5f5   :  { %v13006_v16 = vpop.f32.mrb[80].mxu1 }
 0x5f6   :  { %v8633_v21 = vpack.i.bf16 %v13006_v16, %v13003_v41  ;;  %v4539_v63 = vpop.f32.mrb[81].mxu1  ;;  %v5702_v16 = vld [vmem:[%s13719_s2 + $0x70] sm:$0xff] }
 0x5f7   :  { %v13010_v35 = vpop.f32.mrb[82].mxu1 }
 0x5f8   :  { %v8668_v43 = vpack.i.bf16 %v12874_v12, %v13010_v35  ;;  %v4542_v11 = vpop.f32.mrb[83].mxu1  ;;  %v5695_v12 = vld [vmem:[%s13719_s2 + $0x38] sm:$0xff] }
 0x5fd   :  { %v4545_v9 = vpop.f32.mrb[84].mxu1 }
 0x5fe   :  { %v4547_v6 = vpop.f32.mrb[85].mxu1 }
 0x5ff   :  { %v4548_v45 = vpop.f32.mrb[86].mxu1  ;;  %v8557_v6 = vunpack.i.h.bf16 %v13014_v31 }
 0x600   :  { %v8598_v54 = vpack.i.bf16 %v4548_v45, %v4545_v9  ;;  %v4550_v29 = vpop.f32.mrb[87].mxu1  ;;  %v8760_v9 = vld [vmem:[%s13718_s6 + $0xa0] sm:$0xff]   ;;  %v8556_v45 = vunpack.i.l.bf16 %v13014_v31  ;;  %v8761_v31 = vld [vmem:[%s13718_s6 + $0xe8] sm:$0xff]  }
 0x601   :  { %7810 = vmatpush3.bf16.msra.mxu0 %v8760_v9  ;;  %v5107_v4 = vsel %vm636_vm2, %v12763_v42, %v8557_v6  ;;  %v8765_v9 = vld [vmem:[%s13718_s6 + $0xf8] sm:$0xff]  }
 0x602   :  { %8599 = vrot.lane.b32.xlu1 %v8598_v54, %s8864_s5  ;;  %v5106_v57 = vsel %vm636_vm2, %v12756_v0, %v8556_v45  ;;  %v5116_v42 = vsel %vm5057_vm7, %v5107_v4, %v8572_v3  ;;  %7811 = vmatprep.subr.bf16.mxu0 %v8761_v31  ;;  %v8766_v31 = vld [vmem:[%s13718_s6 + $0xb8] sm:$0xff]  }
 0x603   :  { %v5115_v34 = vsel %vm5057_vm7, %v5106_v57, %v8571_v46 }
 0x605   :  { %v4553_v26 = vpop.f32.mrb[88].mxu1  ;;  %7812 = vmatpush3.bf16.msra.mxu0 %v8762_v5 }
 0x606   :  { %v4555_v61 = vpop.f32.mrb[89].mxu1  ;;  %7813 = vmatprep.subr.bf16.mxu0 %v8763_v32 }
 0x607   :  { %v4556_v10 = vpop.f32.mrb[90].mxu1 }
 0x608   :  { %v8603_v7 = vpack.i.bf16 %v4556_v10, %v4553_v26  ;;  %v4558_v44 = vpop.f32.mrb[91].mxu1 }
 0x609   :  { %v8561_v44 = vunpack.i.l.bf16 %v13016_v25 }
 0x60a   :  { %8604 = vrot.lane.b32.xlu1 %v8603_v7, %s8864_s5  ;;  %v8575_v59 = vpop.permute.xlu0 %8574  ;;  %v8562_v7 = vunpack.i.h.bf16 %v13016_v25  ;;  %v8764_v25 = vld [vmem:[%s13718_s6 + $0xb0] sm:$0xff]  }
 0x60b   :  { %v8577_v58 = vunpack.i.h.bf16 %v8575_v59  ;;  %v8576_v24 = vunpack.i.l.bf16 %v8575_v59  ;;  %7814 = vmatpush3.bf16.msra.mxu0 %v8764_v25 }
 0x60c   :  { %v5109_v53 = vsel %vm636_vm2, %v12781_v17, %v8562_v7  ;;  %7815 = vmatprep.subr.bf16.mxu0 %v8765_v9 }
 0x60d   :  { %v13054_v39 = vsel %vm5067_vm8, %v5113_v50, %v8576_v24  ;;  %v13057_v63 = vsel %vm5067_vm8, %v5114_v62, %v8577_v58  ;;  %v13059_v40 = vpop.f32.mrb[92].mxu1  ;;  %v5108_v62 = vsel %vm636_vm2, %v12774_v38, %v8561_v44 }
 0x60e   :  { %v5160_v55 = vpack.c.bf16 %v13057_v63, %v13054_v39  ;;  %v4563_v11 = vpop.f32.mrb[93].mxu1 }
 0x60f   :  { %v13068_v22 = vpop.f32.mrb[94].mxu1  ;;  %7816 = vmatpush3.bf16.msra.mxu0 %v8766_v31 }
 0x610   :  { %v8613_v54 = vpack.i.bf16 %v13068_v22, %v13059_v40  ;;  %v4566_v29 = vpop.f32.mrb[95].mxu1  ;;  %v5698_v22 = vld [vmem:[%s13719_s2 + $0x50] sm:$0xff] }
 0x612   :  { %v8580_v20 = vpop.permute.xlu0 %8579 }
 0x613   :  { %v8582_v26 = vunpack.i.h.bf16 %v8580_v20  ;;  %v8581_v61 = vunpack.i.l.bf16 %v8580_v20 }
 0x615   :  { %v13088_v0 = vsel %vm5067_vm8, %v5115_v34, %v8581_v61  ;;  %v13091_v49 = vsel %vm5067_vm8, %v5116_v42, %v8582_v26  ;;  %v13093_v10 = vpop.f32.mrb[96].mxu1  ;;  %v5688_v61 = vld [vmem:[%s13719_s2] sm:$0xff] }
 0x616   :  { %v5164_v23 = vpack.c.bf16 %v13091_v49, %v13088_v0  ;;  %v4571_v52 = vpop.f32.mrb[97].mxu1  ;;  %v8620_v27 = vpop.permute.xlu0 %8619 }
 0x617   :  { %v13099_v59 = vpop.f32.mrb[98].mxu1  ;;  %v8622_v8 = vunpack.i.h.bf16 %v8620_v27  ;;  %v8621_v51 = vunpack.i.l.bf16 %v8620_v27  ;;  %v5690_v27 = vld [vmem:[%s13719_s2 + $0x10] sm:$0xff] }
 0x618   :  { %v8648_v30 = vpack.i.bf16 %v13099_v59, %v13093_v10  ;;  %v4574_v58 = vpop.f32.mrb[99].mxu1  ;;  %v5689_v10 = vld [vmem:[%s13719_s2 + $0x8] sm:$0xff] }
 0x619   :  { %v5117_v6 = vsel %vm5057_vm7, %v5108_v62, %v8621_v51  ;;  %v5118_v45 = vsel %vm5057_vm7, %v5109_v53, %v8622_v8  ;;  %v5693_v59 = vld [vmem:[%s13719_s2 + $0x28] sm:$0xff] }
 0x61a   :  { %v8625_v24 = vpop.permute.xlu0 %8624 }
 0x61b   :  { %v8627_v50 = vunpack.i.h.bf16 %v8625_v24  ;;  %v8626_v11 = vunpack.i.l.bf16 %v8625_v24 }
 0x61d   :  { %v13116_v3 = vsel %vm5067_vm8, %v5117_v6, %v8626_v11  ;;  %v13119_v17 = vsel %vm5067_vm8, %v5118_v45, %v8627_v50  ;;  %v4577_v38 = vpop.f32.mrb[100].mxu1 }
 0x61e   :  { %v5168_v46 = vpack.c.bf16 %v13119_v17, %v13116_v3  ;;  %v8673_v29 = vpack.i.bf16 %v12931_v13, %v4577_v38  ;;  %v4579_v20 = vpop.f32.mrb[101].mxu1  ;;  %v8640_v4 = vpop.permute.xlu0 %8639  ;;  %v5694_v38 = vld [vmem:[%s13719_s2 + $0x30] sm:$0xff] }
 0x61f   :  { %v4580_v57 = vpop.f32.mrb[102].mxu1  ;;  %v8642_v32 = vunpack.i.h.bf16 %v8640_v4  ;;  %v8641_v34 = vunpack.i.l.bf16 %v8640_v4 }
 0x620   :  { %v4582_v26 = vpop.f32.mrb[103].mxu1  ;;  %8674 = vrot.lane.b32.xlu0 %v8673_v29, %s8864_s5 }
 0x621   :  { %v5111_v51 = vsel %vm636_vm2, %v12799_v60, %v8642_v32  ;;  %v5110_v58 = vsel %vm636_vm2, %v12792_v14, %v8641_v34  ;;  %v5692_v14 = vld [vmem:[%s13719_s2 + $0x20] sm:$0xff] }
 0x622   :  { %v8655_v5 = vpop.permute.xlu0 %8654  ;;  %v5696_v26 = vld [vmem:[%s13719_s2 + $0x40] sm:$0xff] }
 0x623   :  { %v8657_v13 = vunpack.i.h.bf16 %v8655_v5  ;;  %v8656_v42 = vunpack.i.l.bf16 %v8655_v5  ;;  %v5700_v32 = vld [vmem:[%s13719_s2 + $0x60] sm:$0xff] }
 0x624   :  { %5705 = vperm.xlu0 %8411, %v5688_v61  }
 0x625   :  { %v4585_v52 = vpop.f32.mrb[104].mxu1  ;;  %v5119_v50 = vsel %vm5057_vm7, %v5110_v58, %v8656_v42  ;;  %v5120_v11 = vsel %vm5057_vm7, %v5111_v51, %v8657_v13  ;;  %v5699_v51 = vld [vmem:[%s13719_s2 + $0x58] sm:$0xff] }
 0x626   :  { %v8608_v7 = vpack.i.bf16 %v4585_v52, %v4580_v57  ;;  %v4587_v44 = vpop.f32.mrb[105].mxu1  ;;  %v8660_v8 = vpop.permute.xlu0 %8659 }
 0x627   :  { %v8662_v24 = vunpack.i.h.bf16 %v8660_v8  ;;  %v8661_v53 = vunpack.i.l.bf16 %v8660_v8  ;;  %v4588_v62 = vpop.f32.mrb[106].mxu1  ;;  %v5697_v44 = vld [vmem:[%s13719_s2 + $0x48] sm:$0xff] }
 0x628   :  { %v4590_v25 = vpop.f32.mrb[107].mxu1  ;;  %8609 = vrot.lane.b32.xlu1 %v8608_v7, %s8865_s25  ;;  %5711 = vperm.xlu0 %8411, %v5690_v27  }
 0x629   :  { %v13142_v9 = vsel %vm5067_vm8, %v5119_v50, %v8661_v53  ;;  %v13145_v6 = vsel %vm5067_vm8, %v5120_v11, %v8662_v24  ;;  %v5701_v11 = vld [vmem:[%s13719_s2 + $0x68] sm:$0xff] }
 0x62a   :  { %v5172_v60 = vpack.c.bf16 %v13145_v6, %v13142_v9  ;;  %v14303_v9 = vld [vmem:[#allocation73_spill] sm:$0xff] }
 0x62c   :  { %8614 = vrot.lane.b32.xlu1 %v8613_v54, %s8864_s5  ;;  %5717 = vperm.xlu0 %8411, %v5692_v14   ;;  %v5703_v14 = vld [vmem:[%s13719_s2 + $0x78] sm:$0xff] }
 0x62d   :  { %v4593_v45 = vpop.f32.mrb[108].mxu1 }
 0x62e   :  { %v8628_v29 = vpack.i.bf16 %v4593_v45, %v4588_v62  ;;  %v4595_v20 = vpop.f32.mrb[109].mxu1 }
 0x62f   :  { %v4596_v4 = vpop.f32.mrb[110].mxu1 }
 0x630   :  { %v4598_v57 = vpop.f32.mrb[111].mxu1  ;;  %8629 = vrot.lane.b32.xlu1 %v8628_v29, %s8865_s25  ;;  %5723 = vperm.xlu0 %8411, %v5694_v38  }
 0x634   :  { %8634 = vrot.lane.b32.xlu1 %v8633_v21, %s8863_s4  ;;  %5729 = vperm.xlu0 %8411, %v5696_v26  }
 0x635   :  { %v4601_v40 = vpop.f32.mrb[112].mxu1 }
 0x636   :  { %v8643_v54 = vpack.i.bf16 %v4601_v40, %v4596_v4  ;;  %v4603_v61 = vpop.f32.mrb[113].mxu1 }
 0x637   :  { %v4604_v31 = vpop.f32.mrb[114].mxu1 }
 0x638   :  { %v4606_v5 = vpop.f32.mrb[115].mxu1  ;;  %8644 = vrot.lane.b32.xlu1 %v8643_v54, %s8865_s25  ;;  %5735 = vperm.xlu0 %8411, %v5698_v22  }
 0x63c   :  { %8649 = vrot.lane.b32.xlu1 %v8648_v30, %s8864_s5  ;;  %5741 = vperm.xlu0 %8411, %v5700_v32  }
 0x63d   :  { %v4609_v41 = vpop.f32.mrb[116].mxu1 }
 0x63e   :  { %v8663_v21 = vpack.i.bf16 %v4609_v41, %v4604_v31  ;;  %v4611_v34 = vpop.f32.mrb[117].mxu1 }
 0x63f   :  { %v4612_v13 = vpop.f32.mrb[118].mxu1 }
 0x640   :  { %v8678_v42 = vpack.i.bf16 %v12976_v1, %v4612_v13  ;;  %v4614_v52 = vpop.f32.mrb[119].mxu1  ;;  %8664 = vrot.lane.b32.xlu1 %v8663_v21, %s8865_s25  ;;  %5747 = vperm.xlu0 %8411, %v5702_v16   ;;  %v5691_v1 = vld [vmem:[%s13719_s2 + $0x18] sm:$0xff] }
 0x644   :  { %8669 = vrot.lane.b32.xlu1 %v8668_v43, %s8863_s4 }
 0x648   :  { %8679 = vrot.lane.b32.xlu1 %v8678_v42, %s8865_s25 }
 0x64c   :  { %5708 = vperm.xlu1 %8412, %v5689_v10  }
 0x650   :  { %5714 = vperm.xlu1 %8412, %v5691_v1  }
 0x652   :  { %v8585_v34 = vpop.permute.xlu1 %8584 }
 0x653   :  { %v8587_v1 = vunpack.i.h.bf16 %v8585_v34 }
 0x654   :  { %5720 = vperm.xlu1 %8412, %v5693_v59   ;;  %v8586_v59 = vunpack.i.l.bf16 %v8585_v34 }
 0x656   :  { %v7771_v35 = vpop.f32.mrb[28].mxu0 }
 0x657   :  { %v7772_v43 = vpop.f32.mrb[29].mxu0 }
 0x658   :  { %v13200_v30 = vadd.f32 %v7772_v43, %v7771_v35  ;;  %5726 = vperm.xlu1 %8412, %v5695_v12   ;;  %v7774_v27 = vpop.f32.mrb[30].mxu0 }
 0x659   :  { %v7775_v7 = vpop.f32.mrb[31].mxu0 }
 0x65a   :  { %v13205_v8 = vadd.f32 %v7775_v7, %v7774_v27  ;;  %v8590_v13 = vpop.permute.xlu1 %8589  ;;  %v5132_v27 = vsel %vm636_vm2, %v12985_v15, %v8587_v1  ;;  %v5131_v7 = vsel %vm636_vm2, %v12983_v56, %v8586_v59 }
 0x65c   :  { %5732 = vperm.xlu1 %8412, %v5697_v44  }
 0x65e   :  { %v7777_v58 = vpop.f32.mrb[32].mxu0 }
 0x65f   :  { %v7778_v24 = vpop.f32.mrb[33].mxu0 }
 0x660   :  { %v13210_v53 = vadd.f32 %v7778_v24, %v7777_v58  ;;  %5738 = vperm.xlu1 %8412, %v5699_v51   ;;  %v7780_v62 = vpop.f32.mrb[34].mxu0 }
 0x661   :  { %v7781_v50 = vpop.f32.mrb[35].mxu0 }
 0x662   :  { %v13215_v25 = vadd.f32 %v7781_v50, %v7780_v62  ;;  %v8595_v42 = vpop.permute.xlu1 %8594 }
 0x663   :  { %v8597_v63 = vunpack.i.h.bf16 %v8595_v42 }
 0x664   :  { %5744 = vperm.xlu1 %8412, %v5701_v11  }
 0x666   :  { %v7783_v45 = vpop.f32.mrb[36].mxu0 }
 0x667   :  { %v7784_v38 = vpop.f32.mrb[37].mxu0 }
 0x668   :  { %v13220_v29 = vadd.f32 %v7784_v38, %v7783_v45  ;;  %5750 = vperm.xlu1 %8412, %v5703_v14   ;;  %v7786_v20 = vpop.f32.mrb[38].mxu0  ;;  %v8592_v45 = vunpack.i.h.bf16 %v8590_v13  ;;  %v8591_v38 = vunpack.i.l.bf16 %v8590_v13 }
 0x669   :  { %v7787_v4 = vpop.f32.mrb[39].mxu0 }
 0x66a   :  { %v13222_v57 = vadd.f32 %v7787_v4, %v7786_v20  ;;  %v5134_v15 = vsel %vm636_vm2, %v12989_v19, %v8592_v45  ;;  %v5136_v19 = vsel %vm636_vm2, %v12993_v28, %v8597_v63 }
 0x66e   :  { %v7789_v26 = vpop.f32.mrb[40].mxu0 }
 0x66f   :  { %v7790_v40 = vpop.f32.mrb[41].mxu0 }
 0x670   :  { %v13224_v22 = vadd.f32 %v7790_v40, %v7789_v26  ;;  %v7792_v54 = vpop.f32.mrb[42].mxu0  ;;  %v5133_v26 = vsel %vm636_vm2, %v12987_v33, %v8591_v38 }
 0x671   :  { %v7793_v61 = vpop.f32.mrb[43].mxu0 }
 0x672   :  { %v13226_v31 = vadd.f32 %v7793_v61, %v7792_v54 }
 0x674   :  { %v8600_v52 = vpop.permute.xlu1 %8599 }
 0x675   :  { %v8602_v12 = vunpack.i.h.bf16 %v8600_v52  ;;  %v8601_v35 = vunpack.i.l.bf16 %v8600_v52 }
 0x676   :  { %v7795_v5 = vpop.f32.mrb[44].mxu0 }
 0x677   :  { %v7796_v32 = vpop.f32.mrb[45].mxu0  ;;  %v5140_v58 = vsel %vm5057_vm7, %v5131_v7, %v8601_v35  ;;  %v5141_v24 = vsel %vm5057_vm7, %v5132_v27, %v8602_v12 }
 0x678   :  { %v13228_v41 = vadd.f32 %v7796_v32, %v7795_v5  ;;  %v7798_v16 = vpop.f32.mrb[46].mxu0 }
 0x679   :  { %v7799_v21 = vpop.f32.mrb[47].mxu0 }
 0x67c   :  { %v8605_v10 = vpop.permute.xlu1 %8604 }
 0x67d   :  { %v8607_v20 = vunpack.i.h.bf16 %v8605_v10  ;;  %v8606_v4 = vunpack.i.l.bf16 %v8605_v10 }
 0x67f   :  { %v5142_v61 = vsel %vm5057_vm7, %v5133_v26, %v8606_v4  ;;  %v5143_v5 = vsel %vm5057_vm7, %v5134_v15, %v8607_v20 }
 0x692   :  { %v8675_v17 = vpop.permute.xlu0 %8674 }
 0x693   :  { %v8677_v38 = vunpack.i.h.bf16 %v8675_v17  ;;  %v8676_v20 = vunpack.i.l.bf16 %v8675_v17 }
 0x69a   :  { %v8610_v43 = vpop.permute.xlu1 %8609 }
 0x69b   :  { %v8612_v44 = vunpack.i.h.bf16 %v8610_v43  ;;  %v8611_v51 = vunpack.i.l.bf16 %v8610_v43 }
 0x69d   :  { %v5149_v62 = vsel %vm5067_vm8, %v5140_v58, %v8611_v51  ;;  %v5150_v50 = vsel %vm5067_vm8, %v5141_v24, %v8612_v44 }
 0x69e   :  { %v8615_v11 = vpop.permute.xlu1 %8614  ;;  %v5161_v14 = vpack.c.bf16 %v5150_v50, %v5149_v62 }
 0x69f   :  { %v8617_v34 = vunpack.i.h.bf16 %v8615_v11  ;;  %v8616_v13 = vunpack.i.l.bf16 %v8615_v11 }
 0x6a0   :  { %5538 = vmatprep.mubr.bf16.mxu0 %v5161_v14 }
 0x6a1   :  { %5539 = vmatmul.mubr.bf16.vlgmr.msra.gmra.mrb[48].mxu0 %v5160_v55  ;;  %v8596_v55 = vunpack.i.l.bf16 %v8595_v42  ;;  %v5145_v42 = vsel %vm5057_vm7, %v5136_v19, %v8617_v34 }
 0x6a2   :  { %v8630_v56 = vpop.permute.xlu1 %8629 }
 0x6a3   :  { %v8632_v40 = vunpack.i.h.bf16 %v8630_v56  ;;  %v8631_v54 = vunpack.i.l.bf16 %v8630_v56  ;;  %v5135_v52 = vsel %vm636_vm2, %v12991_v2, %v8596_v55 }
 0x6a4   :  { %v5144_v59 = vsel %vm5057_vm7, %v5135_v52, %v8616_v13 }
 0x6a5   :  { %v5151_v32 = vsel %vm5067_vm8, %v5142_v61, %v8631_v54  ;;  %v5152_v16 = vsel %vm5067_vm8, %v5143_v5, %v8632_v40 }
 0x6a6   :  { %v8635_v21 = vpop.permute.xlu1 %8634  ;;  %v5165_v39 = vpack.c.bf16 %v5152_v16, %v5151_v32 }
 0x6a7   :  { %v8637_v49 = vunpack.i.h.bf16 %v8635_v21 }
 0x6a8   :  { %5546 = vmatprep.mubr.bf16.mxu0 %v5165_v39 }
 0x6a9   :  { %5547 = vmatmul.mubr.bf16.gmra.mrb[52].mxu0 %v5164_v23  ;;  %v8636_v23 = vunpack.i.l.bf16 %v8635_v21  ;;  %v5138_v28 = vsel %vm636_vm2, %v12997_v48, %v8637_v49 }
 0x6aa   :  { %v8645_v33 = vpop.permute.xlu1 %8644 }
 0x6ab   :  { %v8647_v10 = vunpack.i.h.bf16 %v8645_v33  ;;  %v8646_v1 = vunpack.i.l.bf16 %v8645_v33  ;;  %v5137_v44 = vsel %vm636_vm2, %v12995_v47, %v8636_v23 }
 0x6ad   :  { %v5153_v12 = vsel %vm5067_vm8, %v5144_v59, %v8646_v1  ;;  %v5154_v35 = vsel %vm5067_vm8, %v5145_v42, %v8647_v10 }
 0x6ae   :  { %v8650_v43 = vpop.permute.xlu1 %8649  ;;  %v5169_v0 = vpack.c.bf16 %v5154_v35, %v5153_v12 }
 0x6af   :  { %v8652_v27 = vunpack.i.h.bf16 %v8650_v43  ;;  %v8651_v7 = vunpack.i.l.bf16 %v8650_v43 }
 0x6b0   :  { %5554 = vmatprep.mubr.bf16.mxu0 %v5169_v0 }
 0x6b1   :  { %5555 = vmatmul.mubr.bf16.gmra.mrb[56].mxu0 %v5168_v46  ;;  %v5146_v24 = vsel %vm5057_vm7, %v5137_v44, %v8651_v7  ;;  %v5147_v62 = vsel %vm5057_vm7, %v5138_v28, %v8652_v27 }
 0x6b2   :  { %v8665_v2 = vpop.permute.xlu1 %8664 }
 0x6b3   :  { %v8667_v51 = vunpack.i.h.bf16 %v8665_v2  ;;  %v8666_v58 = vunpack.i.l.bf16 %v8665_v2 }
 0x6b5   :  { %v5155_v50 = vsel %vm5067_vm8, %v5146_v24, %v8666_v58  ;;  %v5156_v11 = vsel %vm5067_vm8, %v5147_v62, %v8667_v51 }
 0x6b6   :  { %v8670_v14 = vpop.permute.xlu1 %8669  ;;  %v5173_v3 = vpack.c.bf16 %v5156_v11, %v5155_v50 }
 0x6b7   :  { %v8672_v46 = vunpack.i.h.bf16 %v8670_v14  ;;  %v8671_v45 = vunpack.i.l.bf16 %v8670_v14 }
 0x6b8   :  { %5562 = vmatprep.mubr.bf16.mxu0 %v5173_v3 }
 0x6b9   :  { %v5112_v48 = vsel %vm636_vm2, %v12810_v37, %v8672_v46  ;;  %v5139_v47 = vsel %vm636_vm2, %v12999_v18, %v8671_v45  ;;  %5563 = vmatmul.mubr.bf16.gmra.mrb[60].mxu0 %v5172_v60  ;;  %v5706_v18 = vpop.permute.xlu0 %5705 }
 0x6ba   :  { %v8680_v4 = vpop.permute.xlu1 %8679  ;;  %v5121_v26 = vsel %vm5057_vm7, %v5112_v48, %v8677_v38  ;;  %v5148_v40 = vsel %vm5057_vm7, %v5139_v47, %v8676_v20  ;;  %vm5752_vm2 = vcmp.eq.s32.totalorder %v14303_v9, %v5706_v18 }
 0x6bb   :  { %v8682_v56 = vunpack.i.h.bf16 %v8680_v4  ;;  %v8681_v15 = vunpack.i.l.bf16 %v8680_v4  ;;  %v5768_v60 = vsel %vm5752_vm2, 1.0, %v14121_v36 }
 0x6bd   :  { %v5130_v54 = vsel %vm5067_vm8, %v5121_v26, %v8682_v56  ;;  %v5157_v37 = vsel %vm5067_vm8, %v5148_v40, %v8681_v15 }
 0x6be   :  { %v5176_v61 = vpack.c.bf16 %v5130_v54, %v5130_v54  ;;  %v5177_v5 = vpack.c.bf16 %v5157_v37, %v5157_v37 }
 0x6c0   :  { %5570 = vmatprep.mubr.bf16.mxu0 %v5177_v5 }
 0x6c1   :  { %5571 = vmatmul.mubr.bf16.gmra.mrb[64].mxu0 %v5176_v61 }
 0x6cb   :  { %v5709_v6 = vpop.permute.xlu1 %5708 }
 0x6cc   :  { %vm5753_vm5 = vcmp.eq.s32.totalorder %v14303_v9, %v5709_v6 }
 0x6cd   :  { %v5769_v32 = vsel %vm5753_vm5, 1.0, %v14121_v36 }
 0x6ce   :  { %v5784_v16 = vpack.c.bf16 %v5769_v32, %v5768_v60 }
 0x6d0   :  { %8101 = vmatprep.mubr.msk.bf16.mxu0 %vm5792_vm6, %v5784_v16 }
 0x774   :  { %v7817_v21 = vpop.f32.mrb[48].mxu0 }
 0x775   :  { %v7818_v39 = vpop.f32.mrb[49].mxu0 }
 0x776   :  { %v7819_v63 = vadd.f32 %v7818_v39, %v7817_v21  ;;  %v7820_v55 = vpop.f32.mrb[50].mxu0 }
 0x777   :  { %v7821_v34 = vpop.f32.mrb[51].mxu0 }
 0x778   :  { %v13288_v13 = vadd.f32 %v7819_v63, %v13200_v30  ;;  %v7822_v33 = vadd.f32 %v7821_v34, %v7820_v55 }
 0x77a   :  { %v5602_v19 = vmul.f32 %v13288_v13, %v13288_v13  ;;  %v13293_v52 = vadd.f32 %v7822_v33, %v13205_v8  ;;  %v5578_v10 = vsel %vm5057_vm7, %v13288_v13, 0.0 }
 0x77c   :  { %v5579_v1 = vsel %vm5057_vm7, %v13293_v52, 0.0  ;;  %v5603_v59 = vmul.f32 %v13293_v52, %v13293_v52  ;;  %v7823_v42 = vpop.f32.mrb[52].mxu0  ;;  %v5611_v35 = vsel %vm5057_vm7, %v5602_v19, 0.0 }
 0x77d   :  { %v5580_v12 = vadd.f32 %v5579_v1, %v5578_v10  ;;  %v7824_v30 = vpop.f32.mrb[53].mxu0 }
 0x77e   :  { %v5612_v43 = vsel %vm5057_vm7, %v5603_v59, 0.0  ;;  %v7825_v0 = vadd.f32 %v7824_v30, %v7823_v42  ;;  %v7826_v49 = vpop.f32.mrb[54].mxu0 }
 0x77f   :  { %v5613_v8 = vadd.f32 %v5612_v43, %v5611_v35  ;;  %v7827_v23 = vpop.f32.mrb[55].mxu0 }
 0x780   :  { %v13304_v27 = vadd.f32 %v7825_v0, %v13210_v53  ;;  %v7828_v7 = vadd.f32 %v7827_v23, %v7826_v49 }
 0x782   :  { %v5581_v2 = vsel %vm5057_vm7, %v13304_v27, 0.0  ;;  %v5604_v28 = vmul.f32 %v13304_v27, %v13304_v27  ;;  %v13311_v44 = vadd.f32 %v7828_v7, %v13215_v25 }
 0x783   :  { %v5582_v51 = vadd.f32 %v5581_v2, %v5580_v12 }
 0x784   :  { %v5614_v58 = vsel %vm5057_vm7, %v5604_v28, 0.0  ;;  %v5583_v24 = vsel %vm5057_vm7, %v13311_v44, 0.0  ;;  %v5605_v53 = vmul.f32 %v13311_v44, %v13311_v44  ;;  %v7829_v62 = vpop.f32.mrb[56].mxu0 }
 0x785   :  { %v5615_v50 = vadd.f32 %v5614_v58, %v5613_v8  ;;  %v5584_v11 = vadd.f32 %v5583_v24, %v5582_v51  ;;  %v7830_v14 = vpop.f32.mrb[57].mxu0 }
 0x786   :  { %v5616_v3 = vsel %vm5057_vm7, %v5605_v53, 0.0  ;;  %v7831_v17 = vadd.f32 %v7830_v14, %v7829_v62  ;;  %v7832_v46 = vpop.f32.mrb[58].mxu0 }
 0x787   :  { %v5617_v45 = vadd.f32 %v5616_v3, %v5615_v50  ;;  %v7833_v25 = vpop.f32.mrb[59].mxu0 }
 0x788   :  { %v13320_v48 = vadd.f32 %v7831_v17, %v13220_v29  ;;  %v7834_v47 = vadd.f32 %v7833_v25, %v7832_v46 }
 0x78a   :  { %v5585_v38 = vsel %vm5057_vm7, %v13320_v48, 0.0  ;;  %v5606_v20 = vmul.f32 %v13320_v48, %v13320_v48  ;;  %v13327_v4 = vadd.f32 %v7834_v47, %v13222_v57 }
 0x78b   :  { %v5586_v56 = vadd.f32 %v5585_v38, %v5584_v11  ;;  %v5637_v38 = vld [vmem:[%s13720_s7] sm:$0x1] }
 0x78c   :  { %v5618_v15 = vsel %vm5057_vm7, %v5606_v20, 0.0  ;;  %v5587_v26 = vsel %vm5057_vm7, %v13327_v4, 0.0  ;;  %v5607_v29 = vmul.f32 %v13327_v4, %v13327_v4  ;;  %v7835_v40 = vpop.f32.mrb[60].mxu0 }
 0x78d   :  { %v5619_v54 = vadd.f32 %v5618_v15, %v5617_v45  ;;  %v5588_v37 = vadd.f32 %v5587_v26, %v5586_v56  ;;  %v7836_v61 = vpop.f32.mrb[61].mxu0  ;;  %v5641_v15 = vld [vmem:[%s13721_s8] sm:$0x1] }
 0x78e   :  { %v5620_v5 = vsel %vm5057_vm7, %v5607_v29, 0.0  ;;  %v7837_v18 = vadd.f32 %v7836_v61, %v7835_v40  ;;  %v7838_v6 = vpop.f32.mrb[62].mxu0  ;;  %v14304_v29 = vld [vmem:[#allocation84_spill] sm:$0xff] }
 0x78f   :  { %v5621_v60 = vadd.f32 %v5620_v5, %v5619_v54  ;;  %v7839_v57 = vpop.f32.mrb[63].mxu0 }
 0x790   :  { %v5565_v32 = vadd.f32 %v7837_v18, %v13224_v22  ;;  %v7840_v16 = vadd.f32 %v7839_v57, %v7838_v6 }
 0x792   :  { %v5589_v21 = vsel %vm5057_vm7, %v5565_v32, 0.0  ;;  %v5608_v39 = vmul.f32 %v5565_v32, %v5565_v32  ;;  %v5568_v63 = vadd.f32 %v7840_v16, %v13226_v31 }
 0x793   :  { %v5590_v55 = vadd.f32 %v5589_v21, %v5588_v37 }
 0x794   :  { %v5622_v34 = vsel %vm5057_vm7, %v5608_v39, 0.0  ;;  %v5591_v33 = vsel %vm5057_vm7, %v5568_v63, 0.0  ;;  %v5609_v19 = vmul.f32 %v5568_v63, %v5568_v63  ;;  %v7841_v10 = vpop.f32.mrb[64].mxu0 }
 0x795   :  { %v5623_v1 = vadd.f32 %v5622_v34, %v5621_v60  ;;  %v5592_v59 = vadd.f32 %v5591_v33, %v5590_v55  ;;  %v7842_v42 = vpop.f32.mrb[65].mxu0 }
 0x796   :  { %v5624_v12 = vsel %vm5057_vm7, %v5609_v19, 0.0  ;;  %v7843_v30 = vadd.f32 %v7842_v42, %v7841_v10  ;;  %v7844_v22 = vpop.f32.mrb[66].mxu0 }
 0x797   :  { %v5625_v35 = vadd.f32 %v5624_v12, %v5623_v1  ;;  %v7845_v43 = vpop.f32.mrb[67].mxu0 }
 0x798   :  { %v5573_v0 = vadd.f32 %v7843_v30, %v13228_v41 }
 0x79a   :  { %v5593_v31 = vsel %vm5057_vm7, %v5573_v0, 0.0  ;;  %v5610_v49 = vmul.f32 %v5573_v0, %v5573_v0 }
 0x79b   :  { %v5594_v8 = vadd.f32 %v5593_v31, %v5592_v59  ;;  %v5715_v59 = vpop.permute.xlu1 %5714 }
 0x79c   :  { %v5626_v23 = vsel %vm5057_vm7, %v5610_v49, 0.0  ;;  %vm5755_vm8 = vcmp.eq.s32.totalorder %v14303_v9, %v5715_v59  ;;  %v8777_v59 = vld [vmem:[%s13722_s9 + $0x68] sm:$0xff]  }
 0x79d   :  { %v5595_v7 = vrot.slane %v5594_v8, 4  ;;  %v5627_v2 = vadd.f32 %v5626_v23, %v5625_v35  ;;  %v5712_v35 = vpop.permute.xlu0 %5711 }
 0x79e   :  { %vm5754_vm11 = vcmp.eq.s32.totalorder %v14303_v9, %v5712_v35 }
 0x79f   :  { %v5596_v28 = vadd.f32 %v5595_v7, %v5594_v8  ;;  %v5628_v51 = vrot.slane %v5627_v2, 4  ;;  %v5721_v49 = vpop.permute.xlu1 %5720 }
 0x7a0   :  { %vm5757_vm9 = vcmp.eq.s32.totalorder %v14303_v9, %v5721_v49 }
 0x7a1   :  { %v5597_v58 = vrot.slane %v5596_v28, 2  ;;  %v5629_v24 = vadd.f32 %v5628_v51, %v5627_v2  ;;  %v5718_v8 = vpop.permute.xlu0 %5717 }
 0x7a2   :  { %vm5756_vm12 = vcmp.eq.s32.totalorder %v14303_v9, %v5718_v8 }
 0x7a3   :  { %v5598_v53 = vadd.f32 %v5597_v58, %v5596_v28  ;;  %v5630_v62 = vrot.slane %v5629_v24, 2  ;;  %v5727_v23 = vpop.permute.xlu1 %5726  ;;  %v5771_v58 = vsel %vm5755_vm8, 1.0, %v14121_v36 }
 0x7a4   :  { %vm5759_vm13 = vcmp.eq.s32.totalorder %v14303_v9, %v5727_v23 }
 0x7a5   :  { %v5599_v50 = vrot.slane %v5598_v53, 1  ;;  %v5631_v11 = vadd.f32 %v5630_v62, %v5629_v24  ;;  %v5724_v2 = vpop.permute.xlu0 %5723 }
 0x7a6   :  { %vm5758_vm15 = vcmp.eq.s32.totalorder %v14303_v9, %v5724_v2 }
 0x7a7   :  { %v5600_v14 = vadd.f32 %v5599_v50, %v5598_v53  ;;  %v5632_v3 = vrot.slane %v5631_v11, 1  ;;  %v5733_v51 = vpop.permute.xlu1 %5732  ;;  %v5773_v53 = vsel %vm5757_vm9, 1.0, %v14121_v36  ;;  %v5770_v50 = vsel %vm5754_vm11, 1.0, %v14121_v36 }
 0x7a8   :  { %vm5761_vm14 = vcmp.eq.s32.totalorder %v14303_v9, %v5733_v51 }
 0x7a9   :  { %v5601_v17 = vmul.f32 0.013888889, %v5600_v14  ;;  %v5633_v41 = vadd.f32 %v5632_v3, %v5631_v11  ;;  %v5730_v24 = vpop.permute.xlu0 %5729  ;;  %v5772_v11 = vsel %vm5756_vm12, 1.0, %v14121_v36  ;;  %v5785_v14 = vpack.c.bf16 %v5771_v58, %v5770_v50 }
 0x7aa   :  { %v5786_v3 = vpack.c.bf16 %v5773_v53, %v5772_v11  ;;  %vm5760_vm1 = vcmp.eq.s32.totalorder %v14303_v9, %v5730_v24 }
 0x7ab   :  { %v5634_v46 = vmul.f32 0.013888889, %v5633_v41  ;;  %v5635_v45 = vmul.f32 %v5601_v17, %v5601_v17 }
 0x7ad   :  { %v5636_v25 = vsub.f32 %v5634_v46, %v5635_v45  ;;  %v5736_v41 = vpop.permute.xlu0 %5735  ;;  %v5775_v46 = vsel %vm5759_vm13, 1.0, %v14121_v36  ;;  %v5777_v45 = vsel %vm5761_vm14, 1.0, %v14121_v36  ;;  %vm6688_vm13 = vcmask 64512  }
 0x7ae   :  { %vm5762_vm2 = vcmp.eq.s32.totalorder %v14303_v9, %v5736_v41 }
 0x7af   :  { %v5638_v47 = vadd.f32 1e-05, %v5636_v25  ;;  %v5774_v25 = vsel %vm5758_vm15, 1.0, %v14121_v36 }
 0x7b1   :  { %8849 = vrsqrt.f32 %v5638_v47  ;;  %v5776_v47 = vsel %vm5760_vm1, 1.0, %v14121_v36 }
 0x7bb   :  { %v8850_v20 = vpop.eup %8849 }
 0x7bc   :  { %v5640_v56 = vmul.f32 %v8850_v20, %v5637_v38  ;;  %v5787_v38 = vpack.c.bf16 %v5775_v46, %v5774_v25  ;;  %v8784_v25 = vld [vmem:[%s13722_s9 + $0x80] sm:$0xff]  }
 0x7be   :  { %v5642_v26 = vmul.f32 %v5640_v56, %v5601_v17  ;;  %v5648_v40 = vrot.slane %v5640_v56, %v14304_v29  ;;  %v5739_v17 = vpop.permute.xlu1 %5738  ;;  %v5788_v56 = vpack.c.bf16 %v5777_v45, %v5776_v47  ;;  %v8785_v47 = vld [vmem:[%s13722_s9 + $0xc8] sm:$0xff]  }
 0x7bf   :  { %vm5763_vm3 = vcmp.eq.s32.totalorder %v14303_v9, %v5739_v17 }
 0x7c0   :  { %v5643_v54 = vsub.f32 %v5641_v15, %v5642_v26  ;;  %v5658_v37 = vmul.f32 %v5648_v40, %v5573_v0  ;;  %v5650_v61 = vmul.f32 %v5648_v40, %v13288_v13  ;;  %v5651_v5 = vmul.f32 %v5648_v40, %v13293_v52  ;;  %v5742_v15 = vpop.permute.xlu0 %5741 }
 0x7c1   :  { %v5652_v18 = vmul.f32 %v5648_v40, %v13304_v27  ;;  %v5653_v6 = vmul.f32 %v5648_v40, %v13311_v44  ;;  %v5654_v60 = vmul.f32 %v5648_v40, %v13320_v48  ;;  %v5655_v57 = vmul.f32 %v5648_v40, %v13327_v4 }
 0x7c2   :  { %v5663_v16 = vrot.slane %v5643_v54, %v14304_v29  ;;  %v5656_v21 = vmul.f32 %v5648_v40, %v5565_v32  ;;  %v5657_v39 = vmul.f32 %v5648_v40, %v5568_v63  ;;  %v5745_v20 = vpop.permute.xlu1 %5744  ;;  %vm5764_vm5 = vcmp.eq.s32.totalorder %v14303_v9, %v5742_v15  ;;  %v8787_v15 = vld [vmem:[%s13722_s9 + $0xd0] sm:$0xff]  }
 0x7c3   :  { %vm5765_vm4 = vcmp.eq.s32.totalorder %v14303_v9, %v5745_v20  ;;  %v5779_v26 = vsel %vm5763_vm3, 1.0, %v14121_v36  ;;  %v5778_v54 = vsel %vm5762_vm2, 1.0, %v14121_v36  ;;  %v8786_v20 = vld [vmem:[%s13722_s9 + $0x88] sm:$0xff]  }
 0x7c4   :  { %v5665_v55 = vadd.f32 %v5663_v16, %v5650_v61  ;;  %v5666_v34 = vadd.f32 %v5663_v16, %v5651_v5  ;;  %v5667_v33 = vadd.f32 %v5663_v16, %v5652_v18  ;;  %v5668_v19 = vadd.f32 %v5663_v16, %v5653_v6  ;;  %v5748_v18 = vpop.permute.xlu0 %5747 }
 0x7c5   :  { %v5669_v10 = vadd.f32 %v5663_v16, %v5654_v60  ;;  %v5670_v13 = vadd.f32 %v5663_v16, %v5655_v57  ;;  %v5671_v1 = vadd.f32 %v5663_v16, %v5656_v21  ;;  %v5672_v52 = vadd.f32 %v5663_v16, %v5657_v39  ;;  %v8767_v21 = vld [vmem:[%s13722_s9 + $0x40] sm:$0xff]  }
 0x7c6   :  { %v5674_v27 = vmax.f32 %v5665_v55, 0.0  ;;  %v5675_v42 = vmax.f32 %v5666_v34, 0.0  ;;  %v5676_v44 = vmax.f32 %v5667_v33, 0.0  ;;  %v5677_v12 = vmax.f32 %v5668_v19, 0.0  ;;  %v8768_v39 = vld [vmem:[%s13722_s9] sm:$0xff]   ;;  %v8769_v55 = vld [vmem:[%s13722_s9 + $0x48] sm:$0xff]  }
 0x7c7   :  { %v5678_v48 = vmax.f32 %v5669_v10, 0.0  ;;  %v5679_v30 = vmax.f32 %v5670_v13, 0.0  ;;  %v5680_v4 = vmax.f32 %v5671_v1, 0.0  ;;  %v5681_v22 = vmax.f32 %v5672_v52, 0.0  ;;  %v8770_v34 = vld [vmem:[%s13722_s9 + $0x8] sm:$0xff]   ;;  %v8771_v33 = vld [vmem:[%s13722_s9 + $0x50] sm:$0xff]  }
 0x7c8   :  { %v5683_v32 = vpack.c.bf16 %v5675_v42, %v5674_v27  ;;  %v5684_v63 = vpack.c.bf16 %v5677_v12, %v5676_v44  ;;  %v5673_v43 = vadd.f32 %v5663_v16, %v5658_v37  ;;  %v5781_v40 = vsel %vm5765_vm4, 1.0, %v14121_v36  ;;  %v5751_v37 = vpop.permute.xlu1 %5750  ;;  %v8772_v19 = vld [vmem:[%s13722_s9 + $0x10] sm:$0xff]   ;;  %v8773_v10 = vld [vmem:[%s13722_s9 + $0x58] sm:$0xff]   ;;  %v8775_v1 = vld [vmem:[%s13722_s9 + $0x60] sm:$0xff]  }
 0x7c9   :  { %v5685_v0 = vpack.c.bf16 %v5679_v30, %v5678_v48  ;;  %v5686_v31 = vpack.c.bf16 %v5681_v22, %v5680_v4  ;;  %v5780_v61 = vsel %vm5764_vm5, 1.0, %v14121_v36  ;;  %v5789_v5 = vpack.c.bf16 %v5779_v26, %v5778_v54  ;;  %v8774_v13 = vld [vmem:[%s13722_s9 + $0x18] sm:$0xff]   ;;  %v8776_v52 = vld [vmem:[%s13722_s9 + $0x20] sm:$0xff]   ;;  %v8778_v27 = vld [vmem:[%s13722_s9 + $0x28] sm:$0xff]  }
 0x7ca   :  { %8091 = vmatprep.subr.bf16.mxu0 %v5683_v32  ;;  %v5682_v7 = vmax.f32 %v5673_v43, 0.0  ;;  %v5790_v6 = vpack.c.bf16 %v5781_v40, %v5780_v61  ;;  %vm5767_vm8 = vcmp.eq.s32.totalorder %v14303_v9, %v5751_v37  ;;  %vm5766_vm9 = vcmp.eq.s32.totalorder %v14303_v9, %v5748_v18  ;;  %v8779_v42 = vld [vmem:[%s13722_s9 + $0x70] sm:$0xff]   ;;  %v8781_v12 = vld [vmem:[%s13722_s9 + $0x78] sm:$0xff]   ;;  %v8783_v30 = vld [vmem:[%s13722_s9 + $0xc0] sm:$0xff]  }
 0x7cb   :  { %8092 = vmatpush3.bf16.msra.mxu0 %v5683_v32  ;;  %v5783_v60 = vsel %vm5767_vm8, 1.0, %v14121_v36  ;;  %v5782_v57 = vsel %vm5766_vm9, 1.0, %v14121_v36  ;;  %v8780_v44 = vld [vmem:[%s13722_s9 + $0x30] sm:$0xff]   ;;  %v8782_v48 = vld [vmem:[%s13722_s9 + $0x38] sm:$0xff]   ;;  %v8792_v18 = vld [vmem:[%s13722_s9 + $0xa0] sm:$0xff]  }
 0x7cc   :  { %8093 = vmatprep.subr.bf16.mxu0 %v5684_v63  ;;  %v5687_v28 = vpack.c.bf16 %v5682_v7, %v5682_v7  ;;  %v5791_v16 = vpack.c.bf16 %v5783_v60, %v5782_v57  ;;  %v8788_v54 = vld [vmem:[%s13722_s9 + $0x90] sm:$0xff]   ;;  %v8789_v37 = vld [vmem:[%s13722_s9 + $0xd8] sm:$0xff]   ;;  %v8794_v60 = vld [vmem:[%s13722_s9 + $0xa8] sm:$0xff]  }
 0x7cd   :  { %v8790_v61 = vld [vmem:[%s13722_s9 + $0x98] sm:$0xff]   ;;  %v8795_v57 = vld [vmem:[%s13722_s9 + $0xf0] sm:$0xff]  }
 0x7ce   :  { %v5819_v62 = vsel %vm5817_vm10, %v5687_v28, 0 }
 0x7cf   :  { %8094 = vmatpush3.bf16.msra.mxu0 %v5684_v63 }
 0x7d0   :  { %8095 = vmatprep.subr.bf16.mxu0 %v5685_v0 }
 0x7d3   :  { %8096 = vmatpush3.bf16.msra.mxu0 %v5685_v0 }
 0x7d4   :  { %8097 = vmatprep.subr.bf16.mxu0 %v5686_v31 }
 0x7d7   :  { %8098 = vmatpush3.bf16.msra.mxu0 %v5686_v31 }
 0x7d8   :  { %8403 = vmatprep.subr.msk.bf16.mxu0 %vm5817_vm10, %v5687_v28 }
 0x7db   :  { %8100 = vmatpush3.bf16.msra.mxu0 %v5819_v62 }
 0x7dc   :  { %7860 = vmatprep.subr.bf16.mxu0 %v8767_v21  ;;  %v8796_v21 = vld [vmem:[%s13722_s9 + $0xb0] sm:$0xff]  }
 0x7de   :  { %8102 = vmatmul.mubr.msk.bf16.vlgmr.msra.gmra.mrb[68].mxu0 %vm5792_vm6, %v5785_v14 }
 0x7df   :  { %8105 = vmatprep.mubr.msk.bf16.mxu0 %vm5792_vm6, %v5786_v3  ;;  %7861 = vmatpush3.bf16.msra.mxu0 %v8768_v39  ;;  %v8797_v39 = vld [vmem:[%s13722_s9 + $0xf8] sm:$0xff]  }
 0x7e0   :  { %7862 = vmatprep.subr.bf16.mxu0 %v8769_v55 }
 0x7e3   :  { %7863 = vmatpush3.bf16.msra.mxu0 %v8770_v34 }
 0x7e4   :  { %7864 = vmatprep.subr.bf16.mxu0 %v8771_v33  ;;  %v8798_v33 = vld [vmem:[%s13722_s9 + $0xb8] sm:$0xff]  }
 0x7e6   :  { %8106 = vmatmul.mubr.msk.bf16.gmra.mrb[72].mxu0 %vm5792_vm6, %v5787_v38 }
 0x7e7   :  { %8109 = vmatprep.mubr.msk.bf16.mxu0 %vm5792_vm6, %v5788_v56  ;;  %7865 = vmatpush3.bf16.msra.mxu0 %v8772_v19  ;;  %v8799_v19 = vld [vmem:[%s13722_s9 + $0x140] sm:$0xff]  }
 0x7e8   :  { %7866 = vmatprep.subr.bf16.mxu0 %v8773_v10 }
 0x7eb   :  { %7867 = vmatpush3.bf16.msra.mxu0 %v8774_v13 }
 0x7ec   :  { %7868 = vmatprep.subr.bf16.mxu0 %v8775_v1  ;;  %v8800_v1 = vld [vmem:[%s13722_s9 + $0x100] sm:$0xff]  }
 0x7ee   :  { %8110 = vmatmul.mubr.msk.bf16.gmra.mrb[76].mxu0 %vm5792_vm6, %v5789_v5  ;;  %v8791_v5 = vld [vmem:[%s13722_s9 + $0xe0] sm:$0xff]  }
 0x7ef   :  { %8113 = vmatprep.mubr.msk.bf16.mxu0 %vm5792_vm6, %v5790_v6  ;;  %7869 = vmatpush3.bf16.msra.mxu0 %v8776_v52  ;;  %v8793_v6 = vld [vmem:[%s13722_s9 + $0xe8] sm:$0xff]  }
 0x7f0   :  { %7870 = vmatprep.subr.bf16.mxu0 %v8777_v59  ;;  %v8801_v59 = vld [vmem:[%s13722_s9 + $0x148] sm:$0xff]  }
 0x7f3   :  { %7871 = vmatpush3.bf16.msra.mxu0 %v8778_v27 }
 0x7f4   :  { %7872 = vmatprep.subr.bf16.mxu0 %v8779_v42  ;;  %v8802_v42 = vld [vmem:[%s13722_s9 + $0x108] sm:$0xff]  }
 0x7f6   :  { %8114 = vmatmul.mubr.msk.bf16.gmra.mrb[80].mxu0 %vm5792_vm6, %v5791_v16 }
 0x7f7   :  { %7873 = vmatpush3.bf16.msra.mxu0 %v8780_v44  ;;  %v8803_v44 = vld [vmem:[%s13722_s9 + $0x150] sm:$0xff]  }
 0x7f8   :  { %7874 = vmatprep.subr.bf16.mxu0 %v8781_v12  ;;  %v8804_v12 = vld [vmem:[%s13722_s9 + $0x110] sm:$0xff]  }
 0x7fb   :  { %7875 = vmatpush3.bf16.msra.mxu0 %v8782_v48  ;;  %v8805_v48 = vld [vmem:[%s13722_s9 + $0x158] sm:$0xff]  }
 0x7fc   :  { %7882 = vmatprep.subr.bf16.mxu0 %v8783_v30  ;;  %v8806_v30 = vld [vmem:[%s13722_s9 + $0x118] sm:$0xff]  }
 0x8b1   :  { %v8103_v4 = vpop.f32.mrb[68].mxu0 }
 0x8b2   :  { %v5855_v22 = vpop.f32.mrb[69].mxu0 }
 0x8b3   :  { %v8104_v35 = vpop.f32.mrb[70].mxu0 }
 0x8b4   :  { %v5858_v32 = vpop.f32.mrb[71].mxu0 }
 0x8b5   :  { %v8683_v63 = vpack.i.bf16 %v5858_v32, %v8104_v35  ;;  %v8809_v35 = vld [vmem:[%s13722_s9 + $0x168] sm:$0xff]  }
 0x8b6   :  { %v8810_v32 = vld [vmem:[%s13722_s9 + $0x128] sm:$0xff]  }
 0x8b7   :  { %8684 = vrot.lane.b32.xlu0 %v8683_v63, %s8864_s5  ;;  %v8811_v63 = vld [vmem:[%s13722_s9 + $0x170] sm:$0xff]  }
 0x8b9   :  { %v8107_v43 = vpop.f32.mrb[72].mxu0 }
 0x8ba   :  { %v13447_v0 = vpop.f32.mrb[73].mxu0 }
 0x8bb   :  { %v8108_v31 = vpop.f32.mrb[74].mxu0 }
 0x8bc   :  { %v5874_v49 = vpop.f32.mrb[75].mxu0 }
 0x8bd   :  { %v8688_v8 = vpack.i.bf16 %v5874_v49, %v8108_v31  ;;  %v8813_v31 = vld [vmem:[%s13722_s9 + $0x178] sm:$0xff]  }
 0x8bf   :  { %8689 = vrot.lane.b32.xlu1 %v8688_v8, %s8864_s5 }
 0x8c1   :  { %v8111_v23 = vpop.f32.mrb[76].mxu0 }
 0x8c2   :  { %v13450_v7 = vpop.f32.mrb[77].mxu0 }
 0x8c3   :  { %v8112_v2 = vpop.f32.mrb[78].mxu0 }
 0x8c4   :  { %v5890_v28 = vpop.f32.mrb[79].mxu0 }
 0x8c5   :  { %v8693_v51 = vpack.i.bf16 %v5890_v28, %v8112_v2  ;;  %v8815_v2 = vld [vmem:[%s13722_s9 + $0x1c0] sm:$0xff]  }
 0x8c7   :  { %8694 = vrot.lane.b32.xlu0 %v8693_v51, %s8864_s5 }
 0x8c9   :  { %v13453_v58 = vpop.f32.mrb[80].mxu0 }
 0x8ca   :  { %v13455_v24 = vpop.f32.mrb[81].mxu0 }
 0x8cb   :  { %v8116_v53 = vpop.f32.mrb[82].mxu0 }
 0x8cc   :  { %v5906_v62 = vpop.f32.mrb[83].mxu0 }
 0x8cd   :  { %v8698_v50 = vpack.i.bf16 %v5906_v62, %v8116_v53  ;;  %v8816_v53 = vld [vmem:[%s13722_s9 + $0x180] sm:$0xff]  }
 0x8cf   :  { %8699 = vrot.lane.b32.xlu1 %v8698_v50, %s8864_s5  ;;  %v8817_v50 = vld [vmem:[%s13722_s9 + $0x1c8] sm:$0xff]  }
 0x929   :  { %v8685_v11 = vpop.permute.xlu0 %8684 }
 0x92a   :  { %v8687_v14 = vunpack.i.h.bf16 %v8685_v11  ;;  %v8686_v3 = vunpack.i.l.bf16 %v8685_v11 }
 0x92c   :  { %v5950_v17 = vsel %vm5057_vm7, %v5855_v22, %v8687_v14  ;;  %v5951_v41 = vsel %vm5057_vm7, %v8103_v4, %v8686_v3  ;;  %v8807_v4 = vld [vmem:[%s13722_s9 + $0x160] sm:$0xff]   ;;  %v8820_v14 = vld [vmem:[%s13722_s9 + $0x190] sm:$0xff]   ;;  %v8821_v3 = vld [vmem:[%s13722_s9 + $0x1d8] sm:$0xff]  }
 0x92d   :  { %v5958_v46 = vpack.c.bf16 %v5950_v17, %v5950_v17  ;;  %v5959_v45 = vpack.c.bf16 %v5951_v41, %v5951_v41  ;;  %v8808_v22 = vld [vmem:[%s13722_s9 + $0x120] sm:$0xff]   ;;  %v8822_v17 = vld [vmem:[%s13722_s9 + $0x198] sm:$0xff]  }
 0x92e   :  { %v8823_v41 = vld [vmem:[%s13722_s9 + $0x1e0] sm:$0xff]  }
 0x92f   :  { %6510 = vmatprep.mubr.bf16.mxu0 %v5959_v45  ;;  %v8825_v45 = vld [vmem:[%s13722_s9 + $0x1e8] sm:$0xff]  }
 0x930   :  { %6511 = vmatmul.mubr.bf16.vlgmr.msra.gmra.mrb[84].mxu0 %v5958_v46  ;;  %v8824_v46 = vld [vmem:[%s13722_s9 + $0x1a0] sm:$0xff]  }
 0x931   :  { %7883 = vmatpush3.bf16.msra.mxu0 %v8784_v25  ;;  %v8690_v38 = vpop.permute.xlu1 %8689  ;;  %v8826_v25 = vld [vmem:[%s13722_s9 + $0x1a8] sm:$0xff]  }
 0x932   :  { %v8691_v56 = vunpack.i.l.bf16 %v8690_v38  ;;  %7884 = vmatprep.subr.bf16.mxu0 %v8785_v47  ;;  %v8692_v55 = vunpack.i.h.bf16 %v8690_v38  ;;  %v8827_v47 = vld [vmem:[%s13722_s9 + $0x1f0] sm:$0xff]  }
 0x933   :  { %v8828_v38 = vld [vmem:[%s13722_s9 + $0x1b0] sm:$0xff]  }
 0x934   :  { %v5953_v26 = vsel %vm5057_vm7, %v8107_v43, %v8691_v56  ;;  %v5952_v10 = vsel %vm5057_vm7, %v13447_v0, %v8692_v55  ;;  %v8812_v0 = vld [vmem:[%s13722_s9 + $0x130] sm:$0xff]  }
 0x935   :  { %7885 = vmatpush3.bf16.msra.mxu0 %v8786_v20  ;;  %v5961_v40 = vpack.c.bf16 %v5953_v26, %v5953_v26  ;;  %v5960_v52 = vpack.c.bf16 %v5952_v10, %v5952_v10  ;;  %v8829_v20 = vld [vmem:[%s13722_s9 + $0x1f8] sm:$0xff]  }
 0x936   :  { %7886 = vmatprep.subr.bf16.mxu0 %v8787_v15  ;;  %v8830_v15 = vld [vmem:[%s13722_s9 + $0x1b8] sm:$0xff]  }
 0x937   :  { %6550 = vmatprep.mubr.bf16.mxu0 %v5961_v40 }
 0x939   :  { %7887 = vmatpush3.bf16.msra.mxu0 %v8788_v54  ;;  %v8695_v16 = vpop.permute.xlu0 %8694 }
 0x93a   :  { %7888 = vmatprep.subr.bf16.mxu0 %v8789_v37  ;;  %v8696_v34 = vunpack.i.l.bf16 %v8695_v16  ;;  %v8697_v49 = vunpack.i.h.bf16 %v8695_v16 }
 0x93c   :  { %v5955_v13 = vsel %vm5057_vm7, %v8111_v23, %v8696_v34  ;;  %v8814_v23 = vld [vmem:[%s13722_s9 + $0x138] sm:$0xff]   ;;  %v5954_v28 = vsel %vm5057_vm7, %v13450_v7, %v8697_v49  ;;  %v8818_v7 = vld [vmem:[%s13722_s9 + $0x188] sm:$0xff]  }
 0x93d   :  { %7889 = vmatpush3.bf16.msra.mxu0 %v8790_v61  ;;  %v5963_v27 = vpack.c.bf16 %v5955_v13, %v5955_v13  ;;  %v5962_v62 = vpack.c.bf16 %v5954_v28, %v5954_v28 }
 0x93e   :  { %7890 = vmatprep.subr.bf16.mxu0 %v8791_v5 }
 0x941   :  { %7891 = vmatpush3.bf16.msra.mxu0 %v8792_v18  ;;  %v8700_v43 = vpop.permute.xlu1 %8699 }
 0x942   :  { %7892 = vmatprep.subr.bf16.mxu0 %v8793_v6  ;;  %v8701_v8 = vunpack.i.l.bf16 %v8700_v43  ;;  %v8702_v56 = vunpack.i.h.bf16 %v8700_v43 }
 0x944   :  { %v5957_v51 = vsel %vm5057_vm7, %v13453_v58, %v8701_v8  ;;  %v8819_v58 = vld [vmem:[%s13722_s9 + $0x1d0] sm:$0xff]   ;;  %v5956_v26 = vsel %vm5057_vm7, %v13455_v24, %v8702_v56 }
 0x945   :  { %7893 = vmatpush3.bf16.msra.mxu0 %v8794_v60  ;;  %v5965_v11 = vpack.c.bf16 %v5957_v51, %v5957_v51  ;;  %v5964_v40 = vpack.c.bf16 %v5956_v26, %v5956_v26 }
 0x946   :  { %7894 = vmatprep.subr.bf16.mxu0 %v8795_v57 }
 0x949   :  { %7895 = vmatpush3.bf16.msra.mxu0 %v8796_v21 }
 0x94a   :  { %7896 = vmatprep.subr.bf16.mxu0 %v8797_v39 }
 0x94d   :  { %7897 = vmatpush3.bf16.msra.mxu0 %v8798_v33 }
 0x94e   :  { %7904 = vmatprep.subr.bf16.mxu0 %v8799_v19 }
 0x950   :  { %6551 = vmatmul.mubr.bf16.vlgmr.msra.gmra.mrb[88].mxu0 %v5960_v52 }
 0x951   :  { %7905 = vmatpush3.bf16.msra.mxu0 %v8800_v1  ;;  %6590 = vmatprep.mubr.bf16.mxu0 %v5963_v27 }
 0x952   :  { %7906 = vmatprep.subr.bf16.mxu0 %v8801_v59 }
 0x955   :  { %7907 = vmatpush3.bf16.msra.mxu0 %v8802_v42 }
 0x956   :  { %7908 = vmatprep.subr.bf16.mxu0 %v8803_v44 }
 0x959   :  { %7909 = vmatpush3.bf16.msra.mxu0 %v8804_v12 }
 0x95a   :  { %7910 = vmatprep.subr.bf16.mxu0 %v8805_v48 }
 0x95d   :  { %7911 = vmatpush3.bf16.msra.mxu0 %v8806_v30 }
 0x95e   :  { %7912 = vmatprep.subr.bf16.mxu0 %v8807_v4 }
 0x961   :  { %7913 = vmatpush3.bf16.msra.mxu0 %v8808_v22 }
 0x962   :  { %7914 = vmatprep.subr.bf16.mxu0 %v8809_v35 }
 0x965   :  { %7915 = vmatpush3.bf16.msra.mxu0 %v8810_v32 }
 0x966   :  { %7916 = vmatprep.subr.bf16.mxu0 %v8811_v63 }
 0x969   :  { %7917 = vmatpush3.bf16.msra.mxu0 %v8812_v0 }
 0x96a   :  { %7918 = vmatprep.subr.bf16.mxu0 %v8813_v31 }
 0x96d   :  { %7919 = vmatpush3.bf16.msra.mxu0 %v8814_v23 }
 0x96e   :  { %7926 = vmatprep.subr.bf16.mxu0 %v8815_v2 }
 0x970   :  { %6591 = vmatmul.mubr.bf16.vlgmr.msra.gmra.mrb[92].mxu0 %v5962_v62  ;;  %v14305_v62 = vld [vmem:[#allocation83_spill] sm:$0xff] }
 0x971   :  { %7927 = vmatpush3.bf16.msra.mxu0 %v8816_v53  ;;  %6630 = vmatprep.mubr.bf16.mxu0 %v5965_v11  ;;  %v6655_v53 = vld [vmem:[%s13724_s10] sm:$0x1] }
 0x972   :  { %7928 = vmatprep.subr.bf16.mxu0 %v8817_v50  ;;  %v6682_v50 = vadd.s32 1, %v14305_v62 }
 0x975   :  { %7929 = vmatpush3.bf16.msra.mxu0 %v8818_v7 }
 0x976   :  { %7930 = vmatprep.subr.bf16.mxu0 %v8819_v58  ;;  %v6659_v58 = vld [vmem:[%s13725_s11] sm:$0x1] }
 0x979   :  { %7931 = vmatpush3.bf16.msra.mxu0 %v8820_v14  ;;  %v6680_v14 = vmul.u32 4, %v14305_v62 }
 0x97a   :  { %7932 = vmatprep.subr.bf16.mxu0 %v8821_v3  ;;  %v6683_v3 = vmul.u32 4, %v6682_v50 }
 0x97b   :  { %vm6681_vm6 = vcmp.ge.s32.totalorder %v14303_v9, %v6680_v14 }
 0x97c   :  { %vm6684_vm11 = vcmp.lt.s32.totalorder %v14303_v9, %v6683_v3 }
 0x97d   :  { %7933 = vmatpush3.bf16.msra.mxu0 %v8822_v17  ;;  %vm6685_vm12 = vmand %vm6681_vm6, %vm6684_vm11 }
 0x97e   :  { %7934 = vmatprep.subr.bf16.mxu0 %v8823_v41 }
 0x981   :  { %7935 = vmatpush3.bf16.msra.mxu0 %v8824_v46 }
 0x982   :  { %7936 = vmatprep.subr.bf16.mxu0 %v8825_v45 }
 0x985   :  { %7937 = vmatpush3.bf16.msra.mxu0 %v8826_v25 }
 0x986   :  { %7938 = vmatprep.subr.bf16.mxu0 %v8827_v47 }
 0x989   :  { %7939 = vmatpush3.bf16.msra.mxu0 %v8828_v38 }
 0x98a   :  { %7940 = vmatprep.subr.bf16.mxu0 %v8829_v20  ;;  %v6686_v20 = vsel %vm6685_vm12, 1.0, %v14121_v36 }
 0x98b   :  { %v6687_v26 = vpack.c.bf16 %v6686_v20, %v6686_v20 }
 0x98d   :  { %7941 = vmatpush3.bf16.msra.mxu0 %v8830_v15 }
 0x98e   :  { %8117 = vmatprep.subr.bf16.mxu0 %v14121_v36 }
 0x990   :  { %6631 = vmatmul.mubr.bf16.vlgmr.msra.gmra.mrb[96].mxu0 %v5964_v40  ;;  %v8831_v40 = vld [vmem:[%s13723_s12] sm:$0xff]  }
 0x991   :  { %8119 = vmatprep.mubr.msk.bf16.mxu0 %vm8860_vm0, %v14121_v36 }
 0xa03   :  { %v7876_v54 = vpop.f32.mrb[84].mxu0 }
 0xa04   :  { %v7877_v37 = vpop.f32.mrb[85].mxu0 }
 0xa05   :  { %v7878_v61 = vadd.f32 %v7877_v37, %v7876_v54  ;;  %v7879_v5 = vpop.f32.mrb[86].mxu0  ;;  %v8833_v54 = vld [vmem:[%s13723_s12 + $0x10] sm:$0xff]   ;;  %v8834_v37 = vld [vmem:[%s13723_s12 + $0x18] sm:$0xff]  }
 0xa06   :  { %v7880_v18 = vpop.f32.mrb[87].mxu0  ;;  %v8836_v5 = vld [vmem:[%s13723_s12 + $0x28] sm:$0xff]  }
 0xa07   :  { %v8837_v18 = vld [vmem:[%s13723_s12 + $0x30] sm:$0xff]  }
 0xa23   :  { %v7898_v6 = vpop.f32.mrb[88].mxu0 }
 0xa24   :  { %v7899_v60 = vpop.f32.mrb[89].mxu0 }
 0xa25   :  { %v7900_v57 = vadd.f32 %v7899_v60, %v7898_v6  ;;  %v7901_v16 = vpop.f32.mrb[90].mxu0  ;;  %v8838_v6 = vld [vmem:[%s13723_s12 + $0x38] sm:$0xff]  }
 0xa26   :  { %v7902_v21 = vpop.f32.mrb[91].mxu0 }
 0xa27   :  { %v6553_v39 = vadd.f32 %v7900_v57, %v7878_v61  ;;  %v8835_v61 = vld [vmem:[%s13723_s12 + $0x20] sm:$0xff]  }
 0xa43   :  { %v7920_v24 = vpop.f32.mrb[92].mxu0 }
 0xa44   :  { %v7921_v55 = vpop.f32.mrb[93].mxu0 }
 0xa45   :  { %v7922_v34 = vadd.f32 %v7921_v55, %v7920_v24  ;;  %v7923_v33 = vpop.f32.mrb[94].mxu0 }
 0xa46   :  { %v7924_v19 = vpop.f32.mrb[95].mxu0  ;;  %v8841_v33 = vld [vmem:[%s13726_s14 + $0x10] sm:$0xff]  }
 0xa47   :  { %v6593_v10 = vadd.f32 %v7922_v34, %v6553_v39  ;;  %v8839_v39 = vld [vmem:[%s13726_s14] sm:$0xff]   ;;  %v8840_v34 = vld [vmem:[%s13726_s14 + $0x8] sm:$0xff]   ;;  %v8842_v19 = vld [vmem:[%s13726_s14 + $0x18] sm:$0xff]  }
 0xa63   :  { %v7942_v13 = vpop.f32.mrb[96].mxu0 }
 0xa64   :  { %v7943_v1 = vpop.f32.mrb[97].mxu0 }
 0xa65   :  { %v7944_v52 = vadd.f32 %v7943_v1, %v7942_v13  ;;  %v7945_v59 = vpop.f32.mrb[98].mxu0 }
 0xa66   :  { %v7946_v27 = vpop.f32.mrb[99].mxu0 }
 0xa67   :  { %v6633_v42 = vadd.f32 %v7944_v52, %v6593_v10  ;;  %v7701_v10 = vld [vmem:[%s13728_s13] ss:$0 sm:$0xff] }
 0xa69   :  { %v6638_v44 = vrot.slane %v6633_v42, 4  ;;  %v6645_v12 = vmul.f32 %v6633_v42, %v6633_v42 }
 0xa6b   :  { %v6639_v48 = vadd.f32 %v6638_v44, %v6633_v42  ;;  %v6646_v30 = vrot.slane %v6645_v12, 4  ;;  %v8843_v44 = vld [vmem:[%s13727_s16] sm:$0xff]  }
 0xa6d   :  { %v6640_v4 = vrot.slane %v6639_v48, 2  ;;  %v6647_v22 = vadd.f32 %v6646_v30, %v6645_v12  ;;  %v8845_v30 = vld [vmem:[%s13727_s16 + $0x10] sm:$0xff]  }
 0xa6f   :  { %v6641_v35 = vadd.f32 %v6640_v4, %v6639_v48  ;;  %v6648_v32 = vrot.slane %v6647_v22, 2  ;;  %v8844_v48 = vld [vmem:[%s13727_s16 + $0x8] sm:$0xff]   ;;  %v8846_v4 = vld [vmem:[%s13727_s16 + $0x18] sm:$0xff]  }
 0xa71   :  { %v6642_v63 = vrot.slane %v6641_v35, 1  ;;  %v6649_v43 = vadd.f32 %v6648_v32, %v6647_v22  ;;  %v7710_v22 = vld [vmem:[%s13729_s15] ss:$0 sm:$0xff] }
 0xa73   :  { %v6643_v0 = vadd.f32 %v6642_v63, %v6641_v35  ;;  %v6650_v31 = vrot.slane %v6649_v43, 1 }
 0xa75   :  { %v6651_v49 = vadd.f32 %v6650_v31, %v6649_v43  ;;  %v6644_v8 = vmul.f32 0.125, %v6643_v0 }
 0xa77   :  { %v6652_v23 = vmul.f32 0.125, %v6651_v49  ;;  %v6653_v2 = vmul.f32 %v6644_v8, %v6644_v8 }
 0xa79   :  { %v6654_v28 = vsub.f32 %v6652_v23, %v6653_v2 }
 0xa7b   :  { %v6656_v51 = vadd.f32 1e-05, %v6654_v28 }
 0xa7d   :  { %8851 = vrsqrt.f32 %v6656_v51 }
 0xa87   :  { %v8852_v11 = vpop.eup %8851 }
 0xa88   :  { %v6658_v7 = vmul.f32 %v8852_v11, %v6655_v53 }
 0xa8a   :  { %v6660_v17 = vmul.f32 %v6658_v7, %v6644_v8  ;;  %v6666_v41 = vrot.slane %v6658_v7, %v14304_v29  ;;  %v7716_v8 = vld [vmem:[%s13730_s17] ss:$0 sm:$0xff] }
 0xa8c   :  { %v6661_v46 = vsub.f32 %v6659_v58, %v6660_v17  ;;  %v6668_v45 = vmul.f32 %v6666_v41, %v6633_v42 }
 0xa8e   :  { %v6673_v25 = vrot.slane %v6661_v46, %v14304_v29  ;;  %v8832_v29 = vld [vmem:[%s13723_s12 + $0x8] sm:$0xff]  }
 0xa90   :  { %v6675_v47 = vadd.f32 %v6673_v25, %v6668_v45 }
 0xa92   :  { %v6676_v38 = vmax.f32 %v6675_v47, 0.0 }
 0xa94   :  { %v6677_v56 = vpack.c.bf16 %v6676_v38, %v6676_v38 }
 0xa96   :  { %v6693_v15 = vsel %vm5817_vm10, %v6677_v56, 0  ;;  %vm7025_vm10 = vcmask 9216  }
 0xa97   :  { %8118 = vmatpush3.bf16.msra.mxu0 %v6693_v15 }
 0xa98   :  { %8123 = vmatprep.subr.bf16.mxu0 %v14121_v36 }
 0xa9a   :  { %8120 = vmatmul.mubr.msk.bf16.vlgmr.msra.gmra.mrb[100].mxu0 %vm6688_vm13, %v6687_v26 }
 0xa9b   :  { %8124 = vmatpush3.bf16.msra.mxu0 %v8831_v40  ;;  %8139 = vmatprep.mubr.msk.bf16.mxu0 %vm8860_vm0, %v14121_v36 }
 0xa9c   :  { %8125 = vmatprep.subr.bf16.mxu0 %v14121_v36 }
 0xa9f   :  { %8126 = vmatpush3.bf16.msra.mxu0 %v8832_v29 }
 0xaa0   :  { %8127 = vmatprep.subr.bf16.mxu0 %v14121_v36 }
 0xaa3   :  { %8128 = vmatpush3.bf16.msra.mxu0 %v8833_v54 }
 0xaa4   :  { %8129 = vmatprep.subr.bf16.mxu0 %v14121_v36 }
 0xaa7   :  { %8130 = vmatpush3.bf16.msra.mxu0 %v8834_v37 }
 0xaa8   :  { %8131 = vmatprep.subr.bf16.mxu0 %v14121_v36 }
 0xaab   :  { %8132 = vmatpush3.bf16.msra.mxu0 %v8835_v61 }
 0xaac   :  { %8133 = vmatprep.subr.bf16.mxu0 %v14121_v36 }
 0xaaf   :  { %8134 = vmatpush3.bf16.msra.mxu0 %v8836_v5 }
 0xab0   :  { %8135 = vmatprep.subr.bf16.mxu0 %v14121_v36 }
 0xab3   :  { %8136 = vmatpush3.bf16.msra.mxu0 %v8837_v18 }
 0xab4   :  { %8137 = vmatprep.subr.bf16.mxu0 %v14121_v36 }
 0xab7   :  { %8138 = vmatpush3.bf16.msra.mxu0 %v8838_v6 }
 0xab8   :  { %8143 = vmatprep.subr.bf16.mxu0 %v14121_v36 }
 0xb6d   :  { %v6729_v60 = vpop.f32.mrb[100].mxu0 }
 0xb6e   :  { %v6735_v57 = vmul.f32 0.25, %v6729_v60  ;;  %v8121_v16 = vpop.f32.mrb[101].mxu0 }
 0xb6f   :  { %v6732_v21 = vpop.f32.mrb[102].mxu0 }
 0xb70   :  { %v6736_v24 = vpack.c.bf16 %v6735_v57, %v6735_v57  ;;  %v8122_v55 = vpop.f32.mrb[103].mxu0 }
 0xb72   :  { %8140 = vmatmul.mubr.bf16.vlgmr.msra.gmra.mrb[104].mxu0 %v6736_v24 }
 0xb73   :  { %8144 = vmatpush3.bf16.msra.mxu0 %v8839_v39  ;;  %8151 = vmatprep.mubr.msk.bf16.mxu0 %vm8860_vm0, %v14121_v36 }
 0xb74   :  { %8145 = vmatprep.subr.bf16.mxu0 %v14121_v36 }
 0xb77   :  { %8146 = vmatpush3.bf16.msra.mxu0 %v8840_v34 }
 0xb78   :  { %8147 = vmatprep.subr.bf16.mxu0 %v14121_v36 }
 0xb7b   :  { %8148 = vmatpush3.bf16.msra.mxu0 %v8841_v33 }
 0xb7c   :  { %8149 = vmatprep.subr.bf16.mxu0 %v14121_v36 }
 0xb7f   :  { %8150 = vmatpush3.bf16.msra.mxu0 %v8842_v19 }
 0xb80   :  { %8155 = vmatprep.subr.bf16.mxu0 %v14121_v36 }
 0xc45   :  { %v6842_v13 = vpop.f32.mrb[104].mxu0 }
 0xc46   :  { %v6843_v1 = vadd.f32 %v7701_v10, %v6842_v13  ;;  %v8141_v52 = vpop.f32.mrb[105].mxu0 }
 0xc47   :  { %v6845_v59 = vpop.f32.mrb[106].mxu0 }
 0xc48   :  { %v6848_v27 = vmax.f32 %v6843_v1, 0.0  ;;  %v8142_v42 = vpop.f32.mrb[107].mxu0 }
 0xc4a   :  { %v6849_v12 = vpack.c.bf16 %v6848_v27, %v6848_v27 }
 0xc4c   :  { %8152 = vmatmul.mubr.msk.bf16.vlgmr.msra.gmra.mrb[108].mxu0 %vm5057_vm7, %v6849_v12 }
 0xc4d   :  { %8156 = vmatpush3.bf16.msra.mxu0 %v8843_v44  ;;  %8163 = vmatprep.mubr.msk.bf16.mxu0 %vm8860_vm0, %v14121_v36  ;;  %vm7016_vm0 = vcmp.eq.s32.totalorder %v14303_v9, 0 }
 0xc4e   :  { %8157 = vmatprep.subr.bf16.mxu0 %v14121_v36 }
 0xc51   :  { %8158 = vmatpush3.bf16.msra.mxu0 %v8844_v48 }
 0xc52   :  { %8159 = vmatprep.subr.bf16.mxu0 %v14121_v36 }
 0xc55   :  { %8160 = vmatpush3.bf16.msra.mxu0 %v8845_v30 }
 0xc56   :  { %8161 = vmatprep.subr.bf16.mxu0 %v14121_v36 }
 0xc59   :  { %8162 = vmatpush3.bf16.msra.mxu0 %v8846_v4 }
 0xd1f   :  { %v6926_v35 = vpop.f32.mrb[108].mxu0 }
 0xd20   :  { %v6927_v32 = vadd.f32 %v7710_v22, %v6926_v35  ;;  %v8153_v63 = vpop.f32.mrb[109].mxu0 }
 0xd21   :  { %v6929_v43 = vpop.f32.mrb[110].mxu0 }
 0xd22   :  { %v6932_v0 = vmax.f32 %v6927_v32, 0.0  ;;  %v8154_v31 = vpop.f32.mrb[111].mxu0 }
 0xd24   :  { %v6933_v49 = vpack.c.bf16 %v6932_v0, %v6932_v0 }
 0xd26   :  { %8164 = vmatmul.mubr.msk.bf16.vlgmr.msra.gmra.mrb[112].mxu0 %vm5057_vm7, %v6933_v49 }
 0xdf9   :  { %v7010_v23 = vpop.f32.mrb[112].mxu0 }
 0xdfa   :  { %v7011_v36 = vadd.f32 %v7716_v8, %v7010_v23  ;;  %v8165_v2 = vpop.f32.mrb[113].mxu0 }
 0xdfb   :  { %v7013_v28 = vpop.f32.mrb[114].mxu0 }
 0xdfc   :  { %v7722_v51 = vmul.f32 -1.442695, %v7011_v36  ;;  %v8166_v53 = vpop.f32.mrb[115].mxu0 }
 0xdfe   :  { %8853 = vpow2.f32 %v7722_v51 }
 0xdff   :  { %8855 = vtanh.f32 %v7011_v36 }
 0xe08   :  { %v8854_v62 = vpop.eup %8853 }
 0xe09   :  { %v7021_v50 = vadd.f32 1.0, %v8854_v62  ;;  %v8856_v11 = vpop.eup %8855 }
 0xe0b   :  { %8857 = vrcp.f32 %v7021_v50 }
 0xe15   :  { %v8858_v7 = vpop.eup %8857 }
 0xe16   :  { %v7024_v58 = vsel %vm7016_vm0, %v8856_v11, %v8858_v7 }
 0xe17   :  { %7026 = vst.msk [vmem:[%s13731_s18] sm:$0x3] %vm7025_vm10, %v7024_v58 }

</bundles_post_ra>
